<compile_context>
chip_gen: v7x
topology: tpu7x:2x2x1
jax: 0.10.0
libtpu: 0.0.40
codegen_flags: <defaults>
</compile_context>

<pallas_src>
import functools

import jax
import jax.numpy as jnp
from jax import lax
from jax.experimental import pallas as pl
from jax.experimental.pallas import tpu as pltpu


_CHUNK_ROWS = 512          # target matmul M rows per in-kernel chunk (MXU saturation)
_TARGET_GRID_STEPS = 8     # >=4 pipelined blocks per v7x TensorCore when G allows


def _round_up(x, m):
    return ((x + m - 1) // m) * m


def _cdiv(a, b):
    return -(-a // b)


def _lane(c):
    return _round_up(c, 128)


# ---------------------------------------------------------------------------
# Feature probe: single-buffered (pl.Buffered(1)) grid-invariant operands.
# Runs one tiny eager compile at import; falls back to default double-buffering
# if the running JAX/Mosaic does not support pipeline_mode.
# ---------------------------------------------------------------------------
def _probe_single_buffer():
    try:
        def k(x_ref, w_ref, o_ref):
            o_ref[...] = x_ref[...] + w_ref[...]

        f = pl.pallas_call(
            k,
            out_shape=jax.ShapeDtypeStruct((16, 128), jnp.float32),
            grid=(2,),
            in_specs=[pl.BlockSpec((8, 128), lambda i: (i, 0)),
                      pl.BlockSpec((8, 128), lambda i: (0, 0),
                                   pipeline_mode=pl.Buffered(1))],
            out_specs=pl.BlockSpec((8, 128), lambda i: (i, 0)),
        )
        jax.block_until_ready(jax.jit(f)(jnp.zeros((16, 128), jnp.float32),
                                         jnp.zeros((8, 128), jnp.float32)))
        return True
    except Exception:          # noqa: BLE001 — degrade gracefully
        return False


_SINGLE_BUFFER_OK = _probe_single_buffer()


def _const_spec(shape):
    """BlockSpec for grid-invariant operands (weights / biases): fetched once,
    so a second pipeline buffer is wasted VMEM — single-buffer when possible."""
    index_map = lambda *_: (0,) * len(shape)
    if _SINGLE_BUFFER_OK:
        return pl.BlockSpec(shape, index_map, pipeline_mode=pl.Buffered(1))
    return pl.BlockSpec(shape, index_map)


@functools.lru_cache(maxsize=None)
def _vmem_plan():
    """(vmem_limit_bytes, activation_budget_bytes) — generation aware."""
    phys = 64 << 20
    try:
        info = pltpu.get_tpu_info()
        phys = int(getattr(info, "vmem_capacity_bytes", phys))
    except Exception:          # noqa: BLE001 — assume the smaller (v7x) part
        pass
    limit = (80 << 20) if phys >= (128 << 20) else (32 << 20)   # v5e/v6e vs v7x
    return limit, (limit * 3) // 4


def _plan_tiles(G, ns, c0, couts, out_itemsize, fc_dims=None):
    """Pick (groups_per_grid_step, groups_per_inner_chunk, vmem_limit).

    Footprints use real padded tile sizes (bf16: 16x128, f32: 8x128), count
    the weight buffers explicitly (1 or 2 depending on Buffered(1) support)
    and bound f32 MLP intermediates to one chunk (the kernels are chunked)."""
    limit, budget = _vmem_plan()
    wbuf = 1 if _SINGLE_BUFFER_OK else 2
    cfin = couts[-1]
    with_head = fc_dims is not None
    c_out_final = fc_dims[1] if with_head else cfin

    chunk_g = max(8, _round_up(max(1, _CHUNK_ROWS // ns), 8))
    chunk_g = min(chunk_g, _round_up(G, 8))

    # Fixed VMEM: weights + biases (+ fc head + emb row) + one chunk's activations.
    widths = [c0] + list(couts)
    fixed = 0
    for cin, cout in zip(widths[:-1], widths[1:]):
        fixed += wbuf * (_round_up(cin, 16) * _lane(cout) * 2 + 8 * _lane(cout) * 4)
    if with_head:
        fixed += wbuf * (_round_up(fc_dims[0], 16) * _lane(fc_dims[1]) * 2
                         + 8 * _lane(fc_dims[1]) * 4)
        fixed += 2 * 8 * _lane(fc_dims[1]) * 4                 # sem-mask emb row
    chunk_rows = chunk_g * ns
    fixed += chunk_rows * sum(_lane(c) for c in couts) * 4     # f32 chunk acts
    fixed += chunk_rows * sum(_lane(c) for c in couts[:-1]) * 2  # bf16 re-casts

    # Per-group VMEM: double-buffered bf16 input rows + double-buffered output.
    per_group = 2 * ns * _lane(c0) * 2 + 2 * _lane(c_out_final) * out_itemsize
    if with_head:
        per_group += _lane(cfin) * 4        # pooled f32 scratch row
        per_group += 2 * 128 * 4            # mask block row

    avail = max(0, budget - fixed)
    cap = max(chunk_g, (avail // per_group) // chunk_g * chunk_g)

    if G <= chunk_g:
        return G, G, limit                  # one grid step, one chunk, no padding

    gt = min(cap,
             max(chunk_g, _round_up(_cdiv(G, _TARGET_GRID_STEPS), chunk_g)),
             _round_up(G, chunk_g))
    if G % gt != 0:                         # prefer an exact divisor: avoids jnp.pad
        for cand in range(gt, chunk_g - 1, -chunk_g):
            if G % cand == 0:
                gt = cand
                break
    return gt, chunk_g, limit


# ---------------------------------------------------------------------------
# Pallas kernels (matmul / reduction / elementwise hot paths)
# ---------------------------------------------------------------------------
def _mlp3_bf16(x, w1, b1, w2, b2, w3, b3):
    """3x (bf16 matmul -> f32 acc + f32 bias(BN-folded) + f32 ReLU)."""
    h = jnp.maximum(jnp.dot(x, w1, preferred_element_type=jnp.float32) + b1, 0.0)
    h = jnp.maximum(jnp.dot(h.astype(jnp.bfloat16), w2,
                            preferred_element_type=jnp.float32) + b2, 0.0)
    h = jnp.maximum(jnp.dot(h.astype(jnp.bfloat16), w3,
                            preferred_element_type=jnp.float32) + b3, 0.0)
    return h


def sa_mlp_kernel(x_ref, w1, b1, w2, b2, w3, b3, o_ref, *, ns, gt, chunk_g):
    """x_ref: (gt*ns, C0) bf16 -> o_ref: (gt, C3).  Chunked MLP + max over ns."""
    n_chunks = gt // chunk_g
    w1v, w2v, w3v = w1[...], w2[...], w3[...]
    b1v, b2v, b3v = b1[...], b2[...], b3[...]

    if n_chunks == 1:
        h = _mlp3_bf16(x_ref[...], w1v, b1v, w2v, b2v, w3v, b3v)
        o_ref[...] = jnp.max(h.reshape(gt, ns, h.shape[-1]), axis=1).astype(o_ref.dtype)
        return

    rows = chunk_g * ns

    def body(c, carry):
        r0 = pl.multiple_of(c * rows, rows)
        g0 = pl.multiple_of(c * chunk_g, chunk_g)
        h = _mlp3_bf16(x_ref[pl.ds(r0, rows), :], w1v, b1v, w2v, b2v, w3v, b3v)
        o_ref[pl.ds(g0, chunk_g), :] = jnp.max(
            h.reshape(chunk_g, ns, h.shape[-1]), axis=1).astype(o_ref.dtype)
        return carry

    lax.fori_loop(0, n_chunks, body, 0, unroll=True)


def sa3_head_kernel(x_ref, w1, b1, w2, b2, w3, b3, wf, bf, mask_ref, emb_ref,
                    o_ref, pooled_ref, *, ns, gt, chunk_g):
    """Fused GroupAll MLP + max-pool + Linear(768,768) + sem-mask blend."""
    n_chunks = gt // chunk_g
    w1v, w2v, w3v = w1[...], w2[...], w3[...]
    b1v, b2v, b3v = b1[...], b2[...], b3[...]

    if n_chunks == 1:
        h = _mlp3_bf16(x_ref[...], w1v, b1v, w2v, b2v, w3v, b3v)
        pooled = jnp.max(h.reshape(gt, ns, h.shape[-1]), axis=1)        # (gt, 768)
    else:
        rows = chunk_g * ns

        def body(c, carry):
            r0 = pl.multiple_of(c * rows, rows)
            g0 = pl.multiple_of(c * chunk_g, chunk_g)
            h = _mlp3_bf16(x_ref[pl.ds(r0, rows), :], w1v, b1v, w2v, b2v, w3v, b3v)
            pooled_ref[pl.ds(g0, chunk_g), :] = jnp.max(
                h.reshape(chunk_g, ns, h.shape[-1]), axis=1)
            return carry

        lax.fori_loop(0, n_chunks, body, 0, unroll=True)
        pooled = pooled_ref[...]

    y = jnp.dot(pooled.astype(jnp.bfloat16), wf[...],
                preferred_element_type=jnp.float32) + bf[...]
    m = (mask_ref[...] > 0.0).astype(jnp.float32)                       # (gt, 1)
    o_ref[...] = y * m + emb_ref[...] * (1.0 - m)


# ---------------------------------------------------------------------------
# Pallas wrappers
# ---------------------------------------------------------------------------
def sa_mlp_maxpool(grouped, layer_params):
    """grouped: (G, S, C_in) bf16 -> (G, C_out) bf16.  G = B'*npoint, S = nsample."""
    G, S, C0 = grouped.shape
    (w1, b1), (w2, b2), (w3, b3) = layer_params
    couts = (w1.shape[1], w2.shape[1], w3.shape[1])
    C3 = couts[-1]
    out_dtype = jnp.bfloat16

    gt, chunk_g, vmem_limit = _plan_tiles(G, S, C0, couts,
                                          jnp.dtype(out_dtype).itemsize)
    Gp = _round_up(G, gt)

    x2d = grouped.reshape(G * S, C0)
    if x2d.dtype != jnp.bfloat16:
        x2d = x2d.astype(jnp.bfloat16)
    if Gp != G:      # rare fallback — planner prefers exact divisors of G
        x2d = jnp.pad(x2d, ((0, (Gp - G) * S), (0, 0)))

    w1b, w2b, w3b = (w.astype(jnp.bfloat16) for w in (w1, w2, w3))

    flops = 2 * Gp * S * (C0 * couts[0] + couts[0] * couts[1] + couts[1] * couts[2])
    bytes_accessed = (x2d.size * 2 + (w1.size + w2.size + w3.size) * 2
                      + (b1.size + b2.size + b3.size) * 4 + Gp * C3 * 2)

    kernel = functools.partial(sa_mlp_kernel, ns=S, gt=gt, chunk_g=chunk_g)
    out = pl.pallas_call(
        kernel,
        out_shape=jax.ShapeDtypeStruct((Gp, C3), out_dtype),
        grid_spec=pltpu.PrefetchScalarGridSpec(
            num_scalar_prefetch=0,
            grid=(Gp // gt,),
            in_specs=[
                pl.BlockSpec((gt * S, C0), lambda g: (g, 0)),   # C0 full-extent
                _const_spec(w1b.shape), _const_spec(b1.shape),
                _const_spec(w2b.shape), _const_spec(b2.shape),
                _const_spec(w3b.shape), _const_spec(b3.shape),
            ],
            out_specs=pl.BlockSpec((gt, C3), lambda g: (g, 0)),
        ),
        compiler_params=pltpu.CompilerParams(
            dimension_semantics=("parallel",),
            vmem_limit_bytes=vmem_limit),
        cost_estimate=pl.CostEstimate(flops=int(flops), transcendentals=0,
                                      bytes_accessed=int(bytes_accessed)),
    )(x2d, w1b, b1, w2b, b2, w3b, b3)
    return out[:G]


def sa3_and_head(grouped, layer_params, fc_w, fc_b, mask_f, emb_row):
    """grouped: (G, S, C_in) bf16, mask_f: (G, 1) f32 -> (G, 768) f32."""
    G, S, C0 = grouped.shape
    (w1, b1), (w2, b2), (w3, b3) = layer_params
    couts = (w1.shape[1], w2.shape[1], w3.shape[1])
    C3 = couts[-1]
    Dout = fc_w.shape[1]

    gt, chunk_g, vmem_limit = _plan_tiles(G, S, C0, couts, 4, fc_dims=(C3, Dout))
    Gp = _round_up(G, gt)

    x2d = grouped.reshape(G * S, C0)
    if x2d.dtype != jnp.bfloat16:
        x2d = x2d.astype(jnp.bfloat16)
    mask_p = mask_f
    if Gp != G:      # rare fallback — planner prefers exact divisors of G
        x2d = jnp.pad(x2d, ((0, (Gp - G) * S), (0, 0)))
        mask_p = jnp.pad(mask_f, ((0, Gp - G), (0, 0)))

    w1b, w2b, w3b, fwb = (w.astype(jnp.bfloat16) for w in (w1, w2, w3, fc_w))

    flops = (2 * Gp * S * (C0 * couts[0] + couts[0] * couts[1] + couts[1] * couts[2])
             + 2 * Gp * C3 * Dout)
    bytes_accessed = (x2d.size * 2
                      + (w1.size + w2.size + w3.size + fc_w.size) * 2
                      + (b1.size + b2.size + b3.size + fc_b.size + emb_row.size) * 4
                      + mask_p.size * 4 + Gp * Dout * 4)

    kernel = functools.partial(sa3_head_kernel, ns=S, gt=gt, chunk_g=chunk_g)
    out = pl.pallas_call(
        kernel,
        out_shape=jax.ShapeDtypeStruct((Gp, Dout), jnp.float32),
        grid_spec=pltpu.PrefetchScalarGridSpec(
            num_scalar_prefetch=0,
            grid=(Gp // gt,),
            in_specs=[
                pl.BlockSpec((gt * S, C0), lambda g: (g, 0)),
                _const_spec(w1b.shape), _const_spec(b1.shape),
                _const_spec(w2b.shape), _const_spec(b2.shape),
                _const_spec(w3b.shape), _const_spec(b3.shape),
                _const_spec(fwb.shape), _const_spec(fc_b.shape),
                pl.BlockSpec((gt, 1), lambda g: (g, 0)),
                _const_spec(emb_row.shape),
            ],
            out_specs=pl.BlockSpec((gt, Dout), lambda g: (g, 0)),
            scratch_shapes=[pltpu.VMEM((gt, C3), jnp.float32)],   # pooled chunks
        ),
        compiler_params=pltpu.CompilerParams(
            dimension_semantics=("parallel",),
            vmem_limit_bytes=vmem_limit),
        cost_estimate=pl.CostEstimate(flops=int(flops), transcendentals=0,
                                      bytes_accessed=int(bytes_accessed)),
    )(x2d, w1b, b1, w2b, b2, w3b, b3, fwb, fc_b, mask_p, emb_row)
    return out[:G]


# ---------------------------------------------------------------------------
# Plain-JAX glue: FPS, ball query, grouping (data-dependent index selection)
# TODO(synk): move the neighborhood gather into the Pallas kernel via
#             scalar-prefetched indices + manual DMA to avoid materializing
#             the grouped (G, S, C) tensor in HBM.
# ---------------------------------------------------------------------------
def farthest_point_sample(xyz, npoint):
    """xyz: (B, N, 3) -> int32 (B, npoint). Deterministic FPS starting at idx 0."""
    B, N, _ = xyz.shape

    def body(i, carry):
        dists, idxs, farthest = carry
        idxs = idxs.at[:, i].set(farthest)
        centroid = jnp.take_along_axis(xyz, farthest[:, None, None], axis=1)  # (B,1,3)
        d = jnp.sum((xyz - centroid) ** 2, axis=-1)                           # (B,N)
        dists = jnp.minimum(dists, d)
        farthest = jnp.argmax(dists, axis=-1).astype(jnp.int32)
        return dists, idxs, farthest

    dists = jnp.full((B, N), 1e10, dtype=jnp.float32)
    idxs = jnp.zeros((B, npoint), dtype=jnp.int32)
    farthest = jnp.zeros((B,), dtype=jnp.int32)
    _, idxs, _ = lax.fori_loop(0, npoint, body, (dists, idxs, farthest))
    return idxs


def ball_query(radius, nsample, xyz, new_xyz):
    """First `nsample` neighbors (index order) within `radius`; pad with the
    first found index — matches pointnet2 CUDA ball_query (centers are always
    within radius of themselves, so the pad index always exists)."""
    N = xyz.shape[1]
    d2 = jnp.sum((new_xyz[:, :, None, :] - xyz[:, None, :, :]) ** 2, axis=-1)  # (B,S,N)
    mask = d2 < radius * radius
    ar = jnp.arange(N)
    order = jnp.argsort(jnp.where(mask, ar, N + ar), axis=-1)                  # (B,S,N)
    cnt = jnp.sum(mask, axis=-1, keepdims=True)                                # (B,S,1)
    sel = order[..., :nsample]
    first = order[..., :1]
    pos = jnp.arange(nsample)[None, None, :]
    return jnp.where(pos < cnt, sel, first).astype(jnp.int32)


def group_points(points, idx):
    """points: (B, N, C), idx: (B, S, K) -> (B, S, K, C)."""
    B, S, K = idx.shape
    g = jnp.take_along_axis(points, idx.reshape(B, S * K, 1), axis=1)
    return g.reshape(B, S, K, points.shape[-1])


# ---------------------------------------------------------------------------
# Parameters (deterministic synthetic init; BN folded in eval mode)
# ---------------------------------------------------------------------------
SA_CONFIG = [
    dict(npoint=32, nsample=32, radius=0.2),
    dict(npoint=16, nsample=32, radius=0.4),
    dict(npoint=None, nsample=None, radius=None),   # GroupAll
]
# mlp specs with use_xyz (+3 on the first width): [[8,64,64,128],[128,...],[256,...]]
SA_MLPS = [[8 + 3, 64, 64, 128], [128 + 3, 128, 128, 256], [256 + 3, 256, 512, 768]]


def init_params(key):
    params = {"sa": []}
    bn_scale = 1.0 / jnp.sqrt(1.0 + 1e-5)   # eval BN: gamma=1, beta=0, mean=0, var=1
    for spec in SA_MLPS:
        layers = []
        for cin, cout in zip(spec[:-1], spec[1:]):
            key, k1, k2 = jax.random.split(key, 3)
            w = jax.random.normal(k1, (cin, cout), jnp.float32) * (1.0 / jnp.sqrt(cin))
            b = jax.random.normal(k2, (1, cout), jnp.float32) * 0.01
            layers.append((w * bn_scale, b * bn_scale))  # fold eval-mode BatchNorm2d
        params["sa"].append(tuple(layers))
    key, k1, k2, k3 = jax.random.split(key, 4)
    params["fc_w"] = jax.random.normal(k1, (768, 768), jnp.float32) * (1.0 / jnp.sqrt(768))
    params["fc_b"] = jax.random.normal(k2, (1, 768), jnp.float32) * 0.01
    params["sem_mask_emb"] = jax.random.normal(k3, (1, 768), jnp.float32) * 0.02
    return params


# ---------------------------------------------------------------------------
# Full forward (eval mode: dropout = identity)
# ---------------------------------------------------------------------------
def feature_encoder_forward(obj_pcds, obj_sem_masks, params):
    """obj_pcds: (B, O, P, 3+8) float32,  obj_sem_masks: (B, O) {0,1}."""
    B, O, P, D = obj_pcds.shape
    pc = obj_pcds.reshape(B * O, P, D).astype(jnp.float32)
    xyz = pc[..., :3]                                     # (B', P, 3) f32 for FPS/ball-query
    feats = pc[..., 3:].astype(jnp.bfloat16)              # (B', P, 8)  bf16 MXU operand

    # SA stages 1 & 2: FPS + ball-query + grouping (XLA) -> MLP + max-pool (Pallas).
    for cfg, layer_params in zip(SA_CONFIG[:2], params["sa"][:2]):
        fps_idx = farthest_point_sample(xyz, cfg["npoint"])
        new_xyz = jnp.take_along_axis(xyz, fps_idx[..., None], axis=1)     # (B', np, 3)
        idx = ball_query(cfg["radius"], cfg["nsample"], xyz, new_xyz)
        g_xyz = group_points(xyz, idx) - new_xyz[:, :, None, :]            # relative xyz
        g_feat = group_points(feats, idx)                                  # bf16 gather
        grouped = jnp.concatenate([g_xyz.astype(jnp.bfloat16), g_feat], axis=-1)
        Bp, S, K, Cin = grouped.shape
        out = sa_mlp_maxpool(grouped.reshape(Bp * S, K, Cin), layer_params)  # (Bp*S, Cout) bf16
        feats = out.reshape(Bp, S, -1)
        xyz = new_xyz

    # SA stage 3 (GroupAll) fused with Linear(768,768) + dropout(eval=id) + mask blend.
    grouped = jnp.concatenate([xyz.astype(jnp.bfloat16), feats], axis=-1)  # (B', N2, 259)
    mask_f = obj_sem_masks.reshape(B * O, 1).astype(jnp.float32)
    obj_embeds = sa3_and_head(grouped, params["sa"][2], params["fc_w"], params["fc_b"],
                              mask_f, params["sem_mask_emb"])              # (B*O, 768)
    # TODO(synk): obj3d_clf_pre_head (get_mlp_head 768->768->607) is not defined in
    # the provided spec source, so obj_sem_cls is not computed here.
    return obj_embeds.reshape(B, O, -1)


if __name__ == "__main__":
    key = jax.random.PRNGKey(0)
    kp, kx, km = jax.random.split(key, 3)
    params = init_params(kp)

    # Small but representative: exercises both the multi-step grid and the
    # in-kernel chunked-MLP path (stage 1: G=256 groups -> gt=32, 2 chunks).
    B, O, P, D = 2, 4, 64, 11            # 3 xyz + 8 feature channels
    obj_pcds = jax.random.uniform(kx, (B, O, P, D), jnp.float32)
    obj_sem_masks = (jax.random.uniform(km, (B, O)) > 0.3).astype(jnp.int32)

    out = jax.jit(feature_encoder_forward)(obj_pcds, obj_sem_masks, params)
    out = jax.block_until_ready(out)
    assert out.shape == (B, O, 768), out.shape
    assert bool(jnp.all(jnp.isfinite(out)))
    print("KERNEL_OK")
</pallas_src>

<mosaic_0001>
module attributes {stable_mosaic.version = 11 : i64} {
  func.func @k(%arg0: i32, %arg1: memref<8x128xf32, #tpu.memory_space<vmem>>, %arg2: memref<8x128xf32, #tpu.memory_space<vmem>>, %arg3: memref<8x128xf32, #tpu.memory_space<vmem>>) attributes {dimension_semantics = [#tpu.dimension_semantics<arbitrary>], iteration_bounds = array<i64: 2>, scalar_prefetch = 0 : i64, scratch_operands = 0 : i64, tpu.core_type = #tpu.core_type<tc>, window_params = [{transform_indices = @transform_0, window_bounds = array<i64: 8, 128>}, {pipeline_mode = #tpu.pipeline_mode<synchronous>, transform_indices = @transform_1, window_bounds = array<i64: 8, 128>}, {transform_indices = @transform_2, window_bounds = array<i64: 8, 128>}]} {
    %c0 = arith.constant 0 : index
    %c0_0 = arith.constant 0 : index
    %0 = vector.load %arg1[%c0, %c0_0] : memref<8x128xf32, #tpu.memory_space<vmem>>, vector<8x128xf32>
    %c0_1 = arith.constant 0 : index
    %c0_2 = arith.constant 0 : index
    %1 = vector.load %arg2[%c0_1, %c0_2] : memref<8x128xf32, #tpu.memory_space<vmem>>, vector<8x128xf32>
    %2 = arith.addf %0, %1 : vector<8x128xf32>
    %c0_3 = arith.constant 0 : index
    %c0_4 = arith.constant 0 : index
    %3 = vector.load %arg3[%c0_3, %c0_4] : memref<8x128xf32, #tpu.memory_space<vmem>>, vector<8x128xf32>
    tpu.vector_store %arg3[%c0_3, %c0_4], %2 {strides = array<i32>} : memref<8x128xf32, #tpu.memory_space<vmem>>, vector<8x128xf32>,
    return
  }
  func.func @transform_0(%arg0: i32) -> (i32, i32) {
    %c0_i32 = arith.constant 0 : i32
    %c0_i32_0 = arith.constant 0 : i32
    return %arg0, %c0_i32 : i32, i32
  }
  func.func @transform_1(%arg0: i32) -> (i32, i32) {
    %c0_i32 = arith.constant 0 : i32
    %c0_i32_0 = arith.constant 0 : i32
    %c0_i32_1 = arith.constant 0 : i32
    return %c0_i32, %c0_i32_0 : i32, i32
  }
  func.func @transform_2(%arg0: i32) -> (i32, i32) {
    %c0_i32 = arith.constant 0 : i32
    %c0_i32_0 = arith.constant 0 : i32
    return %arg0, %c0_i32 : i32, i32
  }
}

module attributes {stable_mosaic.version = 11 : i64} {
  func.func @sa_mlp_kernel(%arg0: i32, %arg1: memref<1024x11xbf16, #tpu.memory_space<vmem>>, %arg2: memref<11x64xbf16, #tpu.memory_space<vmem>>, %arg3: memref<1x64xf32, #tpu.memory_space<vmem>>, %arg4: memref<64x64xbf16, #tpu.memory_space<vmem>>, %arg5: memref<1x64xf32, #tpu.memory_space<vmem>>, %arg6: memref<64x128xbf16, #tpu.memory_space<vmem>>, %arg7: memref<1x128xf32, #tpu.memory_space<vmem>>, %arg8: memref<32x128xbf16, #tpu.memory_space<vmem>>) attributes {dimension_semantics = [#tpu.dimension_semantics<parallel>], iteration_bounds = array<i64: 8>, scalar_prefetch = 0 : i64, scratch_operands = 0 : i64, tpu.core_type = #tpu.core_type<tc>, window_params = [{transform_indices = @transform_0, window_bounds = array<i64: 1024, 11>}, {pipeline_mode = #tpu.pipeline_mode<synchronous>, transform_indices = @transform_1, window_bounds = array<i64: 11, 64>}, {pipeline_mode = #tpu.pipeline_mode<synchronous>, transform_indices = @transform_2, window_bounds = array<i64: 1, 64>}, {pipeline_mode = #tpu.pipeline_mode<synchronous>, transform_indices = @transform_3, window_bounds = array<i64: 64, 64>}, {pipeline_mode = #tpu.pipeline_mode<synchronous>, transform_indices = @transform_4, window_bounds = array<i64: 1, 64>}, {pipeline_mode = #tpu.pipeline_mode<synchronous>, transform_indices = @transform_5, window_bounds = array<i64: 64, 128>}, {pipeline_mode = #tpu.pipeline_mode<synchronous>, transform_indices = @transform_6, window_bounds = array<i64: 1, 128>}, {transform_indices = @transform_7, window_bounds = array<i64: 32, 128>}]} {
    %c0 = arith.constant 0 : index
    %c0_0 = arith.constant 0 : index
    %0 = vector.load %arg2[%c0, %c0_0] : memref<11x64xbf16, #tpu.memory_space<vmem>>, vector<11x64xbf16>
    %c0_1 = arith.constant 0 : index
    %c0_2 = arith.constant 0 : index
    %1 = vector.load %arg4[%c0_1, %c0_2] : memref<64x64xbf16, #tpu.memory_space<vmem>>, vector<64x64xbf16>
    %c0_3 = arith.constant 0 : index
    %c0_4 = arith.constant 0 : index
    %2 = vector.load %arg6[%c0_3, %c0_4] : memref<64x128xbf16, #tpu.memory_space<vmem>>, vector<64x128xbf16>
    %c0_5 = arith.constant 0 : index
    %c0_6 = arith.constant 0 : index
    %3 = vector.load %arg3[%c0_5, %c0_6] : memref<1x64xf32, #tpu.memory_space<vmem>>, vector<1x64xf32>
    %c0_7 = arith.constant 0 : index
    %c0_8 = arith.constant 0 : index
    %4 = vector.load %arg5[%c0_7, %c0_8] : memref<1x64xf32, #tpu.memory_space<vmem>>, vector<1x64xf32>
    %c0_9 = arith.constant 0 : index
    %c0_10 = arith.constant 0 : index
    %5 = vector.load %arg7[%c0_9, %c0_10] : memref<1x128xf32, #tpu.memory_space<vmem>>, vector<1x128xf32>
    %c0_i32 = arith.constant 0 : i32
    %c512_i32 = arith.constant 512 : i32
    %6 = arith.muli %c0_i32, %c512_i32 : i32
    %7 = tpu.assume_multiple %6, 512 : i32
    %c16_i32 = arith.constant 16 : i32
    %8 = arith.muli %c0_i32, %c16_i32 : i32
    %9 = tpu.assume_multiple %8, 16 : i32
    %10 = arith.index_cast %7 : i32 to index
    %c0_11 = arith.constant 0 : index
    %11 = vector.load %arg1[%10, %c0_11] : memref<1024x11xbf16, #tpu.memory_space<vmem>>, vector<512x11xbf16>
    %cst = arith.constant dense<0.000000e+00> : vector<512x64xf32>
    %12 = tpu.matmul %11, %0, %cst {dimension_numbers = #tpu.dot_dimension_numbers<[1], [0], [0], [1], [0, 0, 1, 1], [], []>} : vector<512x11xbf16>, vector<11x64xbf16>, vector<512x64xf32> -> vector<512x64xf32>
    %13 = vector.broadcast %3 : vector<1x64xf32> to vector<512x64xf32>
    %14 = arith.addf %12, %13 : vector<512x64xf32>
    %cst_12 = arith.constant 0.000000e+00 : f32
    %15 = vector.broadcast %cst_12 : f32 to vector<512x64xf32>
    %16 = arith.maximumf %14, %15 : vector<512x64xf32>
    %17 = arith.truncf %16 : vector<512x64xf32> to vector<512x64xbf16>
    %cst_13 = arith.constant dense<0.000000e+00> : vector<512x64xf32>
    %18 = tpu.matmul %17, %1, %cst_13 {dimension_numbers = #tpu.dot_dimension_numbers<[1], [0], [0], [1], [0, 0, 1, 1], [], []>} : vector<512x64xbf16>, vector<64x64xbf16>, vector<512x64xf32> -> vector<512x64xf32>
    %19 = vector.broadcast %4 : vector<1x64xf32> to vector<512x64xf32>
    %20 = arith.addf %18, %19 : vector<512x64xf32>
    %cst_14 = arith.constant 0.000000e+00 : f32
    %21 = vector.broadcast %cst_14 : f32 to vector<512x64xf32>
    %22 = arith.maximumf %20, %21 : vector<512x64xf32>
    %23 = arith.truncf %22 : vector<512x64xf32> to vector<512x64xbf16>
    %cst_15 = arith.constant dense<0.000000e+00> : vector<512x128xf32>
    %24 = tpu.matmul %23, %2, %cst_15 {dimension_numbers = #tpu.dot_dimension_numbers<[1], [0], [0], [1], [0, 0, 1, 1], [], []>} : vector<512x64xbf16>, vector<64x128xbf16>, vector<512x128xf32> -> vector<512x128xf32>
    %25 = vector.broadcast %5 : vector<1x128xf32> to vector<512x128xf32>
    %26 = arith.addf %24, %25 : vector<512x128xf32>
    %cst_16 = arith.constant 0.000000e+00 : f32
    %27 = vector.broadcast %cst_16 : f32 to vector<512x128xf32>
    %28 = arith.maximumf %26, %27 : vector<512x128xf32>
    %29 = vector.shape_cast %28 : vector<512x128xf32> to vector<16x32x128xf32>
    %cst_17 = arith.constant dense<0xFF800000> : vector<16x128xf32>
    %30 = vector.multi_reduction <maximumf>, %29, %cst_17 [1] : vector<16x32x128xf32> to vector<16x128xf32>
    %31 = arith.truncf %30 : vector<16x128xf32> to vector<16x128xbf16>
    %32 = arith.index_cast %9 : i32 to index
    %c0_18 = arith.constant 0 : index
    %33 = vector.load %arg8[%32, %c0_18] : memref<32x128xbf16, #tpu.memory_space<vmem>>, vector<16x128xbf16>
    tpu.vector_store %arg8[%32, %c0_18], %31 {strides = array<i32>} : memref<32x128xbf16, #tpu.memory_space<vmem>>, vector<16x128xbf16>,
    %c1_i32 = arith.constant 1 : i32
    %c512_i32_19 = arith.constant 512 : i32
    %34 = arith.muli %c1_i32, %c512_i32_19 : i32
    %35 = tpu.assume_multiple %34, 512 : i32
    %c16_i32_20 = arith.constant 16 : i32
    %36 = arith.muli %c1_i32, %c16_i32_20 : i32
    %37 = tpu.assume_multiple %36, 16 : i32
    %38 = arith.index_cast %35 : i32 to index
    %c0_21 = arith.constant 0 : index
    %39 = vector.load %arg1[%38, %c0_21] : memref<1024x11xbf16, #tpu.memory_space<vmem>>, vector<512x11xbf16>
    %cst_22 = arith.constant dense<0.000000e+00> : vector<512x64xf32>
    %40 = tpu.matmul %39, %0, %cst_22 {dimension_numbers = #tpu.dot_dimension_numbers<[1], [0], [0], [1], [0, 0, 1, 1], [], []>} : vector<512x11xbf16>, vector<11x64xbf16>, vector<512x64xf32> -> vector<512x64xf32>
    %41 = vector.broadcast %3 : vector<1x64xf32> to vector<512x64xf32>
    %42 = arith.addf %40, %41 : vector<512x64xf32>
    %cst_23 = arith.constant 0.000000e+00 : f32
    %43 = vector.broadcast %cst_23 : f32 to vector<512x64xf32>
    %44 = arith.maximumf %42, %43 : vector<512x64xf32>
    %45 = arith.truncf %44 : vector<512x64xf32> to vector<512x64xbf16>
    %cst_24 = arith.constant dense<0.000000e+00> : vector<512x64xf32>
    %46 = tpu.matmul %45, %1, %cst_24 {dimension_numbers = #tpu.dot_dimension_numbers<[1], [0], [0], [1], [0, 0, 1, 1], [], []>} : vector<512x64xbf16>, vector<64x64xbf16>, vector<512x64xf32> -> vector<512x64xf32>
    %47 = vector.broadcast %4 : vector<1x64xf32> to vector<512x64xf32>
    %48 = arith.addf %46, %47 : vector<512x64xf32>
    %cst_25 = arith.constant 0.000000e+00 : f32
    %49 = vector.broadcast %cst_25 : f32 to vector<512x64xf32>
    %50 = arith.maximumf %48, %49 : vector<512x64xf32>
    %51 = arith.truncf %50 : vector<512x64xf32> to vector<512x64xbf16>
    %cst_26 = arith.constant dense<0.000000e+00> : vector<512x128xf32>
    %52 = tpu.matmul %51, %2, %cst_26 {dimension_numbers = #tpu.dot_dimension_numbers<[1], [0], [0], [1], [0, 0, 1, 1], [], []>} : vector<512x64xbf16>, vector<64x128xbf16>, vector<512x128xf32> -> vector<512x128xf32>
    %53 = vector.broadcast %5 : vector<1x128xf32> to vector<512x128xf32>
    %54 = arith.addf %52, %53 : vector<512x128xf32>
    %cst_27 = arith.constant 0.000000e+00 : f32
    %55 = vector.broadcast %cst_27 : f32 to vector<512x128xf32>
    %56 = arith.maximumf %54, %55 : vector<512x128xf32>
    %57 = vector.shape_cast %56 : vector<512x128xf32> to vector<16x32x128xf32>
    %cst_28 = arith.constant dense<0xFF800000> : vector<16x128xf32>
    %58 = vector.multi_reduction <maximumf>, %57, %cst_28 [1] : vector<16x32x128xf32> to vector<16x128xf32>
    %59 = arith.truncf %58 : vector<16x128xf32> to vector<16x128xbf16>
    %60 = arith.index_cast %37 : i32 to index
    %c0_29 = arith.constant 0 : index
    %61 = vector.load %arg8[%60, %c0_29] : memref<32x128xbf16, #tpu.memory_space<vmem>>, vector<16x128xbf16>
    tpu.vector_store %arg8[%60, %c0_29], %59 {strides = array<i32>} : memref<32x128xbf16, #tpu.memory_space<vmem>>, vector<16x128xbf16>,
    %c2_i32 = arith.constant 2 : i32
    return
  }
  func.func @transform_0(%arg0: i32) -> (i32, i32) {
    %c0_i32 = arith.constant 0 : i32
    %c0_i32_0 = arith.constant 0 : i32
    return %arg0, %c0_i32 : i32, i32
  }
  func.func @transform_1(%arg0: i32) -> (i32, i32) {
    %c0_i32 = arith.constant 0 : i32
    %c0_i32_0 = arith.constant 0 : i32
    %c0_i32_1 = arith.constant 0 : i32
    return %c0_i32, %c0_i32_0 : i32, i32
  }
  func.func @transform_2(%arg0: i32) -> (i32, i32) {
    %c0_i32 = arith.constant 0 : i32
    %c0_i32_0 = arith.constant 0 : i32
    %c0_i32_1 = arith.constant 0 : i32
    return %c0_i32, %c0_i32_0 : i32, i32
  }
  func.func @transform_3(%arg0: i32) -> (i32, i32) {
    %c0_i32 = arith.constant 0 : i32
    %c0_i32_0 = arith.constant 0 : i32
    %c0_i32_1 = arith.constant 0 : i32
    return %c0_i32, %c0_i32_0 : i32, i32
  }
  func.func @transform_4(%arg0: i32) -> (i32, i32) {
    %c0_i32 = arith.constant 0 : i32
    %c0_i32_0 = arith.constant 0 : i32
    %c0_i32_1 = arith.constant 0 : i32
    return %c0_i32, %c0_i32_0 : i32, i32
  }
  func.func @transform_5(%arg0: i32) -> (i32, i32) {
    %c0_i32 = arith.constant 0 : i32
    %c0_i32_0 = arith.constant 0 : i32
    %c0_i32_1 = arith.constant 0 : i32
    return %c0_i32, %c0_i32_0 : i32, i32
  }
  func.func @transform_6(%arg0: i32) -> (i32, i32) {
    %c0_i32 = arith.constant 0 : i32
    %c0_i32_0 = arith.constant 0 : i32
    %c0_i32_1 = arith.constant 0 : i32
    return %c0_i32, %c0_i32_0 : i32, i32
  }
  func.func @transform_7(%arg0: i32) -> (i32, i32) {
    %c0_i32 = arith.constant 0 : i32
    %c0_i32_0 = arith.constant 0 : i32
    return %arg0, %c0_i32 : i32, i32
  }
}

module attributes {stable_mosaic.version = 11 : i64} {
  func.func @sa_mlp_kernel(%arg0: i32, %arg1: memref<512x131xbf16, #tpu.memory_space<vmem>>, %arg2: memref<131x128xbf16, #tpu.memory_space<vmem>>, %arg3: memref<1x128xf32, #tpu.memory_space<vmem>>, %arg4: memref<128x128xbf16, #tpu.memory_space<vmem>>, %arg5: memref<1x128xf32, #tpu.memory_space<vmem>>, %arg6: memref<128x256xbf16, #tpu.memory_space<vmem>>, %arg7: memref<1x256xf32, #tpu.memory_space<vmem>>, %arg8: memref<16x256xbf16, #tpu.memory_space<vmem>>) attributes {dimension_semantics = [#tpu.dimension_semantics<parallel>], iteration_bounds = array<i64: 8>, scalar_prefetch = 0 : i64, scratch_operands = 0 : i64, tpu.core_type = #tpu.core_type<tc>, window_params = [{transform_indices = @transform_0, window_bounds = array<i64: 512, 131>}, {pipeline_mode = #tpu.pipeline_mode<synchronous>, transform_indices = @transform_1, window_bounds = array<i64: 131, 128>}, {pipeline_mode = #tpu.pipeline_mode<synchronous>, transform_indices = @transform_2, window_bounds = array<i64: 1, 128>}, {pipeline_mode = #tpu.pipeline_mode<synchronous>, transform_indices = @transform_3, window_bounds = array<i64: 128, 128>}, {pipeline_mode = #tpu.pipeline_mode<synchronous>, transform_indices = @transform_4, window_bounds = array<i64: 1, 128>}, {pipeline_mode = #tpu.pipeline_mode<synchronous>, transform_indices = @transform_5, window_bounds = array<i64: 128, 256>}, {pipeline_mode = #tpu.pipeline_mode<synchronous>, transform_indices = @transform_6, window_bounds = array<i64: 1, 256>}, {transform_indices = @transform_7, window_bounds = array<i64: 16, 256>}]} {
    %c0 = arith.constant 0 : index
    %c0_0 = arith.constant 0 : index
    %0 = vector.load %arg2[%c0, %c0_0] : memref<131x128xbf16, #tpu.memory_space<vmem>>, vector<131x128xbf16>
    %c0_1 = arith.constant 0 : index
    %c0_2 = arith.constant 0 : index
    %1 = vector.load %arg4[%c0_1, %c0_2] : memref<128x128xbf16, #tpu.memory_space<vmem>>, vector<128x128xbf16>
    %c0_3 = arith.constant 0 : index
    %c0_4 = arith.constant 0 : index
    %2 = vector.load %arg6[%c0_3, %c0_4] : memref<128x256xbf16, #tpu.memory_space<vmem>>, vector<128x256xbf16>
    %c0_5 = arith.constant 0 : index
    %c0_6 = arith.constant 0 : index
    %3 = vector.load %arg3[%c0_5, %c0_6] : memref<1x128xf32, #tpu.memory_space<vmem>>, vector<1x128xf32>
    %c0_7 = arith.constant 0 : index
    %c0_8 = arith.constant 0 : index
    %4 = vector.load %arg5[%c0_7, %c0_8] : memref<1x128xf32, #tpu.memory_space<vmem>>, vector<1x128xf32>
    %c0_9 = arith.constant 0 : index
    %c0_10 = arith.constant 0 : index
    %5 = vector.load %arg7[%c0_9, %c0_10] : memref<1x256xf32, #tpu.memory_space<vmem>>, vector<1x256xf32>
    %c0_11 = arith.constant 0 : index
    %c0_12 = arith.constant 0 : index
    %6 = vector.load %arg1[%c0_11, %c0_12] : memref<512x131xbf16, #tpu.memory_space<vmem>>, vector<512x131xbf16>
    %cst = arith.constant dense<0.000000e+00> : vector<512x128xf32>
    %7 = tpu.matmul %6, %0, %cst {dimension_numbers = #tpu.dot_dimension_numbers<[1], [0], [0], [1], [0, 0, 1, 1], [], []>} : vector<512x131xbf16>, vector<131x128xbf16>, vector<512x128xf32> -> vector<512x128xf32>
    %8 = vector.broadcast %3 : vector<1x128xf32> to vector<512x128xf32>
    %9 = arith.addf %7, %8 : vector<512x128xf32>
    %cst_13 = arith.constant 0.000000e+00 : f32
    %10 = vector.broadcast %cst_13 : f32 to vector<512x128xf32>
    %11 = arith.maximumf %9, %10 : vector<512x128xf32>
    %12 = arith.truncf %11 : vector<512x128xf32> to vector<512x128xbf16>
    %cst_14 = arith.constant dense<0.000000e+00> : vector<512x128xf32>
    %13 = tpu.matmul %12, %1, %cst_14 {dimension_numbers = #tpu.dot_dimension_numbers<[1], [0], [0], [1], [0, 0, 1, 1], [], []>} : vector<512x128xbf16>, vector<128x128xbf16>, vector<512x128xf32> -> vector<512x128xf32>
    %14 = vector.broadcast %4 : vector<1x128xf32> to vector<512x128xf32>
    %15 = arith.addf %13, %14 : vector<512x128xf32>
    %cst_15 = arith.constant 0.000000e+00 : f32
    %16 = vector.broadcast %cst_15 : f32 to vector<512x128xf32>
    %17 = arith.maximumf %15, %16 : vector<512x128xf32>
    %18 = arith.truncf %17 : vector<512x128xf32> to vector<512x128xbf16>
    %cst_16 = arith.constant dense<0.000000e+00> : vector<512x256xf32>
    %19 = tpu.matmul %18, %2, %cst_16 {dimension_numbers = #tpu.dot_dimension_numbers<[1], [0], [0], [1], [0, 0, 1, 1], [], []>} : vector<512x128xbf16>, vector<128x256xbf16>, vector<512x256xf32> -> vector<512x256xf32>
    %20 = vector.broadcast %5 : vector<1x256xf32> to vector<512x256xf32>
    %21 = arith.addf %19, %20 : vector<512x256xf32>
    %cst_17 = arith.constant 0.000000e+00 : f32
    %22 = vector.broadcast %cst_17 : f32 to vector<512x256xf32>
    %23 = arith.maximumf %21, %22 : vector<512x256xf32>
    %24 = vector.shape_cast %23 : vector<512x256xf32> to vector<16x32x256xf32>
    %cst_18 = arith.constant dense<0xFF800000> : vector<16x256xf32>
    %25 = vector.multi_reduction <maximumf>, %24, %cst_18 [1] : vector<16x32x256xf32> to vector<16x256xf32>
    %26 = arith.truncf %25 : vector<16x256xf32> to vector<16x256xbf16>
    %c0_19 = arith.constant 0 : index
    %c0_20 = arith.constant 0 : index
    %27 = vector.load %arg8[%c0_19, %c0_20] : memref<16x256xbf16, #tpu.memory_space<vmem>>, vector<16x256xbf16>
    tpu.vector_store %arg8[%c0_19, %c0_20], %26 {strides = array<i32>} : memref<16x256xbf16, #tpu.memory_space<vmem>>, vector<16x256xbf16>,
    return
  }
  func.func @transform_0(%arg0: i32) -> (i32, i32) {
    %c0_i32 = arith.constant 0 : i32
    %c0_i32_0 = arith.constant 0 : i32
    return %arg0, %c0_i32 : i32, i32
  }
  func.func @transform_1(%arg0: i32) -> (i32, i32) {
    %c0_i32 = arith.constant 0 : i32
    %c0_i32_0 = arith.constant 0 : i32
    %c0_i32_1 = arith.constant 0 : i32
    return %c0_i32, %c0_i32_0 : i32, i32
  }
  func.func @transform_2(%arg0: i32) -> (i32, i32) {
    %c0_i32 = arith.constant 0 : i32
    %c0_i32_0 = arith.constant 0 : i32
    %c0_i32_1 = arith.constant 0 : i32
    return %c0_i32, %c0_i32_0 : i32, i32
  }
  func.func @transform_3(%arg0: i32) -> (i32, i32) {
    %c0_i32 = arith.constant 0 : i32
    %c0_i32_0 = arith.constant 0 : i32
    %c0_i32_1 = arith.constant 0 : i32
    return %c0_i32, %c0_i32_0 : i32, i32
  }
  func.func @transform_4(%arg0: i32) -> (i32, i32) {
    %c0_i32 = arith.constant 0 : i32
    %c0_i32_0 = arith.constant 0 : i32
    %c0_i32_1 = arith.constant 0 : i32
    return %c0_i32, %c0_i32_0 : i32, i32
  }
  func.func @transform_5(%arg0: i32) -> (i32, i32) {
    %c0_i32 = arith.constant 0 : i32
    %c0_i32_0 = arith.constant 0 : i32
    %c0_i32_1 = arith.constant 0 : i32
    return %c0_i32, %c0_i32_0 : i32, i32
  }
  func.func @transform_6(%arg0: i32) -> (i32, i32) {
    %c0_i32 = arith.constant 0 : i32
    %c0_i32_0 = arith.constant 0 : i32
    %c0_i32_1 = arith.constant 0 : i32
    return %c0_i32, %c0_i32_0 : i32, i32
  }
  func.func @transform_7(%arg0: i32) -> (i32, i32) {
    %c0_i32 = arith.constant 0 : i32
    %c0_i32_0 = arith.constant 0 : i32
    return %arg0, %c0_i32 : i32, i32
  }
}

module attributes {stable_mosaic.version = 11 : i64} {
  func.func @sa3_head_kernel(%arg0: i32, %arg1: memref<128x259xbf16, #tpu.memory_space<vmem>>, %arg2: memref<259x256xbf16, #tpu.memory_space<vmem>>, %arg3: memref<1x256xf32, #tpu.memory_space<vmem>>, %arg4: memref<256x512xbf16, #tpu.memory_space<vmem>>, %arg5: memref<1x512xf32, #tpu.memory_space<vmem>>, %arg6: memref<512x768xbf16, #tpu.memory_space<vmem>>, %arg7: memref<1x768xf32, #tpu.memory_space<vmem>>, %arg8: memref<768x768xbf16, #tpu.memory_space<vmem>>, %arg9: memref<1x768xf32, #tpu.memory_space<vmem>>, %arg10: memref<8x1xf32, #tpu.memory_space<vmem>>, %arg11: memref<1x768xf32, #tpu.memory_space<vmem>>, %arg12: memref<8x768xf32, #tpu.memory_space<vmem>>, %arg13: memref<8x768xf32, #tpu.memory_space<vmem>>) attributes {dimension_semantics = [#tpu.dimension_semantics<parallel>], iteration_bounds = array<i64: 1>, scalar_prefetch = 0 : i64, scratch_operands = 1 : i64, tpu.core_type = #tpu.core_type<tc>, window_params = [{transform_indices = @transform_0, window_bounds = array<i64: 128, 259>}, {pipeline_mode = #tpu.pipeline_mode<synchronous>, transform_indices = @transform_1, window_bounds = array<i64: 259, 256>}, {pipeline_mode = #tpu.pipeline_mode<synchronous>, transform_indices = @transform_2, window_bounds = array<i64: 1, 256>}, {pipeline_mode = #tpu.pipeline_mode<synchronous>, transform_indices = @transform_3, window_bounds = array<i64: 256, 512>}, {pipeline_mode = #tpu.pipeline_mode<synchronous>, transform_indices = @transform_4, window_bounds = array<i64: 1, 512>}, {pipeline_mode = #tpu.pipeline_mode<synchronous>, transform_indices = @transform_5, window_bounds = array<i64: 512, 768>}, {pipeline_mode = #tpu.pipeline_mode<synchronous>, transform_indices = @transform_6, window_bounds = array<i64: 1, 768>}, {pipeline_mode = #tpu.pipeline_mode<synchronous>, transform_indices = @transform_7, window_bounds = array<i64: 768, 768>}, {pipeline_mode = #tpu.pipeline_mode<synchronous>, transform_indices = @transform_8, window_bounds = array<i64: 1, 768>}, {transform_indices = @transform_9, window_bounds = array<i64: 8, 1>}, {pipeline_mode = #tpu.pipeline_mode<synchronous>, transform_indices = @transform_10, window_bounds = array<i64: 1, 768>}, {transform_indices = @transform_11, window_bounds = array<i64: 8, 768>}]} {
    %c0 = arith.constant 0 : index
    %c0_0 = arith.constant 0 : index
    %0 = vector.load %arg2[%c0, %c0_0] : memref<259x256xbf16, #tpu.memory_space<vmem>>, vector<259x256xbf16>
    %c0_1 = arith.constant 0 : index
    %c0_2 = arith.constant 0 : index
    %1 = vector.load %arg4[%c0_1, %c0_2] : memref<256x512xbf16, #tpu.memory_space<vmem>>, vector<256x512xbf16>
    %c0_3 = arith.constant 0 : index
    %c0_4 = arith.constant 0 : index
    %2 = vector.load %arg6[%c0_3, %c0_4] : memref<512x768xbf16, #tpu.memory_space<vmem>>, vector<512x768xbf16>
    %c0_5 = arith.constant 0 : index
    %c0_6 = arith.constant 0 : index
    %3 = vector.load %arg3[%c0_5, %c0_6] : memref<1x256xf32, #tpu.memory_space<vmem>>, vector<1x256xf32>
    %c0_7 = arith.constant 0 : index
    %c0_8 = arith.constant 0 : index
    %4 = vector.load %arg5[%c0_7, %c0_8] : memref<1x512xf32, #tpu.memory_space<vmem>>, vector<1x512xf32>
    %c0_9 = arith.constant 0 : index
    %c0_10 = arith.constant 0 : index
    %5 = vector.load %arg7[%c0_9, %c0_10] : memref<1x768xf32, #tpu.memory_space<vmem>>, vector<1x768xf32>
    %c0_11 = arith.constant 0 : index
    %c0_12 = arith.constant 0 : index
    %6 = vector.load %arg1[%c0_11, %c0_12] : memref<128x259xbf16, #tpu.memory_space<vmem>>, vector<128x259xbf16>
    %cst = arith.constant dense<0.000000e+00> : vector<128x256xf32>
    %7 = tpu.matmul %6, %0, %cst {dimension_numbers = #tpu.dot_dimension_numbers<[1], [0], [0], [1], [0, 0, 1, 1], [], []>} : vector<128x259xbf16>, vector<259x256xbf16>, vector<128x256xf32> -> vector<128x256xf32>
    %8 = vector.broadcast %3 : vector<1x256xf32> to vector<128x256xf32>
    %9 = arith.addf %7, %8 : vector<128x256xf32>
    %cst_13 = arith.constant 0.000000e+00 : f32
    %10 = vector.broadcast %cst_13 : f32 to vector<128x256xf32>
    %11 = arith.maximumf %9, %10 : vector<128x256xf32>
    %12 = arith.truncf %11 : vector<128x256xf32> to vector<128x256xbf16>
    %cst_14 = arith.constant dense<0.000000e+00> : vector<128x512xf32>
    %13 = tpu.matmul %12, %1, %cst_14 {dimension_numbers = #tpu.dot_dimension_numbers<[1], [0], [0], [1], [0, 0, 1, 1], [], []>} : vector<128x256xbf16>, vector<256x512xbf16>, vector<128x512xf32> -> vector<128x512xf32>
    %14 = vector.broadcast %4 : vector<1x512xf32> to vector<128x512xf32>
    %15 = arith.addf %13, %14 : vector<128x512xf32>
    %cst_15 = arith.constant 0.000000e+00 : f32
    %16 = vector.broadcast %cst_15 : f32 to vector<128x512xf32>
    %17 = arith.maximumf %15, %16 : vector<128x512xf32>
    %18 = arith.truncf %17 : vector<128x512xf32> to vector<128x512xbf16>
    %cst_16 = arith.constant dense<0.000000e+00> : vector<128x768xf32>
    %19 = tpu.matmul %18, %2, %cst_16 {dimension_numbers = #tpu.dot_dimension_numbers<[1], [0], [0], [1], [0, 0, 1, 1], [], []>} : vector<128x512xbf16>, vector<512x768xbf16>, vector<128x768xf32> -> vector<128x768xf32>
    %20 = vector.broadcast %5 : vector<1x768xf32> to vector<128x768xf32>
    %21 = arith.addf %19, %20 : vector<128x768xf32>
    %cst_17 = arith.constant 0.000000e+00 : f32
    %22 = vector.broadcast %cst_17 : f32 to vector<128x768xf32>
    %23 = arith.maximumf %21, %22 : vector<128x768xf32>
    %24 = vector.shape_cast %23 : vector<128x768xf32> to vector<8x16x768xf32>
    %cst_18 = arith.constant dense<0xFF800000> : vector<8x768xf32>
    %25 = vector.multi_reduction <maximumf>, %24, %cst_18 [1] : vector<8x16x768xf32> to vector<8x768xf32>
    %26 = arith.truncf %25 : vector<8x768xf32> to vector<8x768xbf16>
    %c0_19 = arith.constant 0 : index
    %c0_20 = arith.constant 0 : index
    %27 = vector.load %arg8[%c0_19, %c0_20] : memref<768x768xbf16, #tpu.memory_space<vmem>>, vector<768x768xbf16>
    %cst_21 = arith.constant dense<0.000000e+00> : vector<8x768xf32>
    %28 = tpu.matmul %26, %27, %cst_21 {dimension_numbers = #tpu.dot_dimension_numbers<[1], [0], [0], [1], [0, 0, 1, 1], [], []>} : vector<8x768xbf16>, vector<768x768xbf16>, vector<8x768xf32> -> vector<8x768xf32>
    %c0_22 = arith.constant 0 : index
    %c0_23 = arith.constant 0 : index
    %29 = vector.load %arg9[%c0_22, %c0_23] : memref<1x768xf32, #tpu.memory_space<vmem>>, vector<1x768xf32>
    %30 = vector.broadcast %29 : vector<1x768xf32> to vector<8x768xf32>
    %31 = arith.addf %28, %30 : vector<8x768xf32>
    %c0_24 = arith.constant 0 : index
    %c0_25 = arith.constant 0 : index
    %32 = vector.load %arg10[%c0_24, %c0_25] : memref<8x1xf32, #tpu.memory_space<vmem>>, vector<8x1xf32>
    %cst_26 = arith.constant 0.000000e+00 : f32
    %33 = vector.broadcast %cst_26 : f32 to vector<8x1xf32>
    %34 = arith.cmpf ogt, %32, %33 : vector<8x1xf32>
    %35 = arith.extui %34 : vector<8x1xi1> to vector<8x1xi32>
    %36 = arith.sitofp %35 : vector<8x1xi32> to vector<8x1xf32>
    %37 = vector.broadcast %36 : vector<8x1xf32> to vector<8x768xf32>
    %38 = arith.mulf %31, %37 : vector<8x768xf32>
    %c0_27 = arith.constant 0 : index
    %c0_28 = arith.constant 0 : index
    %39 = vector.load %arg11[%c0_27, %c0_28] : memref<1x768xf32, #tpu.memory_space<vmem>>, vector<1x768xf32>
    %cst_29 = arith.constant 1.000000e+00 : f32
    %40 = vector.broadcast %cst_29 : f32 to vector<8x1xf32>
    %41 = arith.subf %40, %36 : vector<8x1xf32>
    %42 = vector.broadcast %39 : vector<1x768xf32> to vector<8x768xf32>
    %43 = vector.broadcast %41 : vector<8x1xf32> to vector<8x768xf32>
    %44 = arith.mulf %42, %43 : vector<8x768xf32>
    %45 = arith.addf %38, %44 : vector<8x768xf32>
    %c0_30 = arith.constant 0 : index
    %c0_31 = arith.constant 0 : index
    %46 = vector.load %arg12[%c0_30, %c0_31] : memref<8x768xf32, #tpu.memory_space<vmem>>, vector<8x768xf32>
    tpu.vector_store %arg12[%c0_30, %c0_31], %45 {strides = array<i32>} : memref<8x768xf32, #tpu.memory_space<vmem>>, vector<8x768xf32>,
    return
  }
  func.func @transform_0(%arg0: i32) -> (i32, i32) {
    %c0_i32 = arith.constant 0 : i32
    %c0_i32_0 = arith.constant 0 : i32
    return %arg0, %c0_i32 : i32, i32
  }
  func.func @transform_1(%arg0: i32) -> (i32, i32) {
    %c0_i32 = arith.constant 0 : i32
    %c0_i32_0 = arith.constant 0 : i32
    %c0_i32_1 = arith.constant 0 : i32
    return %c0_i32, %c0_i32_0 : i32, i32
  }
  func.func @transform_2(%arg0: i32) -> (i32, i32) {
    %c0_i32 = arith.constant 0 : i32
    %c0_i32_0 = arith.constant 0 : i32
    %c0_i32_1 = arith.constant 0 : i32
    return %c0_i32, %c0_i32_0 : i32, i32
  }
  func.func @transform_3(%arg0: i32) -> (i32, i32) {
    %c0_i32 = arith.constant 0 : i32
    %c0_i32_0 = arith.constant 0 : i32
    %c0_i32_1 = arith.constant 0 : i32
    return %c0_i32, %c0_i32_0 : i32, i32
  }
  func.func @transform_4(%arg0: i32) -> (i32, i32) {
    %c0_i32 = arith.constant 0 : i32
    %c0_i32_0 = arith.constant 0 : i32
    %c0_i32_1 = arith.constant 0 : i32
    return %c0_i32, %c0_i32_0 : i32, i32
  }
  func.func @transform_5(%arg0: i32) -> (i32, i32) {
    %c0_i32 = arith.constant 0 : i32
    %c0_i32_0 = arith.constant 0 : i32
    %c0_i32_1 = arith.constant 0 : i32
    return %c0_i32, %c0_i32_0 : i32, i32
  }
  func.func @transform_6(%arg0: i32) -> (i32, i32) {
    %c0_i32 = arith.constant 0 : i32
    %c0_i32_0 = arith.constant 0 : i32
    %c0_i32_1 = arith.constant 0 : i32
    return %c0_i32, %c0_i32_0 : i32, i32
  }
  func.func @transform_7(%arg0: i32) -> (i32, i32) {
    %c0_i32 = arith.constant 0 : i32
    %c0_i32_0 = arith.constant 0 : i32
    %c0_i32_1 = arith.constant 0 : i32
    return %c0_i32, %c0_i32_0 : i32, i32
  }
  func.func @transform_8(%arg0: i32) -> (i32, i32) {
    %c0_i32 = arith.constant 0 : i32
    %c0_i32_0 = arith.constant 0 : i32
    %c0_i32_1 = arith.constant 0 : i32
    return %c0_i32, %c0_i32_0 : i32, i32
  }
  func.func @transform_9(%arg0: i32) -> (i32, i32) {
    %c0_i32 = arith.constant 0 : i32
    %c0_i32_0 = arith.constant 0 : i32
    return %arg0, %c0_i32 : i32, i32
  }
  func.func @transform_10(%arg0: i32) -> (i32, i32) {
    %c0_i32 = arith.constant 0 : i32
    %c0_i32_0 = arith.constant 0 : i32
    %c0_i32_1 = arith.constant 0 : i32
    return %c0_i32, %c0_i32_0 : i32, i32
  }
  func.func @transform_11(%arg0: i32) -> (i32, i32) {
    %c0_i32 = arith.constant 0 : i32
    %c0_i32_0 = arith.constant 0 : i32
    return %arg0, %c0_i32 : i32, i32
  }
}

</mosaic_0001>

<bundles_post_ra>
// kernel: tpu_custom_call.1
= control target key start
LH: loop header
LB: loop body
LE: loop exit
PB: predicated region body
PF: predicated region fallthrough
CT: control target
= control target key end

     0   :  { %7 = vsyncpa [#allocation3], 0  ;;  %s690_s0 = inlined_call_operand.hbm [shape: f32[16,128], index: 0, kind: input, shape index: {}]   ;;  %s691_s1 = inlined_call_operand.hbm [shape: f32[8,128], index: 1, kind: input, shape index: {}]   ;;  %s692_s2 = inlined_call_operand.hbm [shape: f32[16,128], index: 2, kind: output, shape index: {}]  }
   0x1   :  { %9 = vsyncpa [#allocation3 + $0x1], 0 }
   0x2   :  { %10 = vsyncpa [#allocation6], 0 }
   0x3   :  { %11 = vsyncpa [#allocation4], 0 }
   0x4   :  { %13 = vsyncpa [#allocation4 + $0x1], 0  ;;  %s489_s9 = smov 0   ;;  %s491_s10 = smov 0  }
   0x5   :  { %s493_s11 = smov 0   ;;  %s495_s12 = smov 0  }
   0x6 LB: > { %s510_s13 = sadd.s32 4294967295, %s469_s12   ;;  %s270_s14 = sadd.s32 4294967294, %s469_s12   ;;  %s469_s12 = sphi %s495_s12, %s716_s12   ;;  %s465_s11 = sphi %s493_s11, %s715_s11   ;;  %s461_s10 = sphi %s491_s10, %s714_s10   ;;  %s457_s9 = sphi %s489_s9, %s713_s9  }
   0x7   : > { %p39_p0 = scmp.ne.s32.totalorder %s461_s10, %s457_s9  ;;  %p693_p1 = scmp.eq.s32.totalorder %s510_s13, 0 }
   0x8   : > { %p90_p3 = scmp.eq.s32.totalorder %s270_s14, 1  ;;  %p271_p5 = scmp.ge.s32.totalorder %s469_s12, 1 }
   0x9   : > { %p519_p4 = por %p693_p1, %p39_p0  ;;  %p97_p7 = scmp.lt.s32.totalorder %s469_s12, 3 }
   0xa   : > { %p524_p6 = por %p90_p3, %p39_p0  ;;  %s471_s18 = smov [#allocation5]  }
   0xb   : > { %s696_s15 = scalar_select %p519_p4, 1, 0 }
   0xc   : > { %s697_s16 = scalar_select %p524_p6, 1, 0 }
   0xd   : > { %p529_p8 = pnand %p271_p5, %p97_p7  ;;  %s110_s19 = sshll.u32 %s471_s18, 4  ;;  %s111_s19 = int_to_ptr.vmem [resolvable:$true] %s110_s19 }
   0xe   : > { %s537_s20 = sadd.s32 1, %s469_s12   ;;  %s26_s24 = sadd.s32 1, %s465_s11 }
   0xf   : > { %s698_s17 = scalar_select %p529_p8, 1, 0 }
  0x10   : > { %p292_p10 = pneg %p529_p8  ;;  %s23_s22 = ssub.s32 %s469_s12, %s537_s20 }
  0x11   : > { %p547_p12 = scmp.eq.s32.totalorder %s23_s22, 0  ;;  %s341_s27 = scalar_lea.hbm %s691_s1, 128 }
  0x12   : > { %p541_p11 = pnand %p292_p10, %p693_p1  ;;  %p342_p0 = scmp.ne.s32.totalorder %s691_s1, %s341_s27 }
  0x13   : > { %s700_s23 = scalar_select %p547_p12, 1, 0 }
  0x14   : > { %p343_p3 = pneg %p541_p11  ;;  %p348_p10 = scmp.lt.u32.totalorder %s341_s27, %s691_s1 }
  0x16   : > { %p344_p5 = pnand %p343_p3, %p342_p0 }
  0x18   : > { %p345_p7 = pneg %p344_p5 }
  0x1a   : > { %p350_p9 = pnand %p348_p10, %p345_p7 }
  0x1c   : > { %353 = shalt.err (!%p350_p9)
}
  0x1d   : > { %s354_s4 = scalar_lea.vmem %s111_s19, 128  ;;  %p362_p6 = scmp.lt.s32.totalorder %s111_s19, %s111_s19 }
  0x1e   : > { %p355_p1 = scmp.ne.s32.totalorder %s111_s19, %s354_s4  ;;  %p363_p4 = scmp.lt.s32.totalorder %s354_s4, %s354_s4 }
  0x20   : > { %p357_p2 = pnand %p355_p1, %p343_p3  ;;  %p364_p8 = por %p363_p4, %p362_p6 }
  0x22   : > { %p358_p13 = pneg %p357_p2 }
  0x24   : > { %p365_p12 = pnand %p364_p8, %p358_p13 }
  0x26   : > { %368 = shalt.err (!%p365_p12)
}
  0x27   : > { %295 = dma.hbm_to_vmem [thread:$0]  (!%p541_p11), %s691_s1, 128, %s111_s19, [#allocation6]  }
  0x28   : > { %p701_p1 = scmp.ne.s32.totalorder %s700_s23, 0  ;;  %p34_p2 = scmp.eq.s32.totalorder %s469_s12, 0 }
  0x29   : > { %p702_p4 = scmp.ne.s32.totalorder %s465_s11, %s461_s10  ;;  %p703_p6 = scmp.eq.s32.totalorder %s510_s13, 1 }
  0x2a   : > { %s573_s7 = scalar_select %p701_p1, %s465_s11, %s26_s24  }
  0x2b   : > { %p581_p8 = por %p703_p6, %p702_p4  ;;  %p305_p9 = scmp.lt.s32.totalorder %s469_s12, 2 }
  0x2c   : > { %s121_s14 = sand.u32 1, %s465_s11   ;;  %p705_p12 = pmov %p702_p4 }
  0x2d   : > { %s274_s18 = sshll.u32 %s121_s14, 3  ;;  %s275_s21 = sshll.u32 %s469_s12, 7 }
  0x2e   : > { %p35_p13 = por %p34_p2, %p705_p12  ;;  %s594_s19 = scalar_lea.hbm %s690_s0, %s275_s21 }
  0x2f   : > { %s125_s23 = scalar_lea.vmem [#allocation2], %s274_s18  ;;  %s122_s27 = scalar_lea.sflag [#allocation3], %s121_s14 }
  0x30   : > { %s132_s24 = sshll.u32 %s125_s23, 4  ;;  %p596_p11 = pnand %p305_p9, %p35_p13  ;;  %s600_s24 = int_to_ptr.vmem [resolvable:$true] %s132_s24 }
  0x31   : > { %s369_s28 = scalar_lea.hbm %s594_s19, 128  ;;  %s374_s3 = scalar_lea.hbm %s690_s0, 256 }
  0x32   : > { %p370_p0 = scmp.ne.s32.totalorder %s594_s19, %s369_s28  ;;  %p371_p3 = pneg %p596_p11 }
  0x33   : > { %p375_p10 = scmp.lt.u32.totalorder %s594_s19, %s690_s0  ;;  %p376_p1 = scmp.lt.u32.totalorder %s374_s3, %s369_s28 }
  0x34   : > { %p372_p5 = pnand %p371_p3, %p370_p0  ;;  %p378_p4 = scmp.lt.u32.totalorder %s369_s28, %s594_s19 }
  0x35   : > { %p377_p2 = por %p376_p1, %p375_p10 }
  0x36   : > { %p373_p7 = pneg %p372_p5 }
  0x37   : > { %p379_p6 = por %p378_p4, %p377_p2 }
  0x39   : > { %p380_p9 = pnand %p379_p6, %p373_p7 }
  0x3b   : > { %383 = shalt.err (!%p380_p9)
}
  0x3c   : > { %s384_s6 = scalar_lea.vmem %s600_s24, 128  ;;  %s472_s14 = smov [#allocation2]  }
  0x3d   : > { %p385_p12 = scmp.ne.s32.totalorder %s600_s24, %s384_s6  ;;  %s389_s18 = sshll.u32 %s472_s14, 4  ;;  %s390_s18 = int_to_ptr.vmem [resolvable:$false] %s389_s18 }
  0x3e   : > { %s391_s21 = scalar_lea.vmem %s390_s18, 256  ;;  %p392_p5 = scmp.lt.s32.totalorder %s600_s24, %s390_s18 }
  0x3f   : > { %p387_p13 = pnand %p385_p12, %p371_p3  ;;  %p393_p10 = scmp.lt.s32.totalorder %s391_s21, %s384_s6 }
  0x41   : > { %p388_p0 = pneg %p387_p13  ;;  %p394_p1 = por %p393_p10, %p392_p5 }
  0x43   : > { %p395_p2 = pnand %p394_p1, %p388_p0 }
  0x45   : > { %398 = shalt.err (!%p395_p2)
}
  0x46   : > { %299 = dma.hbm_to_vmem [thread:$0]  (!%p596_p11), %s594_s19, 128, %s600_s24, %s122_s27  }
  0x47   : > { %p707_p7 = scmp.ne.s32.totalorder %s698_s17, 0 }
  0x48   : > { %s630_s22 = sand.u32 (!%p707_p7), 1, %s461_s10   ;;  %p708_p3 = scmp.ne.s32.totalorder (!%p707_p7), %s696_s15, 0 }
  0x49   : > { %141 = sbr.rel (%p707_p7) target bundleno = 109 (0x6d), region = 28  ;;  %s277_s25 = sshll.u32 (!%p707_p7), %s630_s22, 3 }
  0x4a   : > { %s144_s23 = scalar_lea.sflag (!%p707_p7), [#allocation3], %s630_s22  ;;  %s147_s28 = scalar_lea.vmem (!%p707_p7), [#allocation2], %s277_s25 }
  0x50   : > { %444 = dma.done.wait (%p708_p3), %s144_s23, 128  }
  0x51   : > { %446 = vsyncadd (%p708_p3), %s144_s23, 4294967168  ;;  %p709_p4 = scmp.eq.s32.totalorder %s510_s13, 0 }
  0x53   : > { %448 = dma.done.wait (%p709_p4), [#allocation6], 128   ;;  %p710_p11 = pmov %p709_p4 }
  0x54   : > { %s171_s17 = scalar_lea.vmem [#allocation7], %s277_s25  ;;  %s281_s24 = sshll.u32 %s510_s13, 7  ;;  %v172_v0 = vld [vmem:[%s147_s28] sm:$0xff]  ;;  %v173_v1 = vld [vmem:[#allocation5] sm:$0xff] }
  0x55   : > { %450 = vsyncadd (%p710_p11), [#allocation6], 4294967168  ;;  %s190_s19 = sshll.u32 %s171_s17, 4  ;;  %v174_v2 = vadd.f32 %v173_v1, %v172_v0  ;;  %s648_s27 = scalar_lea.hbm %s692_s2, %s281_s24  ;;  %s643_s19 = int_to_ptr.vmem [resolvable:$true] %s190_s19 }
  0x56   : > { %s177_s29 = scalar_lea.sflag [#allocation4], %s630_s22  ;;  %s399_s30 = scalar_lea.vmem %s643_s19, 128 }
  0x57   : > { %175 = vst [vmem:[%s171_s17] sm:$0xff] %v174_v2  ;;  %p400_p6 = scmp.ne.s32.totalorder %s643_s19, %s399_s30  ;;  %s473_s13 = smov [#allocation7]  }
  0x58   : > { %s403_s3 = sshll.u32 %s473_s13, 4  ;;  %s404_s3 = int_to_ptr.vmem [resolvable:$false] %s403_s3 }
  0x59   : > { %p401_p9 = pnand %p400_p6, %p581_p8  ;;  %s405_s4 = scalar_lea.vmem %s404_s3, 256 }
  0x5a   : > { %p406_p13 = scmp.lt.s32.totalorder %s643_s19, %s404_s3  ;;  %p407_p0 = scmp.lt.s32.totalorder %s405_s4, %s399_s30 }
  0x5b   : > { %p402_p12 = pneg %p401_p9 }
  0x5c   : > { %p408_p5 = por %p407_p0, %p406_p13 }
  0x5e   : > { %p409_p10 = pnand %p408_p5, %p402_p12 }
  0x60   : > { %412 = shalt.err (!%p409_p10)
}
  0x61   : > { %s413_s5 = scalar_lea.hbm %s648_s27, 128  ;;  %s417_s18 = scalar_lea.hbm %s692_s2, 256 }
  0x62   : > { %p414_p1 = scmp.ne.s32.totalorder %s648_s27, %s413_s5  ;;  %p418_p3 = scmp.lt.u32.totalorder %s648_s27, %s692_s2 }
  0x63   : > { %p419_p4 = scmp.lt.u32.totalorder %s417_s18, %s413_s5  ;;  %p421_p6 = scmp.lt.u32.totalorder %s413_s5, %s648_s27 }
  0x64   : > { %p415_p2 = pnand %p414_p1, %p581_p8 }
  0x65   : > { %p420_p11 = por %p419_p4, %p418_p3 }
  0x66   : > { %p416_p7 = pneg %p415_p2 }
  0x67   : > { %p422_p9 = por %p421_p6, %p420_p11 }
  0x69   : > { %p423_p12 = pnand %p422_p9, %p416_p7 }
  0x6b   : > { %426 = shalt.err (!%p423_p12)
}
  0x6c   : > { %290 = dma.vmem_to_hbm [thread:$0]  (%p581_p8), %s643_s19, 128, %s648_s27, %s177_s29  }
  0x6d PF: > { %s202_s25 = sand.u32 1, %s457_s9   ;;  %p711_p13 = scmp.ne.s32.totalorder %s697_s16, 0 }
  0x6e   : > { %p712_p0 = scmp.ge.s32.totalorder %s469_s12, 2  ;;  %s203_s23 = scalar_lea.sflag [#allocation4], %s202_s25 }
  0x70   : > { %p301_p5 = pnand %p712_p0, %p711_p13 }
  0x72   : > { %452 = dma.done.wait (!%p301_p5), %s203_s23, 128  }
  0x73   : > { %454 = vsyncadd (!%p301_p5), %s203_s23, 4294967168  ;;  %p16_p10 = scmp.ge.s32.totalorder %s537_s20, 4   ;;  %s713_s9 = smov %s461_s10 }
  0x74   : > { %s714_s10 = smov %s465_s11  ;;  %s715_s11 = smov %s573_s7 }
  0x75   : > { %s716_s12 = smov %s537_s20  ;;  %18 = sbr.rel (!%p16_p10) target bundleno = 6 (0x6), region = 77 }
  0x7c   :  { %208 = vsyncpa [#allocation3], 1 }
  0x7d   :  { %210 = vsyncpa [#allocation3 + $0x1], 1 }
  0x7e   :  { %211 = vsyncpa [#allocation6], 1 }
  0x7f   :  { %212 = vsyncpa [#allocation4], 1 }
  0x80   :  { %214 = vsyncpa [#allocation4 + $0x1], 1 }

// kernel: custom-call.16
= control target key start
LH: loop header
LB: loop body
LE: loop exit
PB: predicated region body
PF: predicated region fallthrough
CT: control target
= control target key end

     0   :  { %s6_s0 = inlined_call_operand.vmem [shape: f32[8,64], index: 0, kind: output, shape index: {}]  }

// kernel: custom-call.17
= control target key start
LH: loop header
LB: loop body
LE: loop exit
PB: predicated region body
PF: predicated region fallthrough
CT: control target
= control target key end

     0   :  { %s6_s0 = inlined_call_operand.vmem [shape: f32[8,32], index: 0, kind: output, shape index: {}]  }

// kernel: sub.51
= control target key start
LH: loop header
LB: loop body
LE: loop exit
PB: predicated region body
PF: predicated region fallthrough
CT: control target
= control target key end

     0   :  { %s4060_s0 = inlined_call_operand.vmem [shape: f32[8,16,3], index: 0, kind: input, shape index: {}]   ;;  %s4061_s1 = inlined_call_operand.vmem [shape: f32[8,16,32,3], index: 1, kind: output, shape index: {}]  }
   0x1   :  { %v4_v0 = vld [vmem:[%s4060_s0] ss:$0 sm:$0xff]  ;;  %v1492_v1 = vld [vmem:[%s4060_s0 + $0x10] ss:$0 sm:$0xff]  ;;  %v1506_v8 = vld [vmem:[%s4060_s0 + $0x1] ss:$0 sm:$0xff] }
   0x2   :  { %v1494_v2 = vld [vmem:[%s4060_s0 + $0x20] ss:$0 sm:$0xff]  ;;  %5 = vst [vmem:[%s4061_s1] sm:$0xff] %v4_v0  ;;  %1493 = vst [vmem:[%s4061_s1 + $0x200] sm:$0xff] %v1492_v1  ;;  %v1496_v3 = vld [vmem:[%s4060_s0 + $0x30] ss:$0 sm:$0xff] }
   0x3   :  { %1495 = vst [vmem:[%s4061_s1 + $0x400] sm:$0xff] %v1494_v2  ;;  %v1498_v4 = vld [vmem:[%s4060_s0 + $0x40] ss:$0 sm:$0xff]  ;;  %v1500_v5 = vld [vmem:[%s4060_s0 + $0x50] ss:$0 sm:$0xff]  ;;  %1746 = vst [vmem:[%s4061_s1 + $0x8] sm:$0xff] %v4_v0 }
   0x4   :  { %1747 = vst [vmem:[%s4061_s1 + $0x208] sm:$0xff] %v1492_v1  ;;  %1748 = vst [vmem:[%s4061_s1 + $0x408] sm:$0xff] %v1494_v2  ;;  %v1502_v6 = vld [vmem:[%s4060_s0 + $0x60] ss:$0 sm:$0xff]  ;;  %v1504_v7 = vld [vmem:[%s4060_s0 + $0x70] ss:$0 sm:$0xff] }
   0x5   :  { %1874 = vst [vmem:[%s4061_s1 + $0x10] sm:$0xff] %v4_v0  ;;  %1875 = vst [vmem:[%s4061_s1 + $0x210] sm:$0xff] %v1492_v1  ;;  %v1508_v9 = vld [vmem:[%s4060_s0 + $0x11] ss:$0 sm:$0xff]  ;;  %v1510_v10 = vld [vmem:[%s4060_s0 + $0x21] ss:$0 sm:$0xff] }
   0x6   :  { %1876 = vst [vmem:[%s4061_s1 + $0x410] sm:$0xff] %v1494_v2  ;;  %2002 = vst [vmem:[%s4061_s1 + $0x18] sm:$0xff] %v4_v0  ;;  %v1512_v11 = vld [vmem:[%s4060_s0 + $0x31] ss:$0 sm:$0xff]  ;;  %v1514_v12 = vld [vmem:[%s4060_s0 + $0x41] ss:$0 sm:$0xff] }
   0x7   :  { %2003 = vst [vmem:[%s4061_s1 + $0x218] sm:$0xff] %v1492_v1  ;;  %2004 = vst [vmem:[%s4061_s1 + $0x418] sm:$0xff] %v1494_v2  ;;  %v1516_v13 = vld [vmem:[%s4060_s0 + $0x51] ss:$0 sm:$0xff]  ;;  %v1518_v14 = vld [vmem:[%s4060_s0 + $0x61] ss:$0 sm:$0xff] }
   0x8   :  { %1497 = vst [vmem:[%s4061_s1 + $0x600] sm:$0xff] %v1496_v3  ;;  %1499 = vst [vmem:[%s4061_s1 + $0x800] sm:$0xff] %v1498_v4  ;;  %v1520_v15 = vld [vmem:[%s4060_s0 + $0x71] ss:$0 sm:$0xff]  ;;  %v1522_v16 = vld [vmem:[%s4060_s0 + $0x2] ss:$0 sm:$0xff] }
   0x9   :  { %1501 = vst [vmem:[%s4061_s1 + $0xa00] sm:$0xff] %v1500_v5  ;;  %1749 = vst [vmem:[%s4061_s1 + $0x608] sm:$0xff] %v1496_v3  ;;  %v1524_v17 = vld [vmem:[%s4060_s0 + $0x12] ss:$0 sm:$0xff]  ;;  %v1526_v18 = vld [vmem:[%s4060_s0 + $0x22] ss:$0 sm:$0xff] }
   0xa   :  { %1750 = vst [vmem:[%s4061_s1 + $0x808] sm:$0xff] %v1498_v4  ;;  %1751 = vst [vmem:[%s4061_s1 + $0xa08] sm:$0xff] %v1500_v5  ;;  %v1528_v19 = vld [vmem:[%s4060_s0 + $0x32] ss:$0 sm:$0xff]  ;;  %v1530_v20 = vld [vmem:[%s4060_s0 + $0x42] ss:$0 sm:$0xff] }
   0xb   :  { %1877 = vst [vmem:[%s4061_s1 + $0x610] sm:$0xff] %v1496_v3  ;;  %1878 = vst [vmem:[%s4061_s1 + $0x810] sm:$0xff] %v1498_v4  ;;  %v1532_v21 = vld [vmem:[%s4060_s0 + $0x52] ss:$0 sm:$0xff]  ;;  %v1534_v22 = vld [vmem:[%s4060_s0 + $0x62] ss:$0 sm:$0xff] }
   0xc   :  { %1879 = vst [vmem:[%s4061_s1 + $0xa10] sm:$0xff] %v1500_v5  ;;  %2005 = vst [vmem:[%s4061_s1 + $0x618] sm:$0xff] %v1496_v3  ;;  %v1536_v23 = vld [vmem:[%s4060_s0 + $0x72] ss:$0 sm:$0xff]  ;;  %v1538_v24 = vld [vmem:[%s4060_s0 + $0x3] ss:$0 sm:$0xff] }
   0xd   :  { %2006 = vst [vmem:[%s4061_s1 + $0x818] sm:$0xff] %v1498_v4  ;;  %2007 = vst [vmem:[%s4061_s1 + $0xa18] sm:$0xff] %v1500_v5  ;;  %v1540_v25 = vld [vmem:[%s4060_s0 + $0x13] ss:$0 sm:$0xff]  ;;  %v1542_v26 = vld [vmem:[%s4060_s0 + $0x23] ss:$0 sm:$0xff] }
   0xe   :  { %1503 = vst [vmem:[%s4061_s1 + $0xc00] sm:$0xff] %v1502_v6  ;;  %1505 = vst [vmem:[%s4061_s1 + $0xe00] sm:$0xff] %v1504_v7  ;;  %v1544_v27 = vld [vmem:[%s4060_s0 + $0x33] ss:$0 sm:$0xff]  ;;  %v1546_v28 = vld [vmem:[%s4060_s0 + $0x43] ss:$0 sm:$0xff] }
   0xf   :  { %1507 = vst [vmem:[%s4061_s1 + $0x20] sm:$0xff] %v1506_v8  ;;  %1752 = vst [vmem:[%s4061_s1 + $0xc08] sm:$0xff] %v1502_v6  ;;  %v1548_v29 = vld [vmem:[%s4060_s0 + $0x53] ss:$0 sm:$0xff]  ;;  %v1550_v30 = vld [vmem:[%s4060_s0 + $0x63] ss:$0 sm:$0xff] }
  0x10   :  { %1753 = vst [vmem:[%s4061_s1 + $0xe08] sm:$0xff] %v1504_v7  ;;  %1754 = vst [vmem:[%s4061_s1 + $0x28] sm:$0xff] %v1506_v8  ;;  %v1552_v31 = vld [vmem:[%s4060_s0 + $0x73] ss:$0 sm:$0xff]  ;;  %v1554_v32 = vld [vmem:[%s4060_s0 + $0x4] ss:$0 sm:$0xff] }
  0x11   :  { %1880 = vst [vmem:[%s4061_s1 + $0xc10] sm:$0xff] %v1502_v6  ;;  %1881 = vst [vmem:[%s4061_s1 + $0xe10] sm:$0xff] %v1504_v7  ;;  %v1556_v33 = vld [vmem:[%s4060_s0 + $0x14] ss:$0 sm:$0xff]  ;;  %v1558_v34 = vld [vmem:[%s4060_s0 + $0x24] ss:$0 sm:$0xff] }
  0x12   :  { %1882 = vst [vmem:[%s4061_s1 + $0x30] sm:$0xff] %v1506_v8  ;;  %2008 = vst [vmem:[%s4061_s1 + $0xc18] sm:$0xff] %v1502_v6  ;;  %v1560_v35 = vld [vmem:[%s4060_s0 + $0x34] ss:$0 sm:$0xff]  ;;  %v1562_v36 = vld [vmem:[%s4060_s0 + $0x44] ss:$0 sm:$0xff] }
  0x13   :  { %2009 = vst [vmem:[%s4061_s1 + $0xe18] sm:$0xff] %v1504_v7  ;;  %2010 = vst [vmem:[%s4061_s1 + $0x38] sm:$0xff] %v1506_v8  ;;  %v1564_v37 = vld [vmem:[%s4060_s0 + $0x54] ss:$0 sm:$0xff]  ;;  %v1566_v38 = vld [vmem:[%s4060_s0 + $0x64] ss:$0 sm:$0xff] }
  0x14   :  { %1509 = vst [vmem:[%s4061_s1 + $0x220] sm:$0xff] %v1508_v9  ;;  %1511 = vst [vmem:[%s4061_s1 + $0x420] sm:$0xff] %v1510_v10  ;;  %v1568_v39 = vld [vmem:[%s4060_s0 + $0x74] ss:$0 sm:$0xff]  ;;  %v1570_v40 = vld [vmem:[%s4060_s0 + $0x5] ss:$0 sm:$0xff] }
  0x15   :  { %1513 = vst [vmem:[%s4061_s1 + $0x620] sm:$0xff] %v1512_v11  ;;  %1755 = vst [vmem:[%s4061_s1 + $0x228] sm:$0xff] %v1508_v9  ;;  %v1572_v41 = vld [vmem:[%s4060_s0 + $0x15] ss:$0 sm:$0xff]  ;;  %v1574_v42 = vld [vmem:[%s4060_s0 + $0x25] ss:$0 sm:$0xff] }
  0x16   :  { %1756 = vst [vmem:[%s4061_s1 + $0x428] sm:$0xff] %v1510_v10  ;;  %1757 = vst [vmem:[%s4061_s1 + $0x628] sm:$0xff] %v1512_v11  ;;  %v1576_v43 = vld [vmem:[%s4060_s0 + $0x35] ss:$0 sm:$0xff]  ;;  %v1578_v44 = vld [vmem:[%s4060_s0 + $0x45] ss:$0 sm:$0xff] }
  0x17   :  { %1883 = vst [vmem:[%s4061_s1 + $0x230] sm:$0xff] %v1508_v9  ;;  %1884 = vst [vmem:[%s4061_s1 + $0x430] sm:$0xff] %v1510_v10  ;;  %v1580_v45 = vld [vmem:[%s4060_s0 + $0x55] ss:$0 sm:$0xff]  ;;  %v1582_v46 = vld [vmem:[%s4060_s0 + $0x65] ss:$0 sm:$0xff] }
  0x18   :  { %1885 = vst [vmem:[%s4061_s1 + $0x630] sm:$0xff] %v1512_v11  ;;  %2011 = vst [vmem:[%s4061_s1 + $0x238] sm:$0xff] %v1508_v9  ;;  %v1584_v47 = vld [vmem:[%s4060_s0 + $0x75] ss:$0 sm:$0xff]  ;;  %v1586_v48 = vld [vmem:[%s4060_s0 + $0x6] ss:$0 sm:$0xff] }
  0x19   :  { %2012 = vst [vmem:[%s4061_s1 + $0x438] sm:$0xff] %v1510_v10  ;;  %2013 = vst [vmem:[%s4061_s1 + $0x638] sm:$0xff] %v1512_v11  ;;  %v1588_v49 = vld [vmem:[%s4060_s0 + $0x16] ss:$0 sm:$0xff]  ;;  %v1590_v50 = vld [vmem:[%s4060_s0 + $0x26] ss:$0 sm:$0xff] }
  0x1a   :  { %1515 = vst [vmem:[%s4061_s1 + $0x820] sm:$0xff] %v1514_v12  ;;  %1517 = vst [vmem:[%s4061_s1 + $0xa20] sm:$0xff] %v1516_v13  ;;  %v1592_v51 = vld [vmem:[%s4060_s0 + $0x36] ss:$0 sm:$0xff]  ;;  %v1594_v52 = vld [vmem:[%s4060_s0 + $0x46] ss:$0 sm:$0xff] }
  0x1b   :  { %1519 = vst [vmem:[%s4061_s1 + $0xc20] sm:$0xff] %v1518_v14  ;;  %1758 = vst [vmem:[%s4061_s1 + $0x828] sm:$0xff] %v1514_v12  ;;  %v1596_v53 = vld [vmem:[%s4060_s0 + $0x56] ss:$0 sm:$0xff]  ;;  %v1598_v54 = vld [vmem:[%s4060_s0 + $0x66] ss:$0 sm:$0xff] }
  0x1c   :  { %1759 = vst [vmem:[%s4061_s1 + $0xa28] sm:$0xff] %v1516_v13  ;;  %1760 = vst [vmem:[%s4061_s1 + $0xc28] sm:$0xff] %v1518_v14  ;;  %v1600_v55 = vld [vmem:[%s4060_s0 + $0x76] ss:$0 sm:$0xff]  ;;  %v1602_v56 = vld [vmem:[%s4060_s0 + $0x7] ss:$0 sm:$0xff] }
  0x1d   :  { %1886 = vst [vmem:[%s4061_s1 + $0x830] sm:$0xff] %v1514_v12  ;;  %1887 = vst [vmem:[%s4061_s1 + $0xa30] sm:$0xff] %v1516_v13  ;;  %v1604_v57 = vld [vmem:[%s4060_s0 + $0x17] ss:$0 sm:$0xff]  ;;  %v1606_v58 = vld [vmem:[%s4060_s0 + $0x27] ss:$0 sm:$0xff] }
  0x1e   :  { %1888 = vst [vmem:[%s4061_s1 + $0xc30] sm:$0xff] %v1518_v14  ;;  %2014 = vst [vmem:[%s4061_s1 + $0x838] sm:$0xff] %v1514_v12  ;;  %v1608_v59 = vld [vmem:[%s4060_s0 + $0x37] ss:$0 sm:$0xff]  ;;  %v1610_v60 = vld [vmem:[%s4060_s0 + $0x47] ss:$0 sm:$0xff] }
  0x1f   :  { %2015 = vst [vmem:[%s4061_s1 + $0xa38] sm:$0xff] %v1516_v13  ;;  %2016 = vst [vmem:[%s4061_s1 + $0xc38] sm:$0xff] %v1518_v14  ;;  %v1612_v61 = vld [vmem:[%s4060_s0 + $0x57] ss:$0 sm:$0xff]  ;;  %v1614_v62 = vld [vmem:[%s4060_s0 + $0x67] ss:$0 sm:$0xff] }
  0x20   :  { %1521 = vst [vmem:[%s4061_s1 + $0xe20] sm:$0xff] %v1520_v15  ;;  %1523 = vst [vmem:[%s4061_s1 + $0x40] sm:$0xff] %v1522_v16  ;;  %v1616_v63 = vld [vmem:[%s4060_s0 + $0x77] ss:$0 sm:$0xff]  ;;  %v1618_v0 = vld [vmem:[%s4060_s0 + $0x8] ss:$0 sm:$0xff] }
  0x21   :  { %1525 = vst [vmem:[%s4061_s1 + $0x240] sm:$0xff] %v1524_v17  ;;  %1761 = vst [vmem:[%s4061_s1 + $0xe28] sm:$0xff] %v1520_v15  ;;  %v1620_v1 = vld [vmem:[%s4060_s0 + $0x18] ss:$0 sm:$0xff]  ;;  %v1622_v2 = vld [vmem:[%s4060_s0 + $0x28] ss:$0 sm:$0xff] }
  0x22   :  { %1762 = vst [vmem:[%s4061_s1 + $0x48] sm:$0xff] %v1522_v16  ;;  %1763 = vst [vmem:[%s4061_s1 + $0x248] sm:$0xff] %v1524_v17  ;;  %v1624_v3 = vld [vmem:[%s4060_s0 + $0x38] ss:$0 sm:$0xff]  ;;  %v1626_v4 = vld [vmem:[%s4060_s0 + $0x48] ss:$0 sm:$0xff] }
  0x23   :  { %1889 = vst [vmem:[%s4061_s1 + $0xe30] sm:$0xff] %v1520_v15  ;;  %1890 = vst [vmem:[%s4061_s1 + $0x50] sm:$0xff] %v1522_v16  ;;  %v1628_v5 = vld [vmem:[%s4060_s0 + $0x58] ss:$0 sm:$0xff]  ;;  %v1630_v6 = vld [vmem:[%s4060_s0 + $0x68] ss:$0 sm:$0xff] }
  0x24   :  { %1891 = vst [vmem:[%s4061_s1 + $0x250] sm:$0xff] %v1524_v17  ;;  %2017 = vst [vmem:[%s4061_s1 + $0xe38] sm:$0xff] %v1520_v15  ;;  %v1632_v7 = vld [vmem:[%s4060_s0 + $0x78] ss:$0 sm:$0xff]  ;;  %v1634_v8 = vld [vmem:[%s4060_s0 + $0x9] ss:$0 sm:$0xff] }
  0x25   :  { %2018 = vst [vmem:[%s4061_s1 + $0x58] sm:$0xff] %v1522_v16  ;;  %2019 = vst [vmem:[%s4061_s1 + $0x258] sm:$0xff] %v1524_v17  ;;  %v1636_v9 = vld [vmem:[%s4060_s0 + $0x19] ss:$0 sm:$0xff]  ;;  %v1638_v10 = vld [vmem:[%s4060_s0 + $0x29] ss:$0 sm:$0xff] }
  0x26   :  { %1527 = vst [vmem:[%s4061_s1 + $0x440] sm:$0xff] %v1526_v18  ;;  %1529 = vst [vmem:[%s4061_s1 + $0x640] sm:$0xff] %v1528_v19  ;;  %v1640_v11 = vld [vmem:[%s4060_s0 + $0x39] ss:$0 sm:$0xff]  ;;  %v1642_v12 = vld [vmem:[%s4060_s0 + $0x49] ss:$0 sm:$0xff] }
  0x27   :  { %1531 = vst [vmem:[%s4061_s1 + $0x840] sm:$0xff] %v1530_v20  ;;  %1764 = vst [vmem:[%s4061_s1 + $0x448] sm:$0xff] %v1526_v18  ;;  %v1644_v13 = vld [vmem:[%s4060_s0 + $0x59] ss:$0 sm:$0xff]  ;;  %v1646_v14 = vld [vmem:[%s4060_s0 + $0x69] ss:$0 sm:$0xff] }
  0x28   :  { %1765 = vst [vmem:[%s4061_s1 + $0x648] sm:$0xff] %v1528_v19  ;;  %1766 = vst [vmem:[%s4061_s1 + $0x848] sm:$0xff] %v1530_v20  ;;  %v1648_v15 = vld [vmem:[%s4060_s0 + $0x79] ss:$0 sm:$0xff]  ;;  %v1650_v16 = vld [vmem:[%s4060_s0 + $0xa] ss:$0 sm:$0xff] }
  0x29   :  { %1892 = vst [vmem:[%s4061_s1 + $0x450] sm:$0xff] %v1526_v18  ;;  %1893 = vst [vmem:[%s4061_s1 + $0x650] sm:$0xff] %v1528_v19  ;;  %v1652_v17 = vld [vmem:[%s4060_s0 + $0x1a] ss:$0 sm:$0xff] }
  0x2a   :  { %1894 = vst [vmem:[%s4061_s1 + $0x850] sm:$0xff] %v1530_v20  ;;  %2020 = vst [vmem:[%s4061_s1 + $0x458] sm:$0xff] %v1526_v18  ;;  %v1654_v18 = vld [vmem:[%s4060_s0 + $0x2a] ss:$0 sm:$0xff] }
  0x2b   :  { %2021 = vst [vmem:[%s4061_s1 + $0x658] sm:$0xff] %v1528_v19  ;;  %2022 = vst [vmem:[%s4061_s1 + $0x858] sm:$0xff] %v1530_v20  ;;  %v1656_v19 = vld [vmem:[%s4060_s0 + $0x3a] ss:$0 sm:$0xff]  ;;  %v1658_v20 = vld [vmem:[%s4060_s0 + $0x4a] ss:$0 sm:$0xff] }
  0x2c   :  { %1533 = vst [vmem:[%s4061_s1 + $0xa40] sm:$0xff] %v1532_v21  ;;  %1535 = vst [vmem:[%s4061_s1 + $0xc40] sm:$0xff] %v1534_v22 }
  0x2d   :  { %1537 = vst [vmem:[%s4061_s1 + $0xe40] sm:$0xff] %v1536_v23  ;;  %1767 = vst [vmem:[%s4061_s1 + $0xa48] sm:$0xff] %v1532_v21 }
  0x2e   :  { %1768 = vst [vmem:[%s4061_s1 + $0xc48] sm:$0xff] %v1534_v22  ;;  %1769 = vst [vmem:[%s4061_s1 + $0xe48] sm:$0xff] %v1536_v23 }
  0x2f   :  { %1895 = vst [vmem:[%s4061_s1 + $0xa50] sm:$0xff] %v1532_v21  ;;  %1896 = vst [vmem:[%s4061_s1 + $0xc50] sm:$0xff] %v1534_v22 }
  0x30   :  { %1897 = vst [vmem:[%s4061_s1 + $0xe50] sm:$0xff] %v1536_v23  ;;  %2023 = vst [vmem:[%s4061_s1 + $0xa58] sm:$0xff] %v1532_v21  ;;  %v1660_v21 = vld [vmem:[%s4060_s0 + $0x5a] ss:$0 sm:$0xff] }
  0x31   :  { %2024 = vst [vmem:[%s4061_s1 + $0xc58] sm:$0xff] %v1534_v22  ;;  %2025 = vst [vmem:[%s4061_s1 + $0xe58] sm:$0xff] %v1536_v23  ;;  %v1662_v22 = vld [vmem:[%s4060_s0 + $0x6a] ss:$0 sm:$0xff]  ;;  %v1664_v23 = vld [vmem:[%s4060_s0 + $0x7a] ss:$0 sm:$0xff] }
  0x32   :  { %1539 = vst [vmem:[%s4061_s1 + $0x60] sm:$0xff] %v1538_v24  ;;  %1541 = vst [vmem:[%s4061_s1 + $0x260] sm:$0xff] %v1540_v25 }
  0x33   :  { %1543 = vst [vmem:[%s4061_s1 + $0x460] sm:$0xff] %v1542_v26  ;;  %1770 = vst [vmem:[%s4061_s1 + $0x68] sm:$0xff] %v1538_v24 }
  0x34   :  { %1771 = vst [vmem:[%s4061_s1 + $0x268] sm:$0xff] %v1540_v25  ;;  %1772 = vst [vmem:[%s4061_s1 + $0x468] sm:$0xff] %v1542_v26 }
  0x35   :  { %1898 = vst [vmem:[%s4061_s1 + $0x70] sm:$0xff] %v1538_v24  ;;  %1899 = vst [vmem:[%s4061_s1 + $0x270] sm:$0xff] %v1540_v25 }
  0x36   :  { %1900 = vst [vmem:[%s4061_s1 + $0x470] sm:$0xff] %v1542_v26  ;;  %2026 = vst [vmem:[%s4061_s1 + $0x78] sm:$0xff] %v1538_v24  ;;  %v1666_v24 = vld [vmem:[%s4060_s0 + $0xb] ss:$0 sm:$0xff] }
  0x37   :  { %2027 = vst [vmem:[%s4061_s1 + $0x278] sm:$0xff] %v1540_v25  ;;  %2028 = vst [vmem:[%s4061_s1 + $0x478] sm:$0xff] %v1542_v26  ;;  %v1668_v25 = vld [vmem:[%s4060_s0 + $0x1b] ss:$0 sm:$0xff]  ;;  %v1670_v26 = vld [vmem:[%s4060_s0 + $0x2b] ss:$0 sm:$0xff] }
  0x38   :  { %1545 = vst [vmem:[%s4061_s1 + $0x660] sm:$0xff] %v1544_v27  ;;  %1547 = vst [vmem:[%s4061_s1 + $0x860] sm:$0xff] %v1546_v28 }
  0x39   :  { %1549 = vst [vmem:[%s4061_s1 + $0xa60] sm:$0xff] %v1548_v29  ;;  %1773 = vst [vmem:[%s4061_s1 + $0x668] sm:$0xff] %v1544_v27 }
  0x3a   :  { %1774 = vst [vmem:[%s4061_s1 + $0x868] sm:$0xff] %v1546_v28  ;;  %1775 = vst [vmem:[%s4061_s1 + $0xa68] sm:$0xff] %v1548_v29 }
  0x3b   :  { %1901 = vst [vmem:[%s4061_s1 + $0x670] sm:$0xff] %v1544_v27  ;;  %1902 = vst [vmem:[%s4061_s1 + $0x870] sm:$0xff] %v1546_v28 }
  0x3c   :  { %1903 = vst [vmem:[%s4061_s1 + $0xa70] sm:$0xff] %v1548_v29  ;;  %2029 = vst [vmem:[%s4061_s1 + $0x678] sm:$0xff] %v1544_v27  ;;  %v1672_v27 = vld [vmem:[%s4060_s0 + $0x3b] ss:$0 sm:$0xff] }
  0x3d   :  { %2030 = vst [vmem:[%s4061_s1 + $0x878] sm:$0xff] %v1546_v28  ;;  %2031 = vst [vmem:[%s4061_s1 + $0xa78] sm:$0xff] %v1548_v29  ;;  %v1674_v28 = vld [vmem:[%s4060_s0 + $0x4b] ss:$0 sm:$0xff]  ;;  %v1676_v29 = vld [vmem:[%s4060_s0 + $0x5b] ss:$0 sm:$0xff] }
  0x3e   :  { %1551 = vst [vmem:[%s4061_s1 + $0xc60] sm:$0xff] %v1550_v30  ;;  %1553 = vst [vmem:[%s4061_s1 + $0xe60] sm:$0xff] %v1552_v31 }
  0x3f   :  { %1555 = vst [vmem:[%s4061_s1 + $0x80] sm:$0xff] %v1554_v32  ;;  %1776 = vst [vmem:[%s4061_s1 + $0xc68] sm:$0xff] %v1550_v30 }
  0x40   :  { %1777 = vst [vmem:[%s4061_s1 + $0xe68] sm:$0xff] %v1552_v31  ;;  %1778 = vst [vmem:[%s4061_s1 + $0x88] sm:$0xff] %v1554_v32 }
  0x41   :  { %1904 = vst [vmem:[%s4061_s1 + $0xc70] sm:$0xff] %v1550_v30  ;;  %1905 = vst [vmem:[%s4061_s1 + $0xe70] sm:$0xff] %v1552_v31 }
  0x42   :  { %1906 = vst [vmem:[%s4061_s1 + $0x90] sm:$0xff] %v1554_v32  ;;  %2032 = vst [vmem:[%s4061_s1 + $0xc78] sm:$0xff] %v1550_v30  ;;  %v1678_v30 = vld [vmem:[%s4060_s0 + $0x6b] ss:$0 sm:$0xff] }
  0x43   :  { %2033 = vst [vmem:[%s4061_s1 + $0xe78] sm:$0xff] %v1552_v31  ;;  %2034 = vst [vmem:[%s4061_s1 + $0x98] sm:$0xff] %v1554_v32  ;;  %v1680_v31 = vld [vmem:[%s4060_s0 + $0x7b] ss:$0 sm:$0xff]  ;;  %v1682_v32 = vld [vmem:[%s4060_s0 + $0xc] ss:$0 sm:$0xff] }
  0x44   :  { %1557 = vst [vmem:[%s4061_s1 + $0x280] sm:$0xff] %v1556_v33  ;;  %1559 = vst [vmem:[%s4061_s1 + $0x480] sm:$0xff] %v1558_v34 }
  0x45   :  { %1561 = vst [vmem:[%s4061_s1 + $0x680] sm:$0xff] %v1560_v35  ;;  %1779 = vst [vmem:[%s4061_s1 + $0x288] sm:$0xff] %v1556_v33 }
  0x46   :  { %1780 = vst [vmem:[%s4061_s1 + $0x488] sm:$0xff] %v1558_v34  ;;  %1781 = vst [vmem:[%s4061_s1 + $0x688] sm:$0xff] %v1560_v35 }
  0x47   :  { %1907 = vst [vmem:[%s4061_s1 + $0x290] sm:$0xff] %v1556_v33  ;;  %1908 = vst [vmem:[%s4061_s1 + $0x490] sm:$0xff] %v1558_v34 }
  0x48   :  { %1909 = vst [vmem:[%s4061_s1 + $0x690] sm:$0xff] %v1560_v35  ;;  %2035 = vst [vmem:[%s4061_s1 + $0x298] sm:$0xff] %v1556_v33  ;;  %v1684_v33 = vld [vmem:[%s4060_s0 + $0x1c] ss:$0 sm:$0xff] }
  0x49   :  { %2036 = vst [vmem:[%s4061_s1 + $0x498] sm:$0xff] %v1558_v34  ;;  %2037 = vst [vmem:[%s4061_s1 + $0x698] sm:$0xff] %v1560_v35  ;;  %v1686_v34 = vld [vmem:[%s4060_s0 + $0x2c] ss:$0 sm:$0xff]  ;;  %v1688_v35 = vld [vmem:[%s4060_s0 + $0x3c] ss:$0 sm:$0xff] }
  0x4a   :  { %1563 = vst [vmem:[%s4061_s1 + $0x880] sm:$0xff] %v1562_v36  ;;  %1565 = vst [vmem:[%s4061_s1 + $0xa80] sm:$0xff] %v1564_v37 }
  0x4b   :  { %1567 = vst [vmem:[%s4061_s1 + $0xc80] sm:$0xff] %v1566_v38  ;;  %1782 = vst [vmem:[%s4061_s1 + $0x888] sm:$0xff] %v1562_v36 }
  0x4c   :  { %1783 = vst [vmem:[%s4061_s1 + $0xa88] sm:$0xff] %v1564_v37  ;;  %1784 = vst [vmem:[%s4061_s1 + $0xc88] sm:$0xff] %v1566_v38 }
  0x4d   :  { %1910 = vst [vmem:[%s4061_s1 + $0x890] sm:$0xff] %v1562_v36  ;;  %1911 = vst [vmem:[%s4061_s1 + $0xa90] sm:$0xff] %v1564_v37 }
  0x4e   :  { %1912 = vst [vmem:[%s4061_s1 + $0xc90] sm:$0xff] %v1566_v38  ;;  %2038 = vst [vmem:[%s4061_s1 + $0x898] sm:$0xff] %v1562_v36  ;;  %v1690_v36 = vld [vmem:[%s4060_s0 + $0x4c] ss:$0 sm:$0xff] }
  0x4f   :  { %2039 = vst [vmem:[%s4061_s1 + $0xa98] sm:$0xff] %v1564_v37  ;;  %2040 = vst [vmem:[%s4061_s1 + $0xc98] sm:$0xff] %v1566_v38  ;;  %v1692_v37 = vld [vmem:[%s4060_s0 + $0x5c] ss:$0 sm:$0xff]  ;;  %v1694_v38 = vld [vmem:[%s4060_s0 + $0x6c] ss:$0 sm:$0xff] }
  0x50   :  { %1569 = vst [vmem:[%s4061_s1 + $0xe80] sm:$0xff] %v1568_v39  ;;  %1571 = vst [vmem:[%s4061_s1 + $0xa0] sm:$0xff] %v1570_v40 }
  0x51   :  { %1573 = vst [vmem:[%s4061_s1 + $0x2a0] sm:$0xff] %v1572_v41  ;;  %1785 = vst [vmem:[%s4061_s1 + $0xe88] sm:$0xff] %v1568_v39 }
  0x52   :  { %1786 = vst [vmem:[%s4061_s1 + $0xa8] sm:$0xff] %v1570_v40  ;;  %1787 = vst [vmem:[%s4061_s1 + $0x2a8] sm:$0xff] %v1572_v41 }
  0x53   :  { %1913 = vst [vmem:[%s4061_s1 + $0xe90] sm:$0xff] %v1568_v39  ;;  %1914 = vst [vmem:[%s4061_s1 + $0xb0] sm:$0xff] %v1570_v40 }
  0x54   :  { %1915 = vst [vmem:[%s4061_s1 + $0x2b0] sm:$0xff] %v1572_v41  ;;  %2041 = vst [vmem:[%s4061_s1 + $0xe98] sm:$0xff] %v1568_v39  ;;  %v1696_v39 = vld [vmem:[%s4060_s0 + $0x7c] ss:$0 sm:$0xff] }
  0x55   :  { %2042 = vst [vmem:[%s4061_s1 + $0xb8] sm:$0xff] %v1570_v40  ;;  %2043 = vst [vmem:[%s4061_s1 + $0x2b8] sm:$0xff] %v1572_v41  ;;  %v1698_v40 = vld [vmem:[%s4060_s0 + $0xd] ss:$0 sm:$0xff]  ;;  %v1700_v41 = vld [vmem:[%s4060_s0 + $0x1d] ss:$0 sm:$0xff] }
  0x56   :  { %1575 = vst [vmem:[%s4061_s1 + $0x4a0] sm:$0xff] %v1574_v42  ;;  %1577 = vst [vmem:[%s4061_s1 + $0x6a0] sm:$0xff] %v1576_v43 }
  0x57   :  { %1579 = vst [vmem:[%s4061_s1 + $0x8a0] sm:$0xff] %v1578_v44  ;;  %1788 = vst [vmem:[%s4061_s1 + $0x4a8] sm:$0xff] %v1574_v42 }
  0x58   :  { %1789 = vst [vmem:[%s4061_s1 + $0x6a8] sm:$0xff] %v1576_v43  ;;  %1790 = vst [vmem:[%s4061_s1 + $0x8a8] sm:$0xff] %v1578_v44 }
  0x59   :  { %1916 = vst [vmem:[%s4061_s1 + $0x4b0] sm:$0xff] %v1574_v42  ;;  %1917 = vst [vmem:[%s4061_s1 + $0x6b0] sm:$0xff] %v1576_v43 }
  0x5a   :  { %1918 = vst [vmem:[%s4061_s1 + $0x8b0] sm:$0xff] %v1578_v44  ;;  %2044 = vst [vmem:[%s4061_s1 + $0x4b8] sm:$0xff] %v1574_v42  ;;  %v1702_v42 = vld [vmem:[%s4060_s0 + $0x2d] ss:$0 sm:$0xff] }
  0x5b   :  { %2045 = vst [vmem:[%s4061_s1 + $0x6b8] sm:$0xff] %v1576_v43  ;;  %2046 = vst [vmem:[%s4061_s1 + $0x8b8] sm:$0xff] %v1578_v44  ;;  %v1704_v43 = vld [vmem:[%s4060_s0 + $0x3d] ss:$0 sm:$0xff]  ;;  %v1706_v44 = vld [vmem:[%s4060_s0 + $0x4d] ss:$0 sm:$0xff] }
  0x5c   :  { %1581 = vst [vmem:[%s4061_s1 + $0xaa0] sm:$0xff] %v1580_v45  ;;  %1583 = vst [vmem:[%s4061_s1 + $0xca0] sm:$0xff] %v1582_v46 }
  0x5d   :  { %1585 = vst [vmem:[%s4061_s1 + $0xea0] sm:$0xff] %v1584_v47  ;;  %1791 = vst [vmem:[%s4061_s1 + $0xaa8] sm:$0xff] %v1580_v45 }
  0x5e   :  { %1792 = vst [vmem:[%s4061_s1 + $0xca8] sm:$0xff] %v1582_v46  ;;  %1793 = vst [vmem:[%s4061_s1 + $0xea8] sm:$0xff] %v1584_v47 }
  0x5f   :  { %1919 = vst [vmem:[%s4061_s1 + $0xab0] sm:$0xff] %v1580_v45  ;;  %1920 = vst [vmem:[%s4061_s1 + $0xcb0] sm:$0xff] %v1582_v46 }
  0x60   :  { %1921 = vst [vmem:[%s4061_s1 + $0xeb0] sm:$0xff] %v1584_v47  ;;  %2047 = vst [vmem:[%s4061_s1 + $0xab8] sm:$0xff] %v1580_v45  ;;  %v1708_v45 = vld [vmem:[%s4060_s0 + $0x5d] ss:$0 sm:$0xff] }
  0x61   :  { %2048 = vst [vmem:[%s4061_s1 + $0xcb8] sm:$0xff] %v1582_v46  ;;  %2049 = vst [vmem:[%s4061_s1 + $0xeb8] sm:$0xff] %v1584_v47  ;;  %v1710_v46 = vld [vmem:[%s4060_s0 + $0x6d] ss:$0 sm:$0xff]  ;;  %v1712_v47 = vld [vmem:[%s4060_s0 + $0x7d] ss:$0 sm:$0xff] }
  0x62   :  { %1587 = vst [vmem:[%s4061_s1 + $0xc0] sm:$0xff] %v1586_v48  ;;  %1589 = vst [vmem:[%s4061_s1 + $0x2c0] sm:$0xff] %v1588_v49 }
  0x63   :  { %1591 = vst [vmem:[%s4061_s1 + $0x4c0] sm:$0xff] %v1590_v50  ;;  %1794 = vst [vmem:[%s4061_s1 + $0xc8] sm:$0xff] %v1586_v48 }
  0x64   :  { %1795 = vst [vmem:[%s4061_s1 + $0x2c8] sm:$0xff] %v1588_v49  ;;  %1796 = vst [vmem:[%s4061_s1 + $0x4c8] sm:$0xff] %v1590_v50 }
  0x65   :  { %1922 = vst [vmem:[%s4061_s1 + $0xd0] sm:$0xff] %v1586_v48  ;;  %1923 = vst [vmem:[%s4061_s1 + $0x2d0] sm:$0xff] %v1588_v49 }
  0x66   :  { %1924 = vst [vmem:[%s4061_s1 + $0x4d0] sm:$0xff] %v1590_v50  ;;  %2050 = vst [vmem:[%s4061_s1 + $0xd8] sm:$0xff] %v1586_v48  ;;  %v1714_v48 = vld [vmem:[%s4060_s0 + $0xe] ss:$0 sm:$0xff] }
  0x67   :  { %2051 = vst [vmem:[%s4061_s1 + $0x2d8] sm:$0xff] %v1588_v49  ;;  %2052 = vst [vmem:[%s4061_s1 + $0x4d8] sm:$0xff] %v1590_v50  ;;  %v1716_v49 = vld [vmem:[%s4060_s0 + $0x1e] ss:$0 sm:$0xff]  ;;  %v1718_v50 = vld [vmem:[%s4060_s0 + $0x2e] ss:$0 sm:$0xff] }
  0x68   :  { %1593 = vst [vmem:[%s4061_s1 + $0x6c0] sm:$0xff] %v1592_v51  ;;  %1595 = vst [vmem:[%s4061_s1 + $0x8c0] sm:$0xff] %v1594_v52 }
  0x69   :  { %1597 = vst [vmem:[%s4061_s1 + $0xac0] sm:$0xff] %v1596_v53  ;;  %1797 = vst [vmem:[%s4061_s1 + $0x6c8] sm:$0xff] %v1592_v51 }
  0x6a   :  { %1798 = vst [vmem:[%s4061_s1 + $0x8c8] sm:$0xff] %v1594_v52  ;;  %1799 = vst [vmem:[%s4061_s1 + $0xac8] sm:$0xff] %v1596_v53 }
  0x6b   :  { %1925 = vst [vmem:[%s4061_s1 + $0x6d0] sm:$0xff] %v1592_v51  ;;  %1926 = vst [vmem:[%s4061_s1 + $0x8d0] sm:$0xff] %v1594_v52 }
  0x6c   :  { %1927 = vst [vmem:[%s4061_s1 + $0xad0] sm:$0xff] %v1596_v53  ;;  %2053 = vst [vmem:[%s4061_s1 + $0x6d8] sm:$0xff] %v1592_v51  ;;  %v1720_v51 = vld [vmem:[%s4060_s0 + $0x3e] ss:$0 sm:$0xff] }
  0x6d   :  { %2054 = vst [vmem:[%s4061_s1 + $0x8d8] sm:$0xff] %v1594_v52  ;;  %2055 = vst [vmem:[%s4061_s1 + $0xad8] sm:$0xff] %v1596_v53  ;;  %v1722_v52 = vld [vmem:[%s4060_s0 + $0x4e] ss:$0 sm:$0xff]  ;;  %v1724_v53 = vld [vmem:[%s4060_s0 + $0x5e] ss:$0 sm:$0xff] }
  0x6e   :  { %1599 = vst [vmem:[%s4061_s1 + $0xcc0] sm:$0xff] %v1598_v54  ;;  %1601 = vst [vmem:[%s4061_s1 + $0xec0] sm:$0xff] %v1600_v55 }
  0x6f   :  { %1603 = vst [vmem:[%s4061_s1 + $0xe0] sm:$0xff] %v1602_v56  ;;  %1800 = vst [vmem:[%s4061_s1 + $0xcc8] sm:$0xff] %v1598_v54 }
  0x70   :  { %1801 = vst [vmem:[%s4061_s1 + $0xec8] sm:$0xff] %v1600_v55  ;;  %1802 = vst [vmem:[%s4061_s1 + $0xe8] sm:$0xff] %v1602_v56 }
  0x71   :  { %1928 = vst [vmem:[%s4061_s1 + $0xcd0] sm:$0xff] %v1598_v54  ;;  %1929 = vst [vmem:[%s4061_s1 + $0xed0] sm:$0xff] %v1600_v55 }
  0x72   :  { %1930 = vst [vmem:[%s4061_s1 + $0xf0] sm:$0xff] %v1602_v56  ;;  %2056 = vst [vmem:[%s4061_s1 + $0xcd8] sm:$0xff] %v1598_v54  ;;  %v1726_v54 = vld [vmem:[%s4060_s0 + $0x6e] ss:$0 sm:$0xff] }
  0x73   :  { %2057 = vst [vmem:[%s4061_s1 + $0xed8] sm:$0xff] %v1600_v55  ;;  %2058 = vst [vmem:[%s4061_s1 + $0xf8] sm:$0xff] %v1602_v56  ;;  %v1728_v55 = vld [vmem:[%s4060_s0 + $0x7e] ss:$0 sm:$0xff]  ;;  %v1730_v56 = vld [vmem:[%s4060_s0 + $0xf] ss:$0 sm:$0xff] }
  0x74   :  { %1605 = vst [vmem:[%s4061_s1 + $0x2e0] sm:$0xff] %v1604_v57  ;;  %1607 = vst [vmem:[%s4061_s1 + $0x4e0] sm:$0xff] %v1606_v58 }
  0x75   :  { %1609 = vst [vmem:[%s4061_s1 + $0x6e0] sm:$0xff] %v1608_v59  ;;  %1803 = vst [vmem:[%s4061_s1 + $0x2e8] sm:$0xff] %v1604_v57 }
  0x76   :  { %1804 = vst [vmem:[%s4061_s1 + $0x4e8] sm:$0xff] %v1606_v58  ;;  %1805 = vst [vmem:[%s4061_s1 + $0x6e8] sm:$0xff] %v1608_v59 }
  0x77   :  { %1931 = vst [vmem:[%s4061_s1 + $0x2f0] sm:$0xff] %v1604_v57  ;;  %1932 = vst [vmem:[%s4061_s1 + $0x4f0] sm:$0xff] %v1606_v58 }
  0x78   :  { %1933 = vst [vmem:[%s4061_s1 + $0x6f0] sm:$0xff] %v1608_v59  ;;  %2059 = vst [vmem:[%s4061_s1 + $0x2f8] sm:$0xff] %v1604_v57  ;;  %v1732_v57 = vld [vmem:[%s4060_s0 + $0x1f] ss:$0 sm:$0xff] }
  0x79   :  { %2060 = vst [vmem:[%s4061_s1 + $0x4f8] sm:$0xff] %v1606_v58  ;;  %2061 = vst [vmem:[%s4061_s1 + $0x6f8] sm:$0xff] %v1608_v59  ;;  %v1734_v58 = vld [vmem:[%s4060_s0 + $0x2f] ss:$0 sm:$0xff]  ;;  %v1736_v59 = vld [vmem:[%s4060_s0 + $0x3f] ss:$0 sm:$0xff] }
  0x7a   :  { %1611 = vst [vmem:[%s4061_s1 + $0x8e0] sm:$0xff] %v1610_v60  ;;  %1613 = vst [vmem:[%s4061_s1 + $0xae0] sm:$0xff] %v1612_v61 }
  0x7b   :  { %1615 = vst [vmem:[%s4061_s1 + $0xce0] sm:$0xff] %v1614_v62  ;;  %1806 = vst [vmem:[%s4061_s1 + $0x8e8] sm:$0xff] %v1610_v60 }
  0x7c   :  { %1807 = vst [vmem:[%s4061_s1 + $0xae8] sm:$0xff] %v1612_v61  ;;  %1808 = vst [vmem:[%s4061_s1 + $0xce8] sm:$0xff] %v1614_v62 }
  0x7d   :  { %1934 = vst [vmem:[%s4061_s1 + $0x8f0] sm:$0xff] %v1610_v60  ;;  %1935 = vst [vmem:[%s4061_s1 + $0xaf0] sm:$0xff] %v1612_v61 }
  0x7e   :  { %1936 = vst [vmem:[%s4061_s1 + $0xcf0] sm:$0xff] %v1614_v62  ;;  %2062 = vst [vmem:[%s4061_s1 + $0x8f8] sm:$0xff] %v1610_v60  ;;  %v1738_v60 = vld [vmem:[%s4060_s0 + $0x4f] ss:$0 sm:$0xff] }
  0x7f   :  { %2063 = vst [vmem:[%s4061_s1 + $0xaf8] sm:$0xff] %v1612_v61  ;;  %2064 = vst [vmem:[%s4061_s1 + $0xcf8] sm:$0xff] %v1614_v62  ;;  %v1740_v61 = vld [vmem:[%s4060_s0 + $0x5f] ss:$0 sm:$0xff]  ;;  %v1742_v62 = vld [vmem:[%s4060_s0 + $0x6f] ss:$0 sm:$0xff] }
  0x80   :  { %1617 = vst [vmem:[%s4061_s1 + $0xee0] sm:$0xff] %v1616_v63  ;;  %1619 = vst [vmem:[%s4061_s1 + $0x100] sm:$0xff] %v1618_v0 }
  0x81   :  { %1621 = vst [vmem:[%s4061_s1 + $0x300] sm:$0xff] %v1620_v1  ;;  %1809 = vst [vmem:[%s4061_s1 + $0xee8] sm:$0xff] %v1616_v63 }
  0x82   :  { %1810 = vst [vmem:[%s4061_s1 + $0x108] sm:$0xff] %v1618_v0  ;;  %1811 = vst [vmem:[%s4061_s1 + $0x308] sm:$0xff] %v1620_v1 }
  0x83   :  { %1937 = vst [vmem:[%s4061_s1 + $0xef0] sm:$0xff] %v1616_v63  ;;  %1938 = vst [vmem:[%s4061_s1 + $0x110] sm:$0xff] %v1618_v0 }
  0x84   :  { %1939 = vst [vmem:[%s4061_s1 + $0x310] sm:$0xff] %v1620_v1  ;;  %2065 = vst [vmem:[%s4061_s1 + $0xef8] sm:$0xff] %v1616_v63  ;;  %v1744_v63 = vld [vmem:[%s4060_s0 + $0x7f] ss:$0 sm:$0xff] }
  0x85   :  { %2066 = vst [vmem:[%s4061_s1 + $0x118] sm:$0xff] %v1618_v0  ;;  %2067 = vst [vmem:[%s4061_s1 + $0x318] sm:$0xff] %v1620_v1 }
  0x86   :  { %1623 = vst [vmem:[%s4061_s1 + $0x500] sm:$0xff] %v1622_v2  ;;  %1625 = vst [vmem:[%s4061_s1 + $0x700] sm:$0xff] %v1624_v3 }
  0x87   :  { %1627 = vst [vmem:[%s4061_s1 + $0x900] sm:$0xff] %v1626_v4  ;;  %1812 = vst [vmem:[%s4061_s1 + $0x508] sm:$0xff] %v1622_v2 }
  0x88   :  { %1813 = vst [vmem:[%s4061_s1 + $0x708] sm:$0xff] %v1624_v3  ;;  %1814 = vst [vmem:[%s4061_s1 + $0x908] sm:$0xff] %v1626_v4 }
  0x89   :  { %1940 = vst [vmem:[%s4061_s1 + $0x510] sm:$0xff] %v1622_v2  ;;  %1941 = vst [vmem:[%s4061_s1 + $0x710] sm:$0xff] %v1624_v3 }
  0x8a   :  { %1942 = vst [vmem:[%s4061_s1 + $0x910] sm:$0xff] %v1626_v4  ;;  %2068 = vst [vmem:[%s4061_s1 + $0x518] sm:$0xff] %v1622_v2 }
  0x8b   :  { %2069 = vst [vmem:[%s4061_s1 + $0x718] sm:$0xff] %v1624_v3  ;;  %2070 = vst [vmem:[%s4061_s1 + $0x918] sm:$0xff] %v1626_v4 }
  0x8c   :  { %1629 = vst [vmem:[%s4061_s1 + $0xb00] sm:$0xff] %v1628_v5  ;;  %1631 = vst [vmem:[%s4061_s1 + $0xd00] sm:$0xff] %v1630_v6 }
  0x8d   :  { %1633 = vst [vmem:[%s4061_s1 + $0xf00] sm:$0xff] %v1632_v7  ;;  %1815 = vst [vmem:[%s4061_s1 + $0xb08] sm:$0xff] %v1628_v5 }
  0x8e   :  { %1816 = vst [vmem:[%s4061_s1 + $0xd08] sm:$0xff] %v1630_v6  ;;  %1817 = vst [vmem:[%s4061_s1 + $0xf08] sm:$0xff] %v1632_v7 }
  0x8f   :  { %1943 = vst [vmem:[%s4061_s1 + $0xb10] sm:$0xff] %v1628_v5  ;;  %1944 = vst [vmem:[%s4061_s1 + $0xd10] sm:$0xff] %v1630_v6 }
  0x90   :  { %1945 = vst [vmem:[%s4061_s1 + $0xf10] sm:$0xff] %v1632_v7  ;;  %2071 = vst [vmem:[%s4061_s1 + $0xb18] sm:$0xff] %v1628_v5 }
  0x91   :  { %2072 = vst [vmem:[%s4061_s1 + $0xd18] sm:$0xff] %v1630_v6  ;;  %2073 = vst [vmem:[%s4061_s1 + $0xf18] sm:$0xff] %v1632_v7 }
  0x92   :  { %1635 = vst [vmem:[%s4061_s1 + $0x120] sm:$0xff] %v1634_v8  ;;  %1637 = vst [vmem:[%s4061_s1 + $0x320] sm:$0xff] %v1636_v9 }
  0x93   :  { %1639 = vst [vmem:[%s4061_s1 + $0x520] sm:$0xff] %v1638_v10  ;;  %1818 = vst [vmem:[%s4061_s1 + $0x128] sm:$0xff] %v1634_v8 }
  0x94   :  { %1819 = vst [vmem:[%s4061_s1 + $0x328] sm:$0xff] %v1636_v9  ;;  %1820 = vst [vmem:[%s4061_s1 + $0x528] sm:$0xff] %v1638_v10 }
  0x95   :  { %1946 = vst [vmem:[%s4061_s1 + $0x130] sm:$0xff] %v1634_v8  ;;  %1947 = vst [vmem:[%s4061_s1 + $0x330] sm:$0xff] %v1636_v9 }
  0x96   :  { %1948 = vst [vmem:[%s4061_s1 + $0x530] sm:$0xff] %v1638_v10  ;;  %2074 = vst [vmem:[%s4061_s1 + $0x138] sm:$0xff] %v1634_v8 }
  0x97   :  { %2075 = vst [vmem:[%s4061_s1 + $0x338] sm:$0xff] %v1636_v9  ;;  %2076 = vst [vmem:[%s4061_s1 + $0x538] sm:$0xff] %v1638_v10 }
  0x98   :  { %1641 = vst [vmem:[%s4061_s1 + $0x720] sm:$0xff] %v1640_v11  ;;  %1643 = vst [vmem:[%s4061_s1 + $0x920] sm:$0xff] %v1642_v12 }
  0x99   :  { %1645 = vst [vmem:[%s4061_s1 + $0xb20] sm:$0xff] %v1644_v13  ;;  %1821 = vst [vmem:[%s4061_s1 + $0x728] sm:$0xff] %v1640_v11 }
  0x9a   :  { %1822 = vst [vmem:[%s4061_s1 + $0x928] sm:$0xff] %v1642_v12  ;;  %1823 = vst [vmem:[%s4061_s1 + $0xb28] sm:$0xff] %v1644_v13 }
  0x9b   :  { %1949 = vst [vmem:[%s4061_s1 + $0x730] sm:$0xff] %v1640_v11  ;;  %1950 = vst [vmem:[%s4061_s1 + $0x930] sm:$0xff] %v1642_v12 }
  0x9c   :  { %1951 = vst [vmem:[%s4061_s1 + $0xb30] sm:$0xff] %v1644_v13  ;;  %2077 = vst [vmem:[%s4061_s1 + $0x738] sm:$0xff] %v1640_v11 }
  0x9d   :  { %2078 = vst [vmem:[%s4061_s1 + $0x938] sm:$0xff] %v1642_v12  ;;  %2079 = vst [vmem:[%s4061_s1 + $0xb38] sm:$0xff] %v1644_v13 }
  0x9e   :  { %1647 = vst [vmem:[%s4061_s1 + $0xd20] sm:$0xff] %v1646_v14  ;;  %1649 = vst [vmem:[%s4061_s1 + $0xf20] sm:$0xff] %v1648_v15 }
  0x9f   :  { %1651 = vst [vmem:[%s4061_s1 + $0x140] sm:$0xff] %v1650_v16  ;;  %1824 = vst [vmem:[%s4061_s1 + $0xd28] sm:$0xff] %v1646_v14 }
  0xa0   :  { %1825 = vst [vmem:[%s4061_s1 + $0xf28] sm:$0xff] %v1648_v15  ;;  %1826 = vst [vmem:[%s4061_s1 + $0x148] sm:$0xff] %v1650_v16 }
  0xa1   :  { %1952 = vst [vmem:[%s4061_s1 + $0xd30] sm:$0xff] %v1646_v14  ;;  %1953 = vst [vmem:[%s4061_s1 + $0xf30] sm:$0xff] %v1648_v15 }
  0xa2   :  { %1954 = vst [vmem:[%s4061_s1 + $0x150] sm:$0xff] %v1650_v16  ;;  %2080 = vst [vmem:[%s4061_s1 + $0xd38] sm:$0xff] %v1646_v14 }
  0xa3   :  { %2081 = vst [vmem:[%s4061_s1 + $0xf38] sm:$0xff] %v1648_v15  ;;  %2082 = vst [vmem:[%s4061_s1 + $0x158] sm:$0xff] %v1650_v16 }
  0xa4   :  { %1653 = vst [vmem:[%s4061_s1 + $0x340] sm:$0xff] %v1652_v17  ;;  %1655 = vst [vmem:[%s4061_s1 + $0x540] sm:$0xff] %v1654_v18 }
  0xa5   :  { %1657 = vst [vmem:[%s4061_s1 + $0x740] sm:$0xff] %v1656_v19  ;;  %1827 = vst [vmem:[%s4061_s1 + $0x348] sm:$0xff] %v1652_v17 }
  0xa6   :  { %1828 = vst [vmem:[%s4061_s1 + $0x548] sm:$0xff] %v1654_v18  ;;  %1829 = vst [vmem:[%s4061_s1 + $0x748] sm:$0xff] %v1656_v19 }
  0xa7   :  { %1955 = vst [vmem:[%s4061_s1 + $0x350] sm:$0xff] %v1652_v17  ;;  %1956 = vst [vmem:[%s4061_s1 + $0x550] sm:$0xff] %v1654_v18 }
  0xa8   :  { %1957 = vst [vmem:[%s4061_s1 + $0x750] sm:$0xff] %v1656_v19  ;;  %2083 = vst [vmem:[%s4061_s1 + $0x358] sm:$0xff] %v1652_v17 }
  0xa9   :  { %2084 = vst [vmem:[%s4061_s1 + $0x558] sm:$0xff] %v1654_v18  ;;  %2085 = vst [vmem:[%s4061_s1 + $0x758] sm:$0xff] %v1656_v19 }
  0xaa   :  { %1659 = vst [vmem:[%s4061_s1 + $0x940] sm:$0xff] %v1658_v20  ;;  %1661 = vst [vmem:[%s4061_s1 + $0xb40] sm:$0xff] %v1660_v21 }
  0xab   :  { %1663 = vst [vmem:[%s4061_s1 + $0xd40] sm:$0xff] %v1662_v22  ;;  %1830 = vst [vmem:[%s4061_s1 + $0x948] sm:$0xff] %v1658_v20 }
  0xac   :  { %1831 = vst [vmem:[%s4061_s1 + $0xb48] sm:$0xff] %v1660_v21  ;;  %1832 = vst [vmem:[%s4061_s1 + $0xd48] sm:$0xff] %v1662_v22 }
  0xad   :  { %1958 = vst [vmem:[%s4061_s1 + $0x950] sm:$0xff] %v1658_v20  ;;  %1959 = vst [vmem:[%s4061_s1 + $0xb50] sm:$0xff] %v1660_v21 }
  0xae   :  { %1960 = vst [vmem:[%s4061_s1 + $0xd50] sm:$0xff] %v1662_v22  ;;  %2086 = vst [vmem:[%s4061_s1 + $0x958] sm:$0xff] %v1658_v20 }
  0xaf   :  { %2087 = vst [vmem:[%s4061_s1 + $0xb58] sm:$0xff] %v1660_v21  ;;  %2088 = vst [vmem:[%s4061_s1 + $0xd58] sm:$0xff] %v1662_v22 }
  0xb0   :  { %1665 = vst [vmem:[%s4061_s1 + $0xf40] sm:$0xff] %v1664_v23  ;;  %1667 = vst [vmem:[%s4061_s1 + $0x160] sm:$0xff] %v1666_v24 }
  0xb1   :  { %1669 = vst [vmem:[%s4061_s1 + $0x360] sm:$0xff] %v1668_v25  ;;  %1833 = vst [vmem:[%s4061_s1 + $0xf48] sm:$0xff] %v1664_v23 }
  0xb2   :  { %1834 = vst [vmem:[%s4061_s1 + $0x168] sm:$0xff] %v1666_v24  ;;  %1835 = vst [vmem:[%s4061_s1 + $0x368] sm:$0xff] %v1668_v25 }
  0xb3   :  { %1961 = vst [vmem:[%s4061_s1 + $0xf50] sm:$0xff] %v1664_v23  ;;  %1962 = vst [vmem:[%s4061_s1 + $0x170] sm:$0xff] %v1666_v24 }
  0xb4   :  { %1963 = vst [vmem:[%s4061_s1 + $0x370] sm:$0xff] %v1668_v25  ;;  %2089 = vst [vmem:[%s4061_s1 + $0xf58] sm:$0xff] %v1664_v23 }
  0xb5   :  { %2090 = vst [vmem:[%s4061_s1 + $0x178] sm:$0xff] %v1666_v24  ;;  %2091 = vst [vmem:[%s4061_s1 + $0x378] sm:$0xff] %v1668_v25 }
  0xb6   :  { %1671 = vst [vmem:[%s4061_s1 + $0x560] sm:$0xff] %v1670_v26  ;;  %1673 = vst [vmem:[%s4061_s1 + $0x760] sm:$0xff] %v1672_v27 }
  0xb7   :  { %1675 = vst [vmem:[%s4061_s1 + $0x960] sm:$0xff] %v1674_v28  ;;  %1836 = vst [vmem:[%s4061_s1 + $0x568] sm:$0xff] %v1670_v26 }
  0xb8   :  { %1837 = vst [vmem:[%s4061_s1 + $0x768] sm:$0xff] %v1672_v27  ;;  %1838 = vst [vmem:[%s4061_s1 + $0x968] sm:$0xff] %v1674_v28 }
  0xb9   :  { %1964 = vst [vmem:[%s4061_s1 + $0x570] sm:$0xff] %v1670_v26  ;;  %1965 = vst [vmem:[%s4061_s1 + $0x770] sm:$0xff] %v1672_v27 }
  0xba   :  { %1966 = vst [vmem:[%s4061_s1 + $0x970] sm:$0xff] %v1674_v28  ;;  %2092 = vst [vmem:[%s4061_s1 + $0x578] sm:$0xff] %v1670_v26 }
  0xbb   :  { %2093 = vst [vmem:[%s4061_s1 + $0x778] sm:$0xff] %v1672_v27  ;;  %2094 = vst [vmem:[%s4061_s1 + $0x978] sm:$0xff] %v1674_v28 }
  0xbc   :  { %1677 = vst [vmem:[%s4061_s1 + $0xb60] sm:$0xff] %v1676_v29  ;;  %1679 = vst [vmem:[%s4061_s1 + $0xd60] sm:$0xff] %v1678_v30 }
  0xbd   :  { %1681 = vst [vmem:[%s4061_s1 + $0xf60] sm:$0xff] %v1680_v31  ;;  %1839 = vst [vmem:[%s4061_s1 + $0xb68] sm:$0xff] %v1676_v29 }
  0xbe   :  { %1840 = vst [vmem:[%s4061_s1 + $0xd68] sm:$0xff] %v1678_v30  ;;  %1841 = vst [vmem:[%s4061_s1 + $0xf68] sm:$0xff] %v1680_v31 }
  0xbf   :  { %1967 = vst [vmem:[%s4061_s1 + $0xb70] sm:$0xff] %v1676_v29  ;;  %1968 = vst [vmem:[%s4061_s1 + $0xd70] sm:$0xff] %v1678_v30 }
  0xc0   :  { %1969 = vst [vmem:[%s4061_s1 + $0xf70] sm:$0xff] %v1680_v31  ;;  %2095 = vst [vmem:[%s4061_s1 + $0xb78] sm:$0xff] %v1676_v29 }
  0xc1   :  { %2096 = vst [vmem:[%s4061_s1 + $0xd78] sm:$0xff] %v1678_v30  ;;  %2097 = vst [vmem:[%s4061_s1 + $0xf78] sm:$0xff] %v1680_v31 }
  0xc2   :  { %1683 = vst [vmem:[%s4061_s1 + $0x180] sm:$0xff] %v1682_v32  ;;  %1685 = vst [vmem:[%s4061_s1 + $0x380] sm:$0xff] %v1684_v33 }
  0xc3   :  { %1687 = vst [vmem:[%s4061_s1 + $0x580] sm:$0xff] %v1686_v34  ;;  %1842 = vst [vmem:[%s4061_s1 + $0x188] sm:$0xff] %v1682_v32 }
  0xc4   :  { %1843 = vst [vmem:[%s4061_s1 + $0x388] sm:$0xff] %v1684_v33  ;;  %1844 = vst [vmem:[%s4061_s1 + $0x588] sm:$0xff] %v1686_v34 }
  0xc5   :  { %1970 = vst [vmem:[%s4061_s1 + $0x190] sm:$0xff] %v1682_v32  ;;  %1971 = vst [vmem:[%s4061_s1 + $0x390] sm:$0xff] %v1684_v33 }
  0xc6   :  { %1972 = vst [vmem:[%s4061_s1 + $0x590] sm:$0xff] %v1686_v34  ;;  %2098 = vst [vmem:[%s4061_s1 + $0x198] sm:$0xff] %v1682_v32 }
  0xc7   :  { %2099 = vst [vmem:[%s4061_s1 + $0x398] sm:$0xff] %v1684_v33  ;;  %2100 = vst [vmem:[%s4061_s1 + $0x598] sm:$0xff] %v1686_v34 }
  0xc8   :  { %1689 = vst [vmem:[%s4061_s1 + $0x780] sm:$0xff] %v1688_v35  ;;  %1691 = vst [vmem:[%s4061_s1 + $0x980] sm:$0xff] %v1690_v36 }
  0xc9   :  { %1693 = vst [vmem:[%s4061_s1 + $0xb80] sm:$0xff] %v1692_v37  ;;  %1845 = vst [vmem:[%s4061_s1 + $0x788] sm:$0xff] %v1688_v35 }
  0xca   :  { %1846 = vst [vmem:[%s4061_s1 + $0x988] sm:$0xff] %v1690_v36  ;;  %1847 = vst [vmem:[%s4061_s1 + $0xb88] sm:$0xff] %v1692_v37 }
  0xcb   :  { %1973 = vst [vmem:[%s4061_s1 + $0x790] sm:$0xff] %v1688_v35  ;;  %1974 = vst [vmem:[%s4061_s1 + $0x990] sm:$0xff] %v1690_v36 }
  0xcc   :  { %1975 = vst [vmem:[%s4061_s1 + $0xb90] sm:$0xff] %v1692_v37  ;;  %2101 = vst [vmem:[%s4061_s1 + $0x798] sm:$0xff] %v1688_v35 }
  0xcd   :  { %2102 = vst [vmem:[%s4061_s1 + $0x998] sm:$0xff] %v1690_v36  ;;  %2103 = vst [vmem:[%s4061_s1 + $0xb98] sm:$0xff] %v1692_v37 }
  0xce   :  { %1695 = vst [vmem:[%s4061_s1 + $0xd80] sm:$0xff] %v1694_v38  ;;  %1697 = vst [vmem:[%s4061_s1 + $0xf80] sm:$0xff] %v1696_v39 }
  0xcf   :  { %1699 = vst [vmem:[%s4061_s1 + $0x1a0] sm:$0xff] %v1698_v40  ;;  %1848 = vst [vmem:[%s4061_s1 + $0xd88] sm:$0xff] %v1694_v38 }
  0xd0   :  { %1849 = vst [vmem:[%s4061_s1 + $0xf88] sm:$0xff] %v1696_v39  ;;  %1850 = vst [vmem:[%s4061_s1 + $0x1a8] sm:$0xff] %v1698_v40 }
  0xd1   :  { %1976 = vst [vmem:[%s4061_s1 + $0xd90] sm:$0xff] %v1694_v38  ;;  %1977 = vst [vmem:[%s4061_s1 + $0xf90] sm:$0xff] %v1696_v39 }
  0xd2   :  { %1978 = vst [vmem:[%s4061_s1 + $0x1b0] sm:$0xff] %v1698_v40  ;;  %2104 = vst [vmem:[%s4061_s1 + $0xd98] sm:$0xff] %v1694_v38 }
  0xd3   :  { %2105 = vst [vmem:[%s4061_s1 + $0xf98] sm:$0xff] %v1696_v39  ;;  %2106 = vst [vmem:[%s4061_s1 + $0x1b8] sm:$0xff] %v1698_v40 }
  0xd4   :  { %1701 = vst [vmem:[%s4061_s1 + $0x3a0] sm:$0xff] %v1700_v41  ;;  %1703 = vst [vmem:[%s4061_s1 + $0x5a0] sm:$0xff] %v1702_v42 }
  0xd5   :  { %1705 = vst [vmem:[%s4061_s1 + $0x7a0] sm:$0xff] %v1704_v43  ;;  %1851 = vst [vmem:[%s4061_s1 + $0x3a8] sm:$0xff] %v1700_v41 }
  0xd6   :  { %1852 = vst [vmem:[%s4061_s1 + $0x5a8] sm:$0xff] %v1702_v42  ;;  %1853 = vst [vmem:[%s4061_s1 + $0x7a8] sm:$0xff] %v1704_v43 }
  0xd7   :  { %1979 = vst [vmem:[%s4061_s1 + $0x3b0] sm:$0xff] %v1700_v41  ;;  %1980 = vst [vmem:[%s4061_s1 + $0x5b0] sm:$0xff] %v1702_v42 }
  0xd8   :  { %1981 = vst [vmem:[%s4061_s1 + $0x7b0] sm:$0xff] %v1704_v43  ;;  %2107 = vst [vmem:[%s4061_s1 + $0x3b8] sm:$0xff] %v1700_v41 }
  0xd9   :  { %2108 = vst [vmem:[%s4061_s1 + $0x5b8] sm:$0xff] %v1702_v42  ;;  %2109 = vst [vmem:[%s4061_s1 + $0x7b8] sm:$0xff] %v1704_v43 }
  0xda   :  { %1707 = vst [vmem:[%s4061_s1 + $0x9a0] sm:$0xff] %v1706_v44  ;;  %1709 = vst [vmem:[%s4061_s1 + $0xba0] sm:$0xff] %v1708_v45 }
  0xdb   :  { %1711 = vst [vmem:[%s4061_s1 + $0xda0] sm:$0xff] %v1710_v46  ;;  %1854 = vst [vmem:[%s4061_s1 + $0x9a8] sm:$0xff] %v1706_v44 }
  0xdc   :  { %1855 = vst [vmem:[%s4061_s1 + $0xba8] sm:$0xff] %v1708_v45  ;;  %1856 = vst [vmem:[%s4061_s1 + $0xda8] sm:$0xff] %v1710_v46 }
  0xdd   :  { %1982 = vst [vmem:[%s4061_s1 + $0x9b0] sm:$0xff] %v1706_v44  ;;  %1983 = vst [vmem:[%s4061_s1 + $0xbb0] sm:$0xff] %v1708_v45 }
  0xde   :  { %1984 = vst [vmem:[%s4061_s1 + $0xdb0] sm:$0xff] %v1710_v46  ;;  %2110 = vst [vmem:[%s4061_s1 + $0x9b8] sm:$0xff] %v1706_v44 }
  0xdf   :  { %2111 = vst [vmem:[%s4061_s1 + $0xbb8] sm:$0xff] %v1708_v45  ;;  %2112 = vst [vmem:[%s4061_s1 + $0xdb8] sm:$0xff] %v1710_v46 }
  0xe0   :  { %1713 = vst [vmem:[%s4061_s1 + $0xfa0] sm:$0xff] %v1712_v47  ;;  %1715 = vst [vmem:[%s4061_s1 + $0x1c0] sm:$0xff] %v1714_v48 }
  0xe1   :  { %1717 = vst [vmem:[%s4061_s1 + $0x3c0] sm:$0xff] %v1716_v49  ;;  %1857 = vst [vmem:[%s4061_s1 + $0xfa8] sm:$0xff] %v1712_v47 }
  0xe2   :  { %1858 = vst [vmem:[%s4061_s1 + $0x1c8] sm:$0xff] %v1714_v48  ;;  %1859 = vst [vmem:[%s4061_s1 + $0x3c8] sm:$0xff] %v1716_v49 }
  0xe3   :  { %1985 = vst [vmem:[%s4061_s1 + $0xfb0] sm:$0xff] %v1712_v47  ;;  %1986 = vst [vmem:[%s4061_s1 + $0x1d0] sm:$0xff] %v1714_v48 }
  0xe4   :  { %1987 = vst [vmem:[%s4061_s1 + $0x3d0] sm:$0xff] %v1716_v49  ;;  %2113 = vst [vmem:[%s4061_s1 + $0xfb8] sm:$0xff] %v1712_v47 }
  0xe5   :  { %2114 = vst [vmem:[%s4061_s1 + $0x1d8] sm:$0xff] %v1714_v48  ;;  %2115 = vst [vmem:[%s4061_s1 + $0x3d8] sm:$0xff] %v1716_v49 }
  0xe6   :  { %1719 = vst [vmem:[%s4061_s1 + $0x5c0] sm:$0xff] %v1718_v50  ;;  %1721 = vst [vmem:[%s4061_s1 + $0x7c0] sm:$0xff] %v1720_v51 }
  0xe7   :  { %1723 = vst [vmem:[%s4061_s1 + $0x9c0] sm:$0xff] %v1722_v52  ;;  %1860 = vst [vmem:[%s4061_s1 + $0x5c8] sm:$0xff] %v1718_v50 }
  0xe8   :  { %1861 = vst [vmem:[%s4061_s1 + $0x7c8] sm:$0xff] %v1720_v51  ;;  %1862 = vst [vmem:[%s4061_s1 + $0x9c8] sm:$0xff] %v1722_v52 }
  0xe9   :  { %1988 = vst [vmem:[%s4061_s1 + $0x5d0] sm:$0xff] %v1718_v50  ;;  %1989 = vst [vmem:[%s4061_s1 + $0x7d0] sm:$0xff] %v1720_v51 }
  0xea   :  { %1990 = vst [vmem:[%s4061_s1 + $0x9d0] sm:$0xff] %v1722_v52  ;;  %2116 = vst [vmem:[%s4061_s1 + $0x5d8] sm:$0xff] %v1718_v50 }
  0xeb   :  { %2117 = vst [vmem:[%s4061_s1 + $0x7d8] sm:$0xff] %v1720_v51  ;;  %2118 = vst [vmem:[%s4061_s1 + $0x9d8] sm:$0xff] %v1722_v52 }
  0xec   :  { %1725 = vst [vmem:[%s4061_s1 + $0xbc0] sm:$0xff] %v1724_v53  ;;  %1727 = vst [vmem:[%s4061_s1 + $0xdc0] sm:$0xff] %v1726_v54 }
  0xed   :  { %1729 = vst [vmem:[%s4061_s1 + $0xfc0] sm:$0xff] %v1728_v55  ;;  %1863 = vst [vmem:[%s4061_s1 + $0xbc8] sm:$0xff] %v1724_v53 }
  0xee   :  { %1864 = vst [vmem:[%s4061_s1 + $0xdc8] sm:$0xff] %v1726_v54  ;;  %1865 = vst [vmem:[%s4061_s1 + $0xfc8] sm:$0xff] %v1728_v55 }
  0xef   :  { %1991 = vst [vmem:[%s4061_s1 + $0xbd0] sm:$0xff] %v1724_v53  ;;  %1992 = vst [vmem:[%s4061_s1 + $0xdd0] sm:$0xff] %v1726_v54 }
  0xf0   :  { %1993 = vst [vmem:[%s4061_s1 + $0xfd0] sm:$0xff] %v1728_v55  ;;  %2119 = vst [vmem:[%s4061_s1 + $0xbd8] sm:$0xff] %v1724_v53 }
  0xf1   :  { %2120 = vst [vmem:[%s4061_s1 + $0xdd8] sm:$0xff] %v1726_v54  ;;  %2121 = vst [vmem:[%s4061_s1 + $0xfd8] sm:$0xff] %v1728_v55 }
  0xf2   :  { %1731 = vst [vmem:[%s4061_s1 + $0x1e0] sm:$0xff] %v1730_v56  ;;  %1733 = vst [vmem:[%s4061_s1 + $0x3e0] sm:$0xff] %v1732_v57 }
  0xf3   :  { %1735 = vst [vmem:[%s4061_s1 + $0x5e0] sm:$0xff] %v1734_v58  ;;  %1866 = vst [vmem:[%s4061_s1 + $0x1e8] sm:$0xff] %v1730_v56 }
  0xf4   :  { %1867 = vst [vmem:[%s4061_s1 + $0x3e8] sm:$0xff] %v1732_v57  ;;  %1868 = vst [vmem:[%s4061_s1 + $0x5e8] sm:$0xff] %v1734_v58 }
  0xf5   :  { %1994 = vst [vmem:[%s4061_s1 + $0x1f0] sm:$0xff] %v1730_v56  ;;  %1995 = vst [vmem:[%s4061_s1 + $0x3f0] sm:$0xff] %v1732_v57 }
  0xf6   :  { %1996 = vst [vmem:[%s4061_s1 + $0x5f0] sm:$0xff] %v1734_v58  ;;  %2122 = vst [vmem:[%s4061_s1 + $0x1f8] sm:$0xff] %v1730_v56 }
  0xf7   :  { %2123 = vst [vmem:[%s4061_s1 + $0x3f8] sm:$0xff] %v1732_v57  ;;  %2124 = vst [vmem:[%s4061_s1 + $0x5f8] sm:$0xff] %v1734_v58 }
  0xf8   :  { %1737 = vst [vmem:[%s4061_s1 + $0x7e0] sm:$0xff] %v1736_v59  ;;  %1739 = vst [vmem:[%s4061_s1 + $0x9e0] sm:$0xff] %v1738_v60 }
  0xf9   :  { %1741 = vst [vmem:[%s4061_s1 + $0xbe0] sm:$0xff] %v1740_v61  ;;  %1869 = vst [vmem:[%s4061_s1 + $0x7e8] sm:$0xff] %v1736_v59 }
  0xfa   :  { %1870 = vst [vmem:[%s4061_s1 + $0x9e8] sm:$0xff] %v1738_v60  ;;  %1871 = vst [vmem:[%s4061_s1 + $0xbe8] sm:$0xff] %v1740_v61 }
  0xfb   :  { %1997 = vst [vmem:[%s4061_s1 + $0x7f0] sm:$0xff] %v1736_v59  ;;  %1998 = vst [vmem:[%s4061_s1 + $0x9f0] sm:$0xff] %v1738_v60 }
  0xfc   :  { %1999 = vst [vmem:[%s4061_s1 + $0xbf0] sm:$0xff] %v1740_v61  ;;  %2125 = vst [vmem:[%s4061_s1 + $0x7f8] sm:$0xff] %v1736_v59 }
  0xfd   :  { %2126 = vst [vmem:[%s4061_s1 + $0x9f8] sm:$0xff] %v1738_v60  ;;  %2127 = vst [vmem:[%s4061_s1 + $0xbf8] sm:$0xff] %v1740_v61 }
  0xfe   :  { %1743 = vst [vmem:[%s4061_s1 + $0xde0] sm:$0xff] %v1742_v62  ;;  %1745 = vst [vmem:[%s4061_s1 + $0xfe0] sm:$0xff] %v1744_v63 }
  0xff   :  { %1872 = vst [vmem:[%s4061_s1 + $0xde8] sm:$0xff] %v1742_v62  ;;  %1873 = vst [vmem:[%s4061_s1 + $0xfe8] sm:$0xff] %v1744_v63 }
 0x100   :  { %2000 = vst [vmem:[%s4061_s1 + $0xdf0] sm:$0xff] %v1742_v62  ;;  %2001 = vst [vmem:[%s4061_s1 + $0xff0] sm:$0xff] %v1744_v63 }
 0x101   :  { %2128 = vst [vmem:[%s4061_s1 + $0xdf8] sm:$0xff] %v1742_v62  ;;  %2129 = vst [vmem:[%s4061_s1 + $0xff8] sm:$0xff] %v1744_v63 }

// kernel: feature_encoder_forward.3
= control target key start
LH: loop header
LB: loop body
LE: loop exit
PB: predicated region body
PF: predicated region fallthrough
CT: control target
= control target key end

     0   :  { %s5382_s24 = smov 0   ;;  %s6189_s0 = inlined_call_operand.vmem [shape: bf16[8192,11], index: 0, kind: input, shape index: {}]   ;;  %s6190_s1 = inlined_call_operand.vmem [shape: bf16[11,64], index: 1, kind: input, shape index: {}]   ;;  %s6191_s2 = inlined_call_operand.vmem [shape: f32[1,64], index: 2, kind: input, shape index: {}]   ;;  %s6192_s3 = inlined_call_operand.vmem [shape: bf16[64,64], index: 3, kind: input, shape index: {}]   ;;  %s6193_s4 = inlined_call_operand.vmem [shape: f32[1,64], index: 4, kind: input, shape index: {}]   ;;  %s6194_s5 = inlined_call_operand.vmem [shape: bf16[64,128], index: 5, kind: input, shape index: {}]   ;;  %s6195_s6 = inlined_call_operand.vmem [shape: f32[1,128], index: 6, kind: input, shape index: {}]   ;;  %s6196_s7 = inlined_call_operand.vmem [shape: bf16[256,128], index: 7, kind: output, shape index: {}]  }
   0x1 LB: > { %s4207_s25 = sadd.s32 4294967295, %s5339_s24   ;;  %p4211_p0 = scmp.ge.s32.totalorder %s5339_s24, 1  ;;  %s5339_s24 = sphi %s5382_s24, %s17_s24  }
   0x2   : > { %p238_p1 = scmp.lt.s32.totalorder %s5339_s24, 9 }
   0x4   : > { %p239_p2 = pnand %p4211_p0, %p238_p1 }
   0x5   : > { %v5255_v0 = vld [vmem:[%s6190_s1] sm:$0x3f] (!%p239_p2)   ;;  %vm636_vm0 = vcmask (!%p239_p2), 1044480   ;;  %vm637_vm1 = vcmask (!%p239_p2), 1045504   ;;  %s4212_s28 = sshll.u32 (!%p239_p2), %s4207_s25, 7  ;;  %v5341_v1 = vmov (!%p239_p2), 65535  }
   0x6   : > { %242 = sbr.rel (%p239_p2) target bundleno = 1177 (0x499), region = 48  ;;  %v638_v2 = vsel (!%p239_p2), %vm636_vm0, 4294967295, %v5341_v1  ;;  %p271_p3 = scmp.lt.s32.totalorder (!%p239_p2), %s4212_s28, 1023  ;;  %v5398_v4 = vld [vmem:[%s6192_s3] sm:$0xff] (!%p239_p2)   ;;  %v5289_v6 = vld [vmem:[%s6192_s3 + $0x8] sm:$0xff] (!%p239_p2)   ;;  %vm539_vm2 = vcmask (!%p239_p2), 89088  }
   0x7   : > { %v639_v3 = vsel (!%p239_p2), %vm637_vm1, %v638_v2, 0  ;;  %4892 = vmatprep.subr.bf16.mxu1 (!%p239_p2), %v5398_v4  ;;  %v5464_v31 = vld [vmem:[%s6192_s3 + $0x10] sm:$0xff] (!%p239_p2)   ;;  %v5473_v33 = vld [vmem:[%s6192_s3 + $0x18] sm:$0xff] (!%p239_p2)   ;;  %v5496_v41 = vld [vmem:[%s6194_s5] sm:$0xff] (!%p239_p2)   ;;  %vm1058_vm3 = vcmask (!%p239_p2), 523264   ;;  %vm2243_vm4 = vcmask (!%p239_p2), 1041409  }
   0x8   : > { %v5400_v5 = vand.u32 (!%p239_p2), %v5255_v0, %v639_v3  ;;  %4893 = vmatpush3.bf16.msra.mxu1 (!%p239_p2), %v5398_v4  ;;  %v5503_v42 = vld [vmem:[%s6191_s2] ss:$0 sm:$0xff] (!%p239_p2)  ;;  %v5511_v50 = vld [vmem:[%s6194_s5 + $0x8] sm:$0xff] (!%p239_p2)   ;;  %vm2245_vm5 = vcmask (!%p239_p2), 1042434   ;;  %vm2247_vm6 = vcmask (!%p239_p2), 1043459   ;;  %vm2249_vm7 = vcmask (!%p239_p2), 1044484  }
   0x9   : > { %4894 = vmatprep.subr.bf16.mxu1 (!%p239_p2), %v5289_v6  ;;  %vm2251_vm8 = vcmask (!%p239_p2), 1045509   ;;  %s4214_s17 = sshll.u32 (!%p239_p2), %s4207_s25, 2  ;;  %vm2253_vm9 = vcmask (!%p239_p2), 1046534   ;;  %vm2255_vm10 = vcmask (!%p239_p2), 1047559  }
   0xa   : > { %4826 = vmatprep.subr.bf16.mxu0 (!%p239_p2), %v5400_v5  ;;  %p277_p4 = scmp.lt.s32.totalorder (!%p239_p2), %s4214_s17, 31 }
   0xb   : > { %4827 = vmatpush3.bf16.msra.mxu0 (!%p239_p2), %v5400_v5 }
   0xc   : > { %4895 = vmatpush3.bf16.msra.mxu1 (!%p239_p2), %v5289_v6  ;;  %4964 = vmatprep.subr.bf16.mxu0 (!%p239_p2), %v5496_v41 }
   0xd   : > { %s6198_s28 = smov (!%p271_p3, %s4212_s28), 1023  ;;  %4896 = vmatprep.subr.bf16.mxu1 %v5464_v31  ;;  %s6200_s17 = smov (!%p277_p4, %s4214_s17), 31 }
   0xe   : > { %s4213_s10 = sshll.u32 %s6198_s28, 2  ;;  %s4215_s25 = sshll.u32 %s6200_s17, 2 }
   0xf   : > { %s5412_s13 = scalar_lea.vmem %s6189_s0, %s4213_s10  ;;  %s5967_s20 = scalar_lea.vmem %s6196_s7, %s4215_s25 }
  0x10   : > { %v5256_v7 = vld [vmem:[%s5412_s13] sm:$0xff]   ;;  %v5257_v8 = vld [vmem:[%s5412_s13 + $0x8] sm:$0xff]   ;;  %v5258_v9 = vld [vmem:[%s5412_s13 + $0x10] sm:$0xff]   ;;  %4897 = vmatpush3.bf16.msra.mxu1 %v5464_v31 }
  0x11   : > { %4828 = vmatprep.mubr.msk.bf16.mxu0 %vm539_vm2, %v5256_v7  ;;  %v5259_v10 = vld [vmem:[%s5412_s13 + $0x18] sm:$0xff]   ;;  %v5260_v11 = vld [vmem:[%s5412_s13 + $0x20] sm:$0xff]   ;;  %v5261_v12 = vld [vmem:[%s5412_s13 + $0x28] sm:$0xff]   ;;  %4898 = vmatprep.subr.bf16.mxu1 %v5473_v33 }
  0x12   : > { %4829 = vmatmul.mubr.msk.bf16.vlgmr.msra.gmra.mrb[0].mxu0 %vm539_vm2, %v5257_v8  ;;  %v5262_v13 = vld [vmem:[%s5412_s13 + $0x30] sm:$0xff]   ;;  %v5263_v14 = vld [vmem:[%s5412_s13 + $0x38] sm:$0xff]   ;;  %v5264_v15 = vld [vmem:[%s5412_s13 + $0x40] sm:$0xff]  }
  0x13   : > { %4832 = vmatprep.mubr.msk.bf16.mxu0 %vm539_vm2, %v5258_v9  ;;  %v5265_v16 = vld [vmem:[%s5412_s13 + $0x48] sm:$0xff]   ;;  %v5266_v17 = vld [vmem:[%s5412_s13 + $0x50] sm:$0xff]   ;;  %v5267_v18 = vld [vmem:[%s5412_s13 + $0x58] sm:$0xff]   ;;  %4965 = vmatpush3.bf16.msra.mxu0 %v5496_v41 }
  0x14   : > { %v5268_v19 = vld [vmem:[%s5412_s13 + $0x60] sm:$0xff]   ;;  %v5269_v20 = vld [vmem:[%s5412_s13 + $0x68] sm:$0xff]   ;;  %v5270_v21 = vld [vmem:[%s5412_s13 + $0x70] sm:$0xff]   ;;  %4899 = vmatpush3.bf16.msra.mxu1 %v5473_v33  ;;  %4966 = vmatprep.subr.bf16.mxu0 %v5511_v50 }
  0x15   : > { %v5271_v22 = vld [vmem:[%s5412_s13 + $0x78] sm:$0xff]   ;;  %v5272_v23 = vld [vmem:[%s5412_s13 + $0x80] sm:$0xff]   ;;  %v5273_v24 = vld [vmem:[%s5412_s13 + $0x88] sm:$0xff]   ;;  %5036 = vmatprep.subr.bf16.mxu1 %v5400_v5 }
  0x16   : > { %v5274_v25 = vld [vmem:[%s5412_s13 + $0x90] sm:$0xff]   ;;  %v5275_v26 = vld [vmem:[%s5412_s13 + $0x98] sm:$0xff]   ;;  %v5276_v27 = vld [vmem:[%s5412_s13 + $0xa0] sm:$0xff]  }
  0x17   : > { %v5277_v28 = vld [vmem:[%s5412_s13 + $0xa8] sm:$0xff]   ;;  %v5278_v29 = vld [vmem:[%s5412_s13 + $0xb0] sm:$0xff]   ;;  %v5279_v30 = vld [vmem:[%s5412_s13 + $0xb8] sm:$0xff]   ;;  %4967 = vmatpush3.bf16.msra.mxu0 %v5511_v50 }
  0x18   : > { %v5280_v32 = vld [vmem:[%s5412_s13 + $0xc0] sm:$0xff]   ;;  %v5281_v34 = vld [vmem:[%s5412_s13 + $0xc8] sm:$0xff]   ;;  %v5282_v35 = vld [vmem:[%s5412_s13 + $0xd0] sm:$0xff]  }
  0x19   : > { %v5283_v36 = vld [vmem:[%s5412_s13 + $0xd8] sm:$0xff]   ;;  %v5284_v37 = vld [vmem:[%s5412_s13 + $0xe0] sm:$0xff]   ;;  %v5285_v38 = vld [vmem:[%s5412_s13 + $0xe8] sm:$0xff]  }
  0x1a   : > { %4833 = vmatmul.mubr.msk.bf16.gmra.mrb[4].mxu0 %vm539_vm2, %v5259_v10  ;;  %v5286_v39 = vld [vmem:[%s5412_s13 + $0xf0] sm:$0xff]   ;;  %v5287_v40 = vld [vmem:[%s5412_s13 + $0xf8] sm:$0xff]  }
  0x1b   : > { %4836 = vmatprep.mubr.msk.bf16.mxu0 %vm539_vm2, %v5260_v11 }
  0x22   : > { %4837 = vmatmul.mubr.msk.bf16.gmra.mrb[8].mxu0 %vm539_vm2, %v5261_v12 }
  0x23   : > { %4840 = vmatprep.mubr.msk.bf16.mxu0 %vm539_vm2, %v5262_v13 }
  0x2a   : > { %4841 = vmatmul.mubr.msk.bf16.gmra.mrb[12].mxu0 %vm539_vm2, %v5263_v14 }
  0x2b   : > { %4844 = vmatprep.mubr.msk.bf16.mxu0 %vm539_vm2, %v5264_v15 }
  0x32   : > { %4845 = vmatmul.mubr.msk.bf16.gmra.mrb[16].mxu0 %vm539_vm2, %v5265_v16 }
  0x33   : > { %4848 = vmatprep.mubr.msk.bf16.mxu0 %vm539_vm2, %v5266_v17 }
  0x3a   : > { %4849 = vmatmul.mubr.msk.bf16.gmra.mrb[20].mxu0 %vm539_vm2, %v5267_v18 }
  0x3b   : > { %4852 = vmatprep.mubr.msk.bf16.mxu0 %vm539_vm2, %v5268_v19 }
  0x42   : > { %4853 = vmatmul.mubr.msk.bf16.gmra.mrb[24].mxu0 %vm539_vm2, %v5269_v20 }
  0x43   : > { %4856 = vmatprep.mubr.msk.bf16.mxu0 %vm539_vm2, %v5270_v21 }
  0x4a   : > { %4857 = vmatmul.mubr.msk.bf16.gmra.mrb[28].mxu0 %vm539_vm2, %v5271_v22 }
  0x4b   : > { %4860 = vmatprep.mubr.msk.bf16.mxu0 %vm539_vm2, %v5272_v23 }
  0x52   : > { %4861 = vmatmul.mubr.msk.bf16.gmra.mrb[32].mxu0 %vm539_vm2, %v5273_v24 }
  0x53   : > { %4864 = vmatprep.mubr.msk.bf16.mxu0 %vm539_vm2, %v5274_v25 }
  0x5a   : > { %4865 = vmatmul.mubr.msk.bf16.gmra.mrb[36].mxu0 %vm539_vm2, %v5275_v26 }
  0x5b   : > { %4868 = vmatprep.mubr.msk.bf16.mxu0 %vm539_vm2, %v5276_v27 }
  0x62   : > { %4869 = vmatmul.mubr.msk.bf16.gmra.mrb[40].mxu0 %vm539_vm2, %v5277_v28 }
  0x63   : > { %4872 = vmatprep.mubr.msk.bf16.mxu0 %vm539_vm2, %v5278_v29 }
  0x6a   : > { %4873 = vmatmul.mubr.msk.bf16.gmra.mrb[44].mxu0 %vm539_vm2, %v5279_v30 }
  0x6b   : > { %4876 = vmatprep.mubr.msk.bf16.mxu0 %vm539_vm2, %v5280_v32 }
  0x72   : > { %4877 = vmatmul.mubr.msk.bf16.gmra.mrb[48].mxu0 %vm539_vm2, %v5281_v34 }
  0x73   : > { %4880 = vmatprep.mubr.msk.bf16.mxu0 %vm539_vm2, %v5282_v35 }
  0x7a   : > { %4881 = vmatmul.mubr.msk.bf16.gmra.mrb[52].mxu0 %vm539_vm2, %v5283_v36 }
  0x7b   : > { %4884 = vmatprep.mubr.msk.bf16.mxu0 %vm539_vm2, %v5284_v37 }
  0x82   : > { %4885 = vmatmul.mubr.msk.bf16.gmra.mrb[56].mxu0 %vm539_vm2, %v5285_v38 }
  0x83   : > { %4888 = vmatprep.mubr.msk.bf16.mxu0 %vm539_vm2, %v5286_v39 }
  0x8a   : > { %4889 = vmatmul.mubr.msk.bf16.gmra.mrb[60].mxu0 %vm539_vm2, %v5287_v40 }
  0xe5   : > { %v4830_v43 = vpop.f32.mrb[0].mxu0 }
  0xe6   : > { %v686_v44 = vadd.f32 %v4830_v43, %v5503_v42  ;;  %v677_v45 = vpop.f32.mrb[1].mxu0 }
  0xe7   : > { %v678_v46 = vadd.f32 %v5503_v42, %v677_v45  ;;  %v4831_v47 = vpop.f32.mrb[2].mxu0 }
  0xe8   : > { %v689_v48 = vadd.f32 %v4831_v47, %v5503_v42  ;;  %v680_v49 = vpop.f32.mrb[3].mxu0  ;;  %v934_v52 = vmax.f32 %v686_v44, 0.0 }
  0xe9   : > { %v681_v51 = vadd.f32 %v5503_v42, %v680_v49  ;;  %v932_v54 = vmax.f32 %v678_v46, 0.0 }
  0xea   : > { %v935_v53 = vmax.f32 %v689_v48, 0.0  ;;  %v5544_v48 = vld [vmem:[%s6194_s5 + $0x10] sm:$0xff]  }
  0xeb   : > { %v933_v55 = vmax.f32 %v681_v51, 0.0  ;;  %4968 = vmatprep.subr.bf16.mxu0 %v5544_v48 }
  0xec   : > { %v997_v56 = vpack.c.bf16 %v935_v53, %v934_v52  ;;  %4969 = vmatpush3.bf16.msra.mxu0 %v5544_v48 }
  0xed   : > { %v4834_v57 = vpop.f32.mrb[4].mxu0  ;;  %v996_v58 = vpack.c.bf16 %v933_v55, %v932_v54 }
  0xee   : > { %v702_v59 = vadd.f32 %v4834_v57, %v5503_v42  ;;  %v693_v60 = vpop.f32.mrb[5].mxu0 }
  0xef   : > { %v694_v61 = vadd.f32 %v5503_v42, %v693_v60  ;;  %v4835_v62 = vpop.f32.mrb[6].mxu0  ;;  %4900 = vmatprep.mubr.msk.bf16.mxu1 %vm1058_vm3, %v996_v58 }
  0xf0   : > { %v705_v63 = vadd.f32 %v4835_v62, %v5503_v42  ;;  %v696_v0 = vpop.f32.mrb[7].mxu0  ;;  %4901 = vmatmul.mubr.msk.bf16.vlgmr.msra.gmra.mrb[0].mxu1 %vm1058_vm3, %v997_v56  ;;  %v938_v2 = vmax.f32 %v702_v59, 0.0 }
  0xf1   : > { %v697_v1 = vadd.f32 %v5503_v42, %v696_v0  ;;  %5037 = vmatpush3.bf16.msra.mxu1 %v5400_v5  ;;  %v936_v6 = vmax.f32 %v694_v61, 0.0 }
  0xf2   : > { %v939_v3 = vmax.f32 %v705_v63, 0.0  ;;  %5174 = vmatprep.subr.bf16.mxu1 %v5496_v41 }
  0xf3   : > { %v937_v7 = vmax.f32 %v697_v1, 0.0 }
  0xf4   : > { %v999_v8 = vpack.c.bf16 %v939_v3, %v938_v2 }
  0xf5   : > { %v998_v9 = vpack.c.bf16 %v937_v7, %v936_v6  ;;  %v4838_v10 = vpop.f32.mrb[8].mxu0 }
  0xf6   : > { %v718_v11 = vadd.f32 %v4838_v10, %v5503_v42  ;;  %v709_v12 = vpop.f32.mrb[9].mxu0 }
  0xf7   : > { %v710_v13 = vadd.f32 %v5503_v42, %v709_v12  ;;  %v4839_v14 = vpop.f32.mrb[10].mxu0  ;;  %4904 = vmatprep.mubr.msk.bf16.mxu1 %vm1058_vm3, %v998_v9 }
  0xf8   : > { %v721_v15 = vadd.f32 %v4839_v14, %v5503_v42  ;;  %v712_v5 = vpop.f32.mrb[11].mxu0  ;;  %4905 = vmatmul.mubr.msk.bf16.gmra.mrb[4].mxu1 %vm1058_vm3, %v999_v8  ;;  %v942_v17 = vmax.f32 %v718_v11, 0.0 }
  0xf9   : > { %v713_v16 = vadd.f32 %v5503_v42, %v712_v5  ;;  %v940_v19 = vmax.f32 %v710_v13, 0.0 }
  0xfa   : > { %v943_v18 = vmax.f32 %v721_v15, 0.0 }
  0xfb   : > { %v941_v20 = vmax.f32 %v713_v16, 0.0 }
  0xfc   : > { %v1001_v21 = vpack.c.bf16 %v943_v18, %v942_v17 }
  0xfd   : > { %v1000_v22 = vpack.c.bf16 %v941_v20, %v940_v19  ;;  %v4842_v23 = vpop.f32.mrb[12].mxu0 }
  0xfe   : > { %v734_v24 = vadd.f32 %v4842_v23, %v5503_v42  ;;  %v725_v25 = vpop.f32.mrb[13].mxu0 }
  0xff   : > { %v726_v26 = vadd.f32 %v5503_v42, %v725_v25  ;;  %v4843_v27 = vpop.f32.mrb[14].mxu0  ;;  %4908 = vmatprep.mubr.msk.bf16.mxu1 %vm1058_vm3, %v1000_v22 }
 0x100   : > { %v737_v28 = vadd.f32 %v4843_v27, %v5503_v42  ;;  %v728_v29 = vpop.f32.mrb[15].mxu0  ;;  %4909 = vmatmul.mubr.msk.bf16.gmra.mrb[8].mxu1 %vm1058_vm3, %v1001_v21  ;;  %v946_v32 = vmax.f32 %v734_v24, 0.0 }
 0x101   : > { %v729_v30 = vadd.f32 %v5503_v42, %v728_v29  ;;  %v944_v35 = vmax.f32 %v726_v26, 0.0 }
 0x102   : > { %v947_v34 = vmax.f32 %v737_v28, 0.0 }
 0x103   : > { %v945_v36 = vmax.f32 %v729_v30, 0.0 }
 0x104   : > { %v1003_v37 = vpack.c.bf16 %v947_v34, %v946_v32 }
 0x105   : > { %v1002_v38 = vpack.c.bf16 %v945_v36, %v944_v35  ;;  %v4846_v39 = vpop.f32.mrb[16].mxu0 }
 0x106   : > { %v750_v40 = vadd.f32 %v4846_v39, %v5503_v42  ;;  %v741_v43 = vpop.f32.mrb[17].mxu0 }
 0x107   : > { %v742_v44 = vadd.f32 %v5503_v42, %v741_v43  ;;  %v4847_v45 = vpop.f32.mrb[18].mxu0  ;;  %4912 = vmatprep.mubr.msk.bf16.mxu1 %vm1058_vm3, %v1002_v38 }
 0x108   : > { %v753_v46 = vadd.f32 %v4847_v45, %v5503_v42  ;;  %v744_v47 = vpop.f32.mrb[19].mxu0  ;;  %4913 = vmatmul.mubr.msk.bf16.gmra.mrb[12].mxu1 %vm1058_vm3, %v1003_v37  ;;  %v950_v51 = vmax.f32 %v750_v40, 0.0 }
 0x109   : > { %v745_v49 = vadd.f32 %v5503_v42, %v744_v47  ;;  %v948_v53 = vmax.f32 %v742_v44, 0.0  ;;  %v5575_v47 = vld [vmem:[%s6194_s5 + $0x18] sm:$0xff]  }
 0x10a   : > { %v951_v52 = vmax.f32 %v753_v46, 0.0  ;;  %4970 = vmatprep.subr.bf16.mxu0 %v5575_v47 }
 0x10b   : > { %v949_v54 = vmax.f32 %v745_v49, 0.0  ;;  %4971 = vmatpush3.bf16.msra.mxu0 %v5575_v47 }
 0x10c   : > { %v1005_v55 = vpack.c.bf16 %v951_v52, %v950_v51  ;;  %5102 = vmatprep.subr.bf16.mxu0 %v5398_v4 }
 0x10d   : > { %v1004_v56 = vpack.c.bf16 %v949_v54, %v948_v53  ;;  %v4850_v57 = vpop.f32.mrb[20].mxu0 }
 0x10e   : > { %v766_v58 = vadd.f32 %v4850_v57, %v5503_v42  ;;  %v757_v59 = vpop.f32.mrb[21].mxu0 }
 0x10f   : > { %v758_v60 = vadd.f32 %v5503_v42, %v757_v59  ;;  %v4851_v61 = vpop.f32.mrb[22].mxu0  ;;  %4916 = vmatprep.mubr.msk.bf16.mxu1 %vm1058_vm3, %v1004_v56 }
 0x110   : > { %v769_v62 = vadd.f32 %v4851_v61, %v5503_v42  ;;  %v760_v63 = vpop.f32.mrb[23].mxu0  ;;  %4917 = vmatmul.mubr.msk.bf16.gmra.mrb[16].mxu1 %vm1058_vm3, %v1005_v55  ;;  %v954_v1 = vmax.f32 %v766_v58, 0.0 }
 0x111   : > { %v761_v0 = vadd.f32 %v5503_v42, %v760_v63  ;;  %v952_v3 = vmax.f32 %v758_v60, 0.0 }
 0x112   : > { %v955_v2 = vmax.f32 %v769_v62, 0.0 }
 0x113   : > { %v953_v6 = vmax.f32 %v761_v0, 0.0 }
 0x114   : > { %v1007_v7 = vpack.c.bf16 %v955_v2, %v954_v1 }
 0x115   : > { %v1006_v8 = vpack.c.bf16 %v953_v6, %v952_v3  ;;  %v4854_v9 = vpop.f32.mrb[24].mxu0 }
 0x116   : > { %v782_v10 = vadd.f32 %v4854_v9, %v5503_v42  ;;  %v773_v11 = vpop.f32.mrb[25].mxu0 }
 0x117   : > { %v774_v12 = vadd.f32 %v5503_v42, %v773_v11  ;;  %v4855_v13 = vpop.f32.mrb[26].mxu0  ;;  %4920 = vmatprep.mubr.msk.bf16.mxu1 %vm1058_vm3, %v1006_v8 }
 0x118   : > { %v785_v14 = vadd.f32 %v4855_v13, %v5503_v42  ;;  %v776_v15 = vpop.f32.mrb[27].mxu0  ;;  %4921 = vmatmul.mubr.msk.bf16.gmra.mrb[20].mxu1 %vm1058_vm3, %v1007_v7  ;;  %v958_v16 = vmax.f32 %v782_v10, 0.0 }
 0x119   : > { %v777_v5 = vadd.f32 %v5503_v42, %v776_v15  ;;  %v956_v18 = vmax.f32 %v774_v12, 0.0 }
 0x11a   : > { %v959_v17 = vmax.f32 %v785_v14, 0.0 }
 0x11b   : > { %v957_v19 = vmax.f32 %v777_v5, 0.0 }
 0x11c   : > { %v1009_v20 = vpack.c.bf16 %v959_v17, %v958_v16 }
 0x11d   : > { %v1008_v21 = vpack.c.bf16 %v957_v19, %v956_v18  ;;  %v4858_v22 = vpop.f32.mrb[28].mxu0 }
 0x11e   : > { %v798_v23 = vadd.f32 %v4858_v22, %v5503_v42  ;;  %v789_v24 = vpop.f32.mrb[29].mxu0 }
 0x11f   : > { %v790_v25 = vadd.f32 %v5503_v42, %v789_v24  ;;  %v4859_v26 = vpop.f32.mrb[30].mxu0  ;;  %4924 = vmatprep.mubr.msk.bf16.mxu1 %vm1058_vm3, %v1008_v21 }
 0x120   : > { %v801_v27 = vadd.f32 %v4859_v26, %v5503_v42  ;;  %v792_v28 = vpop.f32.mrb[31].mxu0  ;;  %4925 = vmatmul.mubr.msk.bf16.gmra.mrb[24].mxu1 %vm1058_vm3, %v1009_v20  ;;  %v962_v30 = vmax.f32 %v798_v23, 0.0 }
 0x121   : > { %v793_v29 = vadd.f32 %v5503_v42, %v792_v28  ;;  %v960_v34 = vmax.f32 %v790_v25, 0.0 }
 0x122   : > { %v963_v32 = vmax.f32 %v801_v27, 0.0 }
 0x123   : > { %v961_v35 = vmax.f32 %v793_v29, 0.0 }
 0x124   : > { %v1011_v36 = vpack.c.bf16 %v963_v32, %v962_v30 }
 0x125   : > { %v1010_v37 = vpack.c.bf16 %v961_v35, %v960_v34  ;;  %v4862_v38 = vpop.f32.mrb[32].mxu0 }
 0x126   : > { %v814_v39 = vadd.f32 %v4862_v38, %v5503_v42  ;;  %v805_v40 = vpop.f32.mrb[33].mxu0 }
 0x127   : > { %v806_v43 = vadd.f32 %v5503_v42, %v805_v40  ;;  %v4863_v44 = vpop.f32.mrb[34].mxu0  ;;  %4928 = vmatprep.mubr.msk.bf16.mxu1 %vm1058_vm3, %v1010_v37 }
 0x128   : > { %v817_v45 = vadd.f32 %v4863_v44, %v5503_v42  ;;  %v808_v46 = vpop.f32.mrb[35].mxu0  ;;  %4929 = vmatmul.mubr.msk.bf16.gmra.mrb[28].mxu1 %vm1058_vm3, %v1011_v36  ;;  %v966_v51 = vmax.f32 %v814_v39, 0.0 }
 0x129   : > { %v809_v49 = vadd.f32 %v5503_v42, %v808_v46  ;;  %v964_v53 = vmax.f32 %v806_v43, 0.0 }
 0x12a   : > { %v967_v52 = vmax.f32 %v817_v45, 0.0 }
 0x12b   : > { %v965_v54 = vmax.f32 %v809_v49, 0.0 }
 0x12c   : > { %v1013_v55 = vpack.c.bf16 %v967_v52, %v966_v51 }
 0x12d   : > { %v1012_v56 = vpack.c.bf16 %v965_v54, %v964_v53  ;;  %v4866_v57 = vpop.f32.mrb[36].mxu0 }
 0x12e   : > { %v830_v58 = vadd.f32 %v4866_v57, %v5503_v42  ;;  %v821_v59 = vpop.f32.mrb[37].mxu0 }
 0x12f   : > { %v822_v60 = vadd.f32 %v5503_v42, %v821_v59  ;;  %v4867_v61 = vpop.f32.mrb[38].mxu0  ;;  %4932 = vmatprep.mubr.msk.bf16.mxu1 %vm1058_vm3, %v1012_v56 }
 0x130   : > { %v833_v62 = vadd.f32 %v4867_v61, %v5503_v42  ;;  %v824_v63 = vpop.f32.mrb[39].mxu0  ;;  %4933 = vmatmul.mubr.msk.bf16.gmra.mrb[32].mxu1 %vm1058_vm3, %v1013_v55  ;;  %v970_v1 = vmax.f32 %v830_v58, 0.0 }
 0x131   : > { %v825_v0 = vadd.f32 %v5503_v42, %v824_v63  ;;  %v968_v4 = vmax.f32 %v822_v60, 0.0 }
 0x132   : > { %v971_v2 = vmax.f32 %v833_v62, 0.0 }
 0x133   : > { %v969_v3 = vmax.f32 %v825_v0, 0.0 }
 0x134   : > { %v1015_v6 = vpack.c.bf16 %v971_v2, %v970_v1 }
 0x135   : > { %v1014_v7 = vpack.c.bf16 %v969_v3, %v968_v4  ;;  %v4870_v8 = vpop.f32.mrb[40].mxu0 }
 0x136   : > { %v846_v9 = vadd.f32 %v4870_v8, %v5503_v42  ;;  %v837_v10 = vpop.f32.mrb[41].mxu0 }
 0x137   : > { %v838_v11 = vadd.f32 %v5503_v42, %v837_v10  ;;  %v4871_v12 = vpop.f32.mrb[42].mxu0  ;;  %4936 = vmatprep.mubr.msk.bf16.mxu1 %vm1058_vm3, %v1014_v7 }
 0x138   : > { %v849_v13 = vadd.f32 %v4871_v12, %v5503_v42  ;;  %v840_v14 = vpop.f32.mrb[43].mxu0  ;;  %4937 = vmatmul.mubr.msk.bf16.gmra.mrb[36].mxu1 %vm1058_vm3, %v1015_v6  ;;  %v974_v5 = vmax.f32 %v846_v9, 0.0 }
 0x139   : > { %v841_v15 = vadd.f32 %v5503_v42, %v840_v14  ;;  %v972_v17 = vmax.f32 %v838_v11, 0.0 }
 0x13a   : > { %v975_v16 = vmax.f32 %v849_v13, 0.0 }
 0x13b   : > { %v973_v18 = vmax.f32 %v841_v15, 0.0 }
 0x13c   : > { %v1017_v19 = vpack.c.bf16 %v975_v16, %v974_v5 }
 0x13d   : > { %v1016_v20 = vpack.c.bf16 %v973_v18, %v972_v17  ;;  %v4874_v21 = vpop.f32.mrb[44].mxu0 }
 0x13e   : > { %v862_v22 = vadd.f32 %v4874_v21, %v5503_v42  ;;  %v853_v23 = vpop.f32.mrb[45].mxu0 }
 0x13f   : > { %v854_v24 = vadd.f32 %v5503_v42, %v853_v23  ;;  %v4875_v25 = vpop.f32.mrb[46].mxu0  ;;  %4940 = vmatprep.mubr.msk.bf16.mxu1 %vm1058_vm3, %v1016_v20 }
 0x140   : > { %v865_v26 = vadd.f32 %v4875_v25, %v5503_v42  ;;  %v856_v27 = vpop.f32.mrb[47].mxu0  ;;  %4941 = vmatmul.mubr.msk.bf16.gmra.mrb[40].mxu1 %vm1058_vm3, %v1017_v19  ;;  %v978_v29 = vmax.f32 %v862_v22, 0.0 }
 0x141   : > { %v857_v28 = vadd.f32 %v5503_v42, %v856_v27  ;;  %v976_v32 = vmax.f32 %v854_v24, 0.0 }
 0x142   : > { %v979_v30 = vmax.f32 %v865_v26, 0.0 }
 0x143   : > { %v977_v34 = vmax.f32 %v857_v28, 0.0 }
 0x144   : > { %v1019_v35 = vpack.c.bf16 %v979_v30, %v978_v29 }
 0x145   : > { %v1018_v36 = vpack.c.bf16 %v977_v34, %v976_v32  ;;  %v4878_v37 = vpop.f32.mrb[48].mxu0 }
 0x146   : > { %v878_v38 = vadd.f32 %v4878_v37, %v5503_v42  ;;  %v869_v39 = vpop.f32.mrb[49].mxu0  ;;  %v5295_v37 = vld [vmem:[%s5412_s13 + $0x108] sm:$0xff]  }
 0x147   : > { %v870_v40 = vadd.f32 %v5503_v42, %v869_v39  ;;  %v4879_v43 = vpop.f32.mrb[50].mxu0  ;;  %4944 = vmatprep.mubr.msk.bf16.mxu1 %vm1058_vm3, %v1018_v36  ;;  %v5294_v36 = vld [vmem:[%s5412_s13 + $0x100] sm:$0xff]  }
 0x148   : > { %v881_v44 = vadd.f32 %v4879_v43, %v5503_v42  ;;  %v872_v45 = vpop.f32.mrb[51].mxu0  ;;  %4945 = vmatmul.mubr.msk.bf16.gmra.mrb[44].mxu1 %vm1058_vm3, %v1019_v35  ;;  %v982_v49 = vmax.f32 %v878_v38, 0.0  ;;  %v5296_v38 = vld [vmem:[%s5412_s13 + $0x110] sm:$0xff]   ;;  %v5298_v39 = vld [vmem:[%s5412_s13 + $0x120] sm:$0xff]  }
 0x149   : > { %v873_v46 = vadd.f32 %v5503_v42, %v872_v45  ;;  %v980_v52 = vmax.f32 %v870_v40, 0.0  ;;  %v5300_v40 = vld [vmem:[%s5412_s13 + $0x130] sm:$0xff]   ;;  %v5303_v43 = vld [vmem:[%s5412_s13 + $0x140] sm:$0xff]  }
 0x14a   : > { %v983_v51 = vmax.f32 %v881_v44, 0.0  ;;  %v5305_v44 = vld [vmem:[%s5412_s13 + $0x150] sm:$0xff]   ;;  %v5307_v45 = vld [vmem:[%s5412_s13 + $0x160] sm:$0xff]  }
 0x14b   : > { %v981_v53 = vmax.f32 %v873_v46, 0.0  ;;  %v5308_v46 = vld [vmem:[%s5412_s13 + $0x168] sm:$0xff]  }
 0x14c   : > { %v1021_v54 = vpack.c.bf16 %v983_v51, %v982_v49  ;;  %v5309_v49 = vld [vmem:[%s5412_s13 + $0x170] sm:$0xff]   ;;  %v5310_v51 = vld [vmem:[%s5412_s13 + $0x178] sm:$0xff]  }
 0x14d   : > { %v1020_v55 = vpack.c.bf16 %v981_v53, %v980_v52  ;;  %v4882_v56 = vpop.f32.mrb[52].mxu0  ;;  %v5312_v52 = vld [vmem:[%s5412_s13 + $0x180] sm:$0xff]   ;;  %v5313_v53 = vld [vmem:[%s5412_s13 + $0x188] sm:$0xff]  }
 0x14e   : > { %v894_v57 = vadd.f32 %v4882_v56, %v5503_v42  ;;  %v885_v58 = vpop.f32.mrb[53].mxu0  ;;  %v5316_v56 = vld [vmem:[%s5412_s13 + $0x1a0] sm:$0xff]  }
 0x14f   : > { %v886_v59 = vadd.f32 %v5503_v42, %v885_v58  ;;  %v4883_v60 = vpop.f32.mrb[54].mxu0  ;;  %4948 = vmatprep.mubr.msk.bf16.mxu1 %vm1058_vm3, %v1020_v55  ;;  %v5315_v55 = vld [vmem:[%s5412_s13 + $0x198] sm:$0xff]   ;;  %v5318_v58 = vld [vmem:[%s5412_s13 + $0x1b0] sm:$0xff]  }
 0x150   : > { %v897_v61 = vadd.f32 %v4883_v60, %v5503_v42  ;;  %v888_v62 = vpop.f32.mrb[55].mxu0  ;;  %4949 = vmatmul.mubr.msk.bf16.gmra.mrb[48].mxu1 %vm1058_vm3, %v1021_v54  ;;  %v986_v0 = vmax.f32 %v894_v57, 0.0  ;;  %v5314_v54 = vld [vmem:[%s5412_s13 + $0x190] sm:$0xff]   ;;  %v5317_v57 = vld [vmem:[%s5412_s13 + $0x1a8] sm:$0xff]  }
 0x151   : > { %v889_v63 = vadd.f32 %v5503_v42, %v888_v62  ;;  %v984_v2 = vmax.f32 %v886_v59, 0.0  ;;  %v5680_v59 = vld [vmem:[%s6193_s4] ss:$0 sm:$0xff] }
 0x152   : > { %v987_v1 = vmax.f32 %v897_v61, 0.0 }
 0x153   : > { %v985_v4 = vmax.f32 %v889_v63, 0.0  ;;  %v5319_v63 = vld [vmem:[%s5412_s13 + $0x1b8] sm:$0xff]  }
 0x154   : > { %v1023_v3 = vpack.c.bf16 %v987_v1, %v986_v0 }
 0x155   : > { %v1022_v6 = vpack.c.bf16 %v985_v4, %v984_v2  ;;  %v4886_v7 = vpop.f32.mrb[56].mxu0  ;;  %v5320_v2 = vld [vmem:[%s5412_s13 + $0x1c0] sm:$0xff]  }
 0x156   : > { %v910_v8 = vadd.f32 %v4886_v7, %v5503_v42  ;;  %v901_v9 = vpop.f32.mrb[57].mxu0 }
 0x157   : > { %v902_v10 = vadd.f32 %v5503_v42, %v901_v9  ;;  %v4887_v11 = vpop.f32.mrb[58].mxu0  ;;  %4952 = vmatprep.mubr.msk.bf16.mxu1 %vm1058_vm3, %v1022_v6 }
 0x158   : > { %v913_v12 = vadd.f32 %v4887_v11, %v5503_v42  ;;  %v904_v13 = vpop.f32.mrb[59].mxu0  ;;  %4953 = vmatmul.mubr.msk.bf16.gmra.mrb[52].mxu1 %vm1058_vm3, %v1023_v3  ;;  %v990_v15 = vmax.f32 %v910_v8, 0.0 }
 0x159   : > { %v905_v14 = vadd.f32 %v5503_v42, %v904_v13  ;;  %v988_v16 = vmax.f32 %v902_v10, 0.0 }
 0x15a   : > { %v991_v5 = vmax.f32 %v913_v12, 0.0 }
 0x15b   : > { %v989_v17 = vmax.f32 %v905_v14, 0.0 }
 0x15c   : > { %v1025_v18 = vpack.c.bf16 %v991_v5, %v990_v15  ;;  %v5321_v5 = vld [vmem:[%s5412_s13 + $0x1c8] sm:$0xff]  }
 0x15d   : > { %v1024_v19 = vpack.c.bf16 %v989_v17, %v988_v16  ;;  %v4890_v20 = vpop.f32.mrb[60].mxu0 }
 0x15e   : > { %v926_v21 = vadd.f32 %v4890_v20, %v5503_v42  ;;  %v917_v22 = vpop.f32.mrb[61].mxu0 }
 0x15f   : > { %v918_v23 = vadd.f32 %v5503_v42, %v917_v22  ;;  %v4891_v24 = vpop.f32.mrb[62].mxu0  ;;  %4956 = vmatprep.mubr.msk.bf16.mxu1 %vm1058_vm3, %v1024_v19  ;;  %v5328_v22 = vld [vmem:[%s6192_s3] sm:$0xff]  }
 0x160   : > { %v929_v25 = vadd.f32 %v4891_v24, %v5503_v42  ;;  %v920_v26 = vpop.f32.mrb[63].mxu0  ;;  %4957 = vmatmul.mubr.msk.bf16.gmra.mrb[56].mxu1 %vm1058_vm3, %v1025_v18  ;;  %v994_v28 = vmax.f32 %v926_v21, 0.0  ;;  %v5322_v18 = vld [vmem:[%s5412_s13 + $0x1d0] sm:$0xff]  }
 0x161   : > { %v921_v27 = vadd.f32 %v5503_v42, %v920_v26  ;;  %v992_v30 = vmax.f32 %v918_v23, 0.0  ;;  %v5297_v42 = vld [vmem:[%s5412_s13 + $0x118] sm:$0xff]  }
 0x162   : > { %v995_v29 = vmax.f32 %v929_v25, 0.0  ;;  %v5329_v25 = vld [vmem:[%s6192_s3 + $0x8] sm:$0xff]  }
 0x163   : > { %v993_v32 = vmax.f32 %v921_v27, 0.0 }
 0x164   : > { %v1027_v34 = vpack.c.bf16 %v995_v29, %v994_v28 }
 0x165   : > { %v1026_v35 = vpack.c.bf16 %v993_v32, %v992_v30 }
 0x167   : > { %4960 = vmatprep.mubr.msk.bf16.mxu1 %vm1058_vm3, %v1026_v35  ;;  %v5323_v35 = vld [vmem:[%s5412_s13 + $0x1d8] sm:$0xff]  }
 0x168   : > { %4961 = vmatmul.mubr.msk.bf16.gmra.mrb[60].mxu1 %vm1058_vm3, %v1027_v34 }
 0x169   : > { %5038 = vmatprep.mubr.msk.bf16.mxu1 %vm539_vm2, %v5294_v36 }
 0x170   : > { %5039 = vmatmul.mubr.msk.bf16.vlgmr.msra.gmra.mrb[64].mxu1 %vm539_vm2, %v5295_v37 }
 0x171   : > { %5042 = vmatprep.mubr.msk.bf16.mxu1 %vm539_vm2, %v5296_v38  ;;  %5175 = vmatpush3.bf16.msra.mxu1 %v5496_v41  ;;  %v5299_v41 = vld [vmem:[%s5412_s13 + $0x128] sm:$0xff]   ;;  %v5324_v38 = vld [vmem:[%s5412_s13 + $0x1e0] sm:$0xff]  }
 0x172   : > { %5176 = vmatprep.subr.bf16.mxu1 %v5511_v50 }
 0x175   : > { %5177 = vmatpush3.bf16.msra.mxu1 %v5511_v50  ;;  %v5301_v50 = vld [vmem:[%s5412_s13 + $0x138] sm:$0xff]  }
 0x176   : > { %5178 = vmatprep.subr.bf16.mxu1 %v5544_v48 }
 0x178   : > { %5043 = vmatmul.mubr.msk.bf16.gmra.mrb[68].mxu1 %vm539_vm2, %v5297_v42 }
 0x179   : > { %5046 = vmatprep.mubr.msk.bf16.mxu1 %vm539_vm2, %v5298_v39  ;;  %5179 = vmatpush3.bf16.msra.mxu1 %v5544_v48  ;;  %v5304_v48 = vld [vmem:[%s5412_s13 + $0x148] sm:$0xff]  }
 0x17a   : > { %5180 = vmatprep.subr.bf16.mxu1 %v5575_v47 }
 0x17d   : > { %5181 = vmatpush3.bf16.msra.mxu1 %v5575_v47  ;;  %v5306_v47 = vld [vmem:[%s5412_s13 + $0x158] sm:$0xff]  }
 0x180   : > { %5047 = vmatmul.mubr.msk.bf16.gmra.mrb[72].mxu1 %vm539_vm2, %v5299_v41 }
 0x181   : > { %5050 = vmatprep.mubr.msk.bf16.mxu1 %vm539_vm2, %v5300_v40 }
 0x188   : > { %5051 = vmatmul.mubr.msk.bf16.gmra.mrb[76].mxu1 %vm539_vm2, %v5301_v50 }
 0x189   : > { %5054 = vmatprep.mubr.msk.bf16.mxu1 %vm539_vm2, %v5303_v43 }
 0x190   : > { %5055 = vmatmul.mubr.msk.bf16.gmra.mrb[80].mxu1 %vm539_vm2, %v5304_v48 }
 0x191   : > { %5058 = vmatprep.mubr.msk.bf16.mxu1 %vm539_vm2, %v5305_v44 }
 0x198   : > { %5059 = vmatmul.mubr.msk.bf16.gmra.mrb[84].mxu1 %vm539_vm2, %v5306_v47 }
 0x199   : > { %5062 = vmatprep.mubr.msk.bf16.mxu1 %vm539_vm2, %v5307_v45 }
 0x1a0   : > { %5063 = vmatmul.mubr.msk.bf16.gmra.mrb[88].mxu1 %vm539_vm2, %v5308_v46 }
 0x1a1   : > { %5066 = vmatprep.mubr.msk.bf16.mxu1 %vm539_vm2, %v5309_v49 }
 0x1a8   : > { %5067 = vmatmul.mubr.msk.bf16.gmra.mrb[92].mxu1 %vm539_vm2, %v5310_v51 }
 0x1a9   : > { %5070 = vmatprep.mubr.msk.bf16.mxu1 %vm539_vm2, %v5312_v52 }
 0x1b0   : > { %5071 = vmatmul.mubr.msk.bf16.gmra.mrb[96].mxu1 %vm539_vm2, %v5313_v53  ;;  %v5326_v53 = vld [vmem:[%s5412_s13 + $0x1f0] sm:$0xff]  }
 0x1b1   : > { %5074 = vmatprep.mubr.msk.bf16.mxu1 %vm539_vm2, %v5314_v54 }
 0x1b8   : > { %5075 = vmatmul.mubr.msk.bf16.gmra.mrb[100].mxu1 %vm539_vm2, %v5315_v55 }
 0x1b9   : > { %5078 = vmatprep.mubr.msk.bf16.mxu1 %vm539_vm2, %v5316_v56 }
 0x1c0   : > { %5079 = vmatmul.mubr.msk.bf16.gmra.mrb[104].mxu1 %vm539_vm2, %v5317_v57 }
 0x1c1   : > { %5082 = vmatprep.mubr.msk.bf16.mxu1 %vm539_vm2, %v5318_v58 }
 0x1c3   : > { %v4902_v60 = vpop.f32.mrb[0].mxu1 }
 0x1c4   : > { %v1198_v61 = vadd.f32 %v4902_v60, %v5680_v59  ;;  %v1189_v62 = vpop.f32.mrb[1].mxu1 }
 0x1c5   : > { %v1190_v0 = vadd.f32 %v5680_v59, %v1189_v62  ;;  %v4903_v1 = vpop.f32.mrb[2].mxu1 }
 0x1c6   : > { %v1201_v4 = vadd.f32 %v4903_v1, %v5680_v59  ;;  %v1192_v3 = vpop.f32.mrb[3].mxu1  ;;  %v1446_v7 = vmax.f32 %v1198_v61, 0.0 }
 0x1c7   : > { %v1193_v6 = vadd.f32 %v5680_v59, %v1192_v3  ;;  %v1444_v9 = vmax.f32 %v1190_v0, 0.0 }
 0x1c8   : > { %v1447_v8 = vmax.f32 %v1201_v4, 0.0  ;;  %5083 = vmatmul.mubr.msk.bf16.gmra.mrb[108].mxu1 %vm539_vm2, %v5319_v63 }
 0x1c9   : > { %v1445_v10 = vmax.f32 %v1193_v6, 0.0  ;;  %5086 = vmatprep.mubr.msk.bf16.mxu1 %vm539_vm2, %v5320_v2  ;;  %v5327_v2 = vld [vmem:[%s5412_s13 + $0x1f8] sm:$0xff]  }
 0x1ca   : > { %v1509_v11 = vpack.c.bf16 %v1447_v8, %v1446_v7 }
 0x1cb   : > { %v1508_v12 = vpack.c.bf16 %v1445_v10, %v1444_v9  ;;  %v4906_v13 = vpop.f32.mrb[4].mxu1 }
 0x1cc   : > { %v1214_v14 = vadd.f32 %v4906_v13, %v5680_v59  ;;  %v1205_v15 = vpop.f32.mrb[5].mxu1 }
 0x1cd   : > { %v1206_v16 = vadd.f32 %v5680_v59, %v1205_v15  ;;  %v4907_v17 = vpop.f32.mrb[6].mxu1  ;;  %4972 = vmatprep.mubr.msk.bf16.mxu0 %vm1058_vm3, %v1508_v12 }
 0x1ce   : > { %v1217_v19 = vadd.f32 %v4907_v17, %v5680_v59  ;;  %v1208_v20 = vpop.f32.mrb[7].mxu1  ;;  %4973 = vmatmul.mubr.msk.bf16.vlgmr.msra.gmra.mrb[64].mxu0 %vm1058_vm3, %v1509_v11  ;;  %v1450_v23 = vmax.f32 %v1214_v14, 0.0 }
 0x1cf   : > { %v1209_v21 = vadd.f32 %v5680_v59, %v1208_v20  ;;  %5103 = vmatpush3.bf16.msra.mxu0 %v5328_v22  ;;  %v1448_v26 = vmax.f32 %v1206_v16, 0.0 }
 0x1d0   : > { %v1451_v24 = vmax.f32 %v1217_v19, 0.0  ;;  %5087 = vmatmul.mubr.msk.bf16.gmra.mrb[112].mxu1 %vm539_vm2, %v5321_v5  ;;  %5104 = vmatprep.subr.bf16.mxu0 %v5329_v25 }
 0x1d1   : > { %v1449_v27 = vmax.f32 %v1209_v21, 0.0  ;;  %5090 = vmatprep.mubr.msk.bf16.mxu1 %vm539_vm2, %v5322_v18 }
 0x1d2   : > { %v1511_v28 = vpack.c.bf16 %v1451_v24, %v1450_v23 }
 0x1d3   : > { %v1510_v29 = vpack.c.bf16 %v1449_v27, %v1448_v26  ;;  %v4910_v30 = vpop.f32.mrb[8].mxu1  ;;  %5105 = vmatpush3.bf16.msra.mxu0 %v5329_v25 }
 0x1d4   : > { %v1230_v32 = vadd.f32 %v4910_v30, %v5680_v59  ;;  %v1221_v34 = vpop.f32.mrb[9].mxu1  ;;  %5106 = vmatprep.subr.bf16.mxu0 %v5464_v31 }
 0x1d5   : > { %v1222_v36 = vadd.f32 %v5680_v59, %v1221_v34  ;;  %v4911_v37 = vpop.f32.mrb[10].mxu1  ;;  %4976 = vmatprep.mubr.msk.bf16.mxu0 %vm1058_vm3, %v1510_v29 }
 0x1d6   : > { %v1233_v42 = vadd.f32 %v4911_v37, %v5680_v59  ;;  %v1224_v39 = vpop.f32.mrb[11].mxu1  ;;  %4977 = vmatmul.mubr.msk.bf16.gmra.mrb[68].mxu0 %vm1058_vm3, %v1511_v28  ;;  %v1454_v40 = vmax.f32 %v1230_v32, 0.0 }
 0x1d7   : > { %v1225_v41 = vadd.f32 %v5680_v59, %v1224_v39  ;;  %5107 = vmatpush3.bf16.msra.mxu0 %v5464_v31  ;;  %v1452_v43 = vmax.f32 %v1222_v36, 0.0  ;;  %v5325_v31 = vld [vmem:[%s5412_s13 + $0x1e8] sm:$0xff]  }
 0x1d8   : > { %v1455_v50 = vmax.f32 %v1233_v42, 0.0  ;;  %5091 = vmatmul.mubr.msk.bf16.gmra.mrb[116].mxu1 %vm539_vm2, %v5323_v35  ;;  %5108 = vmatprep.subr.bf16.mxu0 %v5473_v33 }
 0x1d9   : > { %v1453_v48 = vmax.f32 %v1225_v41, 0.0  ;;  %5094 = vmatprep.mubr.msk.bf16.mxu1 %vm539_vm2, %v5324_v38 }
 0x1da   : > { %v1513_v44 = vpack.c.bf16 %v1455_v50, %v1454_v40 }
 0x1db   : > { %v1512_v47 = vpack.c.bf16 %v1453_v48, %v1452_v43  ;;  %v4914_v45 = vpop.f32.mrb[12].mxu1  ;;  %5109 = vmatpush3.bf16.msra.mxu0 %v5473_v33 }
 0x1dc   : > { %v1246_v46 = vadd.f32 %v4914_v45, %v5680_v59  ;;  %v1237_v49 = vpop.f32.mrb[13].mxu1 }
 0x1dd   : > { %v1238_v51 = vadd.f32 %v5680_v59, %v1237_v49  ;;  %v4915_v52 = vpop.f32.mrb[14].mxu1  ;;  %4980 = vmatprep.mubr.msk.bf16.mxu0 %vm1058_vm3, %v1512_v47 }
 0x1de   : > { %v1249_v54 = vadd.f32 %v4915_v52, %v5680_v59  ;;  %v1240_v55 = vpop.f32.mrb[15].mxu1  ;;  %4981 = vmatmul.mubr.msk.bf16.gmra.mrb[72].mxu0 %vm1058_vm3, %v1513_v44  ;;  %v1458_v57 = vmax.f32 %v1246_v46, 0.0 }
 0x1df   : > { %v1241_v56 = vadd.f32 %v5680_v59, %v1240_v55  ;;  %v1456_v58 = vmax.f32 %v1238_v51, 0.0 }
 0x1e0   : > { %v1459_v33 = vmax.f32 %v1249_v54, 0.0  ;;  %5095 = vmatmul.mubr.msk.bf16.gmra.mrb[120].mxu1 %vm539_vm2, %v5325_v31 }
 0x1e1   : > { %v1457_v60 = vmax.f32 %v1241_v56, 0.0  ;;  %5098 = vmatprep.mubr.msk.bf16.mxu1 %vm539_vm2, %v5326_v53 }
 0x1e2   : > { %v1515_v61 = vpack.c.bf16 %v1459_v33, %v1458_v57 }
 0x1e3   : > { %v1514_v62 = vpack.c.bf16 %v1457_v60, %v1456_v58  ;;  %v4918_v63 = vpop.f32.mrb[16].mxu1 }
 0x1e4   : > { %v1262_v0 = vadd.f32 %v4918_v63, %v5680_v59  ;;  %v1253_v1 = vpop.f32.mrb[17].mxu1 }
 0x1e5   : > { %v1254_v4 = vadd.f32 %v5680_v59, %v1253_v1  ;;  %v4919_v3 = vpop.f32.mrb[18].mxu1  ;;  %4984 = vmatprep.mubr.msk.bf16.mxu0 %vm1058_vm3, %v1514_v62 }
 0x1e6   : > { %v1265_v6 = vadd.f32 %v4919_v3, %v5680_v59  ;;  %v1256_v7 = vpop.f32.mrb[19].mxu1  ;;  %4985 = vmatmul.mubr.msk.bf16.gmra.mrb[76].mxu0 %vm1058_vm3, %v1515_v61  ;;  %v1462_v9 = vmax.f32 %v1262_v0, 0.0 }
 0x1e7   : > { %v1257_v8 = vadd.f32 %v5680_v59, %v1256_v7  ;;  %v1460_v11 = vmax.f32 %v1254_v4, 0.0 }
 0x1e8   : > { %v1463_v10 = vmax.f32 %v1265_v6, 0.0  ;;  %5099 = vmatmul.mubr.msk.bf16.gmra.mrb[124].mxu1 %vm539_vm2, %v5327_v2 }
 0x1e9   : > { %v1461_v12 = vmax.f32 %v1257_v8, 0.0 }
 0x1ea   : > { %v1517_v13 = vpack.c.bf16 %v1463_v10, %v1462_v9 }
 0x1eb   : > { %v1516_v14 = vpack.c.bf16 %v1461_v12, %v1460_v11  ;;  %v4922_v15 = vpop.f32.mrb[20].mxu1 }
 0x1ec   : > { %v1278_v5 = vadd.f32 %v4922_v15, %v5680_v59  ;;  %v1269_v16 = vpop.f32.mrb[21].mxu1 }
 0x1ed   : > { %v1270_v17 = vadd.f32 %v5680_v59, %v1269_v16  ;;  %v4923_v18 = vpop.f32.mrb[22].mxu1  ;;  %4988 = vmatprep.mubr.msk.bf16.mxu0 %vm1058_vm3, %v1516_v14 }
 0x1ee   : > { %v1281_v19 = vadd.f32 %v4923_v18, %v5680_v59  ;;  %v1272_v20 = vpop.f32.mrb[23].mxu1  ;;  %4989 = vmatmul.mubr.msk.bf16.gmra.mrb[80].mxu0 %vm1058_vm3, %v1517_v13  ;;  %v1466_v22 = vmax.f32 %v1278_v5, 0.0 }
 0x1ef   : > { %v1273_v21 = vadd.f32 %v5680_v59, %v1272_v20  ;;  %v1464_v24 = vmax.f32 %v1270_v17, 0.0 }
 0x1f0   : > { %v1467_v23 = vmax.f32 %v1281_v19, 0.0 }
 0x1f1   : > { %v1465_v25 = vmax.f32 %v1273_v21, 0.0 }
 0x1f2   : > { %v1519_v26 = vpack.c.bf16 %v1467_v23, %v1466_v22 }
 0x1f3   : > { %v1518_v27 = vpack.c.bf16 %v1465_v25, %v1464_v24  ;;  %v4926_v28 = vpop.f32.mrb[24].mxu1 }
 0x1f4   : > { %v1294_v29 = vadd.f32 %v4926_v28, %v5680_v59  ;;  %v1285_v30 = vpop.f32.mrb[25].mxu1 }
 0x1f5   : > { %v1286_v32 = vadd.f32 %v5680_v59, %v1285_v30  ;;  %v4927_v34 = vpop.f32.mrb[26].mxu1  ;;  %4992 = vmatprep.mubr.msk.bf16.mxu0 %vm1058_vm3, %v1518_v27 }
 0x1f6   : > { %v1297_v35 = vadd.f32 %v4927_v34, %v5680_v59  ;;  %v1288_v36 = vpop.f32.mrb[27].mxu1  ;;  %4993 = vmatmul.mubr.msk.bf16.gmra.mrb[84].mxu0 %vm1058_vm3, %v1519_v26  ;;  %v1470_v38 = vmax.f32 %v1294_v29, 0.0 }
 0x1f7   : > { %v1289_v37 = vadd.f32 %v5680_v59, %v1288_v36  ;;  %v1468_v39 = vmax.f32 %v1286_v32, 0.0 }
 0x1f8   : > { %v1471_v42 = vmax.f32 %v1297_v35, 0.0 }
 0x1f9   : > { %v1469_v41 = vmax.f32 %v1289_v37, 0.0 }
 0x1fa   : > { %v1521_v40 = vpack.c.bf16 %v1471_v42, %v1470_v38 }
 0x1fb   : > { %v1520_v50 = vpack.c.bf16 %v1469_v41, %v1468_v39  ;;  %v4930_v43 = vpop.f32.mrb[28].mxu1 }
 0x1fc   : > { %v1310_v48 = vadd.f32 %v4930_v43, %v5680_v59  ;;  %v1301_v44 = vpop.f32.mrb[29].mxu1 }
 0x1fd   : > { %v1302_v47 = vadd.f32 %v5680_v59, %v1301_v44  ;;  %v4931_v45 = vpop.f32.mrb[30].mxu1  ;;  %4996 = vmatprep.mubr.msk.bf16.mxu0 %vm1058_vm3, %v1520_v50 }
 0x1fe   : > { %v1313_v46 = vadd.f32 %v4931_v45, %v5680_v59  ;;  %v1304_v49 = vpop.f32.mrb[31].mxu1  ;;  %4997 = vmatmul.mubr.msk.bf16.gmra.mrb[88].mxu0 %vm1058_vm3, %v1521_v40  ;;  %v1474_v51 = vmax.f32 %v1310_v48, 0.0 }
 0x1ff   : > { %v1305_v31 = vadd.f32 %v5680_v59, %v1304_v49  ;;  %v1472_v53 = vmax.f32 %v1302_v47, 0.0 }
 0x200   : > { %v1475_v52 = vmax.f32 %v1313_v46, 0.0 }
 0x201   : > { %v1473_v54 = vmax.f32 %v1305_v31, 0.0 }
 0x202   : > { %v1523_v55 = vpack.c.bf16 %v1475_v52, %v1474_v51 }
 0x203   : > { %v1522_v56 = vpack.c.bf16 %v1473_v54, %v1472_v53  ;;  %v4934_v57 = vpop.f32.mrb[32].mxu1 }
 0x204   : > { %v1326_v33 = vadd.f32 %v4934_v57, %v5680_v59  ;;  %v1317_v58 = vpop.f32.mrb[33].mxu1 }
 0x205   : > { %v1318_v60 = vadd.f32 %v5680_v59, %v1317_v58  ;;  %v4935_v61 = vpop.f32.mrb[34].mxu1  ;;  %5000 = vmatprep.mubr.msk.bf16.mxu0 %vm1058_vm3, %v1522_v56 }
 0x206   : > { %v1329_v62 = vadd.f32 %v4935_v61, %v5680_v59  ;;  %v1320_v63 = vpop.f32.mrb[35].mxu1  ;;  %5001 = vmatmul.mubr.msk.bf16.gmra.mrb[92].mxu0 %vm1058_vm3, %v1523_v55  ;;  %v1478_v1 = vmax.f32 %v1326_v33, 0.0 }
 0x207   : > { %v1321_v0 = vadd.f32 %v5680_v59, %v1320_v63  ;;  %v1476_v4 = vmax.f32 %v1318_v60, 0.0 }
 0x208   : > { %v1479_v2 = vmax.f32 %v1329_v62, 0.0 }
 0x209   : > { %v1477_v3 = vmax.f32 %v1321_v0, 0.0 }
 0x20a   : > { %v1525_v6 = vpack.c.bf16 %v1479_v2, %v1478_v1 }
 0x20b   : > { %v1524_v7 = vpack.c.bf16 %v1477_v3, %v1476_v4  ;;  %v4938_v8 = vpop.f32.mrb[36].mxu1 }
 0x20c   : > { %v1342_v9 = vadd.f32 %v4938_v8, %v5680_v59  ;;  %v1333_v10 = vpop.f32.mrb[37].mxu1 }
 0x20d   : > { %v1334_v11 = vadd.f32 %v5680_v59, %v1333_v10  ;;  %v4939_v12 = vpop.f32.mrb[38].mxu1  ;;  %5004 = vmatprep.mubr.msk.bf16.mxu0 %vm1058_vm3, %v1524_v7 }
 0x20e   : > { %v1345_v13 = vadd.f32 %v4939_v12, %v5680_v59  ;;  %v1336_v14 = vpop.f32.mrb[39].mxu1  ;;  %5005 = vmatmul.mubr.msk.bf16.gmra.mrb[96].mxu0 %vm1058_vm3, %v1525_v6  ;;  %v1482_v5 = vmax.f32 %v1342_v9, 0.0 }
 0x20f   : > { %v1337_v15 = vadd.f32 %v5680_v59, %v1336_v14  ;;  %v1480_v17 = vmax.f32 %v1334_v11, 0.0 }
 0x210   : > { %v1483_v16 = vmax.f32 %v1345_v13, 0.0 }
 0x211   : > { %v1481_v18 = vmax.f32 %v1337_v15, 0.0 }
 0x212   : > { %v1527_v19 = vpack.c.bf16 %v1483_v16, %v1482_v5 }
 0x213   : > { %v1526_v20 = vpack.c.bf16 %v1481_v18, %v1480_v17  ;;  %v4942_v21 = vpop.f32.mrb[40].mxu1 }
 0x214   : > { %v1358_v22 = vadd.f32 %v4942_v21, %v5680_v59  ;;  %v1349_v23 = vpop.f32.mrb[41].mxu1 }
 0x215   : > { %v1350_v24 = vadd.f32 %v5680_v59, %v1349_v23  ;;  %v4943_v25 = vpop.f32.mrb[42].mxu1  ;;  %5008 = vmatprep.mubr.msk.bf16.mxu0 %vm1058_vm3, %v1526_v20 }
 0x216   : > { %v1361_v26 = vadd.f32 %v4943_v25, %v5680_v59  ;;  %v1352_v27 = vpop.f32.mrb[43].mxu1  ;;  %5009 = vmatmul.mubr.msk.bf16.gmra.mrb[100].mxu0 %vm1058_vm3, %v1527_v19  ;;  %v1486_v29 = vmax.f32 %v1358_v22, 0.0 }
 0x217   : > { %v1353_v28 = vadd.f32 %v5680_v59, %v1352_v27  ;;  %v1484_v32 = vmax.f32 %v1350_v24, 0.0 }
 0x218   : > { %v1487_v30 = vmax.f32 %v1361_v26, 0.0 }
 0x219   : > { %v1485_v34 = vmax.f32 %v1353_v28, 0.0 }
 0x21a   : > { %v1529_v35 = vpack.c.bf16 %v1487_v30, %v1486_v29 }
 0x21b   : > { %v1528_v36 = vpack.c.bf16 %v1485_v34, %v1484_v32  ;;  %v4946_v37 = vpop.f32.mrb[44].mxu1 }
 0x21c   : > { %v1374_v38 = vadd.f32 %v4946_v37, %v5680_v59  ;;  %v1365_v42 = vpop.f32.mrb[45].mxu1 }
 0x21d   : > { %v1366_v39 = vadd.f32 %v5680_v59, %v1365_v42  ;;  %v4947_v41 = vpop.f32.mrb[46].mxu1  ;;  %5012 = vmatprep.mubr.msk.bf16.mxu0 %vm1058_vm3, %v1528_v36 }
 0x21e   : > { %v1377_v40 = vadd.f32 %v4947_v41, %v5680_v59  ;;  %v1368_v50 = vpop.f32.mrb[47].mxu1  ;;  %5013 = vmatmul.mubr.msk.bf16.gmra.mrb[104].mxu0 %vm1058_vm3, %v1529_v35  ;;  %v1490_v48 = vmax.f32 %v1374_v38, 0.0 }
 0x21f   : > { %v1369_v43 = vadd.f32 %v5680_v59, %v1368_v50  ;;  %v1488_v47 = vmax.f32 %v1366_v39, 0.0 }
 0x220   : > { %v1491_v44 = vmax.f32 %v1377_v40, 0.0 }
 0x221   : > { %v1489_v45 = vmax.f32 %v1369_v43, 0.0 }
 0x222   : > { %v1531_v46 = vpack.c.bf16 %v1491_v44, %v1490_v48  ;;  %v5808_v48 = vld [vmem:[%s6191_s2] ss:$0 sm:$0xff] }
 0x223   : > { %v1530_v49 = vpack.c.bf16 %v1489_v45, %v1488_v47  ;;  %v4950_v31 = vpop.f32.mrb[48].mxu1 }
 0x224   : > { %v1390_v51 = vadd.f32 %v4950_v31, %v5680_v59  ;;  %v1381_v52 = vpop.f32.mrb[49].mxu1 }
 0x225   : > { %v1382_v53 = vadd.f32 %v5680_v59, %v1381_v52  ;;  %v4951_v54 = vpop.f32.mrb[50].mxu1  ;;  %5016 = vmatprep.mubr.msk.bf16.mxu0 %vm1058_vm3, %v1530_v49 }
 0x226   : > { %v1393_v55 = vadd.f32 %v4951_v54, %v5680_v59  ;;  %v1384_v56 = vpop.f32.mrb[51].mxu1  ;;  %5017 = vmatmul.mubr.msk.bf16.gmra.mrb[108].mxu0 %vm1058_vm3, %v1531_v46  ;;  %v1494_v33 = vmax.f32 %v1390_v51, 0.0 }
 0x227   : > { %v1385_v57 = vadd.f32 %v5680_v59, %v1384_v56  ;;  %v1492_v60 = vmax.f32 %v1382_v53, 0.0 }
 0x228   : > { %v1495_v58 = vmax.f32 %v1393_v55, 0.0 }
 0x229   : > { %v1493_v61 = vmax.f32 %v1385_v57, 0.0 }
 0x22a   : > { %v1533_v62 = vpack.c.bf16 %v1495_v58, %v1494_v33 }
 0x22b   : > { %v1532_v63 = vpack.c.bf16 %v1493_v61, %v1492_v60  ;;  %v4954_v0 = vpop.f32.mrb[52].mxu1 }
 0x22c   : > { %v1406_v1 = vadd.f32 %v4954_v0, %v5680_v59  ;;  %v1397_v2 = vpop.f32.mrb[53].mxu1 }
 0x22d   : > { %v1398_v4 = vadd.f32 %v5680_v59, %v1397_v2  ;;  %v4955_v3 = vpop.f32.mrb[54].mxu1  ;;  %5020 = vmatprep.mubr.msk.bf16.mxu0 %vm1058_vm3, %v1532_v63 }
 0x22e   : > { %v1409_v6 = vadd.f32 %v4955_v3, %v5680_v59  ;;  %v1400_v7 = vpop.f32.mrb[55].mxu1  ;;  %5021 = vmatmul.mubr.msk.bf16.gmra.mrb[112].mxu0 %vm1058_vm3, %v1533_v62  ;;  %v1498_v9 = vmax.f32 %v1406_v1, 0.0 }
 0x22f   : > { %v1401_v8 = vadd.f32 %v5680_v59, %v1400_v7  ;;  %v1496_v11 = vmax.f32 %v1398_v4, 0.0 }
 0x230   : > { %v1499_v10 = vmax.f32 %v1409_v6, 0.0 }
 0x231   : > { %v1497_v12 = vmax.f32 %v1401_v8, 0.0 }
 0x232   : > { %v1535_v13 = vpack.c.bf16 %v1499_v10, %v1498_v9 }
 0x233   : > { %v1534_v14 = vpack.c.bf16 %v1497_v12, %v1496_v11  ;;  %v4958_v15 = vpop.f32.mrb[56].mxu1 }
 0x234   : > { %v1422_v5 = vadd.f32 %v4958_v15, %v5680_v59  ;;  %v1413_v16 = vpop.f32.mrb[57].mxu1 }
 0x235   : > { %v1414_v17 = vadd.f32 %v5680_v59, %v1413_v16  ;;  %v4959_v18 = vpop.f32.mrb[58].mxu1  ;;  %5024 = vmatprep.mubr.msk.bf16.mxu0 %vm1058_vm3, %v1534_v14 }
 0x236   : > { %v1425_v19 = vadd.f32 %v4959_v18, %v5680_v59  ;;  %v1416_v20 = vpop.f32.mrb[59].mxu1  ;;  %5025 = vmatmul.mubr.msk.bf16.gmra.mrb[116].mxu0 %vm1058_vm3, %v1535_v13  ;;  %v1502_v22 = vmax.f32 %v1422_v5, 0.0 }
 0x237   : > { %v1417_v21 = vadd.f32 %v5680_v59, %v1416_v20  ;;  %v1500_v24 = vmax.f32 %v1414_v17, 0.0 }
 0x238   : > { %v1503_v23 = vmax.f32 %v1425_v19, 0.0 }
 0x239   : > { %v1501_v25 = vmax.f32 %v1417_v21, 0.0 }
 0x23a   : > { %v1537_v26 = vpack.c.bf16 %v1503_v23, %v1502_v22 }
 0x23b   : > { %v1536_v27 = vpack.c.bf16 %v1501_v25, %v1500_v24  ;;  %v4962_v28 = vpop.f32.mrb[60].mxu1 }
 0x23c   : > { %v1438_v29 = vadd.f32 %v4962_v28, %v5680_v59  ;;  %v1429_v30 = vpop.f32.mrb[61].mxu1 }
 0x23d   : > { %v1430_v32 = vadd.f32 %v5680_v59, %v1429_v30  ;;  %v4963_v34 = vpop.f32.mrb[62].mxu1  ;;  %5028 = vmatprep.mubr.msk.bf16.mxu0 %vm1058_vm3, %v1536_v27 }
 0x23e   : > { %v1441_v35 = vadd.f32 %v4963_v34, %v5680_v59  ;;  %v1432_v36 = vpop.f32.mrb[63].mxu1  ;;  %5029 = vmatmul.mubr.msk.bf16.gmra.mrb[120].mxu0 %vm1058_vm3, %v1537_v26  ;;  %v1506_v38 = vmax.f32 %v1438_v29, 0.0 }
 0x23f   : > { %v1433_v37 = vadd.f32 %v5680_v59, %v1432_v36  ;;  %v1504_v39 = vmax.f32 %v1430_v32, 0.0 }
 0x240   : > { %v1507_v42 = vmax.f32 %v1441_v35, 0.0 }
 0x241   : > { %v1505_v41 = vmax.f32 %v1433_v37, 0.0 }
 0x242   : > { %v1539_v40 = vpack.c.bf16 %v1507_v42, %v1506_v38 }
 0x243   : > { %v1538_v50 = vpack.c.bf16 %v1505_v41, %v1504_v39  ;;  %v5040_v43 = vpop.f32.mrb[64].mxu1 }
 0x244   : > { %v2634_v44 = vadd.f32 %v5808_v48, %v5040_v43  ;;  %v2625_v47 = vpop.f32.mrb[65].mxu1 }
 0x245   : > { %v2626_v45 = vadd.f32 %v5808_v48, %v2625_v47  ;;  %5032 = vmatprep.mubr.msk.bf16.mxu0 %vm1058_vm3, %v1538_v50  ;;  %v5041_v59 = vpop.f32.mrb[66].mxu1 }
 0x246   : > { %v2637_v46 = vadd.f32 %v5808_v48, %v5041_v59  ;;  %5033 = vmatmul.mubr.msk.bf16.gmra.mrb[124].mxu0 %vm1058_vm3, %v1539_v40  ;;  %v2628_v49 = vpop.f32.mrb[67].mxu1  ;;  %v2882_v51 = vmax.f32 %v2634_v44, 0.0 }
 0x247   : > { %v2629_v31 = vadd.f32 %v5808_v48, %v2628_v49  ;;  %v2880_v53 = vmax.f32 %v2626_v45, 0.0 }
 0x248   : > { %v2883_v52 = vmax.f32 %v2637_v46, 0.0 }
 0x249   : > { %v2881_v54 = vmax.f32 %v2629_v31, 0.0 }
 0x24a   : > { %v2945_v55 = vpack.c.bf16 %v2883_v52, %v2882_v51 }
 0x24b   : > { %v2944_v56 = vpack.c.bf16 %v2881_v54, %v2880_v53  ;;  %v5044_v57 = vpop.f32.mrb[68].mxu1 }
 0x24c   : > { %v2650_v33 = vadd.f32 %v5808_v48, %v5044_v57  ;;  %v2641_v58 = vpop.f32.mrb[69].mxu1 }
 0x24d   : > { %v2642_v60 = vadd.f32 %v5808_v48, %v2641_v58  ;;  %v5045_v61 = vpop.f32.mrb[70].mxu1  ;;  %5110 = vmatprep.mubr.msk.bf16.mxu0 %vm1058_vm3, %v2944_v56 }
 0x24e   : > { %v2653_v62 = vadd.f32 %v5808_v48, %v5045_v61  ;;  %v2644_v63 = vpop.f32.mrb[71].mxu1  ;;  %5111 = vmatmul.mubr.msk.bf16.vlgmr.msra.gmra.mrb[128].mxu0 %vm1058_vm3, %v2945_v55  ;;  %v2886_v1 = vmax.f32 %v2650_v33, 0.0 }
 0x24f   : > { %v2645_v0 = vadd.f32 %v5808_v48, %v2644_v63  ;;  %v2884_v4 = vmax.f32 %v2642_v60, 0.0 }
 0x250   : > { %v2887_v2 = vmax.f32 %v2653_v62, 0.0 }
 0x251   : > { %v2885_v3 = vmax.f32 %v2645_v0, 0.0 }
 0x252   : > { %v2947_v6 = vpack.c.bf16 %v2887_v2, %v2886_v1 }
 0x253   : > { %v2946_v7 = vpack.c.bf16 %v2885_v3, %v2884_v4  ;;  %v5048_v8 = vpop.f32.mrb[72].mxu1 }
 0x254   : > { %v2666_v9 = vadd.f32 %v5808_v48, %v5048_v8  ;;  %v2657_v10 = vpop.f32.mrb[73].mxu1 }
 0x255   : > { %v2658_v11 = vadd.f32 %v5808_v48, %v2657_v10  ;;  %v5049_v12 = vpop.f32.mrb[74].mxu1  ;;  %5114 = vmatprep.mubr.msk.bf16.mxu0 %vm1058_vm3, %v2946_v7 }
 0x256   : > { %v2669_v13 = vadd.f32 %v5808_v48, %v5049_v12  ;;  %v2660_v14 = vpop.f32.mrb[75].mxu1  ;;  %5115 = vmatmul.mubr.msk.bf16.gmra.mrb[132].mxu0 %vm1058_vm3, %v2947_v6  ;;  %v2890_v5 = vmax.f32 %v2666_v9, 0.0 }
 0x257   : > { %v2661_v15 = vadd.f32 %v5808_v48, %v2660_v14  ;;  %v2888_v17 = vmax.f32 %v2658_v11, 0.0 }
 0x258   : > { %v2891_v16 = vmax.f32 %v2669_v13, 0.0 }
 0x259   : > { %v2889_v18 = vmax.f32 %v2661_v15, 0.0 }
 0x25a   : > { %v2949_v19 = vpack.c.bf16 %v2891_v16, %v2890_v5 }
 0x25b   : > { %v2948_v20 = vpack.c.bf16 %v2889_v18, %v2888_v17  ;;  %v5052_v21 = vpop.f32.mrb[76].mxu1 }
 0x25c   : > { %v2682_v22 = vadd.f32 %v5808_v48, %v5052_v21  ;;  %v2673_v23 = vpop.f32.mrb[77].mxu1 }
 0x25d   : > { %v2674_v24 = vadd.f32 %v5808_v48, %v2673_v23  ;;  %v5053_v25 = vpop.f32.mrb[78].mxu1  ;;  %5118 = vmatprep.mubr.msk.bf16.mxu0 %vm1058_vm3, %v2948_v20 }
 0x25e   : > { %v2685_v26 = vadd.f32 %v5808_v48, %v5053_v25  ;;  %v2676_v27 = vpop.f32.mrb[79].mxu1  ;;  %5119 = vmatmul.mubr.msk.bf16.gmra.mrb[136].mxu0 %vm1058_vm3, %v2949_v19  ;;  %v2894_v29 = vmax.f32 %v2682_v22, 0.0 }
 0x25f   : > { %v2677_v28 = vadd.f32 %v5808_v48, %v2676_v27  ;;  %v2892_v32 = vmax.f32 %v2674_v24, 0.0 }
 0x260   : > { %v2895_v30 = vmax.f32 %v2685_v26, 0.0 }
 0x261   : > { %v2893_v34 = vmax.f32 %v2677_v28, 0.0 }
 0x262   : > { %v2951_v35 = vpack.c.bf16 %v2895_v30, %v2894_v29 }
 0x263   : > { %v2950_v36 = vpack.c.bf16 %v2893_v34, %v2892_v32  ;;  %v5056_v37 = vpop.f32.mrb[80].mxu1 }
 0x264   : > { %v2698_v38 = vadd.f32 %v5808_v48, %v5056_v37  ;;  %v2689_v42 = vpop.f32.mrb[81].mxu1 }
 0x265   : > { %v2690_v39 = vadd.f32 %v5808_v48, %v2689_v42  ;;  %v5057_v41 = vpop.f32.mrb[82].mxu1  ;;  %5122 = vmatprep.mubr.msk.bf16.mxu0 %vm1058_vm3, %v2950_v36 }
 0x266   : > { %v2701_v40 = vadd.f32 %v5808_v48, %v5057_v41  ;;  %v2692_v50 = vpop.f32.mrb[83].mxu1  ;;  %5123 = vmatmul.mubr.msk.bf16.gmra.mrb[140].mxu0 %vm1058_vm3, %v2951_v35  ;;  %v2898_v44 = vmax.f32 %v2698_v38, 0.0 }
 0x267   : > { %v2693_v43 = vadd.f32 %v5808_v48, %v2692_v50  ;;  %v2896_v45 = vmax.f32 %v2690_v39, 0.0 }
 0x268   : > { %v2899_v47 = vmax.f32 %v2701_v40, 0.0 }
 0x269   : > { %v2897_v59 = vmax.f32 %v2693_v43, 0.0 }
 0x26a   : > { %v2953_v46 = vpack.c.bf16 %v2899_v47, %v2898_v44 }
 0x26b   : > { %v2952_v49 = vpack.c.bf16 %v2897_v59, %v2896_v45  ;;  %v5060_v31 = vpop.f32.mrb[84].mxu1 }
 0x26c   : > { %v2714_v51 = vadd.f32 %v5808_v48, %v5060_v31  ;;  %v2705_v52 = vpop.f32.mrb[85].mxu1 }
 0x26d   : > { %v2706_v53 = vadd.f32 %v5808_v48, %v2705_v52  ;;  %v5061_v54 = vpop.f32.mrb[86].mxu1  ;;  %5126 = vmatprep.mubr.msk.bf16.mxu0 %vm1058_vm3, %v2952_v49 }
 0x26e   : > { %v2717_v55 = vadd.f32 %v5808_v48, %v5061_v54  ;;  %v2708_v56 = vpop.f32.mrb[87].mxu1  ;;  %5127 = vmatmul.mubr.msk.bf16.gmra.mrb[144].mxu0 %vm1058_vm3, %v2953_v46  ;;  %v2902_v33 = vmax.f32 %v2714_v51, 0.0 }
 0x26f   : > { %v2709_v57 = vadd.f32 %v5808_v48, %v2708_v56  ;;  %v2900_v60 = vmax.f32 %v2706_v53, 0.0 }
 0x270   : > { %v2903_v58 = vmax.f32 %v2717_v55, 0.0 }
 0x271   : > { %v2901_v61 = vmax.f32 %v2709_v57, 0.0 }
 0x272   : > { %v2955_v62 = vpack.c.bf16 %v2903_v58, %v2902_v33 }
 0x273   : > { %v2954_v63 = vpack.c.bf16 %v2901_v61, %v2900_v60  ;;  %v5064_v0 = vpop.f32.mrb[88].mxu1 }
 0x274   : > { %v2730_v1 = vadd.f32 %v5808_v48, %v5064_v0  ;;  %v2721_v2 = vpop.f32.mrb[89].mxu1 }
 0x275   : > { %v2722_v4 = vadd.f32 %v5808_v48, %v2721_v2  ;;  %v5065_v3 = vpop.f32.mrb[90].mxu1  ;;  %5130 = vmatprep.mubr.msk.bf16.mxu0 %vm1058_vm3, %v2954_v63 }
 0x276   : > { %v2733_v6 = vadd.f32 %v5808_v48, %v5065_v3  ;;  %v2724_v7 = vpop.f32.mrb[91].mxu1  ;;  %5131 = vmatmul.mubr.msk.bf16.gmra.mrb[148].mxu0 %vm1058_vm3, %v2955_v62  ;;  %v2906_v9 = vmax.f32 %v2730_v1, 0.0 }
 0x277   : > { %v2725_v8 = vadd.f32 %v5808_v48, %v2724_v7  ;;  %v2904_v11 = vmax.f32 %v2722_v4, 0.0 }
 0x278   : > { %v2907_v10 = vmax.f32 %v2733_v6, 0.0 }
 0x279   : > { %v2905_v12 = vmax.f32 %v2725_v8, 0.0 }
 0x27a   : > { %v2957_v13 = vpack.c.bf16 %v2907_v10, %v2906_v9 }
 0x27b   : > { %v2956_v14 = vpack.c.bf16 %v2905_v12, %v2904_v11  ;;  %v5068_v15 = vpop.f32.mrb[92].mxu1 }
 0x27c   : > { %v2746_v5 = vadd.f32 %v5808_v48, %v5068_v15  ;;  %v2737_v16 = vpop.f32.mrb[93].mxu1 }
 0x27d   : > { %v2738_v17 = vadd.f32 %v5808_v48, %v2737_v16  ;;  %v5069_v18 = vpop.f32.mrb[94].mxu1  ;;  %5134 = vmatprep.mubr.msk.bf16.mxu0 %vm1058_vm3, %v2956_v14 }
 0x27e   : > { %v2749_v19 = vadd.f32 %v5808_v48, %v5069_v18  ;;  %v2740_v20 = vpop.f32.mrb[95].mxu1  ;;  %5135 = vmatmul.mubr.msk.bf16.gmra.mrb[152].mxu0 %vm1058_vm3, %v2957_v13  ;;  %v2910_v22 = vmax.f32 %v2746_v5, 0.0 }
 0x27f   : > { %v2741_v21 = vadd.f32 %v5808_v48, %v2740_v20  ;;  %v2908_v24 = vmax.f32 %v2738_v17, 0.0  ;;  %v5885_v17 = vld [vmem:[%s6195_s6] ss:$0 sm:$0xff] }
 0x280   : > { %v2911_v23 = vmax.f32 %v2749_v19, 0.0 }
 0x281   : > { %v2909_v25 = vmax.f32 %v2741_v21, 0.0 }
 0x282   : > { %v2959_v26 = vpack.c.bf16 %v2911_v23, %v2910_v22 }
 0x283   : > { %v2958_v27 = vpack.c.bf16 %v2909_v25, %v2908_v24  ;;  %v5072_v28 = vpop.f32.mrb[96].mxu1 }
 0x284   : > { %v2762_v29 = vadd.f32 %v5808_v48, %v5072_v28  ;;  %v2753_v30 = vpop.f32.mrb[97].mxu1 }
 0x285   : > { %v2754_v32 = vadd.f32 %v5808_v48, %v2753_v30  ;;  %v5073_v34 = vpop.f32.mrb[98].mxu1  ;;  %5138 = vmatprep.mubr.msk.bf16.mxu0 %vm1058_vm3, %v2958_v27 }
 0x286   : > { %v2765_v35 = vadd.f32 %v5808_v48, %v5073_v34  ;;  %v2756_v36 = vpop.f32.mrb[99].mxu1  ;;  %5139 = vmatmul.mubr.msk.bf16.gmra.mrb[156].mxu0 %vm1058_vm3, %v2959_v26  ;;  %v2914_v38 = vmax.f32 %v2762_v29, 0.0 }
 0x287   : > { %v2757_v37 = vadd.f32 %v5808_v48, %v2756_v36  ;;  %v2912_v39 = vmax.f32 %v2754_v32, 0.0 }
 0x288   : > { %v2915_v42 = vmax.f32 %v2765_v35, 0.0 }
 0x289   : > { %v2913_v41 = vmax.f32 %v2757_v37, 0.0 }
 0x28a   : > { %v2961_v40 = vpack.c.bf16 %v2915_v42, %v2914_v38 }
 0x28b   : > { %v2960_v50 = vpack.c.bf16 %v2913_v41, %v2912_v39  ;;  %v5076_v43 = vpop.f32.mrb[100].mxu1 }
 0x28c   : > { %v2778_v44 = vadd.f32 %v5808_v48, %v5076_v43  ;;  %v2769_v47 = vpop.f32.mrb[101].mxu1 }
 0x28d   : > { %v2770_v45 = vadd.f32 %v5808_v48, %v2769_v47  ;;  %v5077_v59 = vpop.f32.mrb[102].mxu1  ;;  %5142 = vmatprep.mubr.msk.bf16.mxu0 %vm1058_vm3, %v2960_v50 }
 0x28e   : > { %v2781_v46 = vadd.f32 %v5808_v48, %v5077_v59  ;;  %v2772_v49 = vpop.f32.mrb[103].mxu1  ;;  %5143 = vmatmul.mubr.msk.bf16.gmra.mrb[160].mxu0 %vm1058_vm3, %v2961_v40  ;;  %v2918_v51 = vmax.f32 %v2778_v44, 0.0 }
 0x28f   : > { %v2773_v31 = vadd.f32 %v5808_v48, %v2772_v49  ;;  %v2916_v53 = vmax.f32 %v2770_v45, 0.0 }
 0x290   : > { %v2919_v52 = vmax.f32 %v2781_v46, 0.0 }
 0x291   : > { %v2917_v54 = vmax.f32 %v2773_v31, 0.0 }
 0x292   : > { %v2963_v55 = vpack.c.bf16 %v2919_v52, %v2918_v51 }
 0x293   : > { %v2962_v56 = vpack.c.bf16 %v2917_v54, %v2916_v53  ;;  %v5080_v57 = vpop.f32.mrb[104].mxu1 }
 0x294   : > { %v2794_v33 = vadd.f32 %v5808_v48, %v5080_v57  ;;  %v2785_v58 = vpop.f32.mrb[105].mxu1 }
 0x295   : > { %v2786_v60 = vadd.f32 %v5808_v48, %v2785_v58  ;;  %v5081_v61 = vpop.f32.mrb[106].mxu1  ;;  %5146 = vmatprep.mubr.msk.bf16.mxu0 %vm1058_vm3, %v2962_v56 }
 0x296   : > { %v2797_v62 = vadd.f32 %v5808_v48, %v5081_v61  ;;  %v2788_v63 = vpop.f32.mrb[107].mxu1  ;;  %5147 = vmatmul.mubr.msk.bf16.gmra.mrb[164].mxu0 %vm1058_vm3, %v2963_v55  ;;  %v2922_v1 = vmax.f32 %v2794_v33, 0.0 }
 0x297   : > { %v2789_v0 = vadd.f32 %v5808_v48, %v2788_v63  ;;  %v2920_v4 = vmax.f32 %v2786_v60, 0.0 }
 0x298   : > { %v2923_v2 = vmax.f32 %v2797_v62, 0.0 }
 0x299   : > { %v2921_v3 = vmax.f32 %v2789_v0, 0.0 }
 0x29a   : > { %v2965_v6 = vpack.c.bf16 %v2923_v2, %v2922_v1 }
 0x29b   : > { %v2964_v7 = vpack.c.bf16 %v2921_v3, %v2920_v4  ;;  %v5084_v8 = vpop.f32.mrb[108].mxu1 }
 0x29c   : > { %v2810_v9 = vadd.f32 %v5808_v48, %v5084_v8  ;;  %v2801_v10 = vpop.f32.mrb[109].mxu1 }
 0x29d   : > { %v2802_v11 = vadd.f32 %v5808_v48, %v2801_v10  ;;  %v5085_v12 = vpop.f32.mrb[110].mxu1  ;;  %5150 = vmatprep.mubr.msk.bf16.mxu0 %vm1058_vm3, %v2964_v7 }
 0x29e   : > { %v2813_v13 = vadd.f32 %v5808_v48, %v5085_v12  ;;  %v2804_v14 = vpop.f32.mrb[111].mxu1  ;;  %5151 = vmatmul.mubr.msk.bf16.gmra.mrb[168].mxu0 %vm1058_vm3, %v2965_v6  ;;  %v2926_v5 = vmax.f32 %v2810_v9, 0.0 }
 0x29f   : > { %v2805_v15 = vadd.f32 %v5808_v48, %v2804_v14  ;;  %v2924_v18 = vmax.f32 %v2802_v11, 0.0 }
 0x2a0   : > { %v2927_v16 = vmax.f32 %v2813_v13, 0.0 }
 0x2a1   : > { %v2925_v19 = vmax.f32 %v2805_v15, 0.0  ;;  %v4974_v20 = vpop.f32.mrb[64].mxu0 }
 0x2a2   : > { %v2967_v21 = vpack.c.bf16 %v2927_v16, %v2926_v5  ;;  %v1700_v22 = vpop.f32.mrb[65].mxu0  ;;  %v1709_v30 = vadd.f32 %v4974_v20, %v5885_v17 }
 0x2a3   : > { %v2966_v23 = vpack.c.bf16 %v2925_v19, %v2924_v18  ;;  %v1701_v24 = vadd.f32 %v5885_v17, %v1700_v22  ;;  %v4975_v25 = vpop.f32.mrb[66].mxu0  ;;  %v5088_v26 = vpop.f32.mrb[112].mxu1 }
 0x2a4   : > { %v2826_v27 = vadd.f32 %v5808_v48, %v5088_v26  ;;  %v1703_v28 = vpop.f32.mrb[67].mxu0  ;;  %v2817_v29 = vpop.f32.mrb[113].mxu1  ;;  %v1712_v42 = vadd.f32 %v4975_v25, %v5885_v17  ;;  %v1957_v43 = vmax.f32 %v1709_v30, 0.0 }
 0x2a5   : > { %v1704_v32 = vadd.f32 %v5885_v17, %v1703_v28  ;;  %v2818_v34 = vadd.f32 %v5808_v48, %v2817_v29  ;;  %v5089_v35 = vpop.f32.mrb[114].mxu1  ;;  %5154 = vmatprep.mubr.msk.bf16.mxu0 %vm1058_vm3, %v2966_v23  ;;  %v1955_v38 = vmax.f32 %v1701_v24, 0.0 }
 0x2a6   : > { %v2829_v36 = vadd.f32 %v5808_v48, %v5089_v35  ;;  %v2820_v37 = vpop.f32.mrb[115].mxu1  ;;  %5155 = vmatmul.mubr.msk.bf16.gmra.mrb[172].mxu0 %vm1058_vm3, %v2967_v21  ;;  %v2930_v40 = vmax.f32 %v2826_v27, 0.0  ;;  %v1958_v31 = vmax.f32 %v1712_v42, 0.0 }
 0x2a7   : > { %v1956_v39 = vmax.f32 %v1704_v32, 0.0  ;;  %v2821_v41 = vadd.f32 %v5808_v48, %v2820_v37  ;;  %v2928_v47 = vmax.f32 %v2818_v34, 0.0 }
 0x2a8   : > { %v2931_v50 = vmax.f32 %v2829_v36, 0.0 }
 0x2a9   : > { %v2019_v44 = vmax.f32 %v1955_v38, %v1956_v39  ;;  %v2929_v45 = vmax.f32 %v2821_v41, 0.0  ;;  %v4978_v59 = vpop.f32.mrb[68].mxu0 }
 0x2aa   : > { %v2969_v46 = vpack.c.bf16 %v2931_v50, %v2930_v40  ;;  %v1716_v49 = vpop.f32.mrb[69].mxu0  ;;  %v1725_v56 = vadd.f32 %v4978_v59, %v5885_v17 }
 0x2ab   : > { %v2020_v51 = vmax.f32 %v2019_v44, %v1957_v43  ;;  %v2968_v52 = vpack.c.bf16 %v2929_v45, %v2928_v47  ;;  %v1717_v53 = vadd.f32 %v5885_v17, %v1716_v49  ;;  %v4979_v54 = vpop.f32.mrb[70].mxu0  ;;  %v5092_v55 = vpop.f32.mrb[116].mxu1 }
 0x2ac   : > { %v2842_v57 = vadd.f32 %v5808_v48, %v5092_v55  ;;  %v1719_v33 = vpop.f32.mrb[71].mxu0  ;;  %v2833_v58 = vpop.f32.mrb[117].mxu1  ;;  %v1728_v0 = vadd.f32 %v4979_v54, %v5885_v17  ;;  %v1961_v8 = vmax.f32 %v1725_v56, 0.0 }
 0x2ad   : > { %v2021_v60 = vmax.f32 %v2020_v51, %v1958_v31  ;;  %v1720_v61 = vadd.f32 %v5885_v17, %v1719_v33  ;;  %v2834_v62 = vadd.f32 %v5808_v48, %v2833_v58  ;;  %v5093_v63 = vpop.f32.mrb[118].mxu1  ;;  %5158 = vmatprep.mubr.msk.bf16.mxu0 %vm1058_vm3, %v2968_v52  ;;  %v1959_v3 = vmax.f32 %v1717_v53, 0.0 }
 0x2ae   : > { %v2845_v1 = vadd.f32 %v5808_v48, %v5093_v63  ;;  %v2836_v2 = vpop.f32.mrb[119].mxu1  ;;  %5159 = vmatmul.mubr.msk.bf16.gmra.mrb[176].mxu0 %vm1058_vm3, %v2969_v46  ;;  %v2934_v9 = vmax.f32 %v2842_v57, 0.0  ;;  %v1962_v5 = vmax.f32 %v1728_v0, 0.0 }
 0x2af   : > { %v2022_v4 = vrot.slane %v2021_v60, 4  ;;  %v1960_v6 = vmax.f32 %v1720_v61, 0.0  ;;  %v2837_v7 = vadd.f32 %v5808_v48, %v2836_v2  ;;  %v2932_v13 = vmax.f32 %v2834_v62, 0.0 }
 0x2b0   : > { %v2935_v10 = vmax.f32 %v2845_v1, 0.0 }
 0x2b1   : > { %v2023_v11 = vmax.f32 %v2021_v60, %v2022_v4  ;;  %v2028_v12 = vmax.f32 %v1959_v3, %v1960_v6  ;;  %v2933_v14 = vmax.f32 %v2837_v7, 0.0  ;;  %v4982_v15 = vpop.f32.mrb[72].mxu0 }
 0x2b2   : > { %v2971_v16 = vpack.c.bf16 %v2935_v10, %v2934_v9  ;;  %v1732_v18 = vpop.f32.mrb[73].mxu0  ;;  %v1741_v25 = vadd.f32 %v4982_v15, %v5885_v17 }
 0x2b3   : > { %v2024_v19 = vrot.slane %v2023_v11, 2  ;;  %v2029_v20 = vmax.f32 %v2028_v12, %v1961_v8  ;;  %v2970_v21 = vpack.c.bf16 %v2933_v14, %v2932_v13  ;;  %v1733_v22 = vadd.f32 %v5885_v17, %v1732_v18  ;;  %v4983_v23 = vpop.f32.mrb[74].mxu0  ;;  %v5096_v24 = vpop.f32.mrb[120].mxu1 }
 0x2b4   : > { %v2858_v26 = vadd.f32 %v5808_v48, %v5096_v24  ;;  %v1735_v27 = vpop.f32.mrb[75].mxu0  ;;  %v2849_v28 = vpop.f32.mrb[121].mxu1  ;;  %v1744_v35 = vadd.f32 %v4983_v23, %v5885_v17  ;;  %v1965_v43 = vmax.f32 %v1741_v25, 0.0 }
 0x2b5   : > { %v2025_v29 = vmax.f32 %v2023_v11, %v2024_v19  ;;  %v2030_v30 = vmax.f32 %v2029_v20, %v1962_v5  ;;  %v1736_v32 = vadd.f32 %v5885_v17, %v1735_v27  ;;  %v5097_v34 = vpop.f32.mrb[122].mxu1  ;;  %5162 = vmatprep.mubr.msk.bf16.mxu0 %vm1058_vm3, %v2970_v21  ;;  %v2850_v36 = vadd.f32 %v5808_v48, %v2849_v28 }
 0x2b6   : > { %v2861_v37 = vadd.f32 %v5808_v48, %v5097_v34  ;;  %v2852_v38 = vpop.f32.mrb[123].mxu1  ;;  %5163 = vmatmul.mubr.msk.bf16.gmra.mrb[180].mxu0 %vm1058_vm3, %v2971_v16  ;;  %v1963_v39 = vmax.f32 %v1733_v22, 0.0  ;;  %v2938_v44 = vmax.f32 %v2858_v26, 0.0  ;;  %v1966_v54 = vmax.f32 %v1744_v35, 0.0 }
 0x2b7   : > { %v2031_v42 = vrot.slane %v2030_v30, 4  ;;  %v1964_v41 = vmax.f32 %v1736_v32, 0.0  ;;  %v2853_v40 = vadd.f32 %v5808_v48, %v2852_v38  ;;  %v2026_v50 = vrot.slane %v2025_v29, 1 }
 0x2b8   : > { %v2939_v47 = vmax.f32 %v2861_v37, 0.0  ;;  %v2936_v46 = vmax.f32 %v2850_v36, 0.0 }
 0x2b9   : > { %v2032_v45 = vmax.f32 %v2030_v30, %v2031_v42  ;;  %v2037_v59 = vmax.f32 %v1963_v39, %v1964_v41  ;;  %v2937_v49 = vmax.f32 %v2853_v40, 0.0  ;;  %v4986_v31 = vpop.f32.mrb[76].mxu0  ;;  %v2027_v58 = vmax.f32 %v2025_v29, %v2026_v50 }
 0x2ba   : > { %v2973_v51 = vpack.c.bf16 %v2939_v47, %v2938_v44  ;;  %v1748_v52 = vpop.f32.mrb[77].mxu0  ;;  %v1757_v60 = vadd.f32 %v4986_v31, %v5885_v17 }
 0x2bb   : > { %v2033_v53 = vrot.slane %v2032_v45, 2  ;;  %v2038_v55 = vmax.f32 %v2037_v59, %v1965_v43  ;;  %v2972_v56 = vpack.c.bf16 %v2937_v49, %v2936_v46  ;;  %v4987_v57 = vpop.f32.mrb[78].mxu0  ;;  %v5100_v33 = vpop.f32.mrb[124].mxu1  ;;  %v1749_v61 = vadd.f32 %v5885_v17, %v1748_v52 }
 0x2bc   : > { %v2874_v62 = vadd.f32 %v5808_v48, %v5100_v33  ;;  %v1751_v63 = vpop.f32.mrb[79].mxu0  ;;  %v2865_v0 = vpop.f32.mrb[125].mxu1  ;;  %v1760_v7 = vadd.f32 %v4987_v57, %v5885_v17  ;;  %v4584_v14 = vpack.c.bf16 %v2027_v58, %v2027_v58  ;;  %v1969_v15 = vmax.f32 %v1757_v60, 0.0 }
 0x2bd   : > { %v2034_v1 = vmax.f32 %v2032_v45, %v2033_v53  ;;  %v2039_v2 = vmax.f32 %v2038_v55, %v1966_v54  ;;  %v1752_v4 = vadd.f32 %v5885_v17, %v1751_v63  ;;  %v5101_v3 = vpop.f32.mrb[126].mxu1  ;;  %5166 = vmatprep.mubr.msk.bf16.mxu0 %vm1058_vm3, %v2972_v56  ;;  %v1967_v6 = vmax.f32 %v1749_v61, 0.0 }
 0x2be   : > { %v2866_v8 = vadd.f32 %v5808_v48, %v2865_v0  ;;  %v2868_v9 = vpop.f32.mrb[127].mxu1  ;;  %5167 = vmatmul.mubr.msk.bf16.gmra.mrb[184].mxu0 %vm1058_vm3, %v2973_v51  ;;  %v2877_v13 = vadd.f32 %v5808_v48, %v5101_v3  ;;  %v2942_v5 = vmax.f32 %v2874_v62, 0.0  ;;  %v1970_v23 = vmax.f32 %v1760_v7, 0.0 }
 0x2bf   : > { %v2035_v10 = vrot.slane %v2034_v1, 1  ;;  %v2040_v11 = vrot.slane %v2039_v2, 4  ;;  %v1968_v12 = vmax.f32 %v1752_v4, 0.0  ;;  %v2869_v16 = vadd.f32 %v5808_v48, %v2868_v9 }
 0x2c0   : > { %v2943_v21 = vmax.f32 %v2877_v13, 0.0  ;;  %v2940_v24 = vmax.f32 %v2866_v8, 0.0  ;;  %v2227_v34 = vunpack.c.l.b16 %v4584_v14 }
 0x2c1   : > { %v2036_v18 = vmax.f32 %v2034_v1, %v2035_v10  ;;  %v2041_v19 = vmax.f32 %v2039_v2, %v2040_v11  ;;  %v2046_v20 = vmax.f32 %v1967_v6, %v1968_v12  ;;  %v4990_v22 = vpop.f32.mrb[80].mxu0  ;;  %v2941_v25 = vmax.f32 %v2869_v16, 0.0 }
 0x2c2   : > { %v1764_v26 = vpop.f32.mrb[81].mxu0  ;;  %v2975_v30 = vpack.c.bf16 %v2943_v21, %v2942_v5  ;;  %v1773_v36 = vadd.f32 %v4990_v22, %v5885_v17 }
 0x2c3   : > { %v4585_v27 = vpack.c.bf16 %v2036_v18, %v2036_v18  ;;  %v2042_v28 = vrot.slane %v2041_v19, 2  ;;  %v2047_v29 = vmax.f32 %v2046_v20, %v1969_v15  ;;  %v4991_v32 = vpop.f32.mrb[82].mxu0  ;;  %v2974_v35 = vpack.c.bf16 %v2941_v25, %v2940_v24 }
 0x2c4   : > { %v1765_v48 = vadd.f32 %v5885_v17, %v1764_v26  ;;  %v1767_v37 = vpop.f32.mrb[83].mxu0  ;;  %v1776_v50 = vadd.f32 %v4991_v32, %v5885_v17  ;;  %v1973_v49 = vmax.f32 %v1773_v36, 0.0 }
 0x2c5   : > { %v2228_v38 = vunpack.c.l.b16 %v4585_v27  ;;  %v2043_v42 = vmax.f32 %v2041_v19, %v2042_v28  ;;  %v2048_v39 = vmax.f32 %v2047_v29, %v1970_v23  ;;  %v1768_v41 = vadd.f32 %v5885_v17, %v1767_v37  ;;  %5170 = vmatprep.mubr.msk.bf16.mxu0 %vm1058_vm3, %v2974_v35 }
 0x2c6   : > { %v1971_v40 = vmax.f32 %v1765_v48, 0.0  ;;  %5171 = vmatmul.mubr.msk.bf16.gmra.mrb[188].mxu0 %vm1058_vm3, %v2975_v30  ;;  %v1974_v55 = vmax.f32 %v1776_v50, 0.0 }
 0x2c7   : > { %v2244_v43 = vsel %vm2243_vm4, %v2228_v38, %v2227_v34  ;;  %v2044_v44 = vrot.slane %v2043_v42, 1  ;;  %v2049_v47 = vrot.slane %v2048_v39, 4  ;;  %v1972_v45 = vmax.f32 %v1768_v41, 0.0 }
 0x2c9   : > { %v2045_v59 = vmax.f32 %v2043_v42, %v2044_v44  ;;  %v2050_v46 = vmax.f32 %v2048_v39, %v2049_v47  ;;  %v2055_v31 = vmax.f32 %v1971_v40, %v1972_v45  ;;  %v4994_v51 = vpop.f32.mrb[84].mxu0 }
 0x2ca   : > { %v1780_v52 = vpop.f32.mrb[85].mxu0  ;;  %v1789_v63 = vadd.f32 %v4994_v51, %v5885_v17 }
 0x2cb   : > { %v4586_v53 = vpack.c.bf16 %v2045_v59, %v2045_v59  ;;  %v2051_v54 = vrot.slane %v2050_v46, 2  ;;  %v2056_v56 = vmax.f32 %v2055_v31, %v1973_v49  ;;  %v4995_v57 = vpop.f32.mrb[86].mxu0  ;;  %v1781_v33 = vadd.f32 %v5885_v17, %v1780_v52 }
 0x2cc   : > { %v1783_v58 = vpop.f32.mrb[87].mxu0  ;;  %v1792_v6 = vadd.f32 %v4995_v57, %v5885_v17  ;;  %v1977_v11 = vmax.f32 %v1789_v63, 0.0 }
 0x2cd   : > { %v2229_v60 = vunpack.c.l.b16 %v4586_v53  ;;  %v2052_v61 = vmax.f32 %v2050_v46, %v2051_v54  ;;  %v2057_v62 = vmax.f32 %v2056_v56, %v1974_v55  ;;  %v1784_v0 = vadd.f32 %v5885_v17, %v1783_v58 }
 0x2ce   : > { %v1975_v3 = vmax.f32 %v1781_v33, 0.0  ;;  %v1978_v18 = vmax.f32 %v1792_v6, 0.0 }
 0x2cf   : > { %v2246_v1 = vsel %vm2245_vm5, %v2229_v60, %v2244_v43  ;;  %v2053_v2 = vrot.slane %v2052_v61, 1  ;;  %v2058_v4 = vrot.slane %v2057_v62, 4  ;;  %v1976_v7 = vmax.f32 %v1784_v0, 0.0 }
 0x2d1   : > { %v2054_v8 = vmax.f32 %v2052_v61, %v2053_v2  ;;  %v2059_v9 = vmax.f32 %v2057_v62, %v2058_v4  ;;  %v4998_v10 = vpop.f32.mrb[88].mxu0  ;;  %v2064_v12 = vmax.f32 %v1975_v3, %v1976_v7 }
 0x2d2   : > { %v1796_v13 = vpop.f32.mrb[89].mxu0  ;;  %v1805_v23 = vadd.f32 %v4998_v10, %v5885_v17 }
 0x2d3   : > { %v4587_v14 = vpack.c.bf16 %v2054_v8, %v2054_v8  ;;  %v2060_v15 = vrot.slane %v2059_v9, 2  ;;  %v1797_v5 = vadd.f32 %v5885_v17, %v1796_v13  ;;  %v4999_v16 = vpop.f32.mrb[90].mxu0  ;;  %v2065_v19 = vmax.f32 %v2064_v12, %v1977_v11 }
 0x2d4   : > { %v1799_v20 = vpop.f32.mrb[91].mxu0  ;;  %v1808_v26 = vadd.f32 %v4999_v16, %v5885_v17  ;;  %v1981_v35 = vmax.f32 %v1805_v23, 0.0 }
 0x2d5   : > { %v2230_v21 = vunpack.c.l.b16 %v4587_v14  ;;  %v2061_v22 = vmax.f32 %v2059_v9, %v2060_v15  ;;  %v1800_v24 = vadd.f32 %v5885_v17, %v1799_v20  ;;  %v2066_v25 = vmax.f32 %v2065_v19, %v1978_v18 }
 0x2d6   : > { %v1979_v29 = vmax.f32 %v1797_v5, 0.0  ;;  %v1982_v39 = vmax.f32 %v1808_v26, 0.0 }
 0x2d7   : > { %v2248_v27 = vsel %vm2247_vm6, %v2230_v21, %v2246_v1  ;;  %v2062_v28 = vrot.slane %v2061_v22, 1  ;;  %v1980_v30 = vmax.f32 %v1800_v24, 0.0  ;;  %v2067_v32 = vrot.slane %v2066_v25, 4 }
 0x2d9   : > { %v2063_v34 = vmax.f32 %v2061_v22, %v2062_v28  ;;  %v2073_v36 = vmax.f32 %v1979_v29, %v1980_v30  ;;  %v5002_v48 = vpop.f32.mrb[92].mxu0  ;;  %v2068_v37 = vmax.f32 %v2066_v25, %v2067_v32 }
 0x2da   : > { %v1812_v38 = vpop.f32.mrb[93].mxu0  ;;  %v1821_v59 = vadd.f32 %v5002_v48, %v5885_v17 }
 0x2db   : > { %v4588_v42 = vpack.c.bf16 %v2063_v34, %v2063_v34  ;;  %v2074_v41 = vmax.f32 %v2073_v36, %v1981_v35  ;;  %v1813_v40 = vadd.f32 %v5885_v17, %v1812_v38  ;;  %v5003_v50 = vpop.f32.mrb[94].mxu0  ;;  %v2069_v43 = vrot.slane %v2068_v37, 2 }
 0x2dc   : > { %v1815_v44 = vpop.f32.mrb[95].mxu0  ;;  %v1824_v31 = vadd.f32 %v5003_v50, %v5885_v17  ;;  %v1985_v57 = vmax.f32 %v1821_v59, 0.0 }
 0x2dd   : > { %v2231_v47 = vunpack.c.l.b16 %v4588_v42  ;;  %v2075_v45 = vmax.f32 %v2074_v41, %v1982_v39  ;;  %v1816_v46 = vadd.f32 %v5885_v17, %v1815_v44  ;;  %v2070_v49 = vmax.f32 %v2068_v37, %v2069_v43 }
 0x2de   : > { %v1983_v53 = vmax.f32 %v1813_v40, 0.0  ;;  %v1986_v63 = vmax.f32 %v1824_v31, 0.0 }
 0x2df   : > { %v2250_v51 = vsel %vm2249_vm7, %v2231_v47, %v2248_v27  ;;  %v2076_v52 = vrot.slane %v2075_v45, 4  ;;  %v1984_v54 = vmax.f32 %v1816_v46, 0.0  ;;  %v2071_v55 = vrot.slane %v2070_v49, 1 }
 0x2e1   : > { %v2077_v56 = vmax.f32 %v2075_v45, %v2076_v52  ;;  %v2082_v33 = vmax.f32 %v1983_v53, %v1984_v54  ;;  %v5006_v58 = vpop.f32.mrb[96].mxu0  ;;  %v2072_v60 = vmax.f32 %v2070_v49, %v2071_v55 }
 0x2e2   : > { %v1828_v61 = vpop.f32.mrb[97].mxu0  ;;  %v1837_v8 = vadd.f32 %v5006_v58, %v5885_v17 }
 0x2e3   : > { %v2078_v62 = vrot.slane %v2077_v56, 2  ;;  %v2083_v0 = vmax.f32 %v2082_v33, %v1985_v57  ;;  %v1829_v1 = vadd.f32 %v5885_v17, %v1828_v61  ;;  %v5007_v2 = vpop.f32.mrb[98].mxu0  ;;  %v4589_v4 = vpack.c.bf16 %v2072_v60, %v2072_v60 }
 0x2e4   : > { %v1831_v3 = vpop.f32.mrb[99].mxu0  ;;  %v1840_v11 = vadd.f32 %v5007_v2, %v5885_v17  ;;  %v1989_v19 = vmax.f32 %v1837_v8, 0.0 }
 0x2e5   : > { %v2079_v6 = vmax.f32 %v2077_v56, %v2078_v62  ;;  %v2084_v7 = vmax.f32 %v2083_v0, %v1986_v63  ;;  %v1832_v9 = vadd.f32 %v5885_v17, %v1831_v3  ;;  %v2232_v10 = vunpack.c.l.b16 %v4589_v4 }
 0x2e6   : > { %v1987_v14 = vmax.f32 %v1829_v1, 0.0  ;;  %v1990_v25 = vmax.f32 %v1840_v11, 0.0 }
 0x2e7   : > { %v2080_v12 = vrot.slane %v2079_v6, 1  ;;  %v2085_v13 = vrot.slane %v2084_v7, 4  ;;  %v1988_v15 = vmax.f32 %v1832_v9, 0.0  ;;  %v2252_v5 = vsel %vm2251_vm8, %v2232_v10, %v2250_v51 }
 0x2e9   : > { %v2081_v16 = vmax.f32 %v2079_v6, %v2080_v12  ;;  %v2086_v18 = vmax.f32 %v2084_v7, %v2085_v13  ;;  %v2091_v20 = vmax.f32 %v1987_v14, %v1988_v15  ;;  %v5010_v21 = vpop.f32.mrb[100].mxu0 }
 0x2ea   : > { %v1844_v22 = vpop.f32.mrb[101].mxu0  ;;  %v1853_v35 = vadd.f32 %v5010_v21, %v5885_v17 }
 0x2eb   : > { %v4590_v23 = vpack.c.bf16 %v2081_v16, %v2081_v16  ;;  %v2087_v24 = vrot.slane %v2086_v18, 2  ;;  %v2092_v26 = vmax.f32 %v2091_v20, %v1989_v19  ;;  %v5011_v27 = vpop.f32.mrb[102].mxu0  ;;  %v1845_v28 = vadd.f32 %v5885_v17, %v1844_v22 }
 0x2ec   : > { %v1847_v29 = vpop.f32.mrb[103].mxu0  ;;  %v1856_v39 = vadd.f32 %v5011_v27, %v5885_v17  ;;  %v1993_v44 = vmax.f32 %v1853_v35, 0.0 }
 0x2ed   : > { %v2233_v30 = vunpack.c.l.b16 %v4590_v23  ;;  %v2088_v32 = vmax.f32 %v2086_v18, %v2087_v24  ;;  %v2093_v34 = vmax.f32 %v2092_v26, %v1990_v25  ;;  %v1848_v36 = vadd.f32 %v5885_v17, %v1847_v29 }
 0x2ee   : > { %v1991_v42 = vmax.f32 %v1845_v28, 0.0  ;;  %v1994_v51 = vmax.f32 %v1856_v39, 0.0 }
 0x2ef   : > { %v2254_v48 = vsel %vm2253_vm9, %v2233_v30, %v2252_v5  ;;  %v2089_v37 = vrot.slane %v2088_v32, 1  ;;  %v2094_v38 = vrot.slane %v2093_v34, 4  ;;  %v1992_v41 = vmax.f32 %v1848_v36, 0.0 }
 0x2f1   : > { %v2090_v40 = vmax.f32 %v2088_v32, %v2089_v37  ;;  %v2095_v50 = vmax.f32 %v2093_v34, %v2094_v38  ;;  %v5014_v43 = vpop.f32.mrb[104].mxu0  ;;  %v2100_v47 = vmax.f32 %v1991_v42, %v1992_v41 }
 0x2f2   : > { %v1860_v45 = vpop.f32.mrb[105].mxu0  ;;  %v1869_v55 = vadd.f32 %v5014_v43, %v5885_v17 }
 0x2f3   : > { %v4591_v59 = vpack.c.bf16 %v2090_v40, %v2090_v40  ;;  %v2096_v46 = vrot.slane %v2095_v50, 2  ;;  %v1861_v49 = vadd.f32 %v5885_v17, %v1860_v45  ;;  %v5015_v31 = vpop.f32.mrb[106].mxu0  ;;  %v2101_v52 = vmax.f32 %v2100_v47, %v1993_v44 }
 0x2f4   : > { %v1863_v53 = vpop.f32.mrb[107].mxu0  ;;  %v1872_v61 = vadd.f32 %v5015_v31, %v5885_v17  ;;  %v1997_v1 = vmax.f32 %v1869_v55, 0.0 }
 0x2f5   : > { %v2234_v54 = vunpack.c.l.b16 %v4591_v59  ;;  %v1864_v56 = vadd.f32 %v5885_v17, %v1863_v53  ;;  %v2097_v57 = vmax.f32 %v2095_v50, %v2096_v46  ;;  %v2102_v33 = vmax.f32 %v2101_v52, %v1994_v51 }
 0x2f6   : > { %v1995_v60 = vmax.f32 %v1861_v49, 0.0  ;;  %v1998_v8 = vmax.f32 %v1872_v61, 0.0 }
 0x2f7   : > { %v2256_v58 = vsel %vm2255_vm10, %v2234_v54, %v2254_v48  ;;  %v1996_v62 = vmax.f32 %v1864_v56, 0.0  ;;  %v2103_v0 = vrot.slane %v2102_v33, 4  ;;  %v2098_v3 = vrot.slane %v2097_v57, 1 }
 0x2f8   : > { %v2264_v63 = vpack.c.b16 %v2256_v58, %v2256_v58 }
 0x2f9   : > { %v2109_v2 = vmax.f32 %v1995_v60, %v1996_v62  ;;  %v5018_v4 = vpop.f32.mrb[108].mxu0  ;;  %v2104_v6 = vmax.f32 %v2102_v33, %v2103_v0  ;;  %v2099_v16 = vmax.f32 %v2097_v57, %v2098_v3 }
 0x2fa   : > { %2268 = vst [vmem:[%s5967_s20] sm:$0xf] %v2264_v63  ;;  %v1876_v7 = vpop.f32.mrb[109].mxu0  ;;  %v1885_v15 = vadd.f32 %v5018_v4, %v5885_v17 }
 0x2fb   : > { %v2110_v9 = vmax.f32 %v2109_v2, %v1997_v1  ;;  %v1877_v10 = vadd.f32 %v5885_v17, %v1876_v7  ;;  %v5019_v11 = vpop.f32.mrb[110].mxu0  ;;  %v2105_v12 = vrot.slane %v2104_v6, 2  ;;  %v4592_v28 = vpack.c.bf16 %v2099_v16, %v2099_v16 }
 0x2fc   : > { %v1879_v13 = vpop.f32.mrb[111].mxu0  ;;  %v1888_v21 = vadd.f32 %v5019_v11, %v5885_v17  ;;  %v2001_v25 = vmax.f32 %v1885_v15, 0.0 }
 0x2fd   : > { %v2111_v14 = vmax.f32 %v2110_v9, %v1998_v8  ;;  %v1880_v5 = vadd.f32 %v5885_v17, %v1879_v13  ;;  %v2106_v18 = vmax.f32 %v2104_v6, %v2105_v12  ;;  %v1999_v20 = vmax.f32 %v1877_v10, 0.0 }
 0x2fe   : > { %v2002_v34 = vmax.f32 %v1888_v21, 0.0  ;;  %v2235_v50 = vunpack.c.l.b16 %v4592_v28 }
 0x2ff   : > { %v2112_v19 = vrot.slane %v2111_v14, 4  ;;  %v2000_v22 = vmax.f32 %v1880_v5, 0.0  ;;  %v2107_v23 = vrot.slane %v2106_v18, 1 }
 0x301   : > { %v2113_v24 = vmax.f32 %v2111_v14, %v2112_v19  ;;  %v2118_v26 = vmax.f32 %v1999_v20, %v2000_v22  ;;  %v5022_v27 = vpop.f32.mrb[112].mxu0  ;;  %v2108_v29 = vmax.f32 %v2106_v18, %v2107_v23 }
 0x302   : > { %v1892_v30 = vpop.f32.mrb[113].mxu0  ;;  %v1901_v41 = vadd.f32 %v5022_v27, %v5885_v17 }
 0x303   : > { %v2114_v32 = vrot.slane %v2113_v24, 2  ;;  %v2119_v35 = vmax.f32 %v2118_v26, %v2001_v25  ;;  %v1893_v36 = vadd.f32 %v5885_v17, %v1892_v30  ;;  %v5023_v48 = vpop.f32.mrb[114].mxu0  ;;  %v4593_v37 = vpack.c.bf16 %v2108_v29, %v2108_v29 }
 0x304   : > { %v1895_v38 = vpop.f32.mrb[115].mxu0  ;;  %v1904_v44 = vadd.f32 %v5023_v48, %v5885_v17  ;;  %v2005_v52 = vmax.f32 %v1901_v41, 0.0 }
 0x305   : > { %v2115_v42 = vmax.f32 %v2113_v24, %v2114_v32  ;;  %v2120_v39 = vmax.f32 %v2119_v35, %v2002_v34  ;;  %v1896_v40 = vadd.f32 %v5885_v17, %v1895_v38  ;;  %v2236_v43 = vunpack.c.l.b16 %v4593_v37 }
 0x306   : > { %v2003_v59 = vmax.f32 %v1893_v36, 0.0  ;;  %v2006_v33 = vmax.f32 %v1904_v44, 0.0 }
 0x307   : > { %v2116_v47 = vrot.slane %v2115_v42, 1  ;;  %v2121_v45 = vrot.slane %v2120_v39, 4  ;;  %v2004_v46 = vmax.f32 %v1896_v40, 0.0  ;;  %v2257_v49 = vsel %vm2243_vm4, %v2236_v43, %v2235_v50 }
 0x309   : > { %v2117_v31 = vmax.f32 %v2115_v42, %v2116_v47  ;;  %v2122_v51 = vmax.f32 %v2120_v39, %v2121_v45  ;;  %v2127_v53 = vmax.f32 %v2003_v59, %v2004_v46  ;;  %v5026_v54 = vpop.f32.mrb[116].mxu0 }
 0x30a   : > { %v1908_v55 = vpop.f32.mrb[117].mxu0  ;;  %v1917_v2 = vadd.f32 %v5026_v54, %v5885_v17 }
 0x30b   : > { %v4594_v56 = vpack.c.bf16 %v2117_v31, %v2117_v31  ;;  %v2123_v57 = vrot.slane %v2122_v51, 2  ;;  %v2128_v58 = vmax.f32 %v2127_v53, %v2005_v52  ;;  %v5027_v60 = vpop.f32.mrb[118].mxu0  ;;  %v1909_v61 = vadd.f32 %v5885_v17, %v1908_v55 }
 0x30c   : > { %v1911_v62 = vpop.f32.mrb[119].mxu0  ;;  %v1920_v9 = vadd.f32 %v5027_v60, %v5885_v17  ;;  %v2009_v14 = vmax.f32 %v1917_v2, 0.0 }
 0x30d   : > { %v2237_v63 = vunpack.c.l.b16 %v4594_v56  ;;  %v2124_v0 = vmax.f32 %v2122_v51, %v2123_v57  ;;  %v2129_v1 = vmax.f32 %v2128_v58, %v2006_v33  ;;  %v1912_v4 = vadd.f32 %v5885_v17, %v1911_v62 }
 0x30e   : > { %v2007_v8 = vmax.f32 %v1909_v61, 0.0  ;;  %v2010_v21 = vmax.f32 %v1920_v9, 0.0 }
 0x30f   : > { %v2258_v3 = vsel %vm2245_vm5, %v2237_v63, %v2257_v49  ;;  %v2125_v6 = vrot.slane %v2124_v0, 1  ;;  %v2130_v7 = vrot.slane %v2129_v1, 4  ;;  %v2008_v10 = vmax.f32 %v1912_v4, 0.0 }
 0x311   : > { %v2126_v11 = vmax.f32 %v2124_v0, %v2125_v6  ;;  %v2131_v12 = vmax.f32 %v2129_v1, %v2130_v7  ;;  %v5030_v13 = vpop.f32.mrb[120].mxu0  ;;  %v2136_v15 = vmax.f32 %v2007_v8, %v2008_v10  ;;  %v5999_v0 = vld [vmem:[%s6193_s4] ss:$0 sm:$0xff] }
 0x312   : > { %v1924_v5 = vpop.f32.mrb[121].mxu0  ;;  %v1933_v26 = vadd.f32 %v5030_v13, %v5885_v17 }
 0x313   : > { %v4595_v16 = vpack.c.bf16 %v2126_v11, %v2126_v11  ;;  %v2132_v18 = vrot.slane %v2131_v12, 2  ;;  %v1925_v19 = vadd.f32 %v5885_v17, %v1924_v5  ;;  %v5031_v20 = vpop.f32.mrb[122].mxu0  ;;  %v2137_v22 = vmax.f32 %v2136_v15, %v2009_v14 }
 0x314   : > { %v1927_v23 = vpop.f32.mrb[123].mxu0  ;;  %v1936_v29 = vadd.f32 %v5031_v20, %v5885_v17  ;;  %v2013_v37 = vmax.f32 %v1933_v26, 0.0 }
 0x315   : > { %v2238_v24 = vunpack.c.l.b16 %v4595_v16  ;;  %v2133_v25 = vmax.f32 %v2131_v12, %v2132_v18  ;;  %v1928_v27 = vadd.f32 %v5885_v17, %v1927_v23  ;;  %v2138_v28 = vmax.f32 %v2137_v22, %v2010_v21 }
 0x316   : > { %v2011_v34 = vmax.f32 %v1925_v19, 0.0  ;;  %v2014_v50 = vmax.f32 %v1936_v29, 0.0 }
 0x317   : > { %v2259_v30 = vsel %vm2247_vm6, %v2238_v24, %v2258_v3  ;;  %v2134_v32 = vrot.slane %v2133_v25, 1  ;;  %v2012_v35 = vmax.f32 %v1928_v27, 0.0  ;;  %v2139_v36 = vrot.slane %v2138_v28, 4 }
 0x319   : > { %v2135_v48 = vmax.f32 %v2133_v25, %v2134_v32  ;;  %v2145_v38 = vmax.f32 %v2011_v34, %v2012_v35  ;;  %v5034_v42 = vpop.f32.mrb[124].mxu0  ;;  %v2140_v39 = vmax.f32 %v2138_v28, %v2139_v36 }
 0x31a   : > { %v1940_v41 = vpop.f32.mrb[125].mxu0  ;;  %v1949_v31 = vadd.f32 %v5034_v42, %v5885_v17 }
 0x31b   : > { %v4596_v40 = vpack.c.bf16 %v2135_v48, %v2135_v48  ;;  %v2146_v43 = vmax.f32 %v2145_v38, %v2013_v37  ;;  %v1941_v44 = vadd.f32 %v5885_v17, %v1940_v41  ;;  %v5035_v47 = vpop.f32.mrb[126].mxu0  ;;  %v2141_v45 = vrot.slane %v2140_v39, 2 }
 0x31c   : > { %v1943_v59 = vpop.f32.mrb[127].mxu0  ;;  %v1952_v53 = vadd.f32 %v5035_v47, %v5885_v17  ;;  %v2017_v60 = vmax.f32 %v1949_v31, 0.0 }
 0x31d   : > { %v2239_v46 = vunpack.c.l.b16 %v4596_v40  ;;  %v2147_v49 = vmax.f32 %v2146_v43, %v2014_v50  ;;  %v1944_v51 = vadd.f32 %v5885_v17, %v1943_v59  ;;  %v2142_v52 = vmax.f32 %v2140_v39, %v2141_v45 }
 0x31e   : > { %v2015_v56 = vmax.f32 %v1941_v44, 0.0  ;;  %v2018_v4 = vmax.f32 %v1952_v53, 0.0 }
 0x31f   : > { %v2260_v54 = vsel %vm2249_vm7, %v2239_v46, %v2259_v30  ;;  %v2148_v55 = vrot.slane %v2147_v49, 4  ;;  %v2016_v57 = vmax.f32 %v1944_v51, 0.0  ;;  %v2143_v33 = vrot.slane %v2142_v52, 1 }
 0x321   : > { %v2149_v58 = vmax.f32 %v2147_v49, %v2148_v55  ;;  %v2154_v61 = vmax.f32 %v2015_v56, %v2016_v57  ;;  %v5112_v62 = vpop.f32.mrb[128].mxu0  ;;  %v2144_v63 = vmax.f32 %v2142_v52, %v2143_v33 }
 0x322   : > { %v3115_v1 = vadd.f32 %v5999_v0, %v5112_v62  ;;  %v3106_v2 = vpop.f32.mrb[129].mxu0 }
 0x323   : > { %v2150_v17 = vrot.slane %v2149_v58, 2  ;;  %v2155_v3 = vmax.f32 %v2154_v61, %v2017_v60  ;;  %v3107_v6 = vadd.f32 %v5999_v0, %v3106_v2  ;;  %v5113_v7 = vpop.f32.mrb[130].mxu0  ;;  %v4597_v8 = vpack.c.bf16 %v2144_v63, %v2144_v63 }
 0x324   : > { %v3118_v9 = vadd.f32 %v5999_v0, %v5113_v7  ;;  %v3109_v10 = vpop.f32.mrb[131].mxu0  ;;  %v3363_v15 = vmax.f32 %v3115_v1, 0.0 }
 0x325   : > { %v2151_v11 = vmax.f32 %v2149_v58, %v2150_v17  ;;  %v2156_v12 = vmax.f32 %v2155_v3, %v2018_v4  ;;  %v3110_v13 = vadd.f32 %v5999_v0, %v3109_v10  ;;  %v2240_v14 = vunpack.c.l.b16 %v4597_v8 }
 0x326   : > { %v3364_v5 = vmax.f32 %v3118_v9, 0.0  ;;  %v3361_v19 = vmax.f32 %v3107_v6, 0.0 }
 0x327   : > { %v2152_v16 = vrot.slane %v2151_v11, 1  ;;  %v2157_v18 = vrot.slane %v2156_v12, 4  ;;  %v3362_v20 = vmax.f32 %v3110_v13, 0.0  ;;  %v2261_v21 = vsel %vm2251_vm8, %v2240_v14, %v2260_v54 }
 0x328   : > { %v3426_v22 = vpack.c.bf16 %v3364_v5, %v3363_v15 }
 0x329   : > { %v2153_v23 = vmax.f32 %v2151_v11, %v2152_v16  ;;  %v2158_v24 = vmax.f32 %v2156_v12, %v2157_v18  ;;  %v3425_v25 = vpack.c.bf16 %v3362_v20, %v3361_v19  ;;  %v5116_v26 = vpop.f32.mrb[132].mxu0 }
 0x32a   : > { %v3131_v27 = vadd.f32 %v5999_v0, %v5116_v26  ;;  %v3122_v28 = vpop.f32.mrb[133].mxu0 }
 0x32b   : > { %v4598_v29 = vpack.c.bf16 %v2153_v23, %v2153_v23  ;;  %v2159_v30 = vrot.slane %v2158_v24, 2  ;;  %v3123_v32 = vadd.f32 %v5999_v0, %v3122_v28  ;;  %v5117_v34 = vpop.f32.mrb[134].mxu0  ;;  %5182 = vmatprep.mubr.msk.bf16.mxu1 %vm1058_vm3, %v3425_v25 }
 0x32c   : > { %v3134_v35 = vadd.f32 %v5999_v0, %v5117_v34  ;;  %v3125_v36 = vpop.f32.mrb[135].mxu0  ;;  %5183 = vmatmul.mubr.msk.bf16.vlgmr.msra.gmra.mrb[128].mxu1 %vm1058_vm3, %v3426_v22  ;;  %v3367_v42 = vmax.f32 %v3131_v27, 0.0 }
 0x32d   : > { %v2241_v48 = vunpack.c.l.b16 %v4598_v29  ;;  %v2160_v37 = vmax.f32 %v2158_v24, %v2159_v30  ;;  %v3126_v38 = vadd.f32 %v5999_v0, %v3125_v36  ;;  %v3365_v50 = vmax.f32 %v3123_v32, 0.0 }
 0x32e   : > { %v3368_v39 = vmax.f32 %v3134_v35, 0.0 }
 0x32f   : > { %v2262_v41 = vsel %vm2253_vm9, %v2241_v48, %v2261_v21  ;;  %v2161_v40 = vrot.slane %v2160_v37, 1  ;;  %v3366_v43 = vmax.f32 %v3126_v38, 0.0 }
 0x330   : > { %v3428_v44 = vpack.c.bf16 %v3368_v39, %v3367_v42 }
 0x331   : > { %v2162_v47 = vmax.f32 %v2160_v37, %v2161_v40  ;;  %v3427_v45 = vpack.c.bf16 %v3366_v43, %v3365_v50  ;;  %v5120_v59 = vpop.f32.mrb[136].mxu0 }
 0x332   : > { %v3147_v46 = vadd.f32 %v5999_v0, %v5120_v59  ;;  %v3138_v49 = vpop.f32.mrb[137].mxu0 }
 0x333   : > { %v4599_v31 = vpack.c.bf16 %v2162_v47, %v2162_v47  ;;  %v3139_v51 = vadd.f32 %v5999_v0, %v3138_v49  ;;  %v5121_v52 = vpop.f32.mrb[138].mxu0  ;;  %5186 = vmatprep.mubr.msk.bf16.mxu1 %vm1058_vm3, %v3427_v45 }
 0x334   : > { %v3150_v53 = vadd.f32 %v5999_v0, %v5121_v52  ;;  %v3141_v54 = vpop.f32.mrb[139].mxu0  ;;  %5187 = vmatmul.mubr.msk.bf16.gmra.mrb[132].mxu1 %vm1058_vm3, %v3428_v44  ;;  %v3371_v57 = vmax.f32 %v3147_v46, 0.0 }
 0x335   : > { %v2242_v55 = vunpack.c.l.b16 %v4599_v31  ;;  %v3142_v56 = vadd.f32 %v5999_v0, %v3141_v54  ;;  %v3369_v60 = vmax.f32 %v3139_v51, 0.0 }
 0x336   : > { %v3372_v33 = vmax.f32 %v3150_v53, 0.0 }
 0x337   : > { %v2263_v58 = vsel %vm2255_vm10, %v2242_v55, %v2262_v41  ;;  %v3370_v61 = vmax.f32 %v3142_v56, 0.0 }
 0x338   : > { %v2265_v62 = vpack.c.b16 %v2263_v58, %v2263_v58  ;;  %v3430_v63 = vpack.c.bf16 %v3372_v33, %v3371_v57 }
 0x339   : > { %v3429_v1 = vpack.c.bf16 %v3370_v61, %v3369_v60  ;;  %v5124_v2 = vpop.f32.mrb[140].mxu0 }
 0x33a   : > { %2269 = vst [vmem:[%s5967_s20 + $0x4] sm:$0xf] %v2265_v62  ;;  %v3163_v17 = vadd.f32 %v5999_v0, %v5124_v2  ;;  %v3154_v4 = vpop.f32.mrb[141].mxu0 }
 0x33b   : > { %v3155_v3 = vadd.f32 %v5999_v0, %v3154_v4  ;;  %v5125_v6 = vpop.f32.mrb[142].mxu0  ;;  %5190 = vmatprep.mubr.msk.bf16.mxu1 %vm1058_vm3, %v3429_v1 }
 0x33c   : > { %v3166_v7 = vadd.f32 %v5999_v0, %v5125_v6  ;;  %v3157_v8 = vpop.f32.mrb[143].mxu0  ;;  %5191 = vmatmul.mubr.msk.bf16.gmra.mrb[136].mxu1 %vm1058_vm3, %v3430_v63  ;;  %v3375_v10 = vmax.f32 %v3163_v17, 0.0 }
 0x33d   : > { %v3158_v9 = vadd.f32 %v5999_v0, %v3157_v8  ;;  %v3373_v12 = vmax.f32 %v3155_v3, 0.0 }
 0x33e   : > { %v3376_v11 = vmax.f32 %v3166_v7, 0.0 }
 0x33f   : > { %v3374_v13 = vmax.f32 %v3158_v9, 0.0 }
 0x340   : > { %v3432_v14 = vpack.c.bf16 %v3376_v11, %v3375_v10 }
 0x341   : > { %v3431_v15 = vpack.c.bf16 %v3374_v13, %v3373_v12  ;;  %v5128_v5 = vpop.f32.mrb[144].mxu0 }
 0x342   : > { %v3179_v16 = vadd.f32 %v5999_v0, %v5128_v5  ;;  %v3170_v18 = vpop.f32.mrb[145].mxu0 }
 0x343   : > { %v3171_v19 = vadd.f32 %v5999_v0, %v3170_v18  ;;  %v5129_v20 = vpop.f32.mrb[146].mxu0  ;;  %5194 = vmatprep.mubr.msk.bf16.mxu1 %vm1058_vm3, %v3431_v15 }
 0x344   : > { %v3182_v21 = vadd.f32 %v5999_v0, %v5129_v20  ;;  %v3173_v22 = vpop.f32.mrb[147].mxu0  ;;  %5195 = vmatmul.mubr.msk.bf16.gmra.mrb[140].mxu1 %vm1058_vm3, %v3432_v14  ;;  %v3379_v24 = vmax.f32 %v3179_v16, 0.0 }
 0x345   : > { %v3174_v23 = vadd.f32 %v5999_v0, %v3173_v22  ;;  %v3377_v26 = vmax.f32 %v3171_v19, 0.0 }
 0x346   : > { %v3380_v25 = vmax.f32 %v3182_v21, 0.0 }
 0x347   : > { %v3378_v27 = vmax.f32 %v3174_v23, 0.0 }
 0x348   : > { %v3434_v28 = vpack.c.bf16 %v3380_v25, %v3379_v24 }
 0x349   : > { %v3433_v29 = vpack.c.bf16 %v3378_v27, %v3377_v26  ;;  %v5132_v30 = vpop.f32.mrb[148].mxu0 }
 0x34a   : > { %v3195_v32 = vadd.f32 %v5999_v0, %v5132_v30  ;;  %v3186_v34 = vpop.f32.mrb[149].mxu0 }
 0x34b   : > { %v3187_v35 = vadd.f32 %v5999_v0, %v3186_v34  ;;  %v5133_v36 = vpop.f32.mrb[150].mxu0  ;;  %5198 = vmatprep.mubr.msk.bf16.mxu1 %vm1058_vm3, %v3433_v29 }
 0x34c   : > { %v3198_v48 = vadd.f32 %v5999_v0, %v5133_v36  ;;  %v3189_v37 = vpop.f32.mrb[151].mxu0  ;;  %5199 = vmatmul.mubr.msk.bf16.gmra.mrb[144].mxu1 %vm1058_vm3, %v3434_v28  ;;  %v3383_v42 = vmax.f32 %v3195_v32, 0.0 }
 0x34d   : > { %v3190_v38 = vadd.f32 %v5999_v0, %v3189_v37  ;;  %v3381_v41 = vmax.f32 %v3187_v35, 0.0 }
 0x34e   : > { %v3384_v39 = vmax.f32 %v3198_v48, 0.0 }
 0x34f   : > { %v3382_v40 = vmax.f32 %v3190_v38, 0.0 }
 0x350   : > { %v3436_v50 = vpack.c.bf16 %v3384_v39, %v3383_v42 }
 0x351   : > { %v3435_v43 = vpack.c.bf16 %v3382_v40, %v3381_v41  ;;  %v5136_v44 = vpop.f32.mrb[152].mxu0 }
 0x352   : > { %v3211_v47 = vadd.f32 %v5999_v0, %v5136_v44  ;;  %v3202_v45 = vpop.f32.mrb[153].mxu0 }
 0x353   : > { %v3203_v59 = vadd.f32 %v5999_v0, %v3202_v45  ;;  %v5137_v46 = vpop.f32.mrb[154].mxu0  ;;  %5202 = vmatprep.mubr.msk.bf16.mxu1 %vm1058_vm3, %v3435_v43 }
 0x354   : > { %v3214_v49 = vadd.f32 %v5999_v0, %v5137_v46  ;;  %v3205_v31 = vpop.f32.mrb[155].mxu0  ;;  %5203 = vmatmul.mubr.msk.bf16.gmra.mrb[148].mxu1 %vm1058_vm3, %v3436_v50  ;;  %v3387_v52 = vmax.f32 %v3211_v47, 0.0 }
 0x355   : > { %v3206_v51 = vadd.f32 %v5999_v0, %v3205_v31  ;;  %v3385_v54 = vmax.f32 %v3203_v59, 0.0 }
 0x356   : > { %v3388_v53 = vmax.f32 %v3214_v49, 0.0 }
 0x357   : > { %v3386_v55 = vmax.f32 %v3206_v51, 0.0 }
 0x358   : > { %v3438_v56 = vpack.c.bf16 %v3388_v53, %v3387_v52 }
 0x359   : > { %v3437_v57 = vpack.c.bf16 %v3386_v55, %v3385_v54  ;;  %v5140_v33 = vpop.f32.mrb[156].mxu0 }
 0x35a   : > { %v3227_v58 = vadd.f32 %v5999_v0, %v5140_v33  ;;  %v3218_v60 = vpop.f32.mrb[157].mxu0 }
 0x35b   : > { %v3219_v61 = vadd.f32 %v5999_v0, %v3218_v60  ;;  %v5141_v62 = vpop.f32.mrb[158].mxu0  ;;  %5206 = vmatprep.mubr.msk.bf16.mxu1 %vm1058_vm3, %v3437_v57 }
 0x35c   : > { %v3230_v63 = vadd.f32 %v5999_v0, %v5141_v62  ;;  %v3221_v1 = vpop.f32.mrb[159].mxu0  ;;  %5207 = vmatmul.mubr.msk.bf16.gmra.mrb[152].mxu1 %vm1058_vm3, %v3438_v56  ;;  %v3391_v17 = vmax.f32 %v3227_v58, 0.0 }
 0x35d   : > { %v3222_v2 = vadd.f32 %v5999_v0, %v3221_v1  ;;  %v3389_v3 = vmax.f32 %v3219_v61, 0.0 }
 0x35e   : > { %v3392_v4 = vmax.f32 %v3230_v63, 0.0 }
 0x35f   : > { %v3390_v6 = vmax.f32 %v3222_v2, 0.0 }
 0x360   : > { %v3440_v7 = vpack.c.bf16 %v3392_v4, %v3391_v17 }
 0x361   : > { %v3439_v8 = vpack.c.bf16 %v3390_v6, %v3389_v3  ;;  %v5144_v9 = vpop.f32.mrb[160].mxu0 }
 0x362   : > { %v3243_v10 = vadd.f32 %v5999_v0, %v5144_v9  ;;  %v3234_v11 = vpop.f32.mrb[161].mxu0 }
 0x363   : > { %v3235_v12 = vadd.f32 %v5999_v0, %v3234_v11  ;;  %v5145_v13 = vpop.f32.mrb[162].mxu0  ;;  %5210 = vmatprep.mubr.msk.bf16.mxu1 %vm1058_vm3, %v3439_v8 }
 0x364   : > { %v3246_v14 = vadd.f32 %v5999_v0, %v5145_v13  ;;  %v3237_v15 = vpop.f32.mrb[163].mxu0  ;;  %5211 = vmatmul.mubr.msk.bf16.gmra.mrb[156].mxu1 %vm1058_vm3, %v3440_v7  ;;  %v3395_v16 = vmax.f32 %v3243_v10, 0.0 }
 0x365   : > { %v3238_v5 = vadd.f32 %v5999_v0, %v3237_v15  ;;  %v3393_v19 = vmax.f32 %v3235_v12, 0.0 }
 0x366   : > { %v3396_v18 = vmax.f32 %v3246_v14, 0.0 }
 0x367   : > { %v3394_v20 = vmax.f32 %v3238_v5, 0.0 }
 0x368   : > { %v3442_v21 = vpack.c.bf16 %v3396_v18, %v3395_v16 }
 0x369   : > { %v3441_v22 = vpack.c.bf16 %v3394_v20, %v3393_v19  ;;  %v5148_v23 = vpop.f32.mrb[164].mxu0 }
 0x36a   : > { %v3259_v24 = vadd.f32 %v5999_v0, %v5148_v23  ;;  %v3250_v25 = vpop.f32.mrb[165].mxu0 }
 0x36b   : > { %v3251_v26 = vadd.f32 %v5999_v0, %v3250_v25  ;;  %v5149_v27 = vpop.f32.mrb[166].mxu0  ;;  %5214 = vmatprep.mubr.msk.bf16.mxu1 %vm1058_vm3, %v3441_v22 }
 0x36c   : > { %v3262_v28 = vadd.f32 %v5999_v0, %v5149_v27  ;;  %v3253_v29 = vpop.f32.mrb[167].mxu0  ;;  %5215 = vmatmul.mubr.msk.bf16.gmra.mrb[160].mxu1 %vm1058_vm3, %v3442_v21  ;;  %v3399_v32 = vmax.f32 %v3259_v24, 0.0 }
 0x36d   : > { %v3254_v30 = vadd.f32 %v5999_v0, %v3253_v29  ;;  %v3397_v35 = vmax.f32 %v3251_v26, 0.0 }
 0x36e   : > { %v3400_v34 = vmax.f32 %v3262_v28, 0.0 }
 0x36f   : > { %v3398_v36 = vmax.f32 %v3254_v30, 0.0 }
 0x370   : > { %v3444_v48 = vpack.c.bf16 %v3400_v34, %v3399_v32 }
 0x371   : > { %v3443_v37 = vpack.c.bf16 %v3398_v36, %v3397_v35  ;;  %v5152_v38 = vpop.f32.mrb[168].mxu0 }
 0x372   : > { %v3275_v42 = vadd.f32 %v5999_v0, %v5152_v38  ;;  %v3266_v39 = vpop.f32.mrb[169].mxu0 }
 0x373   : > { %v3267_v41 = vadd.f32 %v5999_v0, %v3266_v39  ;;  %v5153_v40 = vpop.f32.mrb[170].mxu0  ;;  %5218 = vmatprep.mubr.msk.bf16.mxu1 %vm1058_vm3, %v3443_v37 }
 0x374   : > { %v3278_v50 = vadd.f32 %v5999_v0, %v5153_v40  ;;  %v3269_v43 = vpop.f32.mrb[171].mxu0  ;;  %5219 = vmatmul.mubr.msk.bf16.gmra.mrb[164].mxu1 %vm1058_vm3, %v3444_v48  ;;  %v3403_v47 = vmax.f32 %v3275_v42, 0.0 }
 0x375   : > { %v3270_v44 = vadd.f32 %v5999_v0, %v3269_v43  ;;  %v3401_v59 = vmax.f32 %v3267_v41, 0.0 }
 0x376   : > { %v3404_v45 = vmax.f32 %v3278_v50, 0.0 }
 0x377   : > { %v3402_v46 = vmax.f32 %v3270_v44, 0.0 }
 0x378   : > { %v3446_v49 = vpack.c.bf16 %v3404_v45, %v3403_v47 }
 0x379   : > { %v3445_v31 = vpack.c.bf16 %v3402_v46, %v3401_v59  ;;  %v5156_v51 = vpop.f32.mrb[172].mxu0 }
 0x37a   : > { %v3291_v52 = vadd.f32 %v5999_v0, %v5156_v51  ;;  %v3282_v53 = vpop.f32.mrb[173].mxu0 }
 0x37b   : > { %v3283_v54 = vadd.f32 %v5999_v0, %v3282_v53  ;;  %v5157_v55 = vpop.f32.mrb[174].mxu0  ;;  %5222 = vmatprep.mubr.msk.bf16.mxu1 %vm1058_vm3, %v3445_v31 }
 0x37c   : > { %v3294_v56 = vadd.f32 %v5999_v0, %v5157_v55  ;;  %v3285_v57 = vpop.f32.mrb[175].mxu0  ;;  %5223 = vmatmul.mubr.msk.bf16.gmra.mrb[168].mxu1 %vm1058_vm3, %v3446_v49  ;;  %v3407_v58 = vmax.f32 %v3291_v52, 0.0 }
 0x37d   : > { %v3286_v33 = vadd.f32 %v5999_v0, %v3285_v57  ;;  %v3405_v61 = vmax.f32 %v3283_v54, 0.0 }
 0x37e   : > { %v3408_v60 = vmax.f32 %v3294_v56, 0.0 }
 0x37f   : > { %v3406_v62 = vmax.f32 %v3286_v33, 0.0 }
 0x380   : > { %v3448_v63 = vpack.c.bf16 %v3408_v60, %v3407_v58  ;;  %v6104_v60 = vld [vmem:[%s6195_s6] ss:$0 sm:$0xff] }
 0x381   : > { %v3447_v1 = vpack.c.bf16 %v3406_v62, %v3405_v61  ;;  %v5160_v2 = vpop.f32.mrb[176].mxu0 }
 0x382   : > { %v3307_v17 = vadd.f32 %v5999_v0, %v5160_v2  ;;  %v3298_v4 = vpop.f32.mrb[177].mxu0 }
 0x383   : > { %v3299_v3 = vadd.f32 %v5999_v0, %v3298_v4  ;;  %v5161_v6 = vpop.f32.mrb[178].mxu0  ;;  %5226 = vmatprep.mubr.msk.bf16.mxu1 %vm1058_vm3, %v3447_v1 }
 0x384   : > { %v3310_v7 = vadd.f32 %v5999_v0, %v5161_v6  ;;  %v3301_v8 = vpop.f32.mrb[179].mxu0  ;;  %5227 = vmatmul.mubr.msk.bf16.gmra.mrb[172].mxu1 %vm1058_vm3, %v3448_v63  ;;  %v3411_v10 = vmax.f32 %v3307_v17, 0.0 }
 0x385   : > { %v3302_v9 = vadd.f32 %v5999_v0, %v3301_v8  ;;  %v3409_v12 = vmax.f32 %v3299_v3, 0.0 }
 0x386   : > { %v3412_v11 = vmax.f32 %v3310_v7, 0.0 }
 0x387   : > { %v3410_v13 = vmax.f32 %v3302_v9, 0.0 }
 0x388   : > { %v3450_v14 = vpack.c.bf16 %v3412_v11, %v3411_v10 }
 0x389   : > { %v3449_v15 = vpack.c.bf16 %v3410_v13, %v3409_v12  ;;  %v5164_v5 = vpop.f32.mrb[180].mxu0 }
 0x38a   : > { %v3323_v16 = vadd.f32 %v5999_v0, %v5164_v5  ;;  %v3314_v18 = vpop.f32.mrb[181].mxu0 }
 0x38b   : > { %v3315_v19 = vadd.f32 %v5999_v0, %v3314_v18  ;;  %v5165_v20 = vpop.f32.mrb[182].mxu0  ;;  %5230 = vmatprep.mubr.msk.bf16.mxu1 %vm1058_vm3, %v3449_v15 }
 0x38c   : > { %v3326_v21 = vadd.f32 %v5999_v0, %v5165_v20  ;;  %v3317_v22 = vpop.f32.mrb[183].mxu0  ;;  %5231 = vmatmul.mubr.msk.bf16.gmra.mrb[176].mxu1 %vm1058_vm3, %v3450_v14  ;;  %v3415_v24 = vmax.f32 %v3323_v16, 0.0 }
 0x38d   : > { %v3318_v23 = vadd.f32 %v5999_v0, %v3317_v22  ;;  %v3413_v26 = vmax.f32 %v3315_v19, 0.0 }
 0x38e   : > { %v3416_v25 = vmax.f32 %v3326_v21, 0.0 }
 0x38f   : > { %v3414_v27 = vmax.f32 %v3318_v23, 0.0 }
 0x390   : > { %v3452_v28 = vpack.c.bf16 %v3416_v25, %v3415_v24 }
 0x391   : > { %v3451_v29 = vpack.c.bf16 %v3414_v27, %v3413_v26  ;;  %v5168_v30 = vpop.f32.mrb[184].mxu0 }
 0x392   : > { %v3339_v32 = vadd.f32 %v5999_v0, %v5168_v30  ;;  %v3330_v34 = vpop.f32.mrb[185].mxu0 }
 0x393   : > { %v3331_v35 = vadd.f32 %v5999_v0, %v3330_v34  ;;  %v5169_v36 = vpop.f32.mrb[186].mxu0  ;;  %5234 = vmatprep.mubr.msk.bf16.mxu1 %vm1058_vm3, %v3451_v29 }
 0x394   : > { %v3342_v48 = vadd.f32 %v5999_v0, %v5169_v36  ;;  %v3333_v37 = vpop.f32.mrb[187].mxu0  ;;  %5235 = vmatmul.mubr.msk.bf16.gmra.mrb[180].mxu1 %vm1058_vm3, %v3452_v28  ;;  %v3419_v42 = vmax.f32 %v3339_v32, 0.0 }
 0x395   : > { %v3334_v38 = vadd.f32 %v5999_v0, %v3333_v37  ;;  %v3417_v41 = vmax.f32 %v3331_v35, 0.0 }
 0x396   : > { %v3420_v39 = vmax.f32 %v3342_v48, 0.0 }
 0x397   : > { %v3418_v40 = vmax.f32 %v3334_v38, 0.0 }
 0x398   : > { %v3454_v50 = vpack.c.bf16 %v3420_v39, %v3419_v42 }
 0x399   : > { %v3453_v43 = vpack.c.bf16 %v3418_v40, %v3417_v41  ;;  %v5172_v44 = vpop.f32.mrb[188].mxu0 }
 0x39a   : > { %v3355_v47 = vadd.f32 %v5999_v0, %v5172_v44  ;;  %v3346_v45 = vpop.f32.mrb[189].mxu0 }
 0x39b   : > { %5238 = vmatprep.mubr.msk.bf16.mxu1 %vm1058_vm3, %v3453_v43  ;;  %v3347_v59 = vadd.f32 %v5999_v0, %v3346_v45  ;;  %v5173_v46 = vpop.f32.mrb[190].mxu0 }
 0x39c   : > { %5239 = vmatmul.mubr.msk.bf16.gmra.mrb[184].mxu1 %vm1058_vm3, %v3454_v50  ;;  %v3358_v49 = vadd.f32 %v5999_v0, %v5173_v46  ;;  %v3349_v31 = vpop.f32.mrb[191].mxu0  ;;  %v3423_v52 = vmax.f32 %v3355_v47, 0.0 }
 0x39d   : > { %v3350_v51 = vadd.f32 %v5999_v0, %v3349_v31  ;;  %v3421_v54 = vmax.f32 %v3347_v59, 0.0 }
 0x39e   : > { %v3424_v53 = vmax.f32 %v3358_v49, 0.0 }
 0x39f   : > { %v3422_v55 = vmax.f32 %v3350_v51, 0.0 }
 0x3a0   : > { %v3456_v56 = vpack.c.bf16 %v3424_v53, %v3423_v52 }
 0x3a1   : > { %v3455_v57 = vpack.c.bf16 %v3422_v55, %v3421_v54 }
 0x3a3   : > { %5242 = vmatprep.mubr.msk.bf16.mxu1 %vm1058_vm3, %v3455_v57 }
 0x3a4   : > { %5243 = vmatmul.mubr.msk.bf16.gmra.mrb[188].mxu1 %vm1058_vm3, %v3456_v56 }
 0x3ff   : > { %v5184_v33 = vpop.f32.mrb[128].mxu1 }
 0x400   : > { %v3587_v58 = vpop.f32.mrb[129].mxu1  ;;  %v3596_v63 = vadd.f32 %v6104_v60, %v5184_v33 }
 0x401   : > { %v3588_v61 = vadd.f32 %v6104_v60, %v3587_v58  ;;  %v5185_v0 = vpop.f32.mrb[130].mxu1 }
 0x402   : > { %v3590_v62 = vpop.f32.mrb[131].mxu1  ;;  %v3599_v17 = vadd.f32 %v6104_v60, %v5185_v0  ;;  %v3844_v3 = vmax.f32 %v3596_v63, 0.0 }
 0x403   : > { %v3591_v1 = vadd.f32 %v6104_v60, %v3590_v62  ;;  %v3842_v2 = vmax.f32 %v3588_v61, 0.0 }
 0x404   : > { %v3845_v9 = vmax.f32 %v3599_v17, 0.0 }
 0x405   : > { %v3843_v4 = vmax.f32 %v3591_v1, 0.0 }
 0x407   : > { %v3906_v6 = vmax.f32 %v3842_v2, %v3843_v4  ;;  %v5188_v7 = vpop.f32.mrb[132].mxu1 }
 0x408   : > { %v3603_v8 = vpop.f32.mrb[133].mxu1  ;;  %v3612_v15 = vadd.f32 %v6104_v60, %v5188_v7 }
 0x409   : > { %v3907_v10 = vmax.f32 %v3906_v6, %v3844_v3  ;;  %v3604_v11 = vadd.f32 %v6104_v60, %v3603_v8  ;;  %v5189_v12 = vpop.f32.mrb[134].mxu1 }
 0x40a   : > { %v3606_v13 = vpop.f32.mrb[135].mxu1  ;;  %v3615_v19 = vadd.f32 %v6104_v60, %v5189_v12  ;;  %v3848_v22 = vmax.f32 %v3612_v15, 0.0 }
 0x40b   : > { %v3908_v14 = vmax.f32 %v3907_v10, %v3845_v9  ;;  %v3607_v5 = vadd.f32 %v6104_v60, %v3606_v13  ;;  %v3846_v18 = vmax.f32 %v3604_v11, 0.0 }
 0x40c   : > { %v3849_v27 = vmax.f32 %v3615_v19, 0.0 }
 0x40d   : > { %v3909_v16 = vrot.slane %v3908_v14, 4  ;;  %v3847_v20 = vmax.f32 %v3607_v5, 0.0 }
 0x40f   : > { %v3910_v21 = vmax.f32 %v3908_v14, %v3909_v16  ;;  %v3915_v23 = vmax.f32 %v3846_v18, %v3847_v20  ;;  %v5192_v24 = vpop.f32.mrb[136].mxu1 }
 0x410   : > { %v3619_v25 = vpop.f32.mrb[137].mxu1  ;;  %v3628_v36 = vadd.f32 %v6104_v60, %v5192_v24 }
 0x411   : > { %v3911_v26 = vrot.slane %v3910_v21, 2  ;;  %v3916_v28 = vmax.f32 %v3915_v23, %v3848_v22  ;;  %v3620_v29 = vadd.f32 %v6104_v60, %v3619_v25  ;;  %v5193_v30 = vpop.f32.mrb[138].mxu1 }
 0x412   : > { %v3622_v32 = vpop.f32.mrb[139].mxu1  ;;  %v3631_v42 = vadd.f32 %v6104_v60, %v5193_v30  ;;  %v3852_v50 = vmax.f32 %v3628_v36, 0.0 }
 0x413   : > { %v3912_v34 = vmax.f32 %v3910_v21, %v3911_v26  ;;  %v3917_v35 = vmax.f32 %v3916_v28, %v3849_v27  ;;  %v3623_v48 = vadd.f32 %v6104_v60, %v3622_v32  ;;  %v3850_v38 = vmax.f32 %v3620_v29, 0.0 }
 0x414   : > { %v3853_v59 = vmax.f32 %v3631_v42, 0.0 }
 0x415   : > { %v3918_v37 = vrot.slane %v3917_v35, 4  ;;  %v3851_v39 = vmax.f32 %v3623_v48, 0.0  ;;  %v3913_v41 = vrot.slane %v3912_v34, 1 }
 0x417   : > { %v3919_v40 = vmax.f32 %v3917_v35, %v3918_v37  ;;  %v3924_v43 = vmax.f32 %v3850_v38, %v3851_v39  ;;  %v5196_v44 = vpop.f32.mrb[140].mxu1  ;;  %v3914_v31 = vmax.f32 %v3912_v34, %v3913_v41 }
 0x418   : > { %v3635_v47 = vpop.f32.mrb[141].mxu1  ;;  %v3644_v55 = vadd.f32 %v6104_v60, %v5196_v44 }
 0x419   : > { %v3920_v45 = vrot.slane %v3919_v40, 2  ;;  %v3925_v46 = vmax.f32 %v3924_v43, %v3852_v50  ;;  %v5197_v49 = vpop.f32.mrb[142].mxu1  ;;  %v3636_v51 = vadd.f32 %v6104_v60, %v3635_v47  ;;  %v4600_v58 = vpack.c.bf16 %v3914_v31, %v3914_v31 }
 0x41a   : > { %v3638_v52 = vpop.f32.mrb[143].mxu1  ;;  %v3647_v0 = vadd.f32 %v6104_v60, %v5197_v49  ;;  %v3856_v17 = vmax.f32 %v3644_v55, 0.0 }
 0x41b   : > { %v3921_v53 = vmax.f32 %v3919_v40, %v3920_v45  ;;  %v3926_v54 = vmax.f32 %v3925_v46, %v3853_v59  ;;  %v3639_v56 = vadd.f32 %v6104_v60, %v3638_v52  ;;  %v3854_v61 = vmax.f32 %v3636_v51, 0.0 }
 0x41c   : > { %v4114_v10 = vunpack.c.l.b16 %v4600_v58  ;;  %v3857_v11 = vmax.f32 %v3647_v0, 0.0 }
 0x41d   : > { %v3922_v57 = vrot.slane %v3921_v53, 1  ;;  %v3927_v33 = vrot.slane %v3926_v54, 4  ;;  %v3855_v62 = vmax.f32 %v3639_v56, 0.0 }
 0x41f   : > { %v3923_v63 = vmax.f32 %v3921_v53, %v3922_v57  ;;  %v3928_v1 = vmax.f32 %v3926_v54, %v3927_v33  ;;  %v5200_v2 = vpop.f32.mrb[144].mxu1  ;;  %v3933_v4 = vmax.f32 %v3854_v61, %v3855_v62 }
 0x420   : > { %v3651_v3 = vpop.f32.mrb[145].mxu1  ;;  %v3660_v5 = vadd.f32 %v6104_v60, %v5200_v2 }
 0x421   : > { %v4601_v6 = vpack.c.bf16 %v3923_v63, %v3923_v63  ;;  %v3929_v7 = vrot.slane %v3928_v1, 2  ;;  %v3652_v8 = vadd.f32 %v6104_v60, %v3651_v3  ;;  %v5201_v9 = vpop.f32.mrb[146].mxu1  ;;  %v3934_v12 = vmax.f32 %v3933_v4, %v3856_v17 }
 0x422   : > { %v3654_v13 = vpop.f32.mrb[147].mxu1  ;;  %v3663_v19 = vadd.f32 %v6104_v60, %v5201_v9  ;;  %v3860_v26 = vmax.f32 %v3660_v5, 0.0 }
 0x423   : > { %v4115_v14 = vunpack.c.l.b16 %v4601_v6  ;;  %v3930_v15 = vmax.f32 %v3928_v1, %v3929_v7  ;;  %v3655_v16 = vadd.f32 %v6104_v60, %v3654_v13  ;;  %v3935_v18 = vmax.f32 %v3934_v12, %v3857_v11 }
 0x424   : > { %v3858_v22 = vmax.f32 %v3652_v8, 0.0  ;;  %v3861_v34 = vmax.f32 %v3663_v19, 0.0 }
 0x425   : > { %v4130_v20 = vsel %vm2243_vm4, %v4115_v14, %v4114_v10  ;;  %v3931_v21 = vrot.slane %v3930_v15, 1  ;;  %v3859_v23 = vmax.f32 %v3655_v16, 0.0  ;;  %v3936_v24 = vrot.slane %v3935_v18, 4 }
 0x427   : > { %v3932_v25 = vmax.f32 %v3930_v15, %v3931_v21  ;;  %v3942_v27 = vmax.f32 %v3858_v22, %v3859_v23  ;;  %v5204_v28 = vpop.f32.mrb[148].mxu1  ;;  %v3937_v29 = vmax.f32 %v3935_v18, %v3936_v24 }
 0x428   : > { %v3667_v30 = vpop.f32.mrb[149].mxu1  ;;  %v3676_v41 = vadd.f32 %v6104_v60, %v5204_v28 }
 0x429   : > { %v4602_v32 = vpack.c.bf16 %v3932_v25, %v3932_v25  ;;  %v3943_v35 = vmax.f32 %v3942_v27, %v3860_v26  ;;  %v3668_v36 = vadd.f32 %v6104_v60, %v3667_v30  ;;  %v5205_v48 = vpop.f32.mrb[150].mxu1  ;;  %v3938_v37 = vrot.slane %v3937_v29, 2 }
 0x42a   : > { %v3670_v38 = vpop.f32.mrb[151].mxu1  ;;  %v3679_v43 = vadd.f32 %v6104_v60, %v5205_v48  ;;  %v3864_v31 = vmax.f32 %v3676_v41, 0.0 }
 0x42b   : > { %v4116_v42 = vunpack.c.l.b16 %v4602_v32  ;;  %v3944_v39 = vmax.f32 %v3943_v35, %v3861_v34  ;;  %v3671_v40 = vadd.f32 %v6104_v60, %v3670_v38  ;;  %v3939_v50 = vmax.f32 %v3937_v29, %v3938_v37 }
 0x42c   : > { %v3862_v45 = vmax.f32 %v3668_v36, 0.0  ;;  %v3865_v56 = vmax.f32 %v3679_v43, 0.0 }
 0x42d   : > { %v4131_v44 = vsel %vm2245_vm5, %v4116_v42, %v4130_v20  ;;  %v3945_v47 = vrot.slane %v3944_v39, 4  ;;  %v3863_v59 = vmax.f32 %v3671_v40, 0.0  ;;  %v3940_v46 = vrot.slane %v3939_v50, 1 }
 0x42f   : > { %v3946_v49 = vmax.f32 %v3944_v39, %v3945_v47  ;;  %v3951_v51 = vmax.f32 %v3862_v45, %v3863_v59  ;;  %v5208_v52 = vpop.f32.mrb[152].mxu1  ;;  %v3941_v53 = vmax.f32 %v3939_v50, %v3940_v46 }
 0x430   : > { %v3683_v54 = vpop.f32.mrb[153].mxu1  ;;  %v3692_v1 = vadd.f32 %v6104_v60, %v5208_v52 }
 0x431   : > { %v3947_v55 = vrot.slane %v3946_v49, 2  ;;  %v3952_v57 = vmax.f32 %v3951_v51, %v3864_v31  ;;  %v3684_v33 = vadd.f32 %v6104_v60, %v3683_v54  ;;  %v5209_v58 = vpop.f32.mrb[154].mxu1  ;;  %v4603_v61 = vpack.c.bf16 %v3941_v53, %v3941_v53 }
 0x432   : > { %v3686_v0 = vpop.f32.mrb[155].mxu1  ;;  %v3695_v4 = vadd.f32 %v6104_v60, %v5209_v58  ;;  %v3868_v12 = vmax.f32 %v3692_v1, 0.0 }
 0x433   : > { %v3948_v62 = vmax.f32 %v3946_v49, %v3947_v55  ;;  %v3953_v63 = vmax.f32 %v3952_v57, %v3865_v56  ;;  %v3687_v2 = vadd.f32 %v6104_v60, %v3686_v0  ;;  %v4117_v17 = vunpack.c.l.b16 %v4603_v61 }
 0x434   : > { %v3866_v7 = vmax.f32 %v3684_v33, 0.0  ;;  %v3869_v18 = vmax.f32 %v3695_v4, 0.0 }
 0x435   : > { %v3949_v3 = vrot.slane %v3948_v62, 1  ;;  %v3954_v6 = vrot.slane %v3953_v63, 4  ;;  %v3867_v8 = vmax.f32 %v3687_v2, 0.0  ;;  %v4132_v9 = vsel %vm2247_vm6, %v4117_v17, %v4131_v44 }
 0x437   : > { %v3950_v10 = vmax.f32 %v3948_v62, %v3949_v3  ;;  %v3955_v11 = vmax.f32 %v3953_v63, %v3954_v6  ;;  %v3960_v13 = vmax.f32 %v3866_v7, %v3867_v8  ;;  %v5212_v14 = vpop.f32.mrb[156].mxu1 }
 0x438   : > { %v3699_v15 = vpop.f32.mrb[157].mxu1  ;;  %v3708_v26 = vadd.f32 %v6104_v60, %v5212_v14 }
 0x439   : > { %v4604_v5 = vpack.c.bf16 %v3950_v10, %v3950_v10  ;;  %v3956_v16 = vrot.slane %v3955_v11, 2  ;;  %v3961_v19 = vmax.f32 %v3960_v13, %v3868_v12  ;;  %v5213_v20 = vpop.f32.mrb[158].mxu1  ;;  %v3700_v21 = vadd.f32 %v6104_v60, %v3699_v15 }
 0x43a   : > { %v3702_v22 = vpop.f32.mrb[159].mxu1  ;;  %v3711_v34 = vadd.f32 %v6104_v60, %v5213_v20  ;;  %v3872_v38 = vmax.f32 %v3708_v26, 0.0 }
 0x43b   : > { %v4118_v23 = vunpack.c.l.b16 %v4604_v5  ;;  %v3957_v24 = vmax.f32 %v3955_v11, %v3956_v16  ;;  %v3962_v25 = vmax.f32 %v3961_v19, %v3869_v18  ;;  %v3703_v27 = vadd.f32 %v6104_v60, %v3702_v22 }
 0x43c   : > { %v3870_v32 = vmax.f32 %v3700_v21, 0.0  ;;  %v3873_v44 = vmax.f32 %v3711_v34, 0.0 }
 0x43d   : > { %v4133_v28 = vsel %vm2249_vm7, %v4118_v23, %v4132_v9  ;;  %v3958_v29 = vrot.slane %v3957_v24, 1  ;;  %v3963_v30 = vrot.slane %v3962_v25, 4  ;;  %v3871_v35 = vmax.f32 %v3703_v27, 0.0 }
 0x43f   : > { %v3959_v36 = vmax.f32 %v3957_v24, %v3958_v29  ;;  %v3964_v48 = vmax.f32 %v3962_v25, %v3963_v30  ;;  %v5216_v37 = vpop.f32.mrb[160].mxu1  ;;  %v3969_v42 = vmax.f32 %v3870_v32, %v3871_v35 }
 0x440   : > { %v3715_v39 = vpop.f32.mrb[161].mxu1  ;;  %v3724_v49 = vadd.f32 %v6104_v60, %v5216_v37 }
 0x441   : > { %v4605_v41 = vpack.c.bf16 %v3959_v36, %v3959_v36  ;;  %v3965_v40 = vrot.slane %v3964_v48, 2  ;;  %v3716_v50 = vadd.f32 %v6104_v60, %v3715_v39  ;;  %v5217_v43 = vpop.f32.mrb[162].mxu1  ;;  %v3970_v47 = vmax.f32 %v3969_v42, %v3872_v38 }
 0x442   : > { %v3718_v45 = vpop.f32.mrb[163].mxu1  ;;  %v3727_v52 = vadd.f32 %v6104_v60, %v5217_v43  ;;  %v3876_v58 = vmax.f32 %v3724_v49, 0.0 }
 0x443   : > { %v4119_v59 = vunpack.c.l.b16 %v4605_v41  ;;  %v3966_v46 = vmax.f32 %v3964_v48, %v3965_v40  ;;  %v3719_v31 = vadd.f32 %v6104_v60, %v3718_v45  ;;  %v3971_v51 = vmax.f32 %v3970_v47, %v3873_v44 }
 0x444   : > { %v3874_v55 = vmax.f32 %v3716_v50, 0.0  ;;  %v3877_v2 = vmax.f32 %v3727_v52, 0.0 }
 0x445   : > { %v4134_v53 = vsel %vm2251_vm8, %v4119_v59, %v4133_v28  ;;  %v3967_v54 = vrot.slane %v3966_v46, 1  ;;  %v3875_v56 = vmax.f32 %v3719_v31, 0.0  ;;  %v3972_v57 = vrot.slane %v3971_v51, 4 }
 0x447   : > { %v3968_v33 = vmax.f32 %v3966_v46, %v3967_v54  ;;  %v3978_v61 = vmax.f32 %v3874_v55, %v3875_v56  ;;  %v5220_v0 = vpop.f32.mrb[164].mxu1  ;;  %v3973_v62 = vmax.f32 %v3971_v51, %v3972_v57 }
 0x448   : > { %v3731_v63 = vpop.f32.mrb[165].mxu1  ;;  %v3740_v10 = vadd.f32 %v6104_v60, %v5220_v0 }
 0x449   : > { %v4606_v1 = vpack.c.bf16 %v3968_v33, %v3968_v33  ;;  %v3979_v17 = vmax.f32 %v3978_v61, %v3876_v58  ;;  %v3732_v4 = vadd.f32 %v6104_v60, %v3731_v63  ;;  %v5221_v3 = vpop.f32.mrb[166].mxu1  ;;  %v3974_v6 = vrot.slane %v3973_v62, 2 }
 0x44a   : > { %v3734_v7 = vpop.f32.mrb[167].mxu1  ;;  %v3743_v13 = vadd.f32 %v6104_v60, %v5221_v3  ;;  %v3880_v20 = vmax.f32 %v3740_v10, 0.0 }
 0x44b   : > { %v4120_v8 = vunpack.c.l.b16 %v4606_v1  ;;  %v3980_v9 = vmax.f32 %v3979_v17, %v3877_v2  ;;  %v3735_v11 = vadd.f32 %v6104_v60, %v3734_v7  ;;  %v3975_v12 = vmax.f32 %v3973_v62, %v3974_v6 }
 0x44c   : > { %v3878_v5 = vmax.f32 %v3732_v4, 0.0  ;;  %v3881_v26 = vmax.f32 %v3743_v13, 0.0 }
 0x44d   : > { %v4135_v14 = vsel %vm2253_vm9, %v4120_v8, %v4134_v53  ;;  %v3981_v15 = vrot.slane %v3980_v9, 4  ;;  %v3879_v16 = vmax.f32 %v3735_v11, 0.0  ;;  %v3976_v18 = vrot.slane %v3975_v12, 1 }
 0x44f   : > { %v3982_v19 = vmax.f32 %v3980_v9, %v3981_v15  ;;  %v3987_v21 = vmax.f32 %v3878_v5, %v3879_v16  ;;  %v5224_v22 = vpop.f32.mrb[168].mxu1  ;;  %v3977_v23 = vmax.f32 %v3975_v12, %v3976_v18 }
 0x450   : > { %v3747_v24 = vpop.f32.mrb[169].mxu1  ;;  %v3756_v36 = vadd.f32 %v6104_v60, %v5224_v22 }
 0x451   : > { %v3983_v25 = vrot.slane %v3982_v19, 2  ;;  %v3988_v27 = vmax.f32 %v3987_v21, %v3880_v20  ;;  %v3748_v28 = vadd.f32 %v6104_v60, %v3747_v24  ;;  %v5225_v29 = vpop.f32.mrb[170].mxu1  ;;  %v4607_v30 = vpack.c.bf16 %v3977_v23, %v3977_v23 }
 0x452   : > { %v3750_v32 = vpop.f32.mrb[171].mxu1  ;;  %v3759_v39 = vadd.f32 %v6104_v60, %v5225_v29  ;;  %v3884_v47 = vmax.f32 %v3756_v36, 0.0 }
 0x453   : > { %v3984_v34 = vmax.f32 %v3982_v19, %v3983_v25  ;;  %v3989_v35 = vmax.f32 %v3988_v27, %v3881_v26  ;;  %v3751_v48 = vadd.f32 %v6104_v60, %v3750_v32  ;;  %v4121_v37 = vunpack.c.l.b16 %v4607_v30 }
 0x454   : > { %v3882_v42 = vmax.f32 %v3748_v28, 0.0  ;;  %v3885_v31 = vmax.f32 %v3759_v39, 0.0 }
 0x455   : > { %v3990_v38 = vrot.slane %v3989_v35, 4  ;;  %v3883_v41 = vmax.f32 %v3751_v48, 0.0  ;;  %v4136_v40 = vsel %vm2255_vm10, %v4121_v37, %v4135_v14  ;;  %v3985_v50 = vrot.slane %v3984_v34, 1 }
 0x456   : > { %v4144_v43 = vpack.c.b16 %v4136_v40, %v4136_v40 }
 0x457   : > { %v3991_v44 = vmax.f32 %v3989_v35, %v3990_v38  ;;  %v3996_v45 = vmax.f32 %v3882_v42, %v3883_v41  ;;  %v5228_v59 = vpop.f32.mrb[172].mxu1  ;;  %v3986_v53 = vmax.f32 %v3984_v34, %v3985_v50 }
 0x458   : > { %v3763_v46 = vpop.f32.mrb[173].mxu1  ;;  %4580 = vst [vmem:[%s5967_s20 + $0x8] sm:$0xf] %v4144_v43  ;;  %v3772_v33 = vadd.f32 %v6104_v60, %v5228_v59 }
 0x459   : > { %v3992_v49 = vrot.slane %v3991_v44, 2  ;;  %v3997_v51 = vmax.f32 %v3996_v45, %v3884_v47  ;;  %v5229_v52 = vpop.f32.mrb[174].mxu1  ;;  %v3764_v54 = vadd.f32 %v6104_v60, %v3763_v46  ;;  %v4608_v62 = vpack.c.bf16 %v3986_v53, %v3986_v53 }
 0x45a   : > { %v3766_v55 = vpop.f32.mrb[175].mxu1  ;;  %v3775_v1 = vadd.f32 %v6104_v60, %v5229_v52  ;;  %v3888_v6 = vmax.f32 %v3772_v33, 0.0 }
 0x45b   : > { %v3993_v56 = vmax.f32 %v3991_v44, %v3992_v49  ;;  %v3998_v57 = vmax.f32 %v3997_v51, %v3885_v31  ;;  %v3767_v58 = vadd.f32 %v6104_v60, %v3766_v55  ;;  %v3886_v63 = vmax.f32 %v3764_v54, 0.0 }
 0x45c   : > { %v4122_v13 = vunpack.c.l.b16 %v4608_v62  ;;  %v3889_v14 = vmax.f32 %v3775_v1, 0.0 }
 0x45d   : > { %v3994_v61 = vrot.slane %v3993_v56, 1  ;;  %v3999_v0 = vrot.slane %v3998_v57, 4  ;;  %v3887_v2 = vmax.f32 %v3767_v58, 0.0 }
 0x45f   : > { %v3995_v17 = vmax.f32 %v3993_v56, %v3994_v61  ;;  %v4000_v4 = vmax.f32 %v3998_v57, %v3999_v0  ;;  %v5232_v3 = vpop.f32.mrb[176].mxu1  ;;  %v4005_v7 = vmax.f32 %v3886_v63, %v3887_v2 }
 0x460   : > { %v3779_v8 = vpop.f32.mrb[177].mxu1  ;;  %v3788_v19 = vadd.f32 %v6104_v60, %v5232_v3 }
 0x461   : > { %v4609_v9 = vpack.c.bf16 %v3995_v17, %v3995_v17  ;;  %v4001_v10 = vrot.slane %v4000_v4, 2  ;;  %v3780_v11 = vadd.f32 %v6104_v60, %v3779_v8  ;;  %v5233_v12 = vpop.f32.mrb[178].mxu1  ;;  %v4006_v15 = vmax.f32 %v4005_v7, %v3888_v6 }
 0x462   : > { %v3782_v5 = vpop.f32.mrb[179].mxu1  ;;  %v3791_v22 = vadd.f32 %v6104_v60, %v5233_v12  ;;  %v3892_v29 = vmax.f32 %v3788_v19, 0.0 }
 0x463   : > { %v4123_v16 = vunpack.c.l.b16 %v4609_v9  ;;  %v4002_v18 = vmax.f32 %v4000_v4, %v4001_v10  ;;  %v3783_v20 = vadd.f32 %v6104_v60, %v3782_v5  ;;  %v4007_v21 = vmax.f32 %v4006_v15, %v3889_v14 }
 0x464   : > { %v3890_v25 = vmax.f32 %v3780_v11, 0.0  ;;  %v3893_v48 = vmax.f32 %v3791_v22, 0.0 }
 0x465   : > { %v4137_v23 = vsel %vm2243_vm4, %v4123_v16, %v4122_v13  ;;  %v4003_v24 = vrot.slane %v4002_v18, 1  ;;  %v3891_v26 = vmax.f32 %v3783_v20, 0.0  ;;  %v4008_v27 = vrot.slane %v4007_v21, 4 }
 0x467   : > { %v4004_v28 = vmax.f32 %v4002_v18, %v4003_v24  ;;  %v4014_v30 = vmax.f32 %v3890_v25, %v3891_v26  ;;  %v5236_v32 = vpop.f32.mrb[180].mxu1  ;;  %v4009_v34 = vmax.f32 %v4007_v21, %v4008_v27 }
 0x468   : > { %v3795_v35 = vpop.f32.mrb[181].mxu1  ;;  %v3804_v43 = vadd.f32 %v6104_v60, %v5236_v32 }
 0x469   : > { %v4610_v36 = vpack.c.bf16 %v4004_v28, %v4004_v28  ;;  %v4015_v37 = vmax.f32 %v4014_v30, %v3892_v29  ;;  %v3796_v38 = vadd.f32 %v6104_v60, %v3795_v35  ;;  %v5237_v42 = vpop.f32.mrb[182].mxu1  ;;  %v4010_v39 = vrot.slane %v4009_v34, 2 }
 0x46a   : > { %v3798_v41 = vpop.f32.mrb[183].mxu1  ;;  %v3807_v45 = vadd.f32 %v6104_v60, %v5237_v42  ;;  %v3896_v53 = vmax.f32 %v3804_v43, 0.0 }
 0x46b   : > { %v4124_v40 = vunpack.c.l.b16 %v4610_v36  ;;  %v4016_v50 = vmax.f32 %v4015_v37, %v3893_v48  ;;  %v3799_v44 = vadd.f32 %v6104_v60, %v3798_v41  ;;  %v4011_v47 = vmax.f32 %v4009_v34, %v4010_v39 }
 0x46c   : > { %v3894_v49 = vmax.f32 %v3796_v38, 0.0  ;;  %v3897_v58 = vmax.f32 %v3807_v45, 0.0 }
 0x46d   : > { %v4138_v59 = vsel %vm2245_vm5, %v4124_v40, %v4137_v23  ;;  %v4017_v46 = vrot.slane %v4016_v50, 4  ;;  %v3895_v31 = vmax.f32 %v3799_v44, 0.0  ;;  %v4012_v51 = vrot.slane %v4011_v47, 1 }
 0x46f   : > { %v4018_v52 = vmax.f32 %v4016_v50, %v4017_v46  ;;  %v4023_v54 = vmax.f32 %v3894_v49, %v3895_v31  ;;  %v5240_v55 = vpop.f32.mrb[184].mxu1  ;;  %v4013_v56 = vmax.f32 %v4011_v47, %v4012_v51 }
 0x470   : > { %v3811_v57 = vpop.f32.mrb[185].mxu1  ;;  %v3820_v4 = vadd.f32 %v6104_v60, %v5240_v55 }
 0x471   : > { %v4019_v33 = vrot.slane %v4018_v52, 2  ;;  %v4024_v61 = vmax.f32 %v4023_v54, %v3896_v53  ;;  %v3812_v0 = vadd.f32 %v6104_v60, %v3811_v57  ;;  %v5241_v62 = vpop.f32.mrb[186].mxu1  ;;  %v4611_v63 = vpack.c.bf16 %v4013_v56, %v4013_v56 }
 0x472   : > { %v3814_v1 = vpop.f32.mrb[187].mxu1  ;;  %v3823_v7 = vadd.f32 %v6104_v60, %v5241_v62  ;;  %v3900_v15 = vmax.f32 %v3820_v4, 0.0 }
 0x473   : > { %v4020_v2 = vmax.f32 %v4018_v52, %v4019_v33  ;;  %v4025_v17 = vmax.f32 %v4024_v61, %v3897_v58  ;;  %v3815_v3 = vadd.f32 %v6104_v60, %v3814_v1  ;;  %v4125_v6 = vunpack.c.l.b16 %v4611_v63 }
 0x474   : > { %v3898_v10 = vmax.f32 %v3812_v0, 0.0  ;;  %v3901_v20 = vmax.f32 %v3823_v7, 0.0 }
 0x475   : > { %v4021_v8 = vrot.slane %v4020_v2, 1  ;;  %v4026_v9 = vrot.slane %v4025_v17, 4  ;;  %v3899_v11 = vmax.f32 %v3815_v3, 0.0  ;;  %v4139_v12 = vsel %vm2247_vm6, %v4125_v6, %v4138_v59 }
 0x477   : > { %v4022_v13 = vmax.f32 %v4020_v2, %v4021_v8  ;;  %v4027_v14 = vmax.f32 %v4025_v17, %v4026_v9  ;;  %v4032_v5 = vmax.f32 %v3898_v10, %v3899_v11  ;;  %v5244_v16 = vpop.f32.mrb[188].mxu1 }
 0x478   : > { %v3827_v22 = vpop.f32.mrb[189].mxu1  ;;  %v3836_v29 = vadd.f32 %v6104_v60, %v5244_v16 }
 0x479   : > { %v4612_v18 = vpack.c.bf16 %v4022_v13, %v4022_v13  ;;  %v4028_v19 = vrot.slane %v4027_v14, 2  ;;  %v4033_v21 = vmax.f32 %v4032_v5, %v3900_v15  ;;  %v3828_v23 = vadd.f32 %v6104_v60, %v3827_v22  ;;  %v5245_v24 = vpop.f32.mrb[190].mxu1 }
 0x47a   : > { %v3830_v28 = vpop.f32.mrb[191].mxu1  ;;  %v3839_v48 = vadd.f32 %v6104_v60, %v5245_v24  ;;  %v3904_v39 = vmax.f32 %v3836_v29, 0.0 }
 0x47b   : > { %v4126_v25 = vunpack.c.l.b16 %v4612_v18  ;;  %v4029_v26 = vmax.f32 %v4027_v14, %v4028_v19  ;;  %v4034_v27 = vmax.f32 %v4033_v21, %v3901_v20  ;;  %v3831_v30 = vadd.f32 %v6104_v60, %v3830_v28 }
 0x47c   : > { %v3902_v36 = vmax.f32 %v3828_v23, 0.0  ;;  %v3905_v43 = vmax.f32 %v3839_v48, 0.0 }
 0x47d   : > { %v4140_v32 = vsel %vm2249_vm7, %v4126_v25, %v4139_v12  ;;  %v4030_v34 = vrot.slane %v4029_v26, 1  ;;  %v4035_v35 = vrot.slane %v4034_v27, 4  ;;  %v3903_v37 = vmax.f32 %v3831_v30, 0.0 }
 0x47f   : > { %v4031_v38 = vmax.f32 %v4029_v26, %v4030_v34  ;;  %v4036_v42 = vmax.f32 %v4034_v27, %v4035_v35  ;;  %v4041_v41 = vmax.f32 %v3902_v36, %v3903_v37 }
 0x481   : > { %v4613_v40 = vpack.c.bf16 %v4031_v38, %v4031_v38  ;;  %v4037_v50 = vrot.slane %v4036_v42, 2  ;;  %v4042_v44 = vmax.f32 %v4041_v41, %v3904_v39 }
 0x483   : > { %v4127_v47 = vunpack.c.l.b16 %v4613_v40  ;;  %v4038_v45 = vmax.f32 %v4036_v42, %v4037_v50  ;;  %v4043_v59 = vmax.f32 %v4042_v44, %v3905_v43 }
 0x485   : > { %v4141_v46 = vsel %vm2251_vm8, %v4127_v47, %v4140_v32  ;;  %v4039_v49 = vrot.slane %v4038_v45, 1  ;;  %v4044_v31 = vrot.slane %v4043_v59, 4 }
 0x487   : > { %v4040_v51 = vmax.f32 %v4038_v45, %v4039_v49  ;;  %v4045_v52 = vmax.f32 %v4043_v59, %v4044_v31 }
 0x489   : > { %v4614_v60 = vpack.c.bf16 %v4040_v51, %v4040_v51  ;;  %v4046_v53 = vrot.slane %v4045_v52, 2 }
 0x48b   : > { %v4128_v54 = vunpack.c.l.b16 %v4614_v60  ;;  %v4047_v55 = vmax.f32 %v4045_v52, %v4046_v53 }
 0x48d   : > { %v4142_v56 = vsel %vm2253_vm9, %v4128_v54, %v4141_v46  ;;  %v4048_v57 = vrot.slane %v4047_v55, 1 }
 0x48f   : > { %v4049_v33 = vmax.f32 %v4047_v55, %v4048_v57 }
 0x491   : > { %v4615_v58 = vpack.c.bf16 %v4049_v33, %v4049_v33 }
 0x493   : > { %v4129_v61 = vunpack.c.l.b16 %v4615_v58 }
 0x495   : > { %v4143_v0 = vsel %vm2255_vm10, %v4129_v61, %v4142_v56 }
 0x496   : > { %v4145_v62 = vpack.c.b16 %v4143_v0, %v4143_v0 }
 0x498   : > { %4581 = vst [vmem:[%s5967_s20 + $0xc] sm:$0xf] %v4145_v62 }
 0x499 PF: > { %s17_s24 = sadd.s32 1, %s5339_s24  }
 0x49a   : > { %p14_p5 = scmp.ge.s32.totalorder %s17_s24, 10  }
 0x49c   :  { %16 = sbr.rel (!%p14_p5) target bundleno = 1 (0x1), region = 80 }

// kernel: feature_encoder_forward.4
= control target key start
LH: loop header
LB: loop body
LE: loop exit
PB: predicated region body
PF: predicated region fallthrough
CT: control target
= control target key end

     0   :  { %s3291_s24 = smov 0   ;;  %s3864_s0 = inlined_call_operand.vmem [shape: bf16[4096,131], index: 0, kind: input, shape index: {}]   ;;  %s3865_s1 = inlined_call_operand.vmem [shape: bf16[131,128], index: 1, kind: input, shape index: {}]   ;;  %s3866_s2 = inlined_call_operand.vmem [shape: f32[1,128], index: 2, kind: input, shape index: {}]   ;;  %s3867_s3 = inlined_call_operand.vmem [shape: bf16[128,128], index: 3, kind: input, shape index: {}]   ;;  %s3868_s4 = inlined_call_operand.vmem [shape: f32[1,128], index: 4, kind: input, shape index: {}]   ;;  %s3869_s5 = inlined_call_operand.vmem [shape: bf16[128,256], index: 5, kind: input, shape index: {}]   ;;  %s3870_s6 = inlined_call_operand.vmem [shape: f32[1,256], index: 6, kind: input, shape index: {}]   ;;  %s3871_s7 = inlined_call_operand.vmem [shape: bf16[128,256], index: 7, kind: output, shape index: {}]  }
   0x1 LB: > { %s2780_s25 = sadd.s32 4294967295, %s3247_s24   ;;  %p2784_p0 = scmp.ge.s32.totalorder %s3247_s24, 1  ;;  %s3247_s24 = sphi %s3291_s24, %s17_s24  }
   0x2   : > { %p239_p1 = scmp.lt.s32.totalorder %s3247_s24, 9 }
   0x4   : > { %p240_p2 = pnand %p2784_p0, %p239_p1 }
   0x5   : > { %v3104_v0 = vld [vmem:[%s3865_s1] sm:$0xff] (!%p240_p2)   ;;  %v3249_v1 = vmov (!%p240_p2), 0   ;;  %v3105_v2 = vld [vmem:[%s3865_s1 + $0x8] sm:$0xff] (!%p240_p2)   ;;  %v3106_v3 = vld [vmem:[%s3865_s1 + $0x10] sm:$0xff] (!%p240_p2)   ;;  %s2785_s9 = sshll.u32 (!%p240_p2), %s2780_s25, 6  ;;  %vm749_vm0 = vcmask (!%p240_p2), 23552  }
   0x6   : > { %243 = sbr.rel (%p240_p2) target bundleno = 1008 (0x3f0), region = 48  ;;  %853 = vmatprep.subr.bf16.mxu0 (!%p240_p2), %v3249_v1  ;;  %p274_p3 = scmp.lt.s32.totalorder (!%p240_p2), %s2785_s9, 511  ;;  %v3116_v4 = vld [vmem:[%s3867_s3] sm:$0xff] (!%p240_p2)   ;;  %v3107_v5 = vld [vmem:[%s3865_s1 + $0x18] sm:$0xff] (!%p240_p2)   ;;  %v3129_v6 = vld [vmem:[%s3867_s3 + $0x8] sm:$0xff] (!%p240_p2)   ;;  %vm846_vm1 = vcmask (!%p240_p2), 1040384  }
   0x7   : > { %854 = vmatpush1.bf16.msra.mxu0 (!%p240_p2), %v3104_v0  ;;  %3078 = vmatprep.subr.bf16.mxu1 (!%p240_p2), %v3116_v4  ;;  %v3108_v7 = vld [vmem:[%s3865_s1 + $0x20] sm:$0xff] (!%p240_p2)   ;;  %v3142_v9 = vld [vmem:[%s3867_s3 + $0x10] sm:$0xff] (!%p240_p2)   ;;  %v3109_v10 = vld [vmem:[%s3865_s1 + $0x28] sm:$0xff] (!%p240_p2)   ;;  %vm847_vm2 = vcmask (!%p240_p2), 1041408   ;;  %v3250_v13 = vmov (!%p240_p2), 65535   ;;  %vm2681_vm3 = vcmask (!%p240_p2), 1041409  }
   0x8   : > { %855 = vmatprep.subr.bf16.mxu0 (!%p240_p2), %v3249_v1  ;;  %3086 = vmatpush3.bf16.msra.mxu1 (!%p240_p2), %v3116_v4  ;;  %v3155_v11 = vld [vmem:[%s3867_s3 + $0x18] sm:$0xff] (!%p240_p2)   ;;  %v3110_v12 = vld [vmem:[%s3865_s1 + $0x30] sm:$0xff] (!%p240_p2)   ;;  %v848_v14 = vsel (!%p240_p2), %vm846_vm1, 4294967295, %v3250_v13  ;;  %v3112_v16 = vld [vmem:[%s3865_s1 + $0x40] ss:$0 sps:$4 sm:$0x33] (!%p240_p2)  }
   0x9   : > { %3079 = vmatprep.subr.bf16.mxu1 (!%p240_p2), %v3129_v6  ;;  %v3111_v15 = vld [vmem:[%s3865_s1 + $0x38] sm:$0xff] (!%p240_p2)   ;;  %v849_v17 = vsel (!%p240_p2), %vm847_vm2, %v848_v14, 0  ;;  %v3168_v21 = vld [vmem:[%s3867_s3 + $0x20] sm:$0xff] (!%p240_p2)   ;;  %v3181_v30 = vld [vmem:[%s3867_s3 + $0x28] sm:$0xff] (!%p240_p2)   ;;  %vm2683_vm4 = vcmask (!%p240_p2), 1042434   ;;  %vm2685_vm5 = vcmask (!%p240_p2), 1043459  }
   0xa   : > { %v851_v18 = vand.u32 (!%p240_p2), %v3112_v16, %v849_v17  ;;  %v3194_v39 = vld [vmem:[%s3867_s3 + $0x30] sm:$0xff] (!%p240_p2)   ;;  %v3207_v48 = vld [vmem:[%s3867_s3 + $0x38] sm:$0xff] (!%p240_p2)   ;;  %v3451_v14 = vld [vmem:[%s3866_s2] ss:$0 sm:$0xff] (!%p240_p2)  ;;  %vm2687_vm6 = vcmask (!%p240_p2), 1044484   ;;  %vm2689_vm7 = vcmask (!%p240_p2), 1045509  }
   0xb   : > { %856 = vmatpush1.bf16.msra.mxu0 (!%p240_p2), %v3105_v2  ;;  %vm2691_vm8 = vcmask (!%p240_p2), 1046534   ;;  %s2788_s17 = sshll.u32 (!%p240_p2), %s2780_s25, 1  ;;  %vm2693_vm9 = vcmask (!%p240_p2), 1047559  }
   0xc   : > { %857 = vmatprep.subr.bf16.mxu0 (!%p240_p2), %v3249_v1  ;;  %3087 = vmatpush3.bf16.msra.mxu1 (!%p240_p2), %v3129_v6  ;;  %p281_p4 = scmp.lt.s32.totalorder (!%p240_p2), %s2788_s17, 15 }
   0xd   : > { %s3873_s9 = smov (!%p274_p3, %s2785_s9), 511  ;;  %3080 = vmatprep.subr.bf16.mxu1 %v3142_v9 }
   0xe   : > { %s2940_s14 = sshll.u32 %s3873_s9, 3  ;;  %s3875_s17 = smov (!%p281_p4, %s2788_s17), 15 }
   0xf   : > { %858 = vmatpush1.bf16.msra.mxu0 %v3106_v3  ;;  %s3326_s19 = scalar_lea.vmem %s3864_s0, %s2940_s14  ;;  %s2941_s25 = sshll.u32 %s3875_s17, 3 }
  0x10   : > { %859 = vmatprep.subr.bf16.mxu0 %v3249_v1  ;;  %v3115_v8 = vld [vmem:[%s3326_s19 + $0x4] ss:$8 sps:$4 sm:$0xff]   ;;  %3088 = vmatpush3.bf16.msra.mxu1 %v3142_v9  ;;  %v3113_v19 = vld [vmem:[%s3326_s19] ss:$8 sps:$4 sm:$0xff]   ;;  %v3117_v20 = vld [vmem:[%s3326_s19 + $0x14] ss:$8 sps:$4 sm:$0xff]   ;;  %s3786_s21 = scalar_lea.vmem %s3871_s7, %s2941_s25 }
  0x11   : > { %2865 = vmatprep.mubr.msk.bf16.mxu0 %vm749_vm0, %v3115_v8  ;;  %3081 = vmatprep.subr.bf16.mxu1 %v3155_v11  ;;  %v3119_v22 = vld [vmem:[%s3326_s19 + $0x10] ss:$8 sps:$4 sm:$0xff]   ;;  %v3120_v23 = vld [vmem:[%s3326_s19 + $0x24] ss:$8 sps:$4 sm:$0xff]   ;;  %v3122_v24 = vld [vmem:[%s3326_s19 + $0x20] ss:$8 sps:$4 sm:$0xff]  }
  0x12   : > { %v3123_v25 = vld [vmem:[%s3326_s19 + $0x34] ss:$8 sps:$4 sm:$0xff]   ;;  %v3125_v26 = vld [vmem:[%s3326_s19 + $0x30] ss:$8 sps:$4 sm:$0xff]   ;;  %v3126_v27 = vld [vmem:[%s3326_s19 + $0x44] ss:$8 sps:$4 sm:$0xff]  }
  0x13   : > { %860 = vmatpush1.bf16.msra.mxu0 %v3107_v5  ;;  %v3128_v28 = vld [vmem:[%s3326_s19 + $0x40] ss:$8 sps:$4 sm:$0xff]   ;;  %v3130_v29 = vld [vmem:[%s3326_s19 + $0x54] ss:$8 sps:$4 sm:$0xff]   ;;  %v3132_v31 = vld [vmem:[%s3326_s19 + $0x50] ss:$8 sps:$4 sm:$0xff]  }
  0x14   : > { %861 = vmatprep.subr.bf16.mxu0 %v3249_v1  ;;  %3089 = vmatpush3.bf16.msra.mxu1 %v3155_v11  ;;  %v3133_v32 = vld [vmem:[%s3326_s19 + $0x64] ss:$8 sps:$4 sm:$0xff]   ;;  %v3135_v33 = vld [vmem:[%s3326_s19 + $0x60] ss:$8 sps:$4 sm:$0xff]   ;;  %v3136_v34 = vld [vmem:[%s3326_s19 + $0x74] ss:$8 sps:$4 sm:$0xff]  }
  0x15   : > { %3082 = vmatprep.subr.bf16.mxu1 %v3168_v21  ;;  %v3138_v35 = vld [vmem:[%s3326_s19 + $0x70] ss:$8 sps:$4 sm:$0xff]   ;;  %v3139_v36 = vld [vmem:[%s3326_s19 + $0x84] ss:$8 sps:$4 sm:$0xff]   ;;  %v3141_v37 = vld [vmem:[%s3326_s19 + $0x80] ss:$8 sps:$4 sm:$0xff]  }
  0x16   : > { %v3143_v38 = vld [vmem:[%s3326_s19 + $0x94] ss:$8 sps:$4 sm:$0xff]   ;;  %v3145_v40 = vld [vmem:[%s3326_s19 + $0x90] ss:$8 sps:$4 sm:$0xff]   ;;  %v3146_v41 = vld [vmem:[%s3326_s19 + $0xa4] ss:$8 sps:$4 sm:$0xff]  }
  0x17   : > { %862 = vmatpush1.bf16.msra.mxu0 %v3108_v7  ;;  %v3148_v42 = vld [vmem:[%s3326_s19 + $0xa0] ss:$8 sps:$4 sm:$0xff]   ;;  %v3149_v43 = vld [vmem:[%s3326_s19 + $0xb4] ss:$8 sps:$4 sm:$0xff]   ;;  %v3151_v44 = vld [vmem:[%s3326_s19 + $0xb0] ss:$8 sps:$4 sm:$0xff]  }
  0x18   : > { %863 = vmatprep.subr.bf16.mxu0 %v3249_v1  ;;  %3090 = vmatpush3.bf16.msra.mxu1 %v3168_v21  ;;  %v3152_v45 = vld [vmem:[%s3326_s19 + $0xc4] ss:$8 sps:$4 sm:$0xff]   ;;  %v3154_v46 = vld [vmem:[%s3326_s19 + $0xc0] ss:$8 sps:$4 sm:$0xff]   ;;  %v3156_v47 = vld [vmem:[%s3326_s19 + $0xd4] ss:$8 sps:$4 sm:$0xff]  }
  0x19   : > { %3083 = vmatprep.subr.bf16.mxu1 %v3181_v30  ;;  %v3158_v49 = vld [vmem:[%s3326_s19 + $0xd0] ss:$8 sps:$4 sm:$0xff]   ;;  %v3159_v50 = vld [vmem:[%s3326_s19 + $0xe4] ss:$8 sps:$4 sm:$0xff]   ;;  %v3161_v51 = vld [vmem:[%s3326_s19 + $0xe0] ss:$8 sps:$4 sm:$0xff]  }
  0x1a   : > { %v3162_v52 = vld [vmem:[%s3326_s19 + $0xf4] ss:$8 sps:$4 sm:$0xff]   ;;  %v3164_v53 = vld [vmem:[%s3326_s19 + $0xf0] ss:$8 sps:$4 sm:$0xff]   ;;  %v3165_v54 = vld [vmem:[%s3326_s19 + $0x104] ss:$8 sps:$4 sm:$0xff]  }
  0x1b   : > { %864 = vmatpush1.bf16.msra.mxu0 %v3109_v10  ;;  %v3167_v55 = vld [vmem:[%s3326_s19 + $0x100] ss:$8 sps:$4 sm:$0xff]   ;;  %v3169_v56 = vld [vmem:[%s3326_s19 + $0x114] ss:$8 sps:$4 sm:$0xff]   ;;  %v3171_v57 = vld [vmem:[%s3326_s19 + $0x110] ss:$8 sps:$4 sm:$0xff]  }
  0x1c   : > { %865 = vmatprep.subr.bf16.mxu0 %v3249_v1  ;;  %3091 = vmatpush3.bf16.msra.mxu1 %v3181_v30  ;;  %v3172_v58 = vld [vmem:[%s3326_s19 + $0x124] ss:$8 sps:$4 sm:$0xff]   ;;  %v3174_v59 = vld [vmem:[%s3326_s19 + $0x120] ss:$8 sps:$4 sm:$0xff]   ;;  %v3175_v60 = vld [vmem:[%s3326_s19 + $0x134] ss:$8 sps:$4 sm:$0xff]  }
  0x1d   : > { %3084 = vmatprep.subr.bf16.mxu1 %v3194_v39  ;;  %v3177_v61 = vld [vmem:[%s3326_s19 + $0x130] ss:$8 sps:$4 sm:$0xff]   ;;  %v3178_v62 = vld [vmem:[%s3326_s19 + $0x144] ss:$8 sps:$4 sm:$0xff]   ;;  %v3180_v63 = vld [vmem:[%s3326_s19 + $0x140] ss:$8 sps:$4 sm:$0xff]  }
  0x1e   : > { %v3182_v0 = vld [vmem:[%s3326_s19 + $0x154] ss:$8 sps:$4 sm:$0xff]   ;;  %v3184_v2 = vld [vmem:[%s3326_s19 + $0x150] ss:$8 sps:$4 sm:$0xff]   ;;  %v3185_v3 = vld [vmem:[%s3326_s19 + $0x164] ss:$8 sps:$4 sm:$0xff]  }
  0x1f   : > { %866 = vmatpush1.bf16.msra.mxu0 %v3110_v12  ;;  %v3188_v5 = vld [vmem:[%s3326_s19 + $0x174] ss:$8 sps:$4 sm:$0xff]   ;;  %v3191_v7 = vld [vmem:[%s3326_s19 + $0x184] ss:$8 sps:$4 sm:$0xff]   ;;  %v3193_v8 = vld [vmem:[%s3326_s19 + $0x180] ss:$8 sps:$4 sm:$0xff]  }
  0x20   : > { %867 = vmatprep.subr.bf16.mxu0 %v3249_v1  ;;  %3092 = vmatpush3.bf16.msra.mxu1 %v3194_v39  ;;  %v3197_v10 = vld [vmem:[%s3326_s19 + $0x190] ss:$8 sps:$4 sm:$0xff]   ;;  %v3200_v12 = vld [vmem:[%s3326_s19 + $0x1a0] ss:$8 sps:$4 sm:$0xff]   ;;  %v3201_v13 = vld [vmem:[%s3326_s19 + $0x1b4] ss:$8 sps:$4 sm:$0xff]  }
  0x21   : > { %3085 = vmatprep.subr.bf16.mxu1 %v3207_v48 }
  0x23   : > { %868 = vmatpush1.bf16.msra.mxu0 %v3111_v15 }
  0x24   : > { %869 = vmatprep.subr.bf16.mxu0 %v3249_v1  ;;  %3093 = vmatpush3.bf16.msra.mxu1 %v3207_v48 }
  0x27   : > { %870 = vmatpush1.bf16.msra.mxu0 %v851_v18  ;;  %v3203_v18 = vld [vmem:[%s3326_s19 + $0x1b0] ss:$8 sps:$4 sm:$0xff]  }
  0x28   : > { %2998 = vmatprep.subr.bf16.mxu0 %v3116_v4 }
  0x2a   : > { %886 = vmatmul.mubr.bf16.vlgmr.msra.gmra.mrb[0].mxu0 %v3113_v19 }
  0x2b   : > { %2999 = vmatpush3.bf16.msra.mxu0 %v3116_v4  ;;  %2866 = vmatprep.mubr.msk.bf16.mxu0 %vm749_vm0, %v3117_v20  ;;  %v3187_v4 = vld [vmem:[%s3326_s19 + $0x160] ss:$8 sps:$4 sm:$0xff]   ;;  %v3204_v20 = vld [vmem:[%s3326_s19 + $0x1c4] ss:$8 sps:$4 sm:$0xff]  }
  0x2c   : > { %3000 = vmatprep.subr.bf16.mxu0 %v3129_v6 }
  0x2f   : > { %3001 = vmatpush3.bf16.msra.mxu0 %v3129_v6  ;;  %v3190_v6 = vld [vmem:[%s3326_s19 + $0x170] ss:$8 sps:$4 sm:$0xff]  }
  0x30   : > { %3002 = vmatprep.subr.bf16.mxu0 %v3142_v9 }
  0x32   : > { %894 = vmatmul.mubr.bf16.gmra.mrb[4].mxu0 %v3119_v22 }
  0x33   : > { %2867 = vmatprep.mubr.msk.bf16.mxu0 %vm749_vm0, %v3120_v23  ;;  %3003 = vmatpush3.bf16.msra.mxu0 %v3142_v9  ;;  %v3195_v9 = vld [vmem:[%s3326_s19 + $0x194] ss:$8 sps:$4 sm:$0xff]  }
  0x34   : > { %3004 = vmatprep.subr.bf16.mxu0 %v3155_v11 }
  0x37   : > { %3005 = vmatpush3.bf16.msra.mxu0 %v3155_v11  ;;  %v3198_v11 = vld [vmem:[%s3326_s19 + $0x1a4] ss:$8 sps:$4 sm:$0xff]  }
  0x38   : > { %3006 = vmatprep.subr.bf16.mxu0 %v3168_v21 }
  0x3a   : > { %902 = vmatmul.mubr.bf16.gmra.mrb[8].mxu0 %v3122_v24 }
  0x3b   : > { %2868 = vmatprep.mubr.msk.bf16.mxu0 %vm749_vm0, %v3123_v25  ;;  %3007 = vmatpush3.bf16.msra.mxu0 %v3168_v21 }
  0x3c   : > { %3008 = vmatprep.subr.bf16.mxu0 %v3181_v30 }
  0x3f   : > { %3009 = vmatpush3.bf16.msra.mxu0 %v3181_v30 }
  0x40   : > { %3010 = vmatprep.subr.bf16.mxu0 %v3194_v39 }
  0x42   : > { %910 = vmatmul.mubr.bf16.gmra.mrb[12].mxu0 %v3125_v26 }
  0x43   : > { %2869 = vmatprep.mubr.msk.bf16.mxu0 %vm749_vm0, %v3126_v27  ;;  %3011 = vmatpush3.bf16.msra.mxu0 %v3194_v39 }
  0x44   : > { %3012 = vmatprep.subr.bf16.mxu0 %v3207_v48 }
  0x47   : > { %3013 = vmatpush3.bf16.msra.mxu0 %v3207_v48 }
  0x4a   : > { %918 = vmatmul.mubr.bf16.gmra.mrb[16].mxu0 %v3128_v28 }
  0x4b   : > { %2870 = vmatprep.mubr.msk.bf16.mxu0 %vm749_vm0, %v3130_v29  ;;  %v3206_v29 = vld [vmem:[%s3326_s19 + $0x1c0] ss:$8 sps:$4 sm:$0xff]  }
  0x52   : > { %926 = vmatmul.mubr.bf16.gmra.mrb[20].mxu0 %v3132_v31  ;;  %v3208_v31 = vld [vmem:[%s3326_s19 + $0x1d4] ss:$8 sps:$4 sm:$0xff]  }
  0x53   : > { %2871 = vmatprep.mubr.msk.bf16.mxu0 %vm749_vm0, %v3133_v32 }
  0x5a   : > { %934 = vmatmul.mubr.bf16.gmra.mrb[24].mxu0 %v3135_v33 }
  0x5b   : > { %2872 = vmatprep.mubr.msk.bf16.mxu0 %vm749_vm0, %v3136_v34 }
  0x62   : > { %942 = vmatmul.mubr.bf16.gmra.mrb[28].mxu0 %v3138_v35 }
  0x63   : > { %2873 = vmatprep.mubr.msk.bf16.mxu0 %vm749_vm0, %v3139_v36 }
  0x6a   : > { %950 = vmatmul.mubr.bf16.gmra.mrb[32].mxu0 %v3141_v37 }
  0x6b   : > { %2874 = vmatprep.mubr.msk.bf16.mxu0 %vm749_vm0, %v3143_v38 }
  0x72   : > { %958 = vmatmul.mubr.bf16.gmra.mrb[36].mxu0 %v3145_v40  ;;  %v3210_v40 = vld [vmem:[%s3326_s19 + $0x1d0] ss:$8 sps:$4 sm:$0xff]  }
  0x73   : > { %2875 = vmatprep.mubr.msk.bf16.mxu0 %vm749_vm0, %v3146_v41 }
  0x7a   : > { %966 = vmatmul.mubr.bf16.gmra.mrb[40].mxu0 %v3148_v42  ;;  %v3211_v42 = vld [vmem:[%s3326_s19 + $0x1e4] ss:$8 sps:$4 sm:$0xff]  }
  0x7b   : > { %2876 = vmatprep.mubr.msk.bf16.mxu0 %vm749_vm0, %v3149_v43 }
  0x82   : > { %974 = vmatmul.mubr.bf16.gmra.mrb[44].mxu0 %v3151_v44 }
  0x83   : > { %2877 = vmatprep.mubr.msk.bf16.mxu0 %vm749_vm0, %v3152_v45 }
  0x8a   : > { %982 = vmatmul.mubr.bf16.gmra.mrb[48].mxu0 %v3154_v46 }
  0x8b   : > { %2878 = vmatprep.mubr.msk.bf16.mxu0 %vm749_vm0, %v3156_v47 }
  0x92   : > { %990 = vmatmul.mubr.bf16.gmra.mrb[52].mxu0 %v3158_v49 }
  0x93   : > { %2879 = vmatprep.mubr.msk.bf16.mxu0 %vm749_vm0, %v3159_v50 }
  0x9a   : > { %998 = vmatmul.mubr.bf16.gmra.mrb[56].mxu0 %v3161_v51  ;;  %v3213_v51 = vld [vmem:[%s3326_s19 + $0x1e0] ss:$8 sps:$4 sm:$0xff]  }
  0x9b   : > { %2880 = vmatprep.mubr.msk.bf16.mxu0 %vm749_vm0, %v3162_v52 }
  0xa2   : > { %1006 = vmatmul.mubr.bf16.gmra.mrb[60].mxu0 %v3164_v53  ;;  %v3214_v53 = vld [vmem:[%s3326_s19 + $0x1f4] ss:$8 sps:$4 sm:$0xff]  }
  0xa3   : > { %2881 = vmatprep.mubr.msk.bf16.mxu0 %vm749_vm0, %v3165_v54 }
  0xaa   : > { %1014 = vmatmul.mubr.bf16.gmra.mrb[64].mxu0 %v3167_v55 }
  0xab   : > { %2882 = vmatprep.mubr.msk.bf16.mxu0 %vm749_vm0, %v3169_v56 }
  0xb2   : > { %1022 = vmatmul.mubr.bf16.gmra.mrb[68].mxu0 %v3171_v57 }
  0xb3   : > { %2883 = vmatprep.mubr.msk.bf16.mxu0 %vm749_vm0, %v3172_v58 }
  0xba   : > { %1030 = vmatmul.mubr.bf16.gmra.mrb[72].mxu0 %v3174_v59 }
  0xbb   : > { %2884 = vmatprep.mubr.msk.bf16.mxu0 %vm749_vm0, %v3175_v60 }
  0xc2   : > { %1038 = vmatmul.mubr.bf16.gmra.mrb[76].mxu0 %v3177_v61 }
  0xc3   : > { %2885 = vmatprep.mubr.msk.bf16.mxu0 %vm749_vm0, %v3178_v62  ;;  %v3216_v62 = vld [vmem:[%s3326_s19 + $0x1f0] ss:$8 sps:$4 sm:$0xff]  }
  0xca   : > { %1046 = vmatmul.mubr.bf16.gmra.mrb[80].mxu0 %v3180_v63 }
  0xcb   : > { %2886 = vmatprep.mubr.msk.bf16.mxu0 %vm749_vm0, %v3182_v0 }
  0xd2   : > { %1054 = vmatmul.mubr.bf16.gmra.mrb[84].mxu0 %v3184_v2 }
  0xd3   : > { %2887 = vmatprep.mubr.msk.bf16.mxu0 %vm749_vm0, %v3185_v3 }
  0xda   : > { %1062 = vmatmul.mubr.bf16.gmra.mrb[88].mxu0 %v3187_v4 }
  0xdb   : > { %2888 = vmatprep.mubr.msk.bf16.mxu0 %vm749_vm0, %v3188_v5 }
  0xe2   : > { %1070 = vmatmul.mubr.bf16.gmra.mrb[92].mxu0 %v3190_v6 }
  0xe3   : > { %2889 = vmatprep.mubr.msk.bf16.mxu0 %vm749_vm0, %v3191_v7 }
  0xea   : > { %1078 = vmatmul.mubr.bf16.gmra.mrb[96].mxu0 %v3193_v8 }
  0xeb   : > { %2890 = vmatprep.mubr.msk.bf16.mxu0 %vm749_vm0, %v3195_v9 }
  0xf2   : > { %1086 = vmatmul.mubr.bf16.gmra.mrb[100].mxu0 %v3197_v10 }
  0xf3   : > { %2891 = vmatprep.mubr.msk.bf16.mxu0 %vm749_vm0, %v3198_v11 }
  0xfa   : > { %1094 = vmatmul.mubr.bf16.gmra.mrb[104].mxu0 %v3200_v12 }
  0xfb   : > { %2892 = vmatprep.mubr.msk.bf16.mxu0 %vm749_vm0, %v3201_v13 }
  0xfd   : > { %v887_v15 = vpop.f32.mrb[0].mxu0 }
  0xfe   : > { %v888_v16 = vadd.f32 %v3451_v14, %v887_v15  ;;  %v889_v17 = vpop.f32.mrb[1].mxu0 }
  0xff   : > { %v890_v19 = vpop.f32.mrb[2].mxu0 }
 0x100   : > { %v891_v21 = vadd.f32 %v3451_v14, %v890_v19  ;;  %v892_v22 = vpop.f32.mrb[3].mxu0  ;;  %v1142_v23 = vmax.f32 %v888_v16, 0.0 }
 0x102   : > { %v1143_v24 = vmax.f32 %v891_v21, 0.0  ;;  %1102 = vmatmul.mubr.bf16.gmra.mrb[108].mxu0 %v3203_v18 }
 0x103   : > { %2893 = vmatprep.mubr.msk.bf16.mxu0 %vm749_vm0, %v3204_v20 }
 0x104   : > { %v1206_v25 = vpack.c.bf16 %v1143_v24, %v1142_v23 }
 0x105   : > { %v895_v26 = vpop.f32.mrb[4].mxu0 }
 0x106   : > { %v896_v27 = vadd.f32 %v3451_v14, %v895_v26  ;;  %v897_v28 = vpop.f32.mrb[5].mxu0 }
 0x107   : > { %v898_v30 = vpop.f32.mrb[6].mxu0 }
 0x108   : > { %v899_v32 = vadd.f32 %v3451_v14, %v898_v30  ;;  %v900_v33 = vpop.f32.mrb[7].mxu0  ;;  %v1144_v34 = vmax.f32 %v896_v27, 0.0 }
 0x10a   : > { %v1145_v35 = vmax.f32 %v899_v32, 0.0  ;;  %1110 = vmatmul.mubr.bf16.gmra.mrb[112].mxu0 %v3206_v29 }
 0x10b   : > { %2894 = vmatprep.mubr.msk.bf16.mxu0 %vm749_vm0, %v3208_v31 }
 0x10c   : > { %v1207_v36 = vpack.c.bf16 %v1145_v35, %v1144_v34 }
 0x10d   : > { %v903_v37 = vpop.f32.mrb[8].mxu0 }
 0x10e   : > { %v904_v38 = vadd.f32 %v3451_v14, %v903_v37  ;;  %v905_v39 = vpop.f32.mrb[9].mxu0 }
 0x10f   : > { %v906_v41 = vpop.f32.mrb[10].mxu0 }
 0x110   : > { %v907_v43 = vadd.f32 %v3451_v14, %v906_v41  ;;  %v908_v44 = vpop.f32.mrb[11].mxu0  ;;  %v1146_v45 = vmax.f32 %v904_v38, 0.0 }
 0x112   : > { %v1147_v46 = vmax.f32 %v907_v43, 0.0  ;;  %1118 = vmatmul.mubr.bf16.gmra.mrb[116].mxu0 %v3210_v40  ;;  %v3219_v43 = vld [vmem:[%s3869_s5 + $0x4] ss:$8 sps:$4 sm:$0xff]  }
 0x113   : > { %2895 = vmatprep.mubr.msk.bf16.mxu0 %vm749_vm0, %v3211_v42  ;;  %1768 = vmatprep.subr.bf16.mxu1 %v3219_v43 }
 0x114   : > { %v1208_v47 = vpack.c.bf16 %v1147_v46, %v1146_v45 }
 0x115   : > { %v911_v48 = vpop.f32.mrb[12].mxu0 }
 0x116   : > { %v912_v49 = vadd.f32 %v3451_v14, %v911_v48  ;;  %v913_v50 = vpop.f32.mrb[13].mxu0 }
 0x117   : > { %v914_v52 = vpop.f32.mrb[14].mxu0 }
 0x118   : > { %v915_v54 = vadd.f32 %v3451_v14, %v914_v52  ;;  %v916_v55 = vpop.f32.mrb[15].mxu0  ;;  %v1148_v56 = vmax.f32 %v912_v49, 0.0 }
 0x11a   : > { %v1149_v57 = vmax.f32 %v915_v54, 0.0  ;;  %1126 = vmatmul.mubr.bf16.gmra.mrb[120].mxu0 %v3213_v51 }
 0x11b   : > { %2896 = vmatprep.mubr.msk.bf16.mxu0 %vm749_vm0, %v3214_v53 }
 0x11c   : > { %v1209_v58 = vpack.c.bf16 %v1149_v57, %v1148_v56 }
 0x11d   : > { %v919_v59 = vpop.f32.mrb[16].mxu0 }
 0x11e   : > { %v920_v60 = vadd.f32 %v3451_v14, %v919_v59  ;;  %v921_v61 = vpop.f32.mrb[17].mxu0 }
 0x11f   : > { %v922_v63 = vpop.f32.mrb[18].mxu0 }
 0x120   : > { %v923_v0 = vadd.f32 %v3451_v14, %v922_v63  ;;  %v924_v2 = vpop.f32.mrb[19].mxu0  ;;  %v1150_v3 = vmax.f32 %v920_v60, 0.0 }
 0x122   : > { %v1151_v4 = vmax.f32 %v923_v0, 0.0  ;;  %1134 = vmatmul.mubr.bf16.gmra.mrb[124].mxu0 %v3216_v62 }
 0x123   : > { %3014 = vmatprep.mubr.bf16.mxu0 %v1206_v25 }
 0x124   : > { %v1210_v5 = vpack.c.bf16 %v1151_v4, %v1150_v3 }
 0x125   : > { %v927_v6 = vpop.f32.mrb[20].mxu0 }
 0x126   : > { %v928_v7 = vadd.f32 %v3451_v14, %v927_v6  ;;  %v929_v8 = vpop.f32.mrb[21].mxu0 }
 0x127   : > { %v930_v9 = vpop.f32.mrb[22].mxu0 }
 0x128   : > { %v931_v10 = vadd.f32 %v3451_v14, %v930_v9  ;;  %v932_v11 = vpop.f32.mrb[23].mxu0  ;;  %v1152_v12 = vmax.f32 %v928_v7, 0.0 }
 0x12a   : > { %v1153_v13 = vmax.f32 %v931_v10, 0.0  ;;  %3015 = vmatmul.mubr.bf16.vlgmr.msra.gmra.mrb[128].mxu0 %v1207_v36 }
 0x12b   : > { %3018 = vmatprep.mubr.bf16.mxu0 %v1208_v47 }
 0x12c   : > { %v1211_v15 = vpack.c.bf16 %v1153_v13, %v1152_v12 }
 0x12d   : > { %v935_v16 = vpop.f32.mrb[24].mxu0 }
 0x12e   : > { %v936_v17 = vadd.f32 %v3451_v14, %v935_v16  ;;  %v937_v18 = vpop.f32.mrb[25].mxu0 }
 0x12f   : > { %v938_v19 = vpop.f32.mrb[26].mxu0 }
 0x130   : > { %v939_v20 = vadd.f32 %v3451_v14, %v938_v19  ;;  %v940_v21 = vpop.f32.mrb[27].mxu0  ;;  %v1154_v22 = vmax.f32 %v936_v17, 0.0 }
 0x132   : > { %v1155_v23 = vmax.f32 %v939_v20, 0.0  ;;  %3019 = vmatmul.mubr.bf16.gmra.mrb[132].mxu0 %v1209_v58 }
 0x133   : > { %3022 = vmatprep.mubr.bf16.mxu0 %v1210_v5 }
 0x134   : > { %v1212_v24 = vpack.c.bf16 %v1155_v23, %v1154_v22 }
 0x135   : > { %v943_v25 = vpop.f32.mrb[28].mxu0 }
 0x136   : > { %v944_v26 = vadd.f32 %v3451_v14, %v943_v25  ;;  %v945_v27 = vpop.f32.mrb[29].mxu0 }
 0x137   : > { %v946_v28 = vpop.f32.mrb[30].mxu0 }
 0x138   : > { %v947_v29 = vadd.f32 %v3451_v14, %v946_v28  ;;  %v948_v30 = vpop.f32.mrb[31].mxu0  ;;  %v1156_v31 = vmax.f32 %v944_v26, 0.0 }
 0x13a   : > { %v1157_v32 = vmax.f32 %v947_v29, 0.0  ;;  %3023 = vmatmul.mubr.bf16.gmra.mrb[136].mxu0 %v1211_v15 }
 0x13b   : > { %3026 = vmatprep.mubr.bf16.mxu0 %v1212_v24 }
 0x13c   : > { %v1213_v33 = vpack.c.bf16 %v1157_v32, %v1156_v31 }
 0x13d   : > { %v951_v34 = vpop.f32.mrb[32].mxu0 }
 0x13e   : > { %v952_v35 = vadd.f32 %v3451_v14, %v951_v34  ;;  %v953_v36 = vpop.f32.mrb[33].mxu0 }
 0x13f   : > { %v954_v37 = vpop.f32.mrb[34].mxu0 }
 0x140   : > { %v955_v38 = vadd.f32 %v3451_v14, %v954_v37  ;;  %v956_v39 = vpop.f32.mrb[35].mxu0  ;;  %v1158_v40 = vmax.f32 %v952_v35, 0.0 }
 0x142   : > { %v1159_v41 = vmax.f32 %v955_v38, 0.0  ;;  %3027 = vmatmul.mubr.bf16.gmra.mrb[140].mxu0 %v1213_v33 }
 0x144   : > { %v1214_v42 = vpack.c.bf16 %v1159_v41, %v1158_v40 }
 0x145   : > { %v959_v44 = vpop.f32.mrb[36].mxu0 }
 0x146   : > { %v960_v45 = vadd.f32 %v3451_v14, %v959_v44  ;;  %v961_v46 = vpop.f32.mrb[37].mxu0  ;;  %3030 = vmatprep.mubr.bf16.mxu0 %v1214_v42  ;;  %v3217_v44 = vld [vmem:[%s3869_s5] ss:$8 sps:$4 sm:$0xff]  }
 0x147   : > { %v962_v47 = vpop.f32.mrb[38].mxu0  ;;  %v3222_v46 = vld [vmem:[%s3869_s5 + $0x14] ss:$8 sps:$4 sm:$0xff]  }
 0x148   : > { %v963_v48 = vadd.f32 %v3451_v14, %v962_v47  ;;  %v964_v49 = vpop.f32.mrb[39].mxu0  ;;  %v1160_v50 = vmax.f32 %v960_v45, 0.0 }
 0x14a   : > { %v1161_v51 = vmax.f32 %v963_v48, 0.0 }
 0x14c   : > { %v1215_v52 = vpack.c.bf16 %v1161_v51, %v1160_v50  ;;  %v3220_v51 = vld [vmem:[%s3869_s5 + $0x10] ss:$8 sps:$4 sm:$0xff]  }
 0x14d   : > { %v967_v53 = vpop.f32.mrb[40].mxu0 }
 0x14e   : > { %v968_v54 = vadd.f32 %v3451_v14, %v967_v53  ;;  %v969_v55 = vpop.f32.mrb[41].mxu0  ;;  %3031 = vmatmul.mubr.bf16.gmra.mrb[144].mxu0 %v1215_v52 }
 0x14f   : > { %v970_v56 = vpop.f32.mrb[42].mxu0 }
 0x150   : > { %v971_v57 = vadd.f32 %v3451_v14, %v970_v56  ;;  %v972_v58 = vpop.f32.mrb[43].mxu0  ;;  %v1162_v59 = vmax.f32 %v968_v54, 0.0  ;;  %v3225_v54 = vld [vmem:[%s3869_s5 + $0x24] ss:$8 sps:$4 sm:$0xff]  }
 0x152   : > { %v1163_v60 = vmax.f32 %v971_v57, 0.0  ;;  %v3223_v57 = vld [vmem:[%s3869_s5 + $0x20] ss:$8 sps:$4 sm:$0xff]  }
 0x154   : > { %v1216_v61 = vpack.c.bf16 %v1163_v60, %v1162_v59  ;;  %v3228_v59 = vld [vmem:[%s3869_s5 + $0x34] ss:$8 sps:$4 sm:$0xff]  }
 0x155   : > { %v975_v62 = vpop.f32.mrb[44].mxu0 }
 0x156   : > { %v976_v63 = vadd.f32 %v3451_v14, %v975_v62  ;;  %v977_v0 = vpop.f32.mrb[45].mxu0  ;;  %3034 = vmatprep.mubr.bf16.mxu0 %v1216_v61 }
 0x157   : > { %v978_v2 = vpop.f32.mrb[46].mxu0  ;;  %v3226_v0 = vld [vmem:[%s3869_s5 + $0x30] ss:$8 sps:$4 sm:$0xff]  }
 0x158   : > { %v979_v3 = vadd.f32 %v3451_v14, %v978_v2  ;;  %v980_v4 = vpop.f32.mrb[47].mxu0  ;;  %v1164_v5 = vmax.f32 %v976_v63, 0.0 }
 0x159   : > { %v3231_v4 = vld [vmem:[%s3869_s5 + $0x44] ss:$8 sps:$4 sm:$0xff]  }
 0x15a   : > { %v1165_v6 = vmax.f32 %v979_v3, 0.0 }
 0x15c   : > { %v1217_v7 = vpack.c.bf16 %v1165_v6, %v1164_v5 }
 0x15d   : > { %v983_v8 = vpop.f32.mrb[48].mxu0 }
 0x15e   : > { %v984_v9 = vadd.f32 %v3451_v14, %v983_v8  ;;  %v985_v10 = vpop.f32.mrb[49].mxu0  ;;  %3035 = vmatmul.mubr.bf16.gmra.mrb[148].mxu0 %v1217_v7  ;;  %v3229_v7 = vld [vmem:[%s3869_s5 + $0x40] ss:$8 sps:$4 sm:$0xff]  }
 0x15f   : > { %v986_v11 = vpop.f32.mrb[50].mxu0 }
 0x160   : > { %v987_v12 = vadd.f32 %v3451_v14, %v986_v11  ;;  %v988_v13 = vpop.f32.mrb[51].mxu0  ;;  %v1166_v15 = vmax.f32 %v984_v9, 0.0  ;;  %v3234_v9 = vld [vmem:[%s3869_s5 + $0x54] ss:$8 sps:$4 sm:$0xff]  }
 0x162   : > { %v1167_v16 = vmax.f32 %v987_v12, 0.0 }
 0x164   : > { %v1218_v17 = vpack.c.bf16 %v1167_v16, %v1166_v15  ;;  %v3232_v15 = vld [vmem:[%s3869_s5 + $0x50] ss:$8 sps:$4 sm:$0xff]  }
 0x165   : > { %v991_v18 = vpop.f32.mrb[52].mxu0 }
 0x166   : > { %v992_v19 = vadd.f32 %v3451_v14, %v991_v18  ;;  %v993_v20 = vpop.f32.mrb[53].mxu0  ;;  %3038 = vmatprep.mubr.bf16.mxu0 %v1218_v17  ;;  %v3237_v18 = vld [vmem:[%s3869_s5 + $0x64] ss:$8 sps:$4 sm:$0xff]  }
 0x167   : > { %v994_v21 = vpop.f32.mrb[54].mxu0 }
 0x168   : > { %v995_v22 = vadd.f32 %v3451_v14, %v994_v21  ;;  %v996_v23 = vpop.f32.mrb[55].mxu0  ;;  %v1168_v24 = vmax.f32 %v992_v19, 0.0  ;;  %v3235_v21 = vld [vmem:[%s3869_s5 + $0x60] ss:$8 sps:$4 sm:$0xff]  }
 0x169   : > { %v3240_v23 = vld [vmem:[%s3869_s5 + $0x74] ss:$8 sps:$4 sm:$0xff]  }
 0x16a   : > { %v1169_v25 = vmax.f32 %v995_v22, 0.0 }
 0x16c   : > { %v1219_v26 = vpack.c.bf16 %v1169_v25, %v1168_v24 }
 0x16d   : > { %v999_v27 = vpop.f32.mrb[56].mxu0 }
 0x16e   : > { %v1000_v28 = vadd.f32 %v3451_v14, %v999_v27  ;;  %v1001_v29 = vpop.f32.mrb[57].mxu0  ;;  %3039 = vmatmul.mubr.bf16.gmra.mrb[152].mxu0 %v1219_v26 }
 0x16f   : > { %v1002_v30 = vpop.f32.mrb[58].mxu0 }
 0x170   : > { %v1003_v31 = vadd.f32 %v3451_v14, %v1002_v30  ;;  %v1004_v32 = vpop.f32.mrb[59].mxu0  ;;  %v1170_v33 = vmax.f32 %v1000_v28, 0.0  ;;  %v3238_v28 = vld [vmem:[%s3869_s5 + $0x70] ss:$8 sps:$4 sm:$0xff]  }
 0x172   : > { %v1171_v34 = vmax.f32 %v1003_v31, 0.0 }
 0x174   : > { %v1220_v35 = vpack.c.bf16 %v1171_v34, %v1170_v33 }
 0x175   : > { %v1007_v36 = vpop.f32.mrb[60].mxu0 }
 0x176   : > { %v1008_v37 = vadd.f32 %v3451_v14, %v1007_v36  ;;  %v1009_v38 = vpop.f32.mrb[61].mxu0  ;;  %3042 = vmatprep.mubr.bf16.mxu1 %v1220_v35 }
 0x177   : > { %v1010_v39 = vpop.f32.mrb[62].mxu0 }
 0x178   : > { %v1011_v40 = vadd.f32 %v3451_v14, %v1010_v39  ;;  %v1012_v41 = vpop.f32.mrb[63].mxu0  ;;  %v1172_v42 = vmax.f32 %v1008_v37, 0.0 }
 0x17a   : > { %v1173_v43 = vmax.f32 %v1011_v40, 0.0 }
 0x17c   : > { %v1221_v45 = vpack.c.bf16 %v1173_v43, %v1172_v42 }
 0x17d   : > { %v1015_v47 = vpop.f32.mrb[64].mxu0 }
 0x17e   : > { %v1016_v48 = vadd.f32 %v3451_v14, %v1015_v47  ;;  %v1017_v49 = vpop.f32.mrb[65].mxu0  ;;  %3043 = vmatmul.mubr.bf16.vlgmr.msra.gmra.mrb[0].mxu1 %v1221_v45 }
 0x17f   : > { %v1018_v50 = vpop.f32.mrb[66].mxu0  ;;  %1769 = vmatpush1.bf16.msra.mxu1 %v3217_v44 }
 0x180   : > { %v1019_v52 = vadd.f32 %v3451_v14, %v1018_v50  ;;  %v1020_v53 = vpop.f32.mrb[67].mxu0  ;;  %1770 = vmatprep.subr.bf16.mxu1 %v3222_v46  ;;  %v1174_v55 = vmax.f32 %v1016_v48, 0.0 }
 0x182   : > { %v1175_v56 = vmax.f32 %v1019_v52, 0.0 }
 0x183   : > { %1771 = vmatpush1.bf16.msra.mxu1 %v3220_v51 }
 0x184   : > { %v1222_v58 = vpack.c.bf16 %v1175_v56, %v1174_v55  ;;  %1772 = vmatprep.subr.bf16.mxu1 %v3225_v54 }
 0x185   : > { %v1023_v60 = vpop.f32.mrb[68].mxu0 }
 0x186   : > { %v1024_v61 = vadd.f32 %v3451_v14, %v1023_v60  ;;  %v1025_v62 = vpop.f32.mrb[69].mxu0  ;;  %3046 = vmatprep.mubr.bf16.mxu1 %v1222_v58 }
 0x187   : > { %v1026_v63 = vpop.f32.mrb[70].mxu0  ;;  %1773 = vmatpush1.bf16.msra.mxu1 %v3223_v57 }
 0x188   : > { %v1027_v2 = vadd.f32 %v3451_v14, %v1026_v63  ;;  %v1028_v3 = vpop.f32.mrb[71].mxu0  ;;  %1774 = vmatprep.subr.bf16.mxu1 %v3228_v59  ;;  %v1176_v5 = vmax.f32 %v1024_v61, 0.0 }
 0x18a   : > { %v1177_v6 = vmax.f32 %v1027_v2, 0.0 }
 0x18b   : > { %1775 = vmatpush1.bf16.msra.mxu1 %v3226_v0 }
 0x18c   : > { %v1223_v8 = vpack.c.bf16 %v1177_v6, %v1176_v5  ;;  %1776 = vmatprep.subr.bf16.mxu1 %v3231_v4 }
 0x18d   : > { %v1031_v10 = vpop.f32.mrb[72].mxu0 }
 0x18e   : > { %v1032_v11 = vadd.f32 %v3451_v14, %v1031_v10  ;;  %v1033_v12 = vpop.f32.mrb[73].mxu0  ;;  %3047 = vmatmul.mubr.bf16.gmra.mrb[4].mxu1 %v1223_v8 }
 0x18f   : > { %v1034_v13 = vpop.f32.mrb[74].mxu0  ;;  %1777 = vmatpush1.bf16.msra.mxu1 %v3229_v7 }
 0x190   : > { %v1035_v16 = vadd.f32 %v3451_v14, %v1034_v13  ;;  %v1036_v17 = vpop.f32.mrb[75].mxu0  ;;  %1778 = vmatprep.subr.bf16.mxu1 %v3234_v9  ;;  %v1178_v19 = vmax.f32 %v1032_v11, 0.0 }
 0x192   : > { %v1179_v20 = vmax.f32 %v1035_v16, 0.0 }
 0x193   : > { %1779 = vmatpush1.bf16.msra.mxu1 %v3232_v15 }
 0x194   : > { %v1224_v22 = vpack.c.bf16 %v1179_v20, %v1178_v19  ;;  %1780 = vmatprep.subr.bf16.mxu1 %v3237_v18 }
 0x195   : > { %v1039_v24 = vpop.f32.mrb[76].mxu0 }
 0x196   : > { %v1040_v25 = vadd.f32 %v3451_v14, %v1039_v24  ;;  %v1041_v26 = vpop.f32.mrb[77].mxu0  ;;  %3050 = vmatprep.mubr.bf16.mxu1 %v1224_v22 }
 0x197   : > { %v1042_v27 = vpop.f32.mrb[78].mxu0  ;;  %1781 = vmatpush1.bf16.msra.mxu1 %v3235_v21 }
 0x198   : > { %v1043_v29 = vadd.f32 %v3451_v14, %v1042_v27  ;;  %v1044_v30 = vpop.f32.mrb[79].mxu0  ;;  %1782 = vmatprep.subr.bf16.mxu1 %v3240_v23  ;;  %v1180_v31 = vmax.f32 %v1040_v25, 0.0 }
 0x19a   : > { %v1181_v32 = vmax.f32 %v1043_v29, 0.0 }
 0x19b   : > { %1783 = vmatpush1.bf16.msra.mxu1 %v3238_v28 }
 0x19c   : > { %v1225_v33 = vpack.c.bf16 %v1181_v32, %v1180_v31 }
 0x19d   : > { %v1047_v34 = vpop.f32.mrb[80].mxu0 }
 0x19e   : > { %v1048_v35 = vadd.f32 %v3451_v14, %v1047_v34  ;;  %v1049_v36 = vpop.f32.mrb[81].mxu0  ;;  %3051 = vmatmul.mubr.bf16.gmra.mrb[8].mxu1 %v1225_v33 }
 0x19f   : > { %v1050_v37 = vpop.f32.mrb[82].mxu0 }
 0x1a0   : > { %v1051_v38 = vadd.f32 %v3451_v14, %v1050_v37  ;;  %v1052_v39 = vpop.f32.mrb[83].mxu0  ;;  %v1182_v40 = vmax.f32 %v1048_v35, 0.0 }
 0x1a2   : > { %v1183_v41 = vmax.f32 %v1051_v38, 0.0 }
 0x1a4   : > { %v1226_v42 = vpack.c.bf16 %v1183_v41, %v1182_v40 }
 0x1a5   : > { %v1055_v43 = vpop.f32.mrb[84].mxu0 }
 0x1a6   : > { %v1056_v44 = vadd.f32 %v3451_v14, %v1055_v43  ;;  %v1057_v45 = vpop.f32.mrb[85].mxu0  ;;  %3054 = vmatprep.mubr.bf16.mxu1 %v1226_v42 }
 0x1a7   : > { %v1058_v46 = vpop.f32.mrb[86].mxu0 }
 0x1a8   : > { %v1059_v47 = vadd.f32 %v3451_v14, %v1058_v46  ;;  %v1060_v48 = vpop.f32.mrb[87].mxu0  ;;  %v1184_v49 = vmax.f32 %v1056_v44, 0.0 }
 0x1aa   : > { %v1185_v50 = vmax.f32 %v1059_v47, 0.0 }
 0x1ac   : > { %v1227_v51 = vpack.c.bf16 %v1185_v50, %v1184_v49 }
 0x1ad   : > { %v1063_v52 = vpop.f32.mrb[88].mxu0 }
 0x1ae   : > { %v1064_v53 = vadd.f32 %v3451_v14, %v1063_v52  ;;  %v1065_v54 = vpop.f32.mrb[89].mxu0  ;;  %3055 = vmatmul.mubr.bf16.gmra.mrb[12].mxu1 %v1227_v51 }
 0x1af   : > { %v1066_v55 = vpop.f32.mrb[90].mxu0 }
 0x1b0   : > { %v1067_v56 = vadd.f32 %v3451_v14, %v1066_v55  ;;  %v1068_v57 = vpop.f32.mrb[91].mxu0  ;;  %v1186_v58 = vmax.f32 %v1064_v53, 0.0 }
 0x1b2   : > { %v1187_v59 = vmax.f32 %v1067_v56, 0.0 }
 0x1b4   : > { %v1228_v60 = vpack.c.bf16 %v1187_v59, %v1186_v58 }
 0x1b5   : > { %v1071_v61 = vpop.f32.mrb[92].mxu0 }
 0x1b6   : > { %v1072_v62 = vadd.f32 %v3451_v14, %v1071_v61  ;;  %v1073_v63 = vpop.f32.mrb[93].mxu0  ;;  %3058 = vmatprep.mubr.bf16.mxu1 %v1228_v60 }
 0x1b7   : > { %v1074_v0 = vpop.f32.mrb[94].mxu0 }
 0x1b8   : > { %v1075_v2 = vadd.f32 %v3451_v14, %v1074_v0  ;;  %v1076_v3 = vpop.f32.mrb[95].mxu0  ;;  %v1188_v4 = vmax.f32 %v1072_v62, 0.0 }
 0x1ba   : > { %v1189_v5 = vmax.f32 %v1075_v2, 0.0 }
 0x1bc   : > { %v1229_v6 = vpack.c.bf16 %v1189_v5, %v1188_v4 }
 0x1bd   : > { %v1079_v7 = vpop.f32.mrb[96].mxu0 }
 0x1be   : > { %v1080_v8 = vadd.f32 %v3451_v14, %v1079_v7  ;;  %v1081_v9 = vpop.f32.mrb[97].mxu0  ;;  %3059 = vmatmul.mubr.bf16.gmra.mrb[16].mxu1 %v1229_v6 }
 0x1bf   : > { %v1082_v10 = vpop.f32.mrb[98].mxu0 }
 0x1c0   : > { %v1083_v11 = vadd.f32 %v3451_v14, %v1082_v10  ;;  %v1084_v12 = vpop.f32.mrb[99].mxu0  ;;  %v1190_v13 = vmax.f32 %v1080_v8, 0.0 }
 0x1c2   : > { %v1191_v15 = vmax.f32 %v1083_v11, 0.0 }
 0x1c4   : > { %v1230_v16 = vpack.c.bf16 %v1191_v15, %v1190_v13 }
 0x1c5   : > { %v1087_v17 = vpop.f32.mrb[100].mxu0 }
 0x1c6   : > { %v1088_v18 = vadd.f32 %v3451_v14, %v1087_v17  ;;  %v1089_v19 = vpop.f32.mrb[101].mxu0  ;;  %3062 = vmatprep.mubr.bf16.mxu1 %v1230_v16  ;;  %v3582_v17 = vld [vmem:[%s3868_s4] ss:$0 sm:$0xff] }
 0x1c7   : > { %v1090_v20 = vpop.f32.mrb[102].mxu0 }
 0x1c8   : > { %v1091_v21 = vadd.f32 %v3451_v14, %v1090_v20  ;;  %v1092_v22 = vpop.f32.mrb[103].mxu0  ;;  %v1192_v23 = vmax.f32 %v1088_v18, 0.0 }
 0x1ca   : > { %v1193_v24 = vmax.f32 %v1091_v21, 0.0 }
 0x1cc   : > { %v1231_v25 = vpack.c.bf16 %v1193_v24, %v1192_v23 }
 0x1cd   : > { %v1095_v26 = vpop.f32.mrb[104].mxu0 }
 0x1ce   : > { %v1096_v27 = vadd.f32 %v3451_v14, %v1095_v26  ;;  %v1097_v28 = vpop.f32.mrb[105].mxu0  ;;  %3063 = vmatmul.mubr.bf16.gmra.mrb[20].mxu1 %v1231_v25 }
 0x1cf   : > { %v1098_v29 = vpop.f32.mrb[106].mxu0 }
 0x1d0   : > { %v1099_v30 = vadd.f32 %v3451_v14, %v1098_v29  ;;  %v1100_v31 = vpop.f32.mrb[107].mxu0  ;;  %v1194_v32 = vmax.f32 %v1096_v27, 0.0 }
 0x1d2   : > { %v1195_v33 = vmax.f32 %v1099_v30, 0.0 }
 0x1d4   : > { %v1232_v34 = vpack.c.bf16 %v1195_v33, %v1194_v32 }
 0x1d5   : > { %v1103_v35 = vpop.f32.mrb[108].mxu0 }
 0x1d6   : > { %v1104_v36 = vadd.f32 %v3451_v14, %v1103_v35  ;;  %v1105_v37 = vpop.f32.mrb[109].mxu0  ;;  %3066 = vmatprep.mubr.bf16.mxu1 %v1232_v34 }
 0x1d7   : > { %v1106_v38 = vpop.f32.mrb[110].mxu0 }
 0x1d8   : > { %v1107_v39 = vadd.f32 %v3451_v14, %v1106_v38  ;;  %v1108_v40 = vpop.f32.mrb[111].mxu0  ;;  %v1196_v41 = vmax.f32 %v1104_v36, 0.0 }
 0x1da   : > { %v1197_v42 = vmax.f32 %v1107_v39, 0.0 }
 0x1dc   : > { %v1233_v43 = vpack.c.bf16 %v1197_v42, %v1196_v41 }
 0x1dd   : > { %v1111_v44 = vpop.f32.mrb[112].mxu0 }
 0x1de   : > { %v1112_v45 = vadd.f32 %v3451_v14, %v1111_v44  ;;  %v1113_v46 = vpop.f32.mrb[113].mxu0  ;;  %3067 = vmatmul.mubr.bf16.gmra.mrb[24].mxu1 %v1233_v43 }
 0x1df   : > { %v1114_v47 = vpop.f32.mrb[114].mxu0 }
 0x1e0   : > { %v1115_v48 = vadd.f32 %v3451_v14, %v1114_v47  ;;  %v1116_v49 = vpop.f32.mrb[115].mxu0  ;;  %v1198_v50 = vmax.f32 %v1112_v45, 0.0 }
 0x1e2   : > { %v1199_v51 = vmax.f32 %v1115_v48, 0.0 }
 0x1e4   : > { %v1234_v52 = vpack.c.bf16 %v1199_v51, %v1198_v50 }
 0x1e5   : > { %v1119_v53 = vpop.f32.mrb[116].mxu0 }
 0x1e6   : > { %v1120_v54 = vadd.f32 %v3451_v14, %v1119_v53  ;;  %v1121_v55 = vpop.f32.mrb[117].mxu0  ;;  %3070 = vmatprep.mubr.bf16.mxu1 %v1234_v52 }
 0x1e7   : > { %v1122_v56 = vpop.f32.mrb[118].mxu0 }
 0x1e8   : > { %v1123_v57 = vadd.f32 %v3451_v14, %v1122_v56  ;;  %v1124_v58 = vpop.f32.mrb[119].mxu0  ;;  %v1200_v59 = vmax.f32 %v1120_v54, 0.0 }
 0x1ea   : > { %v1201_v60 = vmax.f32 %v1123_v57, 0.0 }
 0x1ec   : > { %v1235_v61 = vpack.c.bf16 %v1201_v60, %v1200_v59 }
 0x1ed   : > { %v1127_v62 = vpop.f32.mrb[120].mxu0 }
 0x1ee   : > { %v1128_v63 = vadd.f32 %v3451_v14, %v1127_v62  ;;  %v1129_v0 = vpop.f32.mrb[121].mxu0  ;;  %3071 = vmatmul.mubr.bf16.gmra.mrb[28].mxu1 %v1235_v61 }
 0x1ef   : > { %v1130_v2 = vpop.f32.mrb[122].mxu0 }
 0x1f0   : > { %v1131_v3 = vadd.f32 %v3451_v14, %v1130_v2  ;;  %v1132_v4 = vpop.f32.mrb[123].mxu0  ;;  %v1202_v5 = vmax.f32 %v1128_v63, 0.0 }
 0x1f2   : > { %v1203_v6 = vmax.f32 %v1131_v3, 0.0 }
 0x1f4   : > { %v1236_v7 = vpack.c.bf16 %v1203_v6, %v1202_v5 }
 0x1f5   : > { %v1135_v8 = vpop.f32.mrb[124].mxu0 }
 0x1f6   : > { %v1136_v9 = vadd.f32 %v3451_v14, %v1135_v8  ;;  %v1137_v10 = vpop.f32.mrb[125].mxu0  ;;  %3074 = vmatprep.mubr.bf16.mxu1 %v1236_v7 }
 0x1f7   : > { %v1138_v11 = vpop.f32.mrb[126].mxu0 }
 0x1f8   : > { %v1139_v12 = vadd.f32 %v3451_v14, %v1138_v11  ;;  %v1140_v13 = vpop.f32.mrb[127].mxu0  ;;  %v1204_v15 = vmax.f32 %v1136_v9, 0.0 }
 0x1fa   : > { %v1205_v16 = vmax.f32 %v1139_v12, 0.0 }
 0x1fc   : > { %v1237_v18 = vpack.c.bf16 %v1205_v16, %v1204_v15 }
 0x1fd   : > { %v3016_v19 = vpop.f32.mrb[128].mxu0 }
 0x1fe   : > { %v1335_v20 = vadd.f32 %v3016_v19, %v3582_v17  ;;  %v1326_v21 = vpop.f32.mrb[129].mxu0  ;;  %3075 = vmatmul.mubr.bf16.gmra.mrb[32].mxu1 %v1237_v18 }
 0x1ff   : > { %v1327_v22 = vadd.f32 %v3582_v17, %v1326_v21  ;;  %v3017_v23 = vpop.f32.mrb[130].mxu0  ;;  %1800 = vmatprep.mubr.bf16.mxu1 %v3249_v1 }
 0x200   : > { %v1338_v14 = vadd.f32 %v3017_v23, %v3582_v17  ;;  %v1329_v24 = vpop.f32.mrb[131].mxu0  ;;  %v1583_v26 = vmax.f32 %v1335_v20, 0.0 }
 0x201   : > { %v1330_v25 = vadd.f32 %v3582_v17, %v1329_v24  ;;  %v1581_v28 = vmax.f32 %v1327_v22, 0.0 }
 0x202   : > { %v1584_v27 = vmax.f32 %v1338_v14, 0.0 }
 0x203   : > { %v1582_v29 = vmax.f32 %v1330_v25, 0.0 }
 0x204   : > { %v1646_v30 = vpack.c.bf16 %v1584_v27, %v1583_v26 }
 0x205   : > { %v1645_v31 = vpack.c.bf16 %v1582_v29, %v1581_v28  ;;  %v3020_v32 = vpop.f32.mrb[132].mxu0 }
 0x206   : > { %v1351_v33 = vadd.f32 %v3020_v32, %v3582_v17  ;;  %v1342_v34 = vpop.f32.mrb[133].mxu0 }
 0x207   : > { %v1343_v35 = vadd.f32 %v3582_v17, %v1342_v34  ;;  %v3021_v36 = vpop.f32.mrb[134].mxu0  ;;  %1801 = vmatmul.mubr.bf16.vlgmr.msra.gmra.mrb[36].mxu1 %v1645_v31 }
 0x208   : > { %v1354_v37 = vadd.f32 %v3021_v36, %v3582_v17  ;;  %v1345_v38 = vpop.f32.mrb[135].mxu0  ;;  %1810 = vmatprep.mubr.bf16.mxu1 %v3249_v1  ;;  %v1587_v40 = vmax.f32 %v1351_v33, 0.0 }
 0x209   : > { %v1346_v39 = vadd.f32 %v3582_v17, %v1345_v38  ;;  %v1585_v42 = vmax.f32 %v1343_v35, 0.0 }
 0x20a   : > { %v1588_v41 = vmax.f32 %v1354_v37, 0.0 }
 0x20b   : > { %v1586_v43 = vmax.f32 %v1346_v39, 0.0 }
 0x20c   : > { %v1648_v44 = vpack.c.bf16 %v1588_v41, %v1587_v40 }
 0x20d   : > { %v1647_v45 = vpack.c.bf16 %v1586_v43, %v1585_v42  ;;  %v3024_v46 = vpop.f32.mrb[136].mxu0 }
 0x20e   : > { %v1367_v47 = vadd.f32 %v3024_v46, %v3582_v17  ;;  %v1358_v48 = vpop.f32.mrb[137].mxu0 }
 0x20f   : > { %v1359_v49 = vadd.f32 %v3582_v17, %v1358_v48  ;;  %v3025_v50 = vpop.f32.mrb[138].mxu0  ;;  %1811 = vmatmul.mubr.bf16.gmra.mrb[40].mxu1 %v1646_v30 }
 0x210   : > { %v1370_v51 = vadd.f32 %v3025_v50, %v3582_v17  ;;  %v1361_v52 = vpop.f32.mrb[139].mxu0  ;;  %1820 = vmatprep.mubr.bf16.mxu1 %v3249_v1  ;;  %v1591_v54 = vmax.f32 %v1367_v47, 0.0 }
 0x211   : > { %v1362_v53 = vadd.f32 %v3582_v17, %v1361_v52  ;;  %v1589_v56 = vmax.f32 %v1359_v49, 0.0 }
 0x212   : > { %v1592_v55 = vmax.f32 %v1370_v51, 0.0 }
 0x213   : > { %v1590_v57 = vmax.f32 %v1362_v53, 0.0 }
 0x214   : > { %v1650_v58 = vpack.c.bf16 %v1592_v55, %v1591_v54 }
 0x215   : > { %v1649_v59 = vpack.c.bf16 %v1590_v57, %v1589_v56  ;;  %v3028_v60 = vpop.f32.mrb[140].mxu0 }
 0x216   : > { %v1383_v61 = vadd.f32 %v3028_v60, %v3582_v17  ;;  %v1374_v62 = vpop.f32.mrb[141].mxu0 }
 0x217   : > { %v1375_v63 = vadd.f32 %v3582_v17, %v1374_v62  ;;  %v3029_v0 = vpop.f32.mrb[142].mxu0  ;;  %1821 = vmatmul.mubr.bf16.gmra.mrb[44].mxu1 %v1647_v45 }
 0x218   : > { %v1386_v2 = vadd.f32 %v3029_v0, %v3582_v17  ;;  %v1377_v3 = vpop.f32.mrb[143].mxu0  ;;  %1830 = vmatprep.mubr.bf16.mxu1 %v3249_v1  ;;  %v1595_v5 = vmax.f32 %v1383_v61, 0.0 }
 0x219   : > { %v1378_v4 = vadd.f32 %v3582_v17, %v1377_v3  ;;  %v1593_v7 = vmax.f32 %v1375_v63, 0.0 }
 0x21a   : > { %v1596_v6 = vmax.f32 %v1386_v2, 0.0 }
 0x21b   : > { %v1594_v8 = vmax.f32 %v1378_v4, 0.0 }
 0x21c   : > { %v1652_v9 = vpack.c.bf16 %v1596_v6, %v1595_v5 }
 0x21d   : > { %v1651_v10 = vpack.c.bf16 %v1594_v8, %v1593_v7 }
 0x21f   : > { %1831 = vmatmul.mubr.bf16.gmra.mrb[48].mxu1 %v1648_v44 }
 0x220   : > { %1840 = vmatprep.mubr.bf16.mxu1 %v3249_v1 }
 0x221   : > { %v3032_v11 = vpop.f32.mrb[144].mxu0 }
 0x222   : > { %v1399_v12 = vadd.f32 %v3032_v11, %v3582_v17  ;;  %v1390_v13 = vpop.f32.mrb[145].mxu0 }
 0x223   : > { %v1391_v15 = vadd.f32 %v3582_v17, %v1390_v13  ;;  %v3033_v16 = vpop.f32.mrb[146].mxu0 }
 0x224   : > { %v1402_v18 = vadd.f32 %v3033_v16, %v3582_v17  ;;  %v1393_v19 = vpop.f32.mrb[147].mxu0  ;;  %v1599_v21 = vmax.f32 %v1399_v12, 0.0 }
 0x225   : > { %v1394_v20 = vadd.f32 %v3582_v17, %v1393_v19  ;;  %v1597_v23 = vmax.f32 %v1391_v15, 0.0 }
 0x226   : > { %v1600_v22 = vmax.f32 %v1402_v18, 0.0 }
 0x227   : > { %v1598_v14 = vmax.f32 %v1394_v20, 0.0  ;;  %1841 = vmatmul.mubr.bf16.gmra.mrb[52].mxu1 %v1649_v59 }
 0x228   : > { %v1654_v24 = vpack.c.bf16 %v1600_v22, %v1599_v21  ;;  %1850 = vmatprep.mubr.bf16.mxu1 %v3249_v1 }
 0x229   : > { %v1653_v25 = vpack.c.bf16 %v1598_v14, %v1597_v23 }
 0x22f   : > { %1851 = vmatmul.mubr.bf16.gmra.mrb[56].mxu1 %v1650_v58 }
 0x230   : > { %1860 = vmatprep.mubr.bf16.mxu1 %v3249_v1 }
 0x231   : > { %v3036_v26 = vpop.f32.mrb[148].mxu0 }
 0x232   : > { %v1415_v27 = vadd.f32 %v3036_v26, %v3582_v17  ;;  %v1406_v28 = vpop.f32.mrb[149].mxu0 }
 0x233   : > { %v1407_v29 = vadd.f32 %v3582_v17, %v1406_v28  ;;  %v3037_v30 = vpop.f32.mrb[150].mxu0 }
 0x234   : > { %v1418_v31 = vadd.f32 %v3037_v30, %v3582_v17  ;;  %v1409_v32 = vpop.f32.mrb[151].mxu0  ;;  %v1603_v34 = vmax.f32 %v1415_v27, 0.0 }
 0x235   : > { %v1410_v33 = vadd.f32 %v3582_v17, %v1409_v32  ;;  %v1601_v36 = vmax.f32 %v1407_v29, 0.0 }
 0x236   : > { %v1604_v35 = vmax.f32 %v1418_v31, 0.0 }
 0x237   : > { %v1602_v37 = vmax.f32 %v1410_v33, 0.0  ;;  %1861 = vmatmul.mubr.bf16.gmra.mrb[60].mxu1 %v1651_v10 }
 0x238   : > { %v1656_v38 = vpack.c.bf16 %v1604_v35, %v1603_v34  ;;  %1870 = vmatprep.mubr.bf16.mxu1 %v3249_v1 }
 0x239   : > { %v1655_v39 = vpack.c.bf16 %v1602_v37, %v1601_v36 }
 0x23f   : > { %1871 = vmatmul.mubr.bf16.gmra.mrb[64].mxu1 %v1652_v9 }
 0x240   : > { %1880 = vmatprep.mubr.bf16.mxu1 %v3249_v1 }
 0x241   : > { %v3040_v40 = vpop.f32.mrb[152].mxu0 }
 0x242   : > { %v1431_v41 = vadd.f32 %v3040_v40, %v3582_v17  ;;  %v1422_v42 = vpop.f32.mrb[153].mxu0 }
 0x243   : > { %v1423_v43 = vadd.f32 %v3582_v17, %v1422_v42  ;;  %v3041_v44 = vpop.f32.mrb[154].mxu0 }
 0x244   : > { %v1434_v45 = vadd.f32 %v3041_v44, %v3582_v17  ;;  %v1425_v46 = vpop.f32.mrb[155].mxu0  ;;  %v1607_v48 = vmax.f32 %v1431_v41, 0.0 }
 0x245   : > { %v1426_v47 = vadd.f32 %v3582_v17, %v1425_v46  ;;  %v1605_v50 = vmax.f32 %v1423_v43, 0.0 }
 0x246   : > { %v1608_v49 = vmax.f32 %v1434_v45, 0.0 }
 0x247   : > { %v1606_v51 = vmax.f32 %v1426_v47, 0.0  ;;  %1881 = vmatmul.mubr.bf16.gmra.mrb[68].mxu1 %v1653_v25 }
 0x248   : > { %v1658_v52 = vpack.c.bf16 %v1608_v49, %v1607_v48  ;;  %1890 = vmatprep.mubr.bf16.mxu1 %v3249_v1 }
 0x249   : > { %v1657_v53 = vpack.c.bf16 %v1606_v51, %v1605_v50 }
 0x24f   : > { %1891 = vmatmul.mubr.bf16.gmra.mrb[72].mxu1 %v1654_v24 }
 0x250   : > { %1900 = vmatprep.mubr.bf16.mxu1 %v3249_v1 }
 0x251   : > { %v3044_v54 = vpop.f32.mrb[0].mxu1 }
 0x252   : > { %v1447_v55 = vadd.f32 %v3044_v54, %v3582_v17  ;;  %v1438_v56 = vpop.f32.mrb[1].mxu1 }
 0x253   : > { %v1439_v57 = vadd.f32 %v3582_v17, %v1438_v56  ;;  %v3045_v58 = vpop.f32.mrb[2].mxu1 }
 0x254   : > { %v1450_v59 = vadd.f32 %v3045_v58, %v3582_v17  ;;  %v1441_v60 = vpop.f32.mrb[3].mxu1  ;;  %v1611_v62 = vmax.f32 %v1447_v55, 0.0 }
 0x255   : > { %v1442_v61 = vadd.f32 %v3582_v17, %v1441_v60  ;;  %v1609_v0 = vmax.f32 %v1439_v57, 0.0 }
 0x256   : > { %v1612_v63 = vmax.f32 %v1450_v59, 0.0 }
 0x257   : > { %v1610_v2 = vmax.f32 %v1442_v61, 0.0  ;;  %1901 = vmatmul.mubr.bf16.gmra.mrb[76].mxu1 %v1655_v39 }
 0x258   : > { %v1660_v3 = vpack.c.bf16 %v1612_v63, %v1611_v62  ;;  %1910 = vmatprep.mubr.bf16.mxu1 %v3249_v1 }
 0x259   : > { %v1659_v4 = vpack.c.bf16 %v1610_v2, %v1609_v0 }
 0x25f   : > { %1911 = vmatmul.mubr.bf16.gmra.mrb[80].mxu1 %v1656_v38 }
 0x260   : > { %1920 = vmatprep.mubr.bf16.mxu1 %v3249_v1 }
 0x261   : > { %v3048_v5 = vpop.f32.mrb[4].mxu1 }
 0x262   : > { %v1463_v6 = vadd.f32 %v3048_v5, %v3582_v17  ;;  %v1454_v7 = vpop.f32.mrb[5].mxu1 }
 0x263   : > { %v1455_v8 = vadd.f32 %v3582_v17, %v1454_v7  ;;  %v3049_v9 = vpop.f32.mrb[6].mxu1 }
 0x264   : > { %v1466_v10 = vadd.f32 %v3049_v9, %v3582_v17  ;;  %v1457_v11 = vpop.f32.mrb[7].mxu1  ;;  %v1615_v13 = vmax.f32 %v1463_v6, 0.0 }
 0x265   : > { %v1458_v12 = vadd.f32 %v3582_v17, %v1457_v11  ;;  %v1613_v16 = vmax.f32 %v1455_v8, 0.0 }
 0x266   : > { %v1616_v15 = vmax.f32 %v1466_v10, 0.0 }
 0x267   : > { %v1614_v18 = vmax.f32 %v1458_v12, 0.0  ;;  %1921 = vmatmul.mubr.bf16.gmra.mrb[84].mxu1 %v1657_v53 }
 0x268   : > { %v1662_v19 = vpack.c.bf16 %v1616_v15, %v1615_v13  ;;  %1930 = vmatprep.mubr.bf16.mxu1 %v3249_v1 }
 0x269   : > { %v1661_v20 = vpack.c.bf16 %v1614_v18, %v1613_v16 }
 0x26f   : > { %1931 = vmatmul.mubr.bf16.gmra.mrb[88].mxu1 %v1658_v52 }
 0x270   : > { %1940 = vmatprep.mubr.bf16.mxu1 %v3249_v1 }
 0x271   : > { %v3052_v21 = vpop.f32.mrb[8].mxu1 }
 0x272   : > { %v1479_v22 = vadd.f32 %v3052_v21, %v3582_v17  ;;  %v1470_v23 = vpop.f32.mrb[9].mxu1 }
 0x273   : > { %v1471_v14 = vadd.f32 %v3582_v17, %v1470_v23  ;;  %v3053_v24 = vpop.f32.mrb[10].mxu1 }
 0x274   : > { %v1482_v25 = vadd.f32 %v3053_v24, %v3582_v17  ;;  %v1473_v26 = vpop.f32.mrb[11].mxu1  ;;  %v1619_v28 = vmax.f32 %v1479_v22, 0.0 }
 0x275   : > { %v1474_v27 = vadd.f32 %v3582_v17, %v1473_v26  ;;  %v1617_v30 = vmax.f32 %v1471_v14, 0.0 }
 0x276   : > { %v1620_v29 = vmax.f32 %v1482_v25, 0.0 }
 0x277   : > { %v1618_v31 = vmax.f32 %v1474_v27, 0.0  ;;  %1941 = vmatmul.mubr.bf16.gmra.mrb[92].mxu1 %v1659_v4 }
 0x278   : > { %v1664_v32 = vpack.c.bf16 %v1620_v29, %v1619_v28  ;;  %1950 = vmatprep.mubr.bf16.mxu1 %v3249_v1 }
 0x279   : > { %v1663_v33 = vpack.c.bf16 %v1618_v31, %v1617_v30 }
 0x27f   : > { %1951 = vmatmul.mubr.bf16.gmra.mrb[96].mxu1 %v1660_v3 }
 0x280   : > { %1960 = vmatprep.mubr.bf16.mxu1 %v3249_v1 }
 0x281   : > { %v3056_v34 = vpop.f32.mrb[12].mxu1 }
 0x282   : > { %v1495_v35 = vadd.f32 %v3056_v34, %v3582_v17  ;;  %v1486_v36 = vpop.f32.mrb[13].mxu1 }
 0x283   : > { %v1487_v37 = vadd.f32 %v3582_v17, %v1486_v36  ;;  %v3057_v38 = vpop.f32.mrb[14].mxu1 }
 0x284   : > { %v1498_v39 = vadd.f32 %v3057_v38, %v3582_v17  ;;  %v1489_v40 = vpop.f32.mrb[15].mxu1  ;;  %v1623_v42 = vmax.f32 %v1495_v35, 0.0 }
 0x285   : > { %v1490_v41 = vadd.f32 %v3582_v17, %v1489_v40  ;;  %v1621_v44 = vmax.f32 %v1487_v37, 0.0 }
 0x286   : > { %v1624_v43 = vmax.f32 %v1498_v39, 0.0 }
 0x287   : > { %v1622_v45 = vmax.f32 %v1490_v41, 0.0  ;;  %1961 = vmatmul.mubr.bf16.gmra.mrb[100].mxu1 %v1661_v20 }
 0x288   : > { %v1666_v46 = vpack.c.bf16 %v1624_v43, %v1623_v42  ;;  %1970 = vmatprep.mubr.bf16.mxu1 %v3249_v1  ;;  %v1678_v42 = vlaneseq }
 0x289   : > { %v1665_v47 = vpack.c.bf16 %v1622_v45, %v1621_v44 }
 0x28a   : > { %v1679_v43 = vshrl.u32 %v1678_v42, 7 }
 0x28f   : > { %1971 = vmatmul.mubr.bf16.gmra.mrb[104].mxu1 %v1662_v19 }
 0x290   : > { %1980 = vmatprep.mubr.bf16.mxu1 %v3249_v1 }
 0x291   : > { %v3060_v48 = vpop.f32.mrb[16].mxu1 }
 0x292   : > { %v1511_v49 = vadd.f32 %v3060_v48, %v3582_v17  ;;  %v1502_v50 = vpop.f32.mrb[17].mxu1 }
 0x293   : > { %v1503_v51 = vadd.f32 %v3582_v17, %v1502_v50  ;;  %v3061_v52 = vpop.f32.mrb[18].mxu1 }
 0x294   : > { %v1514_v53 = vadd.f32 %v3061_v52, %v3582_v17  ;;  %v1505_v54 = vpop.f32.mrb[19].mxu1  ;;  %v1627_v56 = vmax.f32 %v1511_v49, 0.0  ;;  %v1680_v49 = vsub.s32 0, %v1679_v43  ;;  %v339_v52 = vld [vmem:[%s3870_s6] sm:$0x3] }
 0x295   : > { %v1506_v55 = vadd.f32 %v3582_v17, %v1505_v54  ;;  %v1625_v58 = vmax.f32 %v1503_v51, 0.0 }
 0x296   : > { %v1628_v57 = vmax.f32 %v1514_v53, 0.0  ;;  %v1684_v53 = vsub.s32 1, %v1679_v43 }
 0x297   : > { %v1626_v59 = vmax.f32 %v1506_v55, 0.0  ;;  %1981 = vmatmul.mubr.bf16.gmra.mrb[108].mxu1 %v1663_v33 }
 0x298   : > { %v1668_v60 = vpack.c.bf16 %v1628_v57, %v1627_v56  ;;  %1990 = vmatprep.mubr.bf16.mxu1 %v3249_v1 }
 0x299   : > { %v1667_v61 = vpack.c.bf16 %v1626_v59, %v1625_v58  ;;  %v3680_v59 = vrot.slane %v339_v52, %v1680_v49 }
 0x29f   : > { %1991 = vmatmul.mubr.bf16.gmra.mrb[112].mxu1 %v1664_v32 }
 0x2a0   : > { %2000 = vmatprep.mubr.bf16.mxu1 %v3249_v1 }
 0x2a1   : > { %v3064_v62 = vpop.f32.mrb[20].mxu1 }
 0x2a2   : > { %v1527_v63 = vadd.f32 %v3064_v62, %v3582_v17  ;;  %v1518_v0 = vpop.f32.mrb[21].mxu1 }
 0x2a3   : > { %v1519_v2 = vadd.f32 %v3582_v17, %v1518_v0  ;;  %v3065_v3 = vpop.f32.mrb[22].mxu1 }
 0x2a4   : > { %v1530_v4 = vadd.f32 %v3065_v3, %v3582_v17  ;;  %v1521_v5 = vpop.f32.mrb[23].mxu1  ;;  %v1631_v7 = vmax.f32 %v1527_v63, 0.0 }
 0x2a5   : > { %v1522_v6 = vadd.f32 %v3582_v17, %v1521_v5  ;;  %v1629_v9 = vmax.f32 %v1519_v2, 0.0 }
 0x2a6   : > { %v1632_v8 = vmax.f32 %v1530_v4, 0.0 }
 0x2a7   : > { %v1630_v10 = vmax.f32 %v1522_v6, 0.0  ;;  %2001 = vmatmul.mubr.bf16.gmra.mrb[116].mxu1 %v1665_v47 }
 0x2a8   : > { %v1670_v11 = vpack.c.bf16 %v1632_v8, %v1631_v7  ;;  %2010 = vmatprep.mubr.bf16.mxu1 %v3249_v1 }
 0x2a9   : > { %v1669_v12 = vpack.c.bf16 %v1630_v10, %v1629_v9 }
 0x2af   : > { %2011 = vmatmul.mubr.bf16.gmra.mrb[120].mxu1 %v1666_v46 }
 0x2b0   : > { %2020 = vmatprep.mubr.bf16.mxu1 %v3249_v1 }
 0x2b1   : > { %v3068_v13 = vpop.f32.mrb[24].mxu1 }
 0x2b2   : > { %v1543_v15 = vadd.f32 %v3068_v13, %v3582_v17  ;;  %v1534_v16 = vpop.f32.mrb[25].mxu1 }
 0x2b3   : > { %v1535_v18 = vadd.f32 %v3582_v17, %v1534_v16  ;;  %v3069_v19 = vpop.f32.mrb[26].mxu1 }
 0x2b4   : > { %v1546_v20 = vadd.f32 %v3069_v19, %v3582_v17  ;;  %v1537_v21 = vpop.f32.mrb[27].mxu1  ;;  %v1635_v23 = vmax.f32 %v1543_v15, 0.0 }
 0x2b5   : > { %v1538_v22 = vadd.f32 %v3582_v17, %v1537_v21  ;;  %v1633_v24 = vmax.f32 %v1535_v18, 0.0 }
 0x2b6   : > { %v1636_v14 = vmax.f32 %v1546_v20, 0.0 }
 0x2b7   : > { %v1634_v25 = vmax.f32 %v1538_v22, 0.0  ;;  %2021 = vmatmul.mubr.bf16.gmra.mrb[124].mxu1 %v1667_v61  ;;  %v3684_v61 = vrot.slane %v339_v52, %v1684_v53 }
 0x2b8   : > { %v1672_v26 = vpack.c.bf16 %v1636_v14, %v1635_v23  ;;  %2030 = vmatprep.mubr.bf16.mxu1 %v3249_v1 }
 0x2b9   : > { %v1671_v27 = vpack.c.bf16 %v1634_v25, %v1633_v24 }
 0x2bf   : > { %2031 = vmatmul.mubr.bf16.gmra.mrb[128].mxu1 %v1668_v60 }
 0x2c0   : > { %2040 = vmatprep.mubr.bf16.mxu1 %v3249_v1 }
 0x2c1   : > { %v3072_v28 = vpop.f32.mrb[28].mxu1 }
 0x2c2   : > { %v1559_v29 = vadd.f32 %v3072_v28, %v3582_v17  ;;  %v1550_v30 = vpop.f32.mrb[29].mxu1 }
 0x2c3   : > { %v1551_v31 = vadd.f32 %v3582_v17, %v1550_v30  ;;  %v3073_v32 = vpop.f32.mrb[30].mxu1 }
 0x2c4   : > { %v1562_v33 = vadd.f32 %v3073_v32, %v3582_v17  ;;  %v1553_v34 = vpop.f32.mrb[31].mxu1  ;;  %v1639_v36 = vmax.f32 %v1559_v29, 0.0 }
 0x2c5   : > { %v1554_v35 = vadd.f32 %v3582_v17, %v1553_v34  ;;  %v1637_v38 = vmax.f32 %v1551_v31, 0.0 }
 0x2c6   : > { %v1640_v37 = vmax.f32 %v1562_v33, 0.0 }
 0x2c7   : > { %v1638_v39 = vmax.f32 %v1554_v35, 0.0  ;;  %2041 = vmatmul.mubr.bf16.gmra.mrb[132].mxu1 %v1669_v12 }
 0x2c8   : > { %v3669_v40 = vpack.c.bf16 %v1640_v37, %v1639_v36  ;;  %2050 = vmatprep.mubr.bf16.mxu1 %v3249_v1 }
 0x2c9   : > { %v1673_v41 = vpack.c.bf16 %v1638_v39, %v1637_v38 }
 0x2cf   : > { %2051 = vmatmul.mubr.bf16.gmra.mrb[136].mxu1 %v1670_v11 }
 0x2d0   : > { %2060 = vmatprep.mubr.bf16.mxu1 %v3249_v1 }
 0x2d1   : > { %v3076_v44 = vpop.f32.mrb[32].mxu1 }
 0x2d2   : > { %v1575_v45 = vadd.f32 %v3076_v44, %v3582_v17  ;;  %v1566_v46 = vpop.f32.mrb[33].mxu1 }
 0x2d3   : > { %v1567_v47 = vadd.f32 %v3582_v17, %v1566_v46  ;;  %v3077_v48 = vpop.f32.mrb[34].mxu1 }
 0x2d4   : > { %v1578_v50 = vadd.f32 %v3077_v48, %v3582_v17  ;;  %v1569_v51 = vpop.f32.mrb[35].mxu1  ;;  %v1643_v55 = vmax.f32 %v1575_v45, 0.0 }
 0x2d5   : > { %v1570_v54 = vadd.f32 %v3582_v17, %v1569_v51  ;;  %v1641_v57 = vmax.f32 %v1567_v47, 0.0 }
 0x2d6   : > { %v1644_v56 = vmax.f32 %v1578_v50, 0.0 }
 0x2d7   : > { %v1642_v58 = vmax.f32 %v1570_v54, 0.0  ;;  %2061 = vmatmul.mubr.bf16.gmra.mrb[140].mxu1 %v1671_v27 }
 0x2d8   : > { %v3682_v60 = vpack.c.bf16 %v1644_v56, %v1643_v55  ;;  %2070 = vmatprep.mubr.bf16.mxu1 %v3249_v1 }
 0x2d9   : > { %v3687_v62 = vpack.c.bf16 %v1642_v58, %v1641_v57 }
 0x2da   : > { %v1802_v63 = vpop.f32.mrb[36].mxu1 }
 0x2db   : > { %v1803_v0 = vadd.f32 %v1802_v63, %v3680_v59  ;;  %v1804_v2 = vpop.f32.mrb[37].mxu1 }
 0x2dc   : > { %v1805_v17 = vadd.f32 %v1804_v2, %v3684_v61  ;;  %v1806_v3 = vpop.f32.mrb[38].mxu1 }
 0x2dd   : > { %v1807_v4 = vadd.f32 %v1806_v3, %v3680_v59  ;;  %v1808_v5 = vpop.f32.mrb[39].mxu1  ;;  %v2121_v7 = vmax.f32 %v1803_v0, 0.0 }
 0x2de   : > { %v1809_v6 = vadd.f32 %v1808_v5, %v3684_v61  ;;  %v2122_v9 = vmax.f32 %v1805_v17, 0.0 }
 0x2df   : > { %v2123_v8 = vmax.f32 %v1807_v4, 0.0  ;;  %2071 = vmatmul.mubr.bf16.gmra.mrb[144].mxu1 %v1672_v26 }
 0x2e0   : > { %v2124_v10 = vmax.f32 %v1809_v6, 0.0  ;;  %2080 = vmatprep.mubr.bf16.mxu1 %v3249_v1 }
 0x2e1   : > { %v2249_v11 = vmax.f32 %v2121_v7, %v2123_v8 }
 0x2e2   : > { %v2258_v12 = vmax.f32 %v2122_v9, %v2124_v10  ;;  %v1812_v13 = vpop.f32.mrb[40].mxu1 }
 0x2e3   : > { %v1813_v15 = vadd.f32 %v1812_v13, %v3680_v59  ;;  %v1814_v16 = vpop.f32.mrb[41].mxu1 }
 0x2e4   : > { %v1815_v18 = vadd.f32 %v1814_v16, %v3684_v61  ;;  %v1816_v19 = vpop.f32.mrb[42].mxu1 }
 0x2e5   : > { %v2125_v20 = vmax.f32 %v1813_v15, 0.0  ;;  %v1817_v21 = vadd.f32 %v1816_v19, %v3680_v59  ;;  %v1818_v22 = vpop.f32.mrb[43].mxu1 }
 0x2e6   : > { %v2126_v23 = vmax.f32 %v1815_v18, 0.0  ;;  %v1819_v14 = vadd.f32 %v1818_v22, %v3684_v61 }
 0x2e7   : > { %v2250_v24 = vmax.f32 %v2249_v11, %v2125_v20  ;;  %v2127_v25 = vmax.f32 %v1817_v21, 0.0  ;;  %2081 = vmatmul.mubr.bf16.gmra.mrb[148].mxu1 %v1673_v41 }
 0x2e8   : > { %v2259_v26 = vmax.f32 %v2258_v12, %v2126_v23  ;;  %v2128_v27 = vmax.f32 %v1819_v14, 0.0  ;;  %2090 = vmatprep.mubr.bf16.mxu1 %v3249_v1 }
 0x2e9   : > { %v2251_v28 = vmax.f32 %v2250_v24, %v2127_v25 }
 0x2ea   : > { %v2260_v29 = vmax.f32 %v2259_v26, %v2128_v27  ;;  %v1822_v30 = vpop.f32.mrb[44].mxu1 }
 0x2eb   : > { %v2252_v31 = vrot.slane %v2251_v28, 4  ;;  %v1823_v32 = vadd.f32 %v1822_v30, %v3680_v59  ;;  %v1824_v33 = vpop.f32.mrb[45].mxu1 }
 0x2ec   : > { %v2261_v34 = vrot.slane %v2260_v29, 4  ;;  %v1825_v35 = vadd.f32 %v1824_v33, %v3684_v61  ;;  %v1826_v36 = vpop.f32.mrb[46].mxu1 }
 0x2ed   : > { %v2253_v37 = vmax.f32 %v2251_v28, %v2252_v31  ;;  %v1827_v38 = vadd.f32 %v1826_v36, %v3680_v59  ;;  %v1828_v39 = vpop.f32.mrb[47].mxu1  ;;  %v2129_v44 = vmax.f32 %v1823_v32, 0.0 }
 0x2ee   : > { %v2262_v41 = vmax.f32 %v2260_v29, %v2261_v34  ;;  %v1829_v42 = vadd.f32 %v1828_v39, %v3684_v61  ;;  %v2130_v47 = vmax.f32 %v1825_v35, 0.0 }
 0x2ef   : > { %v2254_v43 = vrot.slane %v2253_v37, 2  ;;  %v2131_v45 = vmax.f32 %v1827_v38, 0.0  ;;  %2091 = vmatmul.mubr.bf16.gmra.mrb[152].mxu1 %v3669_v40 }
 0x2f0   : > { %v2263_v46 = vrot.slane %v2262_v41, 2  ;;  %v2132_v48 = vmax.f32 %v1829_v42, 0.0  ;;  %2100 = vmatprep.mubr.bf16.mxu1 %v3249_v1 }
 0x2f1   : > { %v2255_v49 = vmax.f32 %v2253_v37, %v2254_v43  ;;  %v2267_v50 = vmax.f32 %v2129_v44, %v2131_v45 }
 0x2f2   : > { %v2264_v51 = vmax.f32 %v2262_v41, %v2263_v46  ;;  %v2276_v52 = vmax.f32 %v2130_v47, %v2132_v48  ;;  %v1832_v53 = vpop.f32.mrb[48].mxu1 }
 0x2f3   : > { %v2256_v54 = vrot.slane %v2255_v49, 1  ;;  %v1833_v55 = vadd.f32 %v1832_v53, %v3680_v59  ;;  %v1834_v56 = vpop.f32.mrb[49].mxu1 }
 0x2f4   : > { %v2265_v57 = vrot.slane %v2264_v51, 1  ;;  %v1835_v58 = vadd.f32 %v1834_v56, %v3684_v61  ;;  %v1836_v63 = vpop.f32.mrb[50].mxu1 }
 0x2f5   : > { %v2257_v0 = vmax.f32 %v2255_v49, %v2256_v54  ;;  %v2133_v40 = vmax.f32 %v1833_v55, 0.0  ;;  %v1837_v2 = vadd.f32 %v1836_v63, %v3680_v59  ;;  %v1838_v17 = vpop.f32.mrb[51].mxu1 }
 0x2f6   : > { %v2266_v3 = vmax.f32 %v2264_v51, %v2265_v57  ;;  %v2134_v4 = vmax.f32 %v1835_v58, 0.0  ;;  %v1839_v5 = vadd.f32 %v1838_v17, %v3684_v61 }
 0x2f7   : > { %v2268_v6 = vmax.f32 %v2267_v50, %v2133_v40  ;;  %v2135_v7 = vmax.f32 %v1837_v2, 0.0  ;;  %2101 = vmatmul.mubr.bf16.gmra.mrb[156].mxu1 %v3687_v62 }
 0x2f8   : > { %v2942_v8 = vpack.c.bf16 %v2266_v3, %v2257_v0  ;;  %v2277_v9 = vmax.f32 %v2276_v52, %v2134_v4  ;;  %v2136_v10 = vmax.f32 %v1839_v5, 0.0  ;;  %2110 = vmatprep.mubr.bf16.mxu1 %v3249_v1 }
 0x2f9   : > { %v2269_v11 = vmax.f32 %v2268_v6, %v2135_v7 }
 0x2fa   : > { %v2278_v12 = vmax.f32 %v2277_v9, %v2136_v10  ;;  %v1842_v13 = vpop.f32.mrb[52].mxu1  ;;  %v2649_v53 = vunpack.c.l.b16 %v2942_v8  ;;  %v2650_v55 = vunpack.c.h.b16 %v2942_v8 }
 0x2fb   : > { %v2270_v15 = vrot.slane %v2269_v11, 4  ;;  %v1843_v16 = vadd.f32 %v1842_v13, %v3680_v59  ;;  %v1844_v18 = vpop.f32.mrb[53].mxu1 }
 0x2fc   : > { %v2279_v19 = vrot.slane %v2278_v12, 4  ;;  %v1845_v20 = vadd.f32 %v1844_v18, %v3684_v61  ;;  %v1846_v21 = vpop.f32.mrb[54].mxu1 }
 0x2fd   : > { %v2271_v22 = vmax.f32 %v2269_v11, %v2270_v15  ;;  %v1847_v23 = vadd.f32 %v1846_v21, %v3680_v59  ;;  %v1848_v62 = vpop.f32.mrb[55].mxu1  ;;  %v2137_v1 = vmax.f32 %v1843_v16, 0.0 }
 0x2fe   : > { %v2280_v14 = vmax.f32 %v2278_v12, %v2279_v19  ;;  %v1849_v24 = vadd.f32 %v1848_v62, %v3684_v61  ;;  %v2138_v28 = vmax.f32 %v1845_v20, 0.0 }
 0x2ff   : > { %v2272_v25 = vrot.slane %v2271_v22, 2  ;;  %v2139_v26 = vmax.f32 %v1847_v23, 0.0  ;;  %2111 = vmatmul.mubr.bf16.gmra.mrb[160].mxu1 %v3682_v60 }
 0x300   : > { %v2281_v27 = vrot.slane %v2280_v14, 2  ;;  %v2140_v29 = vmax.f32 %v1849_v24, 0.0 }
 0x301   : > { %v2273_v30 = vmax.f32 %v2271_v22, %v2272_v25  ;;  %v2285_v31 = vmax.f32 %v2137_v1, %v2139_v26 }
 0x302   : > { %v2282_v32 = vmax.f32 %v2280_v14, %v2281_v27  ;;  %v2294_v33 = vmax.f32 %v2138_v28, %v2140_v29  ;;  %v1852_v34 = vpop.f32.mrb[56].mxu1 }
 0x303   : > { %v2274_v35 = vrot.slane %v2273_v30, 1  ;;  %v1853_v36 = vadd.f32 %v1852_v34, %v3680_v59  ;;  %v1854_v37 = vpop.f32.mrb[57].mxu1 }
 0x304   : > { %v2283_v38 = vrot.slane %v2282_v32, 1  ;;  %v1855_v39 = vadd.f32 %v1854_v37, %v3684_v61  ;;  %v1856_v41 = vpop.f32.mrb[58].mxu1 }
 0x305   : > { %v2275_v42 = vmax.f32 %v2273_v30, %v2274_v35  ;;  %v2141_v43 = vmax.f32 %v1853_v36, 0.0  ;;  %v1857_v60 = vadd.f32 %v1856_v41, %v3680_v59  ;;  %v1858_v44 = vpop.f32.mrb[59].mxu1 }
 0x306   : > { %v2284_v45 = vmax.f32 %v2282_v32, %v2283_v38  ;;  %v2142_v46 = vmax.f32 %v1855_v39, 0.0  ;;  %v1859_v47 = vadd.f32 %v1858_v44, %v3684_v61 }
 0x307   : > { %v2286_v48 = vmax.f32 %v2285_v31, %v2141_v43  ;;  %v2143_v49 = vmax.f32 %v1857_v60, 0.0 }
 0x308   : > { %v2943_v50 = vpack.c.bf16 %v2284_v45, %v2275_v42  ;;  %v2295_v51 = vmax.f32 %v2294_v33, %v2142_v46  ;;  %v2144_v52 = vmax.f32 %v1859_v47, 0.0 }
 0x309   : > { %v2287_v54 = vmax.f32 %v2286_v48, %v2143_v49 }
 0x30a   : > { %v2651_v56 = vunpack.c.l.b16 %v2943_v50  ;;  %v2652_v57 = vunpack.c.h.b16 %v2943_v50  ;;  %v2296_v58 = vmax.f32 %v2295_v51, %v2144_v52  ;;  %v1862_v63 = vpop.f32.mrb[60].mxu1 }
 0x30b   : > { %v2288_v0 = vrot.slane %v2287_v54, 4  ;;  %v1863_v40 = vadd.f32 %v1862_v63, %v3680_v59  ;;  %v1864_v2 = vpop.f32.mrb[61].mxu1 }
 0x30c   : > { %v2682_v17 = vsel %vm2681_vm3, %v2651_v56, %v2649_v53  ;;  %v2695_v3 = vsel %vm2681_vm3, %v2652_v57, %v2650_v55  ;;  %v2297_v4 = vrot.slane %v2296_v58, 4  ;;  %v1865_v5 = vadd.f32 %v1864_v2, %v3684_v61  ;;  %v1866_v6 = vpop.f32.mrb[62].mxu1 }
 0x30d   : > { %v2289_v7 = vmax.f32 %v2287_v54, %v2288_v0  ;;  %v1867_v9 = vadd.f32 %v1866_v6, %v3680_v59  ;;  %v1868_v8 = vpop.f32.mrb[63].mxu1  ;;  %v2145_v13 = vmax.f32 %v1863_v40, 0.0 }
 0x30e   : > { %v2298_v10 = vmax.f32 %v2296_v58, %v2297_v4  ;;  %v1869_v11 = vadd.f32 %v1868_v8, %v3684_v61  ;;  %v2146_v18 = vmax.f32 %v1865_v5, 0.0 }
 0x30f   : > { %v2290_v12 = vrot.slane %v2289_v7, 2  ;;  %v2147_v15 = vmax.f32 %v1867_v9, 0.0 }
 0x310   : > { %v2299_v16 = vrot.slane %v2298_v10, 2  ;;  %v2148_v19 = vmax.f32 %v1869_v11, 0.0 }
 0x311   : > { %v2291_v20 = vmax.f32 %v2289_v7, %v2290_v12  ;;  %v2303_v21 = vmax.f32 %v2145_v13, %v2147_v15 }
 0x312   : > { %v2300_v22 = vmax.f32 %v2298_v10, %v2299_v16  ;;  %v2312_v23 = vmax.f32 %v2146_v18, %v2148_v19  ;;  %v1872_v62 = vpop.f32.mrb[64].mxu1 }
 0x313   : > { %v2292_v14 = vrot.slane %v2291_v20, 1  ;;  %v1873_v24 = vadd.f32 %v1872_v62, %v3680_v59  ;;  %v1874_v25 = vpop.f32.mrb[65].mxu1 }
 0x314   : > { %v2301_v1 = vrot.slane %v2300_v22, 1  ;;  %v1875_v26 = vadd.f32 %v1874_v25, %v3684_v61  ;;  %v1876_v27 = vpop.f32.mrb[66].mxu1 }
 0x315   : > { %v2293_v28 = vmax.f32 %v2291_v20, %v2292_v14  ;;  %v2149_v29 = vmax.f32 %v1873_v24, 0.0  ;;  %v1877_v30 = vadd.f32 %v1876_v27, %v3680_v59  ;;  %v1878_v31 = vpop.f32.mrb[67].mxu1 }
 0x316   : > { %v2302_v32 = vmax.f32 %v2300_v22, %v2301_v1  ;;  %v2150_v33 = vmax.f32 %v1875_v26, 0.0  ;;  %v1879_v34 = vadd.f32 %v1878_v31, %v3684_v61 }
 0x317   : > { %v2304_v35 = vmax.f32 %v2303_v21, %v2149_v29  ;;  %v2151_v36 = vmax.f32 %v1877_v30, 0.0 }
 0x318   : > { %v2944_v37 = vpack.c.bf16 %v2302_v32, %v2293_v28  ;;  %v2313_v38 = vmax.f32 %v2312_v23, %v2150_v33  ;;  %v2152_v39 = vmax.f32 %v1879_v34, 0.0 }
 0x319   : > { %v2305_v41 = vmax.f32 %v2304_v35, %v2151_v36 }
 0x31a   : > { %v2653_v42 = vunpack.c.l.b16 %v2944_v37  ;;  %v2654_v43 = vunpack.c.h.b16 %v2944_v37  ;;  %v2314_v60 = vmax.f32 %v2313_v38, %v2152_v39  ;;  %v1882_v44 = vpop.f32.mrb[68].mxu1 }
 0x31b   : > { %v2306_v45 = vrot.slane %v2305_v41, 4  ;;  %v1883_v46 = vadd.f32 %v1882_v44, %v3680_v59  ;;  %v1884_v47 = vpop.f32.mrb[69].mxu1 }
 0x31c   : > { %v2684_v48 = vsel %vm2683_vm4, %v2653_v42, %v2682_v17  ;;  %v2696_v49 = vsel %vm2683_vm4, %v2654_v43, %v2695_v3  ;;  %v2315_v50 = vrot.slane %v2314_v60, 4  ;;  %v1885_v51 = vadd.f32 %v1884_v47, %v3684_v61  ;;  %v1886_v52 = vpop.f32.mrb[70].mxu1 }
 0x31d   : > { %v2307_v53 = vmax.f32 %v2305_v41, %v2306_v45  ;;  %v1887_v54 = vadd.f32 %v1886_v52, %v3680_v59  ;;  %v1888_v55 = vpop.f32.mrb[71].mxu1  ;;  %v2153_v63 = vmax.f32 %v1883_v46, 0.0 }
 0x31e   : > { %v2316_v56 = vmax.f32 %v2314_v60, %v2315_v50  ;;  %v1889_v57 = vadd.f32 %v1888_v55, %v3684_v61  ;;  %v2154_v2 = vmax.f32 %v1885_v51, 0.0 }
 0x31f   : > { %v2308_v58 = vrot.slane %v2307_v53, 2  ;;  %v2155_v0 = vmax.f32 %v1887_v54, 0.0 }
 0x320   : > { %v2317_v40 = vrot.slane %v2316_v56, 2  ;;  %v2156_v4 = vmax.f32 %v1889_v57, 0.0 }
 0x321   : > { %v2309_v17 = vmax.f32 %v2307_v53, %v2308_v58  ;;  %v2321_v5 = vmax.f32 %v2153_v63, %v2155_v0 }
 0x322   : > { %v2318_v3 = vmax.f32 %v2316_v56, %v2317_v40  ;;  %v2330_v6 = vmax.f32 %v2154_v2, %v2156_v4  ;;  %v1892_v7 = vpop.f32.mrb[72].mxu1 }
 0x323   : > { %v2310_v9 = vrot.slane %v2309_v17, 1  ;;  %v1893_v8 = vadd.f32 %v1892_v7, %v3680_v59  ;;  %v1894_v10 = vpop.f32.mrb[73].mxu1 }
 0x324   : > { %v2319_v11 = vrot.slane %v2318_v3, 1  ;;  %v1895_v12 = vadd.f32 %v1894_v10, %v3684_v61  ;;  %v1896_v13 = vpop.f32.mrb[74].mxu1 }
 0x325   : > { %v2311_v15 = vmax.f32 %v2309_v17, %v2310_v9  ;;  %v2157_v16 = vmax.f32 %v1893_v8, 0.0  ;;  %v1897_v18 = vadd.f32 %v1896_v13, %v3680_v59  ;;  %v1898_v19 = vpop.f32.mrb[75].mxu1 }
 0x326   : > { %v2320_v20 = vmax.f32 %v2318_v3, %v2319_v11  ;;  %v2158_v21 = vmax.f32 %v1895_v12, 0.0  ;;  %v1899_v22 = vadd.f32 %v1898_v19, %v3684_v61 }
 0x327   : > { %v2322_v23 = vmax.f32 %v2321_v5, %v2157_v16  ;;  %v2159_v62 = vmax.f32 %v1897_v18, 0.0 }
 0x328   : > { %v2945_v14 = vpack.c.bf16 %v2320_v20, %v2311_v15  ;;  %v2331_v24 = vmax.f32 %v2330_v6, %v2158_v21  ;;  %v2160_v25 = vmax.f32 %v1899_v22, 0.0 }
 0x329   : > { %v2323_v1 = vmax.f32 %v2322_v23, %v2159_v62 }
 0x32a   : > { %v2655_v26 = vunpack.c.l.b16 %v2945_v14  ;;  %v2656_v27 = vunpack.c.h.b16 %v2945_v14  ;;  %v2332_v28 = vmax.f32 %v2331_v24, %v2160_v25  ;;  %v1902_v29 = vpop.f32.mrb[76].mxu1 }
 0x32b   : > { %v2324_v30 = vrot.slane %v2323_v1, 4  ;;  %v1903_v31 = vadd.f32 %v1902_v29, %v3680_v59  ;;  %v1904_v32 = vpop.f32.mrb[77].mxu1 }
 0x32c   : > { %v2686_v33 = vsel %vm2685_vm5, %v2655_v26, %v2684_v48  ;;  %v2697_v34 = vsel %vm2685_vm5, %v2656_v27, %v2696_v49  ;;  %v2333_v35 = vrot.slane %v2332_v28, 4  ;;  %v1905_v36 = vadd.f32 %v1904_v32, %v3684_v61  ;;  %v1906_v37 = vpop.f32.mrb[78].mxu1 }
 0x32d   : > { %v2325_v38 = vmax.f32 %v2323_v1, %v2324_v30  ;;  %v1907_v39 = vadd.f32 %v1906_v37, %v3680_v59  ;;  %v1908_v41 = vpop.f32.mrb[79].mxu1  ;;  %v2161_v44 = vmax.f32 %v1903_v31, 0.0 }
 0x32e   : > { %v2334_v42 = vmax.f32 %v2332_v28, %v2333_v35  ;;  %v1909_v43 = vadd.f32 %v1908_v41, %v3684_v61  ;;  %v2162_v47 = vmax.f32 %v1905_v36, 0.0 }
 0x32f   : > { %v2326_v60 = vrot.slane %v2325_v38, 2  ;;  %v2163_v45 = vmax.f32 %v1907_v39, 0.0 }
 0x330   : > { %v2335_v46 = vrot.slane %v2334_v42, 2  ;;  %v2164_v50 = vmax.f32 %v1909_v43, 0.0 }
 0x331   : > { %v2327_v48 = vmax.f32 %v2325_v38, %v2326_v60  ;;  %v2339_v51 = vmax.f32 %v2161_v44, %v2163_v45 }
 0x332   : > { %v2336_v49 = vmax.f32 %v2334_v42, %v2335_v46  ;;  %v2348_v52 = vmax.f32 %v2162_v47, %v2164_v50  ;;  %v1912_v53 = vpop.f32.mrb[80].mxu1 }
 0x333   : > { %v2328_v54 = vrot.slane %v2327_v48, 1  ;;  %v1913_v55 = vadd.f32 %v1912_v53, %v3680_v59  ;;  %v1914_v56 = vpop.f32.mrb[81].mxu1 }
 0x334   : > { %v2337_v57 = vrot.slane %v2336_v49, 1  ;;  %v1915_v58 = vadd.f32 %v1914_v56, %v3684_v61  ;;  %v1916_v63 = vpop.f32.mrb[82].mxu1 }
 0x335   : > { %v2329_v0 = vmax.f32 %v2327_v48, %v2328_v54  ;;  %v2165_v40 = vmax.f32 %v1913_v55, 0.0  ;;  %v1917_v2 = vadd.f32 %v1916_v63, %v3680_v59  ;;  %v1918_v4 = vpop.f32.mrb[83].mxu1 }
 0x336   : > { %v2338_v17 = vmax.f32 %v2336_v49, %v2337_v57  ;;  %v2166_v5 = vmax.f32 %v1915_v58, 0.0  ;;  %v1919_v3 = vadd.f32 %v1918_v4, %v3684_v61 }
 0x337   : > { %v2340_v6 = vmax.f32 %v2339_v51, %v2165_v40  ;;  %v2167_v7 = vmax.f32 %v1917_v2, 0.0 }
 0x338   : > { %v2946_v9 = vpack.c.bf16 %v2338_v17, %v2329_v0  ;;  %v2349_v8 = vmax.f32 %v2348_v52, %v2166_v5  ;;  %v2168_v10 = vmax.f32 %v1919_v3, 0.0 }
 0x339   : > { %v2341_v11 = vmax.f32 %v2340_v6, %v2167_v7 }
 0x33a   : > { %v2657_v12 = vunpack.c.l.b16 %v2946_v9  ;;  %v2658_v13 = vunpack.c.h.b16 %v2946_v9  ;;  %v2350_v15 = vmax.f32 %v2349_v8, %v2168_v10  ;;  %v1922_v16 = vpop.f32.mrb[84].mxu1 }
 0x33b   : > { %v2342_v18 = vrot.slane %v2341_v11, 4  ;;  %v1923_v19 = vadd.f32 %v1922_v16, %v3680_v59  ;;  %v1924_v20 = vpop.f32.mrb[85].mxu1 }
 0x33c   : > { %v2688_v21 = vsel %vm2687_vm6, %v2657_v12, %v2686_v33  ;;  %v2698_v22 = vsel %vm2687_vm6, %v2658_v13, %v2697_v34  ;;  %v2351_v23 = vrot.slane %v2350_v15, 4  ;;  %v1925_v62 = vadd.f32 %v1924_v20, %v3684_v61  ;;  %v1926_v14 = vpop.f32.mrb[86].mxu1 }
 0x33d   : > { %v2343_v24 = vmax.f32 %v2341_v11, %v2342_v18  ;;  %v1927_v25 = vadd.f32 %v1926_v14, %v3680_v59  ;;  %v1928_v1 = vpop.f32.mrb[87].mxu1  ;;  %v2169_v29 = vmax.f32 %v1923_v19, 0.0 }
 0x33e   : > { %v2352_v26 = vmax.f32 %v2350_v15, %v2351_v23  ;;  %v1929_v27 = vadd.f32 %v1928_v1, %v3684_v61  ;;  %v2170_v32 = vmax.f32 %v1925_v62, 0.0 }
 0x33f   : > { %v2344_v28 = vrot.slane %v2343_v24, 2  ;;  %v2171_v30 = vmax.f32 %v1927_v25, 0.0 }
 0x340   : > { %v2353_v31 = vrot.slane %v2352_v26, 2  ;;  %v2172_v35 = vmax.f32 %v1929_v27, 0.0 }
 0x341   : > { %v2345_v33 = vmax.f32 %v2343_v24, %v2344_v28  ;;  %v2357_v36 = vmax.f32 %v2169_v29, %v2171_v30 }
 0x342   : > { %v2354_v34 = vmax.f32 %v2352_v26, %v2353_v31  ;;  %v2366_v37 = vmax.f32 %v2170_v32, %v2172_v35  ;;  %v1932_v38 = vpop.f32.mrb[88].mxu1 }
 0x343   : > { %v2346_v39 = vrot.slane %v2345_v33, 1  ;;  %v1933_v41 = vadd.f32 %v1932_v38, %v3680_v59  ;;  %v1934_v42 = vpop.f32.mrb[89].mxu1 }
 0x344   : > { %v2355_v43 = vrot.slane %v2354_v34, 1  ;;  %v1935_v60 = vadd.f32 %v1934_v42, %v3684_v61  ;;  %v1936_v44 = vpop.f32.mrb[90].mxu1 }
 0x345   : > { %v2347_v45 = vmax.f32 %v2345_v33, %v2346_v39  ;;  %v2173_v46 = vmax.f32 %v1933_v41, 0.0  ;;  %v1937_v47 = vadd.f32 %v1936_v44, %v3680_v59  ;;  %v1938_v50 = vpop.f32.mrb[91].mxu1 }
 0x346   : > { %v2356_v48 = vmax.f32 %v2354_v34, %v2355_v43  ;;  %v2174_v51 = vmax.f32 %v1935_v60, 0.0  ;;  %v1939_v49 = vadd.f32 %v1938_v50, %v3684_v61 }
 0x347   : > { %v2358_v52 = vmax.f32 %v2357_v36, %v2173_v46  ;;  %v2175_v53 = vmax.f32 %v1937_v47, 0.0 }
 0x348   : > { %v2947_v54 = vpack.c.bf16 %v2356_v48, %v2347_v45  ;;  %v2367_v55 = vmax.f32 %v2366_v37, %v2174_v51  ;;  %v2176_v56 = vmax.f32 %v1939_v49, 0.0 }
 0x349   : > { %v2359_v57 = vmax.f32 %v2358_v52, %v2175_v53 }
 0x34a   : > { %v2659_v58 = vunpack.c.l.b16 %v2947_v54  ;;  %v2660_v63 = vunpack.c.h.b16 %v2947_v54  ;;  %v2368_v0 = vmax.f32 %v2367_v55, %v2176_v56  ;;  %v1942_v40 = vpop.f32.mrb[92].mxu1 }
 0x34b   : > { %v2360_v2 = vrot.slane %v2359_v57, 4  ;;  %v1943_v4 = vadd.f32 %v1942_v40, %v3680_v59  ;;  %v1944_v17 = vpop.f32.mrb[93].mxu1 }
 0x34c   : > { %v2690_v5 = vsel %vm2689_vm7, %v2659_v58, %v2688_v21  ;;  %v2699_v3 = vsel %vm2689_vm7, %v2660_v63, %v2698_v22  ;;  %v2369_v6 = vrot.slane %v2368_v0, 4  ;;  %v1945_v7 = vadd.f32 %v1944_v17, %v3684_v61  ;;  %v1946_v9 = vpop.f32.mrb[94].mxu1 }
 0x34d   : > { %v2361_v8 = vmax.f32 %v2359_v57, %v2360_v2  ;;  %v1947_v10 = vadd.f32 %v1946_v9, %v3680_v59  ;;  %v1948_v11 = vpop.f32.mrb[95].mxu1  ;;  %v2177_v16 = vmax.f32 %v1943_v4, 0.0 }
 0x34e   : > { %v2370_v12 = vmax.f32 %v2368_v0, %v2369_v6  ;;  %v1949_v13 = vadd.f32 %v1948_v11, %v3684_v61  ;;  %v2178_v20 = vmax.f32 %v1945_v7, 0.0 }
 0x34f   : > { %v2362_v15 = vrot.slane %v2361_v8, 2  ;;  %v2179_v18 = vmax.f32 %v1947_v10, 0.0 }
 0x350   : > { %v2371_v19 = vrot.slane %v2370_v12, 2  ;;  %v2180_v23 = vmax.f32 %v1949_v13, 0.0 }
 0x351   : > { %v2363_v21 = vmax.f32 %v2361_v8, %v2362_v15  ;;  %v2375_v62 = vmax.f32 %v2177_v16, %v2179_v18 }
 0x352   : > { %v2372_v22 = vmax.f32 %v2370_v12, %v2371_v19  ;;  %v2384_v14 = vmax.f32 %v2178_v20, %v2180_v23  ;;  %v1952_v24 = vpop.f32.mrb[96].mxu1 }
 0x353   : > { %v2364_v25 = vrot.slane %v2363_v21, 1  ;;  %v1953_v1 = vadd.f32 %v1952_v24, %v3680_v59  ;;  %v1954_v26 = vpop.f32.mrb[97].mxu1 }
 0x354   : > { %v2373_v27 = vrot.slane %v2372_v22, 1  ;;  %v1955_v28 = vadd.f32 %v1954_v26, %v3684_v61  ;;  %v1956_v29 = vpop.f32.mrb[98].mxu1 }
 0x355   : > { %v2365_v30 = vmax.f32 %v2363_v21, %v2364_v25  ;;  %v2181_v31 = vmax.f32 %v1953_v1, 0.0  ;;  %v1957_v32 = vadd.f32 %v1956_v29, %v3680_v59  ;;  %v1958_v35 = vpop.f32.mrb[99].mxu1 }
 0x356   : > { %v2374_v33 = vmax.f32 %v2372_v22, %v2373_v27  ;;  %v2182_v36 = vmax.f32 %v1955_v28, 0.0  ;;  %v1959_v34 = vadd.f32 %v1958_v35, %v3684_v61 }
 0x357   : > { %v2376_v37 = vmax.f32 %v2375_v62, %v2181_v31  ;;  %v2183_v38 = vmax.f32 %v1957_v32, 0.0 }
 0x358   : > { %v2948_v39 = vpack.c.bf16 %v2374_v33, %v2365_v30  ;;  %v2385_v41 = vmax.f32 %v2384_v14, %v2182_v36  ;;  %v2184_v42 = vmax.f32 %v1959_v34, 0.0 }
 0x359   : > { %v2377_v43 = vmax.f32 %v2376_v37, %v2183_v38 }
 0x35a   : > { %v2661_v60 = vunpack.c.l.b16 %v2948_v39  ;;  %v2662_v44 = vunpack.c.h.b16 %v2948_v39  ;;  %v2386_v45 = vmax.f32 %v2385_v41, %v2184_v42  ;;  %v1962_v46 = vpop.f32.mrb[100].mxu1 }
 0x35b   : > { %v2378_v47 = vrot.slane %v2377_v43, 4  ;;  %v1963_v50 = vadd.f32 %v1962_v46, %v3680_v59  ;;  %v1964_v48 = vpop.f32.mrb[101].mxu1 }
 0x35c   : > { %v2692_v51 = vsel %vm2691_vm8, %v2661_v60, %v2690_v5  ;;  %v2700_v49 = vsel %vm2691_vm8, %v2662_v44, %v2699_v3  ;;  %v2387_v52 = vrot.slane %v2386_v45, 4  ;;  %v1965_v53 = vadd.f32 %v1964_v48, %v3684_v61  ;;  %v1966_v54 = vpop.f32.mrb[102].mxu1 }
 0x35d   : > { %v2379_v55 = vmax.f32 %v2377_v43, %v2378_v47  ;;  %v1967_v56 = vadd.f32 %v1966_v54, %v3680_v59  ;;  %v1968_v57 = vpop.f32.mrb[103].mxu1  ;;  %v2185_v40 = vmax.f32 %v1963_v50, 0.0 }
 0x35e   : > { %v2388_v58 = vmax.f32 %v2386_v45, %v2387_v52  ;;  %v1969_v63 = vadd.f32 %v1968_v57, %v3684_v61  ;;  %v2186_v17 = vmax.f32 %v1965_v53, 0.0 }
 0x35f   : > { %v2380_v0 = vrot.slane %v2379_v55, 2  ;;  %v2187_v2 = vmax.f32 %v1967_v56, 0.0 }
 0x360   : > { %v2389_v4 = vrot.slane %v2388_v58, 2  ;;  %v2188_v5 = vmax.f32 %v1969_v63, 0.0 }
 0x361   : > { %v2381_v3 = vmax.f32 %v2379_v55, %v2380_v0  ;;  %v2393_v6 = vmax.f32 %v2185_v40, %v2187_v2 }
 0x362   : > { %v2390_v7 = vmax.f32 %v2388_v58, %v2389_v4  ;;  %v2402_v9 = vmax.f32 %v2186_v17, %v2188_v5  ;;  %v1972_v8 = vpop.f32.mrb[104].mxu1 }
 0x363   : > { %v2382_v10 = vrot.slane %v2381_v3, 1  ;;  %v1973_v11 = vadd.f32 %v1972_v8, %v3680_v59  ;;  %v1974_v12 = vpop.f32.mrb[105].mxu1 }
 0x364   : > { %v2391_v13 = vrot.slane %v2390_v7, 1  ;;  %v1975_v15 = vadd.f32 %v1974_v12, %v3684_v61  ;;  %v1976_v16 = vpop.f32.mrb[106].mxu1 }
 0x365   : > { %v2383_v18 = vmax.f32 %v2381_v3, %v2382_v10  ;;  %v2189_v19 = vmax.f32 %v1973_v11, 0.0  ;;  %v1977_v20 = vadd.f32 %v1976_v16, %v3680_v59  ;;  %v1978_v23 = vpop.f32.mrb[107].mxu1 }
 0x366   : > { %v2392_v21 = vmax.f32 %v2390_v7, %v2391_v13  ;;  %v2190_v62 = vmax.f32 %v1975_v15, 0.0  ;;  %v1979_v22 = vadd.f32 %v1978_v23, %v3684_v61 }
 0x367   : > { %v2394_v14 = vmax.f32 %v2393_v6, %v2189_v19  ;;  %v2191_v24 = vmax.f32 %v1977_v20, 0.0 }
 0x368   : > { %v2949_v25 = vpack.c.bf16 %v2392_v21, %v2383_v18  ;;  %v2403_v1 = vmax.f32 %v2402_v9, %v2190_v62  ;;  %v2192_v26 = vmax.f32 %v1979_v22, 0.0 }
 0x369   : > { %v2395_v27 = vmax.f32 %v2394_v14, %v2191_v24 }
 0x36a   : > { %v2663_v28 = vunpack.c.l.b16 %v2949_v25  ;;  %v2664_v29 = vunpack.c.h.b16 %v2949_v25  ;;  %v2404_v30 = vmax.f32 %v2403_v1, %v2192_v26  ;;  %v1982_v31 = vpop.f32.mrb[108].mxu1 }
 0x36b   : > { %v2396_v32 = vrot.slane %v2395_v27, 4  ;;  %v1983_v35 = vadd.f32 %v1982_v31, %v3680_v59  ;;  %v1984_v33 = vpop.f32.mrb[109].mxu1 }
 0x36c   : > { %v2694_v36 = vsel %vm2693_vm9, %v2663_v28, %v2692_v51  ;;  %v2701_v34 = vsel %vm2693_vm9, %v2664_v29, %v2700_v49  ;;  %v2405_v37 = vrot.slane %v2404_v30, 4  ;;  %v1985_v38 = vadd.f32 %v1984_v33, %v3684_v61  ;;  %v1986_v39 = vpop.f32.mrb[110].mxu1 }
 0x36d   : > { %v2716_v41 = vpack.c.b16 %v2701_v34, %v2694_v36  ;;  %v2397_v42 = vmax.f32 %v2395_v27, %v2396_v32  ;;  %v1987_v43 = vadd.f32 %v1986_v39, %v3680_v59  ;;  %v1988_v60 = vpop.f32.mrb[111].mxu1  ;;  %v2193_v47 = vmax.f32 %v1983_v35, 0.0 }
 0x36e   : > { %v2406_v44 = vmax.f32 %v2404_v30, %v2405_v37  ;;  %v1989_v45 = vadd.f32 %v1988_v60, %v3684_v61  ;;  %v2194_v51 = vmax.f32 %v1985_v38, 0.0 }
 0x36f   : > { %2720 = vst [vmem:[%s3786_s21] sm:$0xff] %v2716_v41  ;;  %v2398_v46 = vrot.slane %v2397_v42, 2  ;;  %v2195_v50 = vmax.f32 %v1987_v43, 0.0 }
 0x370   : > { %v2407_v48 = vrot.slane %v2406_v44, 2  ;;  %v2196_v52 = vmax.f32 %v1989_v45, 0.0 }
 0x371   : > { %v2399_v49 = vmax.f32 %v2397_v42, %v2398_v46  ;;  %v2411_v53 = vmax.f32 %v2193_v47, %v2195_v50 }
 0x372   : > { %v2408_v54 = vmax.f32 %v2406_v44, %v2407_v48  ;;  %v2420_v55 = vmax.f32 %v2194_v51, %v2196_v52  ;;  %v1992_v56 = vpop.f32.mrb[112].mxu1 }
 0x373   : > { %v2400_v57 = vrot.slane %v2399_v49, 1  ;;  %v1993_v58 = vadd.f32 %v1992_v56, %v3680_v59  ;;  %v1994_v63 = vpop.f32.mrb[113].mxu1 }
 0x374   : > { %v2409_v0 = vrot.slane %v2408_v54, 1  ;;  %v1995_v40 = vadd.f32 %v1994_v63, %v3684_v61  ;;  %v1996_v2 = vpop.f32.mrb[114].mxu1 }
 0x375   : > { %v2401_v4 = vmax.f32 %v2399_v49, %v2400_v57  ;;  %v2197_v17 = vmax.f32 %v1993_v58, 0.0  ;;  %v1997_v5 = vadd.f32 %v1996_v2, %v3680_v59  ;;  %v1998_v3 = vpop.f32.mrb[115].mxu1 }
 0x376   : > { %v2410_v6 = vmax.f32 %v2408_v54, %v2409_v0  ;;  %v2198_v7 = vmax.f32 %v1995_v40, 0.0  ;;  %v1999_v9 = vadd.f32 %v1998_v3, %v3684_v61 }
 0x377   : > { %v2412_v8 = vmax.f32 %v2411_v53, %v2197_v17  ;;  %v2199_v10 = vmax.f32 %v1997_v5, 0.0 }
 0x378   : > { %v2950_v11 = vpack.c.bf16 %v2410_v6, %v2401_v4  ;;  %v2421_v12 = vmax.f32 %v2420_v55, %v2198_v7  ;;  %v2200_v13 = vmax.f32 %v1999_v9, 0.0 }
 0x379   : > { %v2413_v15 = vmax.f32 %v2412_v8, %v2199_v10 }
 0x37a   : > { %v2422_v16 = vmax.f32 %v2421_v12, %v2200_v13  ;;  %v2002_v18 = vpop.f32.mrb[116].mxu1  ;;  %v2665_v56 = vunpack.c.l.b16 %v2950_v11  ;;  %v2666_v58 = vunpack.c.h.b16 %v2950_v11 }
 0x37b   : > { %v2414_v19 = vrot.slane %v2413_v15, 4  ;;  %v2003_v20 = vadd.f32 %v2002_v18, %v3680_v59  ;;  %v2004_v23 = vpop.f32.mrb[117].mxu1 }
 0x37c   : > { %v2423_v21 = vrot.slane %v2422_v16, 4  ;;  %v2005_v62 = vadd.f32 %v2004_v23, %v3684_v61  ;;  %v2006_v22 = vpop.f32.mrb[118].mxu1 }
 0x37d   : > { %v2415_v14 = vmax.f32 %v2413_v15, %v2414_v19  ;;  %v2007_v24 = vadd.f32 %v2006_v22, %v3680_v59  ;;  %v2008_v25 = vpop.f32.mrb[119].mxu1  ;;  %v2201_v28 = vmax.f32 %v2003_v20, 0.0 }
 0x37e   : > { %v2424_v1 = vmax.f32 %v2422_v16, %v2423_v21  ;;  %v2009_v26 = vadd.f32 %v2008_v25, %v3684_v61  ;;  %v2202_v31 = vmax.f32 %v2005_v62, 0.0 }
 0x37f   : > { %v2416_v27 = vrot.slane %v2415_v14, 2  ;;  %v2203_v29 = vmax.f32 %v2007_v24, 0.0 }
 0x380   : > { %v2425_v30 = vrot.slane %v2424_v1, 2  ;;  %v2204_v32 = vmax.f32 %v2009_v26, 0.0 }
 0x381   : > { %v2417_v35 = vmax.f32 %v2415_v14, %v2416_v27  ;;  %v2429_v33 = vmax.f32 %v2201_v28, %v2203_v29 }
 0x382   : > { %v2426_v36 = vmax.f32 %v2424_v1, %v2425_v30  ;;  %v2438_v34 = vmax.f32 %v2202_v31, %v2204_v32  ;;  %v2012_v37 = vpop.f32.mrb[120].mxu1 }
 0x383   : > { %v2418_v38 = vrot.slane %v2417_v35, 1  ;;  %v2013_v39 = vadd.f32 %v2012_v37, %v3680_v59  ;;  %v2014_v41 = vpop.f32.mrb[121].mxu1 }
 0x384   : > { %v2427_v42 = vrot.slane %v2426_v36, 1  ;;  %v2015_v43 = vadd.f32 %v2014_v41, %v3684_v61  ;;  %v2016_v60 = vpop.f32.mrb[122].mxu1 }
 0x385   : > { %v2419_v44 = vmax.f32 %v2417_v35, %v2418_v38  ;;  %v2205_v45 = vmax.f32 %v2013_v39, 0.0  ;;  %v2017_v46 = vadd.f32 %v2016_v60, %v3680_v59  ;;  %v2018_v47 = vpop.f32.mrb[123].mxu1 }
 0x386   : > { %v2428_v50 = vmax.f32 %v2426_v36, %v2427_v42  ;;  %v2206_v48 = vmax.f32 %v2015_v43, 0.0  ;;  %v2019_v51 = vadd.f32 %v2018_v47, %v3684_v61 }
 0x387   : > { %v2430_v52 = vmax.f32 %v2429_v33, %v2205_v45  ;;  %v2207_v49 = vmax.f32 %v2017_v46, 0.0 }
 0x388   : > { %v2951_v53 = vpack.c.bf16 %v2428_v50, %v2419_v44  ;;  %v2439_v54 = vmax.f32 %v2438_v34, %v2206_v48  ;;  %v2208_v55 = vmax.f32 %v2019_v51, 0.0 }
 0x389   : > { %v2431_v57 = vmax.f32 %v2430_v52, %v2207_v49 }
 0x38a   : > { %v2667_v63 = vunpack.c.l.b16 %v2951_v53  ;;  %v2668_v0 = vunpack.c.h.b16 %v2951_v53  ;;  %v2440_v40 = vmax.f32 %v2439_v54, %v2208_v55  ;;  %v2022_v2 = vpop.f32.mrb[124].mxu1 }
 0x38b   : > { %v2432_v4 = vrot.slane %v2431_v57, 4  ;;  %v2023_v17 = vadd.f32 %v2022_v2, %v3680_v59  ;;  %v2024_v5 = vpop.f32.mrb[125].mxu1 }
 0x38c   : > { %v2702_v3 = vsel %vm2681_vm3, %v2667_v63, %v2665_v56  ;;  %v2709_v6 = vsel %vm2681_vm3, %v2668_v0, %v2666_v58  ;;  %v2441_v7 = vrot.slane %v2440_v40, 4  ;;  %v2025_v9 = vadd.f32 %v2024_v5, %v3684_v61  ;;  %v2026_v8 = vpop.f32.mrb[126].mxu1 }
 0x38d   : > { %v2433_v10 = vmax.f32 %v2431_v57, %v2432_v4  ;;  %v2027_v12 = vadd.f32 %v2026_v8, %v3680_v59  ;;  %v2028_v11 = vpop.f32.mrb[127].mxu1  ;;  %v2209_v18 = vmax.f32 %v2023_v17, 0.0 }
 0x38e   : > { %v2442_v13 = vmax.f32 %v2440_v40, %v2441_v7  ;;  %v2029_v15 = vadd.f32 %v2028_v11, %v3684_v61  ;;  %v2210_v23 = vmax.f32 %v2025_v9, 0.0 }
 0x38f   : > { %v2434_v16 = vrot.slane %v2433_v10, 2  ;;  %v2211_v19 = vmax.f32 %v2027_v12, 0.0 }
 0x390   : > { %v2443_v20 = vrot.slane %v2442_v13, 2  ;;  %v2212_v21 = vmax.f32 %v2029_v15, 0.0 }
 0x391   : > { %v2435_v62 = vmax.f32 %v2433_v10, %v2434_v16  ;;  %v2447_v22 = vmax.f32 %v2209_v18, %v2211_v19 }
 0x392   : > { %v2444_v14 = vmax.f32 %v2442_v13, %v2443_v20  ;;  %v2456_v24 = vmax.f32 %v2210_v23, %v2212_v21  ;;  %v2032_v25 = vpop.f32.mrb[128].mxu1 }
 0x393   : > { %v2436_v1 = vrot.slane %v2435_v62, 1  ;;  %v2033_v26 = vadd.f32 %v2032_v25, %v3680_v59  ;;  %v2034_v27 = vpop.f32.mrb[129].mxu1 }
 0x394   : > { %v2445_v28 = vrot.slane %v2444_v14, 1  ;;  %v2035_v29 = vadd.f32 %v2034_v27, %v3684_v61  ;;  %v2036_v30 = vpop.f32.mrb[130].mxu1 }
 0x395   : > { %v2437_v31 = vmax.f32 %v2435_v62, %v2436_v1  ;;  %v2213_v32 = vmax.f32 %v2033_v26, 0.0  ;;  %v2037_v35 = vadd.f32 %v2036_v30, %v3680_v59  ;;  %v2038_v33 = vpop.f32.mrb[131].mxu1 }
 0x396   : > { %v2446_v36 = vmax.f32 %v2444_v14, %v2445_v28  ;;  %v2214_v34 = vmax.f32 %v2035_v29, 0.0  ;;  %v2039_v37 = vadd.f32 %v2038_v33, %v3684_v61 }
 0x397   : > { %v2448_v38 = vmax.f32 %v2447_v22, %v2213_v32  ;;  %v2215_v39 = vmax.f32 %v2037_v35, 0.0 }
 0x398   : > { %v2952_v41 = vpack.c.bf16 %v2446_v36, %v2437_v31  ;;  %v2457_v42 = vmax.f32 %v2456_v24, %v2214_v34  ;;  %v2216_v43 = vmax.f32 %v2039_v37, 0.0 }
 0x399   : > { %v2449_v60 = vmax.f32 %v2448_v38, %v2215_v39 }
 0x39a   : > { %v2669_v44 = vunpack.c.l.b16 %v2952_v41  ;;  %v2670_v45 = vunpack.c.h.b16 %v2952_v41  ;;  %v2458_v46 = vmax.f32 %v2457_v42, %v2216_v43  ;;  %v2042_v47 = vpop.f32.mrb[132].mxu1 }
 0x39b   : > { %v2450_v50 = vrot.slane %v2449_v60, 4  ;;  %v2043_v48 = vadd.f32 %v2042_v47, %v3680_v59  ;;  %v2044_v51 = vpop.f32.mrb[133].mxu1 }
 0x39c   : > { %v2703_v52 = vsel %vm2683_vm4, %v2669_v44, %v2702_v3  ;;  %v2710_v49 = vsel %vm2683_vm4, %v2670_v45, %v2709_v6  ;;  %v2459_v53 = vrot.slane %v2458_v46, 4  ;;  %v2045_v54 = vadd.f32 %v2044_v51, %v3684_v61  ;;  %v2046_v55 = vpop.f32.mrb[134].mxu1 }
 0x39d   : > { %v2451_v56 = vmax.f32 %v2449_v60, %v2450_v50  ;;  %v2047_v57 = vadd.f32 %v2046_v55, %v3680_v59  ;;  %v2048_v58 = vpop.f32.mrb[135].mxu1  ;;  %v2217_v2 = vmax.f32 %v2043_v48, 0.0 }
 0x39e   : > { %v2460_v63 = vmax.f32 %v2458_v46, %v2459_v53  ;;  %v2049_v0 = vadd.f32 %v2048_v58, %v3684_v61  ;;  %v2218_v5 = vmax.f32 %v2045_v54, 0.0 }
 0x39f   : > { %v2452_v40 = vrot.slane %v2451_v56, 2  ;;  %v2219_v4 = vmax.f32 %v2047_v57, 0.0 }
 0x3a0   : > { %v2461_v17 = vrot.slane %v2460_v63, 2  ;;  %v2220_v7 = vmax.f32 %v2049_v0, 0.0 }
 0x3a1   : > { %v2453_v3 = vmax.f32 %v2451_v56, %v2452_v40  ;;  %v2465_v9 = vmax.f32 %v2217_v2, %v2219_v4 }
 0x3a2   : > { %v2462_v6 = vmax.f32 %v2460_v63, %v2461_v17  ;;  %v2474_v8 = vmax.f32 %v2218_v5, %v2220_v7  ;;  %v2052_v10 = vpop.f32.mrb[136].mxu1 }
 0x3a3   : > { %v2454_v12 = vrot.slane %v2453_v3, 1  ;;  %v2053_v11 = vadd.f32 %v2052_v10, %v3680_v59  ;;  %v2054_v13 = vpop.f32.mrb[137].mxu1 }
 0x3a4   : > { %v2463_v15 = vrot.slane %v2462_v6, 1  ;;  %v2055_v16 = vadd.f32 %v2054_v13, %v3684_v61  ;;  %v2056_v18 = vpop.f32.mrb[138].mxu1 }
 0x3a5   : > { %v2455_v19 = vmax.f32 %v2453_v3, %v2454_v12  ;;  %v2221_v20 = vmax.f32 %v2053_v11, 0.0  ;;  %v2057_v23 = vadd.f32 %v2056_v18, %v3680_v59  ;;  %v2058_v21 = vpop.f32.mrb[139].mxu1 }
 0x3a6   : > { %v2464_v62 = vmax.f32 %v2462_v6, %v2463_v15  ;;  %v2222_v22 = vmax.f32 %v2055_v16, 0.0  ;;  %v2059_v14 = vadd.f32 %v2058_v21, %v3684_v61 }
 0x3a7   : > { %v2466_v24 = vmax.f32 %v2465_v9, %v2221_v20  ;;  %v2223_v25 = vmax.f32 %v2057_v23, 0.0 }
 0x3a8   : > { %v2953_v1 = vpack.c.bf16 %v2464_v62, %v2455_v19  ;;  %v2475_v26 = vmax.f32 %v2474_v8, %v2222_v22  ;;  %v2224_v27 = vmax.f32 %v2059_v14, 0.0 }
 0x3a9   : > { %v2467_v28 = vmax.f32 %v2466_v24, %v2223_v25 }
 0x3aa   : > { %v2671_v29 = vunpack.c.l.b16 %v2953_v1  ;;  %v2672_v30 = vunpack.c.h.b16 %v2953_v1  ;;  %v2476_v31 = vmax.f32 %v2475_v26, %v2224_v27  ;;  %v2062_v32 = vpop.f32.mrb[140].mxu1 }
 0x3ab   : > { %v2468_v35 = vrot.slane %v2467_v28, 4  ;;  %v2063_v33 = vadd.f32 %v2062_v32, %v3680_v59  ;;  %v2064_v36 = vpop.f32.mrb[141].mxu1 }
 0x3ac   : > { %v2704_v34 = vsel %vm2685_vm5, %v2671_v29, %v2703_v52  ;;  %v2711_v37 = vsel %vm2685_vm5, %v2672_v30, %v2710_v49  ;;  %v2477_v38 = vrot.slane %v2476_v31, 4  ;;  %v2065_v39 = vadd.f32 %v2064_v36, %v3684_v61  ;;  %v2066_v41 = vpop.f32.mrb[142].mxu1 }
 0x3ad   : > { %v2469_v42 = vmax.f32 %v2467_v28, %v2468_v35  ;;  %v2067_v43 = vadd.f32 %v2066_v41, %v3680_v59  ;;  %v2068_v60 = vpop.f32.mrb[143].mxu1  ;;  %v2225_v47 = vmax.f32 %v2063_v33, 0.0 }
 0x3ae   : > { %v2478_v44 = vmax.f32 %v2476_v31, %v2477_v38  ;;  %v2069_v45 = vadd.f32 %v2068_v60, %v3684_v61  ;;  %v2226_v51 = vmax.f32 %v2065_v39, 0.0 }
 0x3af   : > { %v2470_v46 = vrot.slane %v2469_v42, 2  ;;  %v2227_v50 = vmax.f32 %v2067_v43, 0.0 }
 0x3b0   : > { %v2479_v48 = vrot.slane %v2478_v44, 2  ;;  %v2228_v53 = vmax.f32 %v2069_v45, 0.0 }
 0x3b1   : > { %v2471_v52 = vmax.f32 %v2469_v42, %v2470_v46  ;;  %v2483_v54 = vmax.f32 %v2225_v47, %v2227_v50 }
 0x3b2   : > { %v2480_v49 = vmax.f32 %v2478_v44, %v2479_v48  ;;  %v2492_v55 = vmax.f32 %v2226_v51, %v2228_v53  ;;  %v2072_v56 = vpop.f32.mrb[144].mxu1 }
 0x3b3   : > { %v2472_v57 = vrot.slane %v2471_v52, 1  ;;  %v2073_v58 = vadd.f32 %v2072_v56, %v3680_v59  ;;  %v2074_v63 = vpop.f32.mrb[145].mxu1 }
 0x3b4   : > { %v2481_v0 = vrot.slane %v2480_v49, 1  ;;  %v2075_v40 = vadd.f32 %v2074_v63, %v3684_v61  ;;  %v2076_v2 = vpop.f32.mrb[146].mxu1 }
 0x3b5   : > { %v2473_v4 = vmax.f32 %v2471_v52, %v2472_v57  ;;  %v2229_v17 = vmax.f32 %v2073_v58, 0.0  ;;  %v2077_v5 = vadd.f32 %v2076_v2, %v3680_v59  ;;  %v2078_v7 = vpop.f32.mrb[147].mxu1 }
 0x3b6   : > { %v2482_v3 = vmax.f32 %v2480_v49, %v2481_v0  ;;  %v2230_v9 = vmax.f32 %v2075_v40, 0.0  ;;  %v2079_v6 = vadd.f32 %v2078_v7, %v3684_v61 }
 0x3b7   : > { %v2484_v8 = vmax.f32 %v2483_v54, %v2229_v17  ;;  %v2231_v10 = vmax.f32 %v2077_v5, 0.0 }
 0x3b8   : > { %v2954_v12 = vpack.c.bf16 %v2482_v3, %v2473_v4  ;;  %v2493_v11 = vmax.f32 %v2492_v55, %v2230_v9  ;;  %v2232_v13 = vmax.f32 %v2079_v6, 0.0 }
 0x3b9   : > { %v2485_v15 = vmax.f32 %v2484_v8, %v2231_v10 }
 0x3ba   : > { %v2673_v16 = vunpack.c.l.b16 %v2954_v12  ;;  %v2674_v18 = vunpack.c.h.b16 %v2954_v12  ;;  %v2494_v19 = vmax.f32 %v2493_v11, %v2232_v13  ;;  %v2082_v20 = vpop.f32.mrb[148].mxu1 }
 0x3bb   : > { %v2486_v23 = vrot.slane %v2485_v15, 4  ;;  %v2083_v21 = vadd.f32 %v2082_v20, %v3680_v59  ;;  %v2084_v62 = vpop.f32.mrb[149].mxu1 }
 0x3bc   : > { %v2705_v22 = vsel %vm2687_vm6, %v2673_v16, %v2704_v34  ;;  %v2712_v14 = vsel %vm2687_vm6, %v2674_v18, %v2711_v37  ;;  %v2495_v24 = vrot.slane %v2494_v19, 4  ;;  %v2085_v25 = vadd.f32 %v2084_v62, %v3684_v61  ;;  %v2086_v1 = vpop.f32.mrb[150].mxu1 }
 0x3bd   : > { %v2487_v26 = vmax.f32 %v2485_v15, %v2486_v23  ;;  %v2087_v27 = vadd.f32 %v2086_v1, %v3680_v59  ;;  %v2088_v28 = vpop.f32.mrb[151].mxu1  ;;  %v2233_v32 = vmax.f32 %v2083_v21, 0.0 }
 0x3be   : > { %v2496_v29 = vmax.f32 %v2494_v19, %v2495_v24  ;;  %v2089_v30 = vadd.f32 %v2088_v28, %v3684_v61  ;;  %v2234_v36 = vmax.f32 %v2085_v25, 0.0 }
 0x3bf   : > { %v2488_v31 = vrot.slane %v2487_v26, 2  ;;  %v2235_v35 = vmax.f32 %v2087_v27, 0.0 }
 0x3c0   : > { %v2497_v33 = vrot.slane %v2496_v29, 2  ;;  %v2236_v38 = vmax.f32 %v2089_v30, 0.0 }
 0x3c1   : > { %v2489_v34 = vmax.f32 %v2487_v26, %v2488_v31  ;;  %v2501_v39 = vmax.f32 %v2233_v32, %v2235_v35 }
 0x3c2   : > { %v2498_v37 = vmax.f32 %v2496_v29, %v2497_v33  ;;  %v2510_v41 = vmax.f32 %v2234_v36, %v2236_v38  ;;  %v2092_v42 = vpop.f32.mrb[152].mxu1 }
 0x3c3   : > { %v2490_v43 = vrot.slane %v2489_v34, 1  ;;  %v2093_v60 = vadd.f32 %v2092_v42, %v3680_v59  ;;  %v2094_v44 = vpop.f32.mrb[153].mxu1 }
 0x3c4   : > { %v2499_v45 = vrot.slane %v2498_v37, 1  ;;  %v2095_v46 = vadd.f32 %v2094_v44, %v3684_v61  ;;  %v2096_v47 = vpop.f32.mrb[154].mxu1 }
 0x3c5   : > { %v2491_v50 = vmax.f32 %v2489_v34, %v2490_v43  ;;  %v2237_v48 = vmax.f32 %v2093_v60, 0.0  ;;  %v2097_v51 = vadd.f32 %v2096_v47, %v3680_v59  ;;  %v2098_v53 = vpop.f32.mrb[155].mxu1 }
 0x3c6   : > { %v2500_v52 = vmax.f32 %v2498_v37, %v2499_v45  ;;  %v2238_v54 = vmax.f32 %v2095_v46, 0.0  ;;  %v2099_v49 = vadd.f32 %v2098_v53, %v3684_v61 }
 0x3c7   : > { %v2502_v55 = vmax.f32 %v2501_v39, %v2237_v48  ;;  %v2239_v56 = vmax.f32 %v2097_v51, 0.0 }
 0x3c8   : > { %v2955_v57 = vpack.c.bf16 %v2500_v52, %v2491_v50  ;;  %v2511_v58 = vmax.f32 %v2510_v41, %v2238_v54  ;;  %v2240_v63 = vmax.f32 %v2099_v49, 0.0 }
 0x3c9   : > { %v2503_v0 = vmax.f32 %v2502_v55, %v2239_v56 }
 0x3ca   : > { %v2675_v40 = vunpack.c.l.b16 %v2955_v57  ;;  %v2676_v2 = vunpack.c.h.b16 %v2955_v57  ;;  %v2512_v4 = vmax.f32 %v2511_v58, %v2240_v63  ;;  %v2102_v17 = vpop.f32.mrb[156].mxu1 }
 0x3cb   : > { %v2504_v5 = vrot.slane %v2503_v0, 4  ;;  %v2103_v7 = vadd.f32 %v2102_v17, %v3680_v59  ;;  %v2104_v3 = vpop.f32.mrb[157].mxu1 }
 0x3cc   : > { %v2706_v9 = vsel %vm2689_vm7, %v2675_v40, %v2705_v22  ;;  %v2713_v6 = vsel %vm2689_vm7, %v2676_v2, %v2712_v14  ;;  %v2513_v8 = vrot.slane %v2512_v4, 4  ;;  %v2105_v10 = vadd.f32 %v2104_v3, %v3684_v61  ;;  %v2106_v12 = vpop.f32.mrb[158].mxu1 }
 0x3cd   : > { %v2505_v11 = vmax.f32 %v2503_v0, %v2504_v5  ;;  %v2107_v13 = vadd.f32 %v2106_v12, %v3680_v59  ;;  %v2108_v15 = vpop.f32.mrb[159].mxu1  ;;  %v2241_v20 = vmax.f32 %v2103_v7, 0.0 }
 0x3ce   : > { %v2514_v16 = vmax.f32 %v2512_v4, %v2513_v8  ;;  %v2109_v18 = vadd.f32 %v2108_v15, %v3684_v61  ;;  %v2242_v62 = vmax.f32 %v2105_v10, 0.0 }
 0x3cf   : > { %v2506_v19 = vrot.slane %v2505_v11, 2  ;;  %v2243_v23 = vmax.f32 %v2107_v13, 0.0 }
 0x3d0   : > { %v2515_v21 = vrot.slane %v2514_v16, 2  ;;  %v2244_v24 = vmax.f32 %v2109_v18, 0.0 }
 0x3d1   : > { %v2507_v22 = vmax.f32 %v2505_v11, %v2506_v19  ;;  %v2519_v25 = vmax.f32 %v2241_v20, %v2243_v23 }
 0x3d2   : > { %v2516_v14 = vmax.f32 %v2514_v16, %v2515_v21  ;;  %v2528_v1 = vmax.f32 %v2242_v62, %v2244_v24  ;;  %v2112_v26 = vpop.f32.mrb[160].mxu1 }
 0x3d3   : > { %v2508_v27 = vrot.slane %v2507_v22, 1  ;;  %v2113_v28 = vadd.f32 %v2112_v26, %v3680_v59  ;;  %v2114_v29 = vpop.f32.mrb[161].mxu1 }
 0x3d4   : > { %v2517_v30 = vrot.slane %v2516_v14, 1  ;;  %v2115_v31 = vadd.f32 %v2114_v29, %v3684_v61  ;;  %v2116_v32 = vpop.f32.mrb[162].mxu1 }
 0x3d5   : > { %v2509_v35 = vmax.f32 %v2507_v22, %v2508_v27  ;;  %v2245_v33 = vmax.f32 %v2113_v28, 0.0  ;;  %v2117_v36 = vadd.f32 %v2116_v32, %v3680_v59  ;;  %v2118_v38 = vpop.f32.mrb[163].mxu1 }
 0x3d6   : > { %v2518_v34 = vmax.f32 %v2516_v14, %v2517_v30  ;;  %v2246_v39 = vmax.f32 %v2115_v31, 0.0  ;;  %v2119_v37 = vadd.f32 %v2118_v38, %v3684_v61 }
 0x3d7   : > { %v2520_v41 = vmax.f32 %v2519_v25, %v2245_v33  ;;  %v2247_v42 = vmax.f32 %v2117_v36, 0.0 }
 0x3d8   : > { %v2956_v43 = vpack.c.bf16 %v2518_v34, %v2509_v35  ;;  %v2529_v60 = vmax.f32 %v2528_v1, %v2246_v39  ;;  %v2248_v44 = vmax.f32 %v2119_v37, 0.0 }
 0x3d9   : > { %v2521_v45 = vmax.f32 %v2520_v41, %v2247_v42 }
 0x3da   : > { %v2677_v46 = vunpack.c.l.b16 %v2956_v43  ;;  %v2678_v47 = vunpack.c.h.b16 %v2956_v43  ;;  %v2530_v50 = vmax.f32 %v2529_v60, %v2248_v44 }
 0x3db   : > { %v2522_v48 = vrot.slane %v2521_v45, 4 }
 0x3dc   : > { %v2707_v51 = vsel %vm2691_vm8, %v2677_v46, %v2706_v9  ;;  %v2714_v53 = vsel %vm2691_vm8, %v2678_v47, %v2713_v6  ;;  %v2531_v59 = vrot.slane %v2530_v50, 4 }
 0x3dd   : > { %v2523_v52 = vmax.f32 %v2521_v45, %v2522_v48 }
 0x3de   : > { %v2532_v54 = vmax.f32 %v2530_v50, %v2531_v59 }
 0x3df   : > { %v2524_v49 = vrot.slane %v2523_v52, 2 }
 0x3e0   : > { %v2533_v61 = vrot.slane %v2532_v54, 2 }
 0x3e1   : > { %v2525_v55 = vmax.f32 %v2523_v52, %v2524_v49 }
 0x3e2   : > { %v2534_v56 = vmax.f32 %v2532_v54, %v2533_v61 }
 0x3e3   : > { %v2526_v57 = vrot.slane %v2525_v55, 1 }
 0x3e4   : > { %v2535_v58 = vrot.slane %v2534_v56, 1 }
 0x3e5   : > { %v2527_v63 = vmax.f32 %v2525_v55, %v2526_v57 }
 0x3e6   : > { %v2536_v0 = vmax.f32 %v2534_v56, %v2535_v58 }
 0x3e8   : > { %v2957_v40 = vpack.c.bf16 %v2536_v0, %v2527_v63 }
 0x3ea   : > { %v2679_v2 = vunpack.c.l.b16 %v2957_v40  ;;  %v2680_v4 = vunpack.c.h.b16 %v2957_v40 }
 0x3ec   : > { %v2708_v17 = vsel %vm2693_vm9, %v2679_v2, %v2707_v51  ;;  %v2715_v5 = vsel %vm2693_vm9, %v2680_v4, %v2714_v53 }
 0x3ed   : > { %v2717_v7 = vpack.c.b16 %v2715_v5, %v2708_v17 }
 0x3ef   : > { %2721 = vst [vmem:[%s3786_s21 + $0x8] sm:$0xff] %v2717_v7 }
 0x3f0 PF: > { %s17_s24 = sadd.s32 1, %s3247_s24  }
 0x3f1   : > { %p14_p5 = scmp.ge.s32.totalorder %s17_s24, 10  }
 0x3f3   :  { %16 = sbr.rel (!%p14_p5) target bundleno = 1 (0x1), region = 78 }

// kernel: feature_encoder_forward.5
= control target key start
LH: loop header
LB: loop body
LE: loop exit
PB: predicated region body
PF: predicated region fallthrough
CT: control target
= control target key end

     0   :  { %v7941_v1 = vmov 0   ;;  %vm684_vm0 = vcmask 1040384   ;;  %vm685_vm1 = vcmask 1041408   ;;  %v7942_v32 = vmov 65535   ;;  %s10621_s1 = inlined_call_operand.vmem [shape: bf16[259,256], index: 1, kind: input, shape index: {}]   ;;  %s10622_s0 = inlined_call_operand.vmem [shape: bf16[128,259], index: 0, kind: input, shape index: {}]   ;;  %s10623_s3 = inlined_call_operand.vmem [shape: bf16[256,512], index: 3, kind: input, shape index: {}]   ;;  %s10624_s2 = inlined_call_operand.vmem [shape: f32[1,256], index: 2, kind: input, shape index: {}]   ;;  %s10625_s5 = inlined_call_operand.vmem [shape: bf16[512,768], index: 5, kind: input, shape index: {}]   ;;  %s10626_s4 = inlined_call_operand.vmem [shape: f32[1,512], index: 4, kind: input, shape index: {}]   ;;  %s10627_s7 = inlined_call_operand.vmem [shape: bf16[768,768], index: 7, kind: input, shape index: {}]   ;;  %s10628_s6 = inlined_call_operand.vmem [shape: f32[1,768], index: 6, kind: input, shape index: {}]   ;;  %s10629_s9 = inlined_call_operand.vmem [shape: f32[8,1], index: 9, kind: input, shape index: {}]   ;;  %s10630_s8 = inlined_call_operand.vmem [shape: f32[1,768], index: 8, kind: input, shape index: {}]   ;;  %s10631_s10 = inlined_call_operand.vmem [shape: f32[1,768], index: 10, kind: input, shape index: {}]   ;;  %s10632_s11 = inlined_call_operand.vmem [shape: f32[8,768], index: 11, kind: output, shape index: {}]  }
   0x1   :  { %v7042_v0 = vld [vmem:[%s10621_s1 + $0x4] ss:$8 sps:$4 sm:$0xff]   ;;  %7041 = vset.pattern.permute.xlu0 %v7941_v1  ;;  %v7044_v2 = vld [vmem:[%s10621_s1] ss:$8 sps:$4 sm:$0xff]   ;;  %v7045_v3 = vld [vmem:[%s10621_s1 + $0x14] ss:$8 sps:$4 sm:$0xff]  }
   0x2   :  { %694 = vmatprep.subr.bf16.mxu0 %v7042_v0  ;;  %v7047_v4 = vld [vmem:[%s10621_s1 + $0x10] ss:$8 sps:$4 sm:$0xff]   ;;  %v7048_v5 = vld [vmem:[%s10621_s1 + $0x24] ss:$8 sps:$4 sm:$0xff]   ;;  %v7050_v6 = vld [vmem:[%s10621_s1 + $0x20] ss:$8 sps:$4 sm:$0xff]  }
   0x3   :  { %695 = vmatpush1.bf16.msra.mxu0 %v7044_v2  ;;  %v7051_v7 = vld [vmem:[%s10621_s1 + $0x34] ss:$8 sps:$4 sm:$0xff]   ;;  %v7053_v8 = vld [vmem:[%s10621_s1 + $0x30] ss:$8 sps:$4 sm:$0xff]   ;;  %v7054_v9 = vld [vmem:[%s10621_s1 + $0x44] ss:$8 sps:$4 sm:$0xff]  }
   0x4   :  { %696 = vmatprep.subr.bf16.mxu0 %v7045_v3  ;;  %v7056_v10 = vld [vmem:[%s10621_s1 + $0x40] ss:$8 sps:$4 sm:$0xff]   ;;  %v7057_v11 = vld [vmem:[%s10621_s1 + $0x54] ss:$8 sps:$4 sm:$0xff]   ;;  %v7059_v12 = vld [vmem:[%s10621_s1 + $0x50] ss:$8 sps:$4 sm:$0xff]  }
   0x5   :  { %v7060_v13 = vld [vmem:[%s10621_s1 + $0x64] ss:$8 sps:$4 sm:$0xff]   ;;  %v7062_v15 = vld [vmem:[%s10621_s1 + $0x60] ss:$8 sps:$4 sm:$0xff]   ;;  %v7063_v16 = vld [vmem:[%s10621_s1 + $0x74] ss:$8 sps:$4 sm:$0xff]  }
   0x6   :  { %v7092_v14 = vld [vmem:[%s10622_s0 + $0x4] ss:$12 sps:$4 sm:$0xff]   ;;  %v7068_v19 = vld [vmem:[%s10621_s1 + $0x80] ss:$8 sps:$4 sm:$0xff]   ;;  %v7069_v20 = vld [vmem:[%s10621_s1 + $0x94] ss:$8 sps:$4 sm:$0xff]  }
   0x7   :  { %697 = vmatpush1.bf16.msra.mxu0 %v7047_v4  ;;  %726 = vmatprep.mubr.bf16.mxu0 %v7092_v14  ;;  %v7065_v17 = vld [vmem:[%s10621_s1 + $0x70] ss:$8 sps:$4 sm:$0xff]   ;;  %v7066_v18 = vld [vmem:[%s10621_s1 + $0x84] ss:$8 sps:$4 sm:$0xff]   ;;  %v7074_v23 = vld [vmem:[%s10621_s1 + $0xa0] ss:$8 sps:$4 sm:$0xff]  }
   0x8   :  { %698 = vmatprep.subr.bf16.mxu0 %v7048_v5  ;;  %v7071_v21 = vld [vmem:[%s10621_s1 + $0x90] ss:$8 sps:$4 sm:$0xff]   ;;  %v7072_v22 = vld [vmem:[%s10621_s1 + $0xa4] ss:$8 sps:$4 sm:$0xff]   ;;  %v7075_v24 = vld [vmem:[%s10621_s1 + $0xb4] ss:$8 sps:$4 sm:$0xff]  }
   0x9   :  { %v7077_v25 = vld [vmem:[%s10621_s1 + $0xb0] ss:$8 sps:$4 sm:$0xff]   ;;  %v7078_v26 = vld [vmem:[%s10621_s1 + $0xc4] ss:$8 sps:$4 sm:$0xff]   ;;  %v7080_v27 = vld [vmem:[%s10621_s1 + $0xc0] ss:$8 sps:$4 sm:$0xff]  }
   0xa   :  { %v7081_v28 = vld [vmem:[%s10621_s1 + $0xd4] ss:$8 sps:$4 sm:$0xff]   ;;  %v7083_v29 = vld [vmem:[%s10621_s1 + $0xd0] ss:$8 sps:$4 sm:$0xff]   ;;  %v7084_v30 = vld [vmem:[%s10621_s1 + $0xe4] ss:$8 sps:$4 sm:$0xff]  }
   0xb   :  { %699 = vmatpush1.bf16.msra.mxu0 %v7050_v6  ;;  %v71_v31 = vld [vmem:[%s10621_s1 + $0x100] sm:$0x33]  ;;  %v686_v33 = vsel %vm684_vm0, 4294967295, %v7942_v32  ;;  %v7087_v35 = vld [vmem:[%s10621_s1 + $0xf4] ss:$8 sps:$4 sm:$0xff]   ;;  %vm659_vm2 = vcmask 23552  }
   0xc   :  { %700 = vmatprep.subr.bf16.mxu0 %v7051_v7  ;;  %v7086_v34 = vld [vmem:[%s10621_s1 + $0xe0] ss:$8 sps:$4 sm:$0xff]   ;;  %v6198_v36 = vcombine.high %v71_v31, %v71_v31  ;;  %v687_v37 = vsel %vm685_vm1, %v686_v33, 0  ;;  %v7089_v38 = vld [vmem:[%s10621_s1 + $0xf0] ss:$8 sps:$4 sm:$0xff]   ;;  %v6197_v39 = vcombine.low %v71_v31, %v71_v31  ;;  %vm4196_vm3 = vcmask 1041409  }
   0xd   :  { %v7124_v40 = vld [vmem:[%s10623_s3 + $0x4] ss:$16 sps:$4 sm:$0xff]   ;;  %v7126_v42 = vld [vmem:[%s10623_s3] ss:$16 sps:$4 sm:$0xff]   ;;  %v7095_v47 = vld [vmem:[%s10622_s0 + $0x1c] ss:$12 sps:$4 sm:$0xff]  }
   0xe   :  { %v692_v41 = vand.u32 %v6198_v36, %v687_v37  ;;  %1309 = vmatprep.subr.bf16.mxu1 %v7124_v40  ;;  %v7127_v43 = vld [vmem:[%s10623_s3 + $0x24] ss:$16 sps:$4 sm:$0xff]   ;;  %v7090_v44 = vld [vmem:[%s10622_s0] ss:$12 sps:$4 sm:$0xff]   ;;  %v689_v46 = vand.u32 %v6197_v39, %v687_v37  ;;  %v7100_v57 = vld [vmem:[%s10622_s0 + $0x30] ss:$12 sps:$4 sm:$0xff]  }
   0xf   :  { %701 = vmatpush1.bf16.msra.mxu0 %v7053_v8  ;;  %1310 = vmatpush1.bf16.msra.mxu1 %v7126_v42  ;;  %v7129_v45 = vld [vmem:[%s10623_s3 + $0x20] ss:$16 sps:$4 sm:$0xff]   ;;  %v7130_v48 = vld [vmem:[%s10623_s3 + $0x44] ss:$16 sps:$4 sm:$0xff]   ;;  %v7101_v58 = vld [vmem:[%s10622_s0 + $0x4c] ss:$12 sps:$4 sm:$0xff]  }
  0x10   :  { %702 = vmatprep.subr.bf16.mxu0 %v7054_v9  ;;  %1311 = vmatprep.subr.bf16.mxu1 %v7127_v43  ;;  %v7132_v49 = vld [vmem:[%s10623_s3 + $0x40] ss:$16 sps:$4 sm:$0xff]   ;;  %v7133_v50 = vld [vmem:[%s10623_s3 + $0x64] ss:$16 sps:$4 sm:$0xff]   ;;  %v7107_v8 = vld [vmem:[%s10622_s0 + $0x7c] ss:$12 sps:$4 sm:$0xff]  }
  0x11   :  { %v7097_v51 = vld [vmem:[%s10622_s0 + $0x18] ss:$12 sps:$4 sm:$0xff]   ;;  %v7098_v52 = vld [vmem:[%s10622_s0 + $0x34] ss:$12 sps:$4 sm:$0xff]   ;;  %v7174_v33 = vld [vmem:[%s10623_s3 + $0xc] ss:$16 sps:$4 sm:$0xff]  }
  0x12   :  { %v7135_v53 = vld [vmem:[%s10623_s3 + $0x60] ss:$16 sps:$4 sm:$0xff]   ;;  %v7136_v54 = vld [vmem:[%s10623_s3 + $0x84] ss:$16 sps:$4 sm:$0xff]   ;;  %vm4198_vm4 = vcmask 1042434   ;;  %vm4200_vm5 = vcmask 1043459  }
  0x13   :  { %703 = vmatpush1.bf16.msra.mxu0 %v7056_v10  ;;  %1312 = vmatpush1.bf16.msra.mxu1 %v7129_v45  ;;  %v7138_v55 = vld [vmem:[%s10623_s3 + $0x80] ss:$16 sps:$4 sm:$0xff]   ;;  %v7139_v56 = vld [vmem:[%s10623_s3 + $0xa4] ss:$16 sps:$4 sm:$0xff]   ;;  %vm4202_vm6 = vcmask 1044484   ;;  %vm4204_vm7 = vcmask 1045509  }
  0x14   :  { %704 = vmatprep.subr.bf16.mxu0 %v7057_v11  ;;  %1313 = vmatprep.subr.bf16.mxu1 %v7130_v48  ;;  %v7141_v59 = vld [vmem:[%s10623_s3 + $0xa0] ss:$16 sps:$4 sm:$0xff]   ;;  %v7142_v60 = vld [vmem:[%s10623_s3 + $0xc4] ss:$16 sps:$4 sm:$0xff]   ;;  %vm4206_vm8 = vcmask 1046534   ;;  %vm4208_vm9 = vcmask 1047559  }
  0x15   :  { %v7144_v61 = vld [vmem:[%s10623_s3 + $0xc0] ss:$16 sps:$4 sm:$0xff]   ;;  %v7145_v62 = vld [vmem:[%s10623_s3 + $0xe4] ss:$16 sps:$4 sm:$0xff]  }
  0x16   :  { %v7103_v63 = vld [vmem:[%s10622_s0 + $0x48] ss:$12 sps:$4 sm:$0xff]   ;;  %v7147_v0 = vld [vmem:[%s10623_s3 + $0xe0] ss:$16 sps:$4 sm:$0xff]  }
  0x17   :  { %705 = vmatpush1.bf16.msra.mxu0 %v7059_v12  ;;  %1314 = vmatpush1.bf16.msra.mxu1 %v7132_v49  ;;  %v7104_v2 = vld [vmem:[%s10622_s0 + $0x64] ss:$12 sps:$4 sm:$0xff]   ;;  %v7106_v6 = vld [vmem:[%s10622_s0 + $0x60] ss:$12 sps:$4 sm:$0xff]  }
  0x18   :  { %706 = vmatprep.subr.bf16.mxu0 %v7060_v13  ;;  %1315 = vmatprep.subr.bf16.mxu1 %v7133_v50  ;;  %v7148_v3 = vld [vmem:[%s10623_s3 + $0x104] ss:$16 sps:$4 sm:$0xff]   ;;  %v7150_v4 = vld [vmem:[%s10623_s3 + $0x100] ss:$16 sps:$4 sm:$0xff]  }
  0x19   :  { %v7151_v5 = vld [vmem:[%s10623_s3 + $0x124] ss:$16 sps:$4 sm:$0xff]   ;;  %v7153_v7 = vld [vmem:[%s10623_s3 + $0x120] ss:$16 sps:$4 sm:$0xff]  }
  0x1a   :  { %v7154_v9 = vld [vmem:[%s10623_s3 + $0x144] ss:$16 sps:$4 sm:$0xff]   ;;  %v7156_v10 = vld [vmem:[%s10623_s3 + $0x140] ss:$16 sps:$4 sm:$0xff]  }
  0x1b   :  { %707 = vmatpush1.bf16.msra.mxu0 %v7062_v15  ;;  %1316 = vmatpush1.bf16.msra.mxu1 %v7135_v53  ;;  %v7157_v11 = vld [vmem:[%s10623_s3 + $0x164] ss:$16 sps:$4 sm:$0xff]   ;;  %v7159_v13 = vld [vmem:[%s10623_s3 + $0x160] ss:$16 sps:$4 sm:$0xff]  }
  0x1c   :  { %708 = vmatprep.subr.bf16.mxu0 %v7063_v16  ;;  %1317 = vmatprep.subr.bf16.mxu1 %v7136_v54  ;;  %v7109_v12 = vld [vmem:[%s10622_s0 + $0x78] ss:$12 sps:$4 sm:$0xff]   ;;  %v7110_v14 = vld [vmem:[%s10622_s0 + $0x94] ss:$12 sps:$4 sm:$0xff]  }
  0x1d   :  { %v7160_v15 = vld [vmem:[%s10623_s3 + $0x184] ss:$16 sps:$4 sm:$0xff]   ;;  %v7162_v16 = vld [vmem:[%s10623_s3 + $0x180] ss:$16 sps:$4 sm:$0xff]  }
  0x1e   :  { %v7168_v31 = vld [vmem:[%s10623_s3 + $0x1c0] ss:$16 sps:$4 sm:$0xff]  }
  0x1f   :  { %709 = vmatpush1.bf16.msra.mxu0 %v7065_v17  ;;  %1318 = vmatpush1.bf16.msra.mxu1 %v7138_v55  ;;  %v7163_v17 = vld [vmem:[%s10623_s3 + $0x1a4] ss:$16 sps:$4 sm:$0xff]   ;;  %v7171_v32 = vld [vmem:[%s10623_s3 + $0x1e0] ss:$16 sps:$4 sm:$0xff]  }
  0x20   :  { %710 = vmatprep.subr.bf16.mxu0 %v7066_v18  ;;  %1319 = vmatprep.subr.bf16.mxu1 %v7139_v56  ;;  %v7112_v18 = vld [vmem:[%s10622_s0 + $0x90] ss:$12 sps:$4 sm:$0xff]   ;;  %v328_v37 = vld [vmem:[%s10624_s2] sm:$0x3]  ;;  %v7172_v56 = vld [vmem:[%s10623_s3 + $0x8] ss:$16 sps:$4 sm:$0xff]  }
  0x21   :  { %v7220_v49 = vld [vmem:[%s10625_s5] ss:$24 sps:$4 sm:$0xff]  }
  0x23   :  { %711 = vmatpush1.bf16.msra.mxu0 %v7068_v19  ;;  %1320 = vmatpush1.bf16.msra.mxu1 %v7141_v59  ;;  %v7113_v19 = vld [vmem:[%s10622_s0 + $0xac] ss:$12 sps:$4 sm:$0xff]  }
  0x24   :  { %712 = vmatprep.subr.bf16.mxu0 %v7069_v20  ;;  %1321 = vmatprep.subr.bf16.mxu1 %v7142_v60  ;;  %v7115_v20 = vld [vmem:[%s10622_s0 + $0xa8] ss:$12 sps:$4 sm:$0xff]  }
  0x25   :  { %v7226_v60 = vld [vmem:[%s10625_s5 + $0x30] ss:$24 sps:$4 sm:$0xff]  }
  0x27   :  { %713 = vmatpush1.bf16.msra.mxu0 %v7071_v21  ;;  %1322 = vmatpush1.bf16.msra.mxu1 %v7144_v61  ;;  %v7116_v21 = vld [vmem:[%s10622_s0 + $0x8] ss:$12 sps:$4 sm:$0xff]  }
  0x28   :  { %714 = vmatprep.subr.bf16.mxu0 %v7072_v22  ;;  %1323 = vmatprep.subr.bf16.mxu1 %v7145_v62  ;;  %v7117_v22 = vld [vmem:[%s10622_s0 + $0x20] ss:$12 sps:$4 sm:$0xff]  }
  0x2b   :  { %715 = vmatpush1.bf16.msra.mxu0 %v7074_v23  ;;  %1324 = vmatpush1.bf16.msra.mxu1 %v7147_v0  ;;  %v7118_v23 = vld [vmem:[%s10622_s0 + $0x38] ss:$12 sps:$4 sm:$0xff]  }
  0x2c   :  { %716 = vmatprep.subr.bf16.mxu0 %v7075_v24  ;;  %1325 = vmatprep.subr.bf16.mxu1 %v7148_v3  ;;  %v7119_v24 = vld [vmem:[%s10622_s0 + $0x50] ss:$12 sps:$4 sm:$0xff]  }
  0x2d   :  { %v7234_v3 = vld [vmem:[%s10625_s5 + $0x64] ss:$24 sps:$4 sm:$0xff]  }
  0x2f   :  { %717 = vmatpush1.bf16.msra.mxu0 %v7077_v25  ;;  %1326 = vmatpush1.bf16.msra.mxu1 %v7150_v4  ;;  %v7120_v25 = vld [vmem:[%s10622_s0 + $0x68] ss:$12 sps:$4 sm:$0xff]  }
  0x30   :  { %718 = vmatprep.subr.bf16.mxu0 %v7078_v26  ;;  %1327 = vmatprep.subr.bf16.mxu1 %v7151_v5  ;;  %v7121_v26 = vld [vmem:[%s10622_s0 + $0x80] ss:$12 sps:$4 sm:$0xff]  }
  0x33   :  { %719 = vmatpush1.bf16.msra.mxu0 %v7080_v27  ;;  %1328 = vmatpush1.bf16.msra.mxu1 %v7153_v7  ;;  %v7122_v27 = vld [vmem:[%s10622_s0 + $0x98] ss:$12 sps:$4 sm:$0xff]  }
  0x34   :  { %720 = vmatprep.subr.bf16.mxu0 %v7081_v28  ;;  %1329 = vmatprep.subr.bf16.mxu1 %v7154_v9  ;;  %v7123_v28 = vld [vmem:[%s10622_s0 + $0xb0] ss:$12 sps:$4 sm:$0xff]   ;;  %v7232_v9 = vld [vmem:[%s10625_s5 + $0x60] ss:$24 sps:$4 sm:$0xff]  }
  0x37   :  { %721 = vmatpush1.bf16.msra.mxu0 %v7083_v29  ;;  %1330 = vmatpush1.bf16.msra.mxu1 %v7156_v10  ;;  %v7165_v29 = vld [vmem:[%s10623_s3 + $0x1a0] ss:$16 sps:$4 sm:$0xff]  }
  0x38   :  { %722 = vmatprep.subr.bf16.mxu0 %v7084_v30  ;;  %1331 = vmatprep.subr.bf16.mxu1 %v7157_v11  ;;  %v7166_v30 = vld [vmem:[%s10623_s3 + $0x1c4] ss:$16 sps:$4 sm:$0xff]  }
  0x3b   :  { %723 = vmatpush1.bf16.msra.mxu0 %v7086_v34  ;;  %1332 = vmatpush1.bf16.msra.mxu1 %v7159_v13  ;;  %v364_v34 = vlaneseq }
  0x3c   :  { %724 = vmatprep.subr.bf16.mxu0 %v7087_v35  ;;  %1333 = vmatprep.subr.bf16.mxu1 %v7160_v15 }
  0x3d   :  { %v8291_v35 = vshrl.u32 %v364_v34, 7 }
  0x3f   :  { %725 = vmatpush1.bf16.msra.mxu0 %v7089_v38  ;;  %1334 = vmatpush1.bf16.msra.mxu1 %v7162_v16  ;;  %v8294_v36 = vsub.s32 0, %v8291_v35  ;;  %v8300_v38 = vsub.s32 1, %v8291_v35  ;;  %v7178_v16 = vld [vmem:[%s10623_s3 + $0x48] ss:$16 sps:$4 sm:$0xff]  }
  0x40   :  { %807 = vmatprep.subr.bf16.mxu0 %v692_v41  ;;  %1335 = vmatprep.subr.bf16.mxu1 %v7163_v17  ;;  %v7183_v17 = vld [vmem:[%s10623_s3 + $0x6c] ss:$16 sps:$4 sm:$0xff]  }
  0x41   :  { %10637 = vst [vmem:[#allocation3_spill] sm:$0xff] %v8300_v38  ;;  %v8303_v39 = vrot.slane %v328_v37, %v8294_v36  ;;  %v8306_v40 = vrot.slane %v328_v37, %v8300_v38 }
  0x42   :  { %727 = vmatmul.mubr.bf16.vlgmr.msra.gmra.mrb[0].mxu0 %v7090_v44 }
  0x43   :  { %808 = vmatpush1.bf16.msra.mxu0 %v689_v46  ;;  %736 = vmatprep.mubr.bf16.mxu0 %v7095_v47 }
  0x44   :  { %1336 = vmatpush1.bf16.msra.mxu1 %v7165_v29 }
  0x45   :  { %1337 = vmatprep.subr.bf16.mxu1 %v7166_v30  ;;  %v7186_v30 = vld [vmem:[%s10623_s3 + $0x8c] ss:$16 sps:$4 sm:$0xff]  }
  0x48   :  { %1338 = vmatpush1.bf16.msra.mxu1 %v7168_v31  ;;  %v7244_v31 = vld [vmem:[%s10625_s5 + $0xc0] ss:$24 sps:$4 sm:$0xff]  }
  0x4a   :  { %737 = vmatmul.mubr.bf16.gmra.mrb[4].mxu0 %v7097_v51 }
  0x4b   :  { %746 = vmatprep.mubr.bf16.mxu0 %v7098_v52  ;;  %v7222_v52 = vld [vmem:[%s10625_s5 + $0x4] ss:$24 sps:$4 sm:$0xff]  }
  0x4c   :  { %2622 = vmatprep.subr.bf16.mxu0 %v7222_v52 }
  0x52   :  { %747 = vmatmul.mubr.bf16.gmra.mrb[8].mxu0 %v7100_v57  ;;  %v7228_v57 = vld [vmem:[%s10625_s5 + $0x34] ss:$24 sps:$4 sm:$0xff]  }
  0x53   :  { %756 = vmatprep.mubr.bf16.mxu0 %v7101_v58 }
  0x5a   :  { %757 = vmatmul.mubr.bf16.gmra.mrb[12].mxu0 %v7103_v63  ;;  %v7177_v63 = vld [vmem:[%s10623_s3 + $0x2c] ss:$16 sps:$4 sm:$0xff]  }
  0x5b   :  { %766 = vmatprep.mubr.bf16.mxu0 %v7104_v2 }
  0x62   :  { %767 = vmatmul.mubr.bf16.gmra.mrb[16].mxu0 %v7106_v6  ;;  %v7175_v6 = vld [vmem:[%s10623_s3 + $0x28] ss:$16 sps:$4 sm:$0xff]  }
  0x63   :  { %776 = vmatprep.mubr.bf16.mxu0 %v7107_v8  ;;  %v7180_v8 = vld [vmem:[%s10623_s3 + $0x4c] ss:$16 sps:$4 sm:$0xff]  }
  0x6a   :  { %777 = vmatmul.mubr.bf16.gmra.mrb[20].mxu0 %v7109_v12  ;;  %v7240_v12 = vld [vmem:[%s10625_s5 + $0x94] ss:$24 sps:$4 sm:$0xff]  }
  0x6b   :  { %786 = vmatprep.mubr.bf16.mxu0 %v7110_v14 }
  0x72   :  { %787 = vmatmul.mubr.bf16.gmra.mrb[24].mxu0 %v7112_v18 }
  0x73   :  { %796 = vmatprep.mubr.bf16.mxu0 %v7113_v19 }
  0x7a   :  { %797 = vmatmul.mubr.bf16.gmra.mrb[28].mxu0 %v7115_v20  ;;  %v7238_v20 = vld [vmem:[%s10625_s5 + $0x90] ss:$24 sps:$4 sm:$0xff]  }
  0x7b   :  { %839 = vmatprep.mubr.bf16.mxu0 %v7941_v1 }
  0x82   :  { %6199 = vmatmul.mubr.msk.bf16.vlgmr.msra.gmra.mrb[0].mxu0 %vm659_vm2, %v7116_v21 }
  0x83   :  { %849 = vmatprep.mubr.bf16.mxu0 %v7941_v1  ;;  %2623 = vmatpush1.bf16.msra.mxu0 %v7220_v49  ;;  %v7258_v49 = vld [vmem:[%s10625_s5 + $0x124] ss:$24 sps:$4 sm:$0xff]  }
  0x84   :  { %2624 = vmatprep.subr.bf16.mxu0 %v7228_v57  ;;  %v7192_v57 = vld [vmem:[%s10623_s3 + $0xcc] ss:$16 sps:$4 sm:$0xff]  }
  0x87   :  { %2625 = vmatpush1.bf16.msra.mxu0 %v7226_v60 }
  0x88   :  { %2626 = vmatprep.subr.bf16.mxu0 %v7234_v3  ;;  %v7190_v3 = vld [vmem:[%s10623_s3 + $0xc8] ss:$16 sps:$4 sm:$0xff]  }
  0x8a   :  { %6200 = vmatmul.mubr.msk.bf16.gmra.mrb[4].mxu0 %vm659_vm2, %v7117_v22 }
  0x8b   :  { %859 = vmatprep.mubr.bf16.mxu0 %v7941_v1  ;;  %2627 = vmatpush1.bf16.msra.mxu0 %v7232_v9 }
  0x8c   :  { %2628 = vmatprep.subr.bf16.mxu0 %v7240_v12 }
  0x8f   :  { %2629 = vmatpush1.bf16.msra.mxu0 %v7238_v20  ;;  %v7268_v20 = vld [vmem:[%s10625_s5 + $0x180] ss:$24 sps:$4 sm:$0xff]  }
  0x92   :  { %6201 = vmatmul.mubr.msk.bf16.gmra.mrb[8].mxu0 %vm659_vm2, %v7118_v23  ;;  %v7246_v23 = vld [vmem:[%s10625_s5 + $0xc4] ss:$24 sps:$4 sm:$0xff]  }
  0x93   :  { %869 = vmatprep.mubr.bf16.mxu0 %v7941_v1  ;;  %2630 = vmatprep.subr.bf16.mxu0 %v7246_v23  ;;  %v7276_v23 = vld [vmem:[%s10625_s5 + $0x1b4] ss:$24 sps:$4 sm:$0xff]  }
  0x94   :  { %2631 = vmatpush1.bf16.msra.mxu0 %v7244_v31 }
  0x9a   :  { %6202 = vmatmul.mubr.msk.bf16.gmra.mrb[12].mxu0 %vm659_vm2, %v7119_v24 }
  0x9b   :  { %879 = vmatprep.mubr.bf16.mxu0 %v7941_v1 }
  0xa2   :  { %6203 = vmatmul.mubr.msk.bf16.gmra.mrb[16].mxu0 %vm659_vm2, %v7120_v25 }
  0xa3   :  { %889 = vmatprep.mubr.bf16.mxu0 %v7941_v1 }
  0xaa   :  { %6204 = vmatmul.mubr.msk.bf16.gmra.mrb[20].mxu0 %vm659_vm2, %v7121_v26 }
  0xab   :  { %899 = vmatprep.mubr.bf16.mxu0 %v7941_v1 }
  0xb2   :  { %6205 = vmatmul.mubr.msk.bf16.gmra.mrb[24].mxu0 %vm659_vm2, %v7122_v27 }
  0xb3   :  { %909 = vmatprep.mubr.bf16.mxu0 %v7941_v1  ;;  %v7169_v1 = vld [vmem:[%s10623_s3 + $0x1e4] ss:$16 sps:$4 sm:$0xff]  }
  0xb4   :  { %1339 = vmatprep.subr.bf16.mxu1 %v7169_v1 }
  0xb5   :  { %1340 = vmatpush1.bf16.msra.mxu1 %v7171_v32 }
  0xb6   :  { %1422 = vmatprep.subr.bf16.mxu1 %v7174_v33  ;;  %v7252_v33 = vld [vmem:[%s10625_s5 + $0xf4] ss:$24 sps:$4 sm:$0xff]  }
  0xb7   :  { %2632 = vmatprep.subr.bf16.mxu0 %v7252_v33  ;;  %v7282_v33 = vld [vmem:[%s10625_s5 + $0x1e4] ss:$24 sps:$4 sm:$0xff]  }
  0xba   :  { %6206 = vmatmul.mubr.msk.bf16.gmra.mrb[28].mxu0 %vm659_vm2, %v7123_v28  ;;  %v7181_v28 = vld [vmem:[%s10623_s3 + $0x68] ss:$16 sps:$4 sm:$0xff]  }
 0x155   :  { %v841_v41 = vpop.f32.mrb[0].mxu0 }
 0x156   :  { %v6752_v42 = vadd.f32 %v841_v41, %v8303_v39  ;;  %v843_v43 = vpop.f32.mrb[1].mxu0 }
 0x157   :  { %v6753_v44 = vadd.f32 %v843_v43, %v8306_v40  ;;  %v845_v45 = vpop.f32.mrb[2].mxu0  ;;  %v7189_v43 = vld [vmem:[%s10623_s3 + $0xac] ss:$16 sps:$4 sm:$0xff]  }
 0x158   :  { %v6754_v46 = vadd.f32 %v845_v45, %v8303_v39  ;;  %v847_v47 = vpop.f32.mrb[3].mxu0  ;;  %v920_v50 = vmax.f32 %v6752_v42, 0.0  ;;  %v7184_v42 = vld [vmem:[%s10623_s3 + $0x88] ss:$16 sps:$4 sm:$0xff]  }
 0x159   :  { %v6755_v48 = vadd.f32 %v847_v47, %v8306_v40  ;;  %v921_v53 = vmax.f32 %v6753_v44, 0.0 }
 0x15a   :  { %v922_v51 = vmax.f32 %v6754_v46, 0.0  ;;  %v7250_v46 = vld [vmem:[%s10625_s5 + $0xf0] ss:$24 sps:$4 sm:$0xff]  }
 0x15b   :  { %v923_v54 = vmax.f32 %v6755_v48, 0.0  ;;  %2633 = vmatpush1.bf16.msra.mxu0 %v7250_v46 }
 0x15c   :  { %v8318_v55 = vpack.c.bf16 %v922_v51, %v920_v50  ;;  %2634 = vmatprep.subr.bf16.mxu0 %v7258_v49 }
 0x15d   :  { %v851_v58 = vpop.f32.mrb[4].mxu0  ;;  %v8326_v59 = vpack.c.bf16 %v923_v54, %v921_v53  ;;  %v7187_v54 = vld [vmem:[%s10623_s3 + $0xa8] ss:$16 sps:$4 sm:$0xff]  }
 0x15e   :  { %v6756_v61 = vadd.f32 %v851_v58, %v8303_v39  ;;  %v853_v62 = vpop.f32.mrb[5].mxu0  ;;  %v7256_v58 = vld [vmem:[%s10625_s5 + $0x120] ss:$24 sps:$4 sm:$0xff]  }
 0x15f   :  { %v6757_v0 = vadd.f32 %v853_v62, %v8306_v40  ;;  %v855_v2 = vpop.f32.mrb[6].mxu0  ;;  %1341 = vmatprep.mubr.bf16.mxu1 %v8326_v59  ;;  %v7264_v62 = vld [vmem:[%s10625_s5 + $0x154] ss:$24 sps:$4 sm:$0xff]   ;;  %2635 = vmatpush1.bf16.msra.mxu0 %v7256_v58 }
 0x160   :  { %v6758_v4 = vadd.f32 %v855_v2, %v8303_v39  ;;  %v857_v5 = vpop.f32.mrb[7].mxu0  ;;  %1342 = vmatmul.mubr.bf16.vlgmr.msra.gmra.mrb[0].mxu1 %v8318_v55  ;;  %v924_v10 = vmax.f32 %v6756_v61, 0.0  ;;  %2636 = vmatprep.subr.bf16.mxu0 %v7264_v62  ;;  %v7207_v58 = vld [vmem:[%s10623_s3 + $0x16c] ss:$16 sps:$4 sm:$0xff]  }
 0x161   :  { %v6759_v7 = vadd.f32 %v857_v5, %v8306_v40  ;;  %1423 = vmatpush1.bf16.msra.mxu1 %v7172_v56  ;;  %v925_v13 = vmax.f32 %v6757_v0, 0.0 }
 0x162   :  { %v926_v11 = vmax.f32 %v6758_v4, 0.0  ;;  %1424 = vmatprep.subr.bf16.mxu1 %v7177_v63  ;;  %v7195_v4 = vld [vmem:[%s10623_s3 + $0xec] ss:$16 sps:$4 sm:$0xff]  }
 0x163   :  { %v927_v14 = vmax.f32 %v6759_v7, 0.0  ;;  %v7262_v7 = vld [vmem:[%s10625_s5 + $0x150] ss:$24 sps:$4 sm:$0xff]  }
 0x164   :  { %v8355_v15 = vpack.c.bf16 %v926_v11, %v924_v10  ;;  %v7270_v10 = vld [vmem:[%s10625_s5 + $0x184] ss:$24 sps:$4 sm:$0xff]   ;;  %2637 = vmatpush1.bf16.msra.mxu0 %v7262_v7  ;;  %v7292_v7 = vld [vmem:[%s10625_s5 + $0x240] ss:$24 sps:$4 sm:$0xff]  }
 0x165   :  { %v8363_v18 = vpack.c.bf16 %v927_v14, %v925_v13  ;;  %v861_v19 = vpop.f32.mrb[8].mxu0  ;;  %1425 = vmatpush1.bf16.msra.mxu1 %v7175_v6  ;;  %2638 = vmatprep.subr.bf16.mxu0 %v7270_v10  ;;  %v7210_v10 = vld [vmem:[%s10623_s3 + $0x18c] ss:$16 sps:$4 sm:$0xff]  }
 0x166   :  { %v6760_v21 = vadd.f32 %v861_v19, %v8303_v39  ;;  %v863_v22 = vpop.f32.mrb[9].mxu0  ;;  %1426 = vmatprep.subr.bf16.mxu1 %v7180_v8  ;;  %v7198_v19 = vld [vmem:[%s10623_s3 + $0x10c] ss:$16 sps:$4 sm:$0xff]  }
 0x167   :  { %v6761_v24 = vadd.f32 %v863_v22, %v8306_v40  ;;  %v865_v25 = vpop.f32.mrb[10].mxu0  ;;  %1351 = vmatprep.mubr.bf16.mxu1 %v8363_v18 }
 0x168   :  { %v6762_v26 = vadd.f32 %v865_v25, %v8303_v39  ;;  %v867_v27 = vpop.f32.mrb[11].mxu0  ;;  %1352 = vmatmul.mubr.bf16.gmra.mrb[4].mxu1 %v8355_v15  ;;  %v928_v1 = vmax.f32 %v6760_v21, 0.0  ;;  %2639 = vmatpush1.bf16.msra.mxu0 %v7268_v20  ;;  %v7298_v20 = vld [vmem:[%s10625_s5 + $0x270] ss:$24 sps:$4 sm:$0xff]  }
 0x169   :  { %v6763_v29 = vadd.f32 %v867_v27, %v8306_v40  ;;  %1427 = vmatpush1.bf16.msra.mxu1 %v7178_v16  ;;  %v929_v34 = vmax.f32 %v6761_v24, 0.0  ;;  %v7193_v16 = vld [vmem:[%s10623_s3 + $0xe8] ss:$16 sps:$4 sm:$0xff]   ;;  %2640 = vmatprep.subr.bf16.mxu0 %v7276_v23 }
 0x16a   :  { %v930_v32 = vmax.f32 %v6762_v26, 0.0  ;;  %1428 = vmatprep.subr.bf16.mxu1 %v7183_v17  ;;  %v7196_v27 = vld [vmem:[%s10623_s3 + $0x108] ss:$16 sps:$4 sm:$0xff]  }
 0x16b   :  { %v931_v37 = vmax.f32 %v6763_v29, 0.0 }
 0x16c   :  { %v8389_v41 = vpack.c.bf16 %v930_v32, %v928_v1  ;;  %v7201_v32 = vld [vmem:[%s10623_s3 + $0x12c] ss:$16 sps:$4 sm:$0xff]  }
 0x16d   :  { %v8397_v44 = vpack.c.bf16 %v931_v37, %v929_v34  ;;  %v871_v45 = vpop.f32.mrb[12].mxu0  ;;  %1429 = vmatpush1.bf16.msra.mxu1 %v7181_v28 }
 0x16e   :  { %v6764_v47 = vadd.f32 %v871_v45, %v8303_v39  ;;  %v873_v48 = vpop.f32.mrb[13].mxu0  ;;  %1430 = vmatprep.subr.bf16.mxu1 %v7186_v30  ;;  %v7274_v30 = vld [vmem:[%s10625_s5 + $0x1b0] ss:$24 sps:$4 sm:$0xff]  }
 0x16f   :  { %v6765_v50 = vadd.f32 %v873_v48, %v8306_v40  ;;  %v875_v51 = vpop.f32.mrb[14].mxu0  ;;  %1361 = vmatprep.mubr.bf16.mxu1 %v8397_v44  ;;  %v7288_v48 = vld [vmem:[%s10625_s5 + $0x214] ss:$24 sps:$4 sm:$0xff]   ;;  %2641 = vmatpush1.bf16.msra.mxu0 %v7274_v30 }
 0x170   :  { %v6766_v52 = vadd.f32 %v875_v51, %v8303_v39  ;;  %v877_v53 = vpop.f32.mrb[15].mxu0  ;;  %1362 = vmatmul.mubr.bf16.gmra.mrb[8].mxu1 %v8389_v41  ;;  %v932_v60 = vmax.f32 %v6764_v47, 0.0  ;;  %v7204_v47 = vld [vmem:[%s10623_s3 + $0x14c] ss:$16 sps:$4 sm:$0xff]   ;;  %2642 = vmatprep.subr.bf16.mxu0 %v7282_v33 }
 0x171   :  { %v6767_v56 = vadd.f32 %v877_v53, %v8306_v40  ;;  %1431 = vmatpush1.bf16.msra.mxu1 %v7184_v42  ;;  %v933_v63 = vmax.f32 %v6765_v50, 0.0  ;;  %v7199_v42 = vld [vmem:[%s10623_s3 + $0x128] ss:$16 sps:$4 sm:$0xff]   ;;  %v7216_v33 = vld [vmem:[%s10623_s3 + $0x1cc] ss:$16 sps:$4 sm:$0xff]  }
 0x172   :  { %v934_v61 = vmax.f32 %v6766_v52, 0.0  ;;  %1432 = vmatprep.subr.bf16.mxu1 %v7189_v43  ;;  %v7280_v43 = vld [vmem:[%s10625_s5 + $0x1e0] ss:$24 sps:$4 sm:$0xff]  }
 0x173   :  { %v935_v0 = vmax.f32 %v6767_v56, 0.0  ;;  %v7286_v56 = vld [vmem:[%s10625_s5 + $0x210] ss:$24 sps:$4 sm:$0xff]   ;;  %2643 = vmatpush1.bf16.msra.mxu0 %v7280_v43 }
 0x174   :  { %v8423_v2 = vpack.c.bf16 %v934_v61, %v932_v60  ;;  %v7294_v60 = vld [vmem:[%s10625_s5 + $0x244] ss:$24 sps:$4 sm:$0xff]   ;;  %2644 = vmatprep.subr.bf16.mxu0 %v7288_v48 }
 0x175   :  { %v8431_v5 = vpack.c.bf16 %v935_v0, %v933_v63  ;;  %v881_v6 = vpop.f32.mrb[16].mxu0  ;;  %1433 = vmatpush1.bf16.msra.mxu1 %v7187_v54  ;;  %v7202_v54 = vld [vmem:[%s10623_s3 + $0x148] ss:$16 sps:$4 sm:$0xff]  }
 0x176   :  { %v6768_v8 = vadd.f32 %v881_v6, %v8303_v39  ;;  %v883_v9 = vpop.f32.mrb[17].mxu0  ;;  %1434 = vmatprep.subr.bf16.mxu1 %v7192_v57  ;;  %v7205_v6 = vld [vmem:[%s10623_s3 + $0x168] ss:$16 sps:$4 sm:$0xff]  }
 0x177   :  { %v6769_v11 = vadd.f32 %v883_v9, %v8306_v40  ;;  %v885_v12 = vpop.f32.mrb[18].mxu0  ;;  %1371 = vmatprep.mubr.bf16.mxu1 %v8431_v5  ;;  %2645 = vmatpush1.bf16.msra.mxu0 %v7286_v56  ;;  %v7247_v56 = vld [vmem:[%s10625_s5 + $0xc8] ss:$24 sps:$4 sm:$0xff]  }
 0x178   :  { %v6770_v13 = vadd.f32 %v885_v12, %v8303_v39  ;;  %v887_v14 = vpop.f32.mrb[19].mxu0  ;;  %1372 = vmatmul.mubr.bf16.gmra.mrb[12].mxu1 %v8423_v2  ;;  %v936_v21 = vmax.f32 %v6768_v8, 0.0  ;;  %2646 = vmatprep.subr.bf16.mxu0 %v7294_v60  ;;  %v7306_v60 = vld [vmem:[%s10625_s5 + $0x2a4] ss:$24 sps:$4 sm:$0xff]  }
 0x179   :  { %v6771_v17 = vadd.f32 %v887_v14, %v8306_v40  ;;  %1435 = vmatpush1.bf16.msra.mxu1 %v7190_v3  ;;  %v937_v24 = vmax.f32 %v6769_v11, 0.0  ;;  %v7300_v11 = vld [vmem:[%s10625_s5 + $0x274] ss:$24 sps:$4 sm:$0xff]  }
 0x17a   :  { %v938_v22 = vmax.f32 %v6770_v13, 0.0  ;;  %1436 = vmatprep.subr.bf16.mxu1 %v7195_v4 }
 0x17b   :  { %v939_v25 = vmax.f32 %v6771_v17, 0.0  ;;  %2647 = vmatpush1.bf16.msra.mxu0 %v7292_v7  ;;  %v7277_v7 = vld [vmem:[%s10625_s5 + $0x1b8] ss:$24 sps:$4 sm:$0xff]  }
 0x17c   :  { %v8457_v26 = vpack.c.bf16 %v938_v22, %v936_v21  ;;  %v7213_v22 = vld [vmem:[%s10623_s3 + $0x1ac] ss:$16 sps:$4 sm:$0xff]   ;;  %2648 = vmatprep.subr.bf16.mxu0 %v7300_v11  ;;  %v7295_v11 = vld [vmem:[%s10625_s5 + $0x248] ss:$24 sps:$4 sm:$0xff]  }
 0x17d   :  { %v8462_v28 = vpack.c.bf16 %v939_v25, %v937_v24  ;;  %v891_v29 = vpop.f32.mrb[20].mxu0  ;;  %1437 = vmatpush1.bf16.msra.mxu1 %v7193_v16 }
 0x17e   :  { %v6772_v31 = vadd.f32 %v891_v29, %v8303_v39  ;;  %v893_v1 = vpop.f32.mrb[21].mxu0  ;;  %1438 = vmatprep.subr.bf16.mxu1 %v7198_v19  ;;  %v7208_v19 = vld [vmem:[%s10623_s3 + $0x188] ss:$16 sps:$4 sm:$0xff]  }
 0x17f   :  { %v6773_v34 = vadd.f32 %v893_v1, %v8306_v40  ;;  %v895_v37 = vpop.f32.mrb[22].mxu0  ;;  %1381 = vmatprep.mubr.bf16.mxu1 %v8462_v28  ;;  %2649 = vmatpush1.bf16.msra.mxu0 %v7298_v20  ;;  %v8698_v20 = vld [vmem:[%s10626_s4] sm:$0xf] }
 0x180   :  { %v6774_v45 = vadd.f32 %v895_v37, %v8303_v39  ;;  %v897_v46 = vpop.f32.mrb[23].mxu0  ;;  %1382 = vmatmul.mubr.bf16.gmra.mrb[16].mxu1 %v8457_v26  ;;  %v940_v50 = vmax.f32 %v6772_v31, 0.0  ;;  %v7211_v31 = vld [vmem:[%s10623_s3 + $0x1a8] ss:$16 sps:$4 sm:$0xff]   ;;  %2650 = vmatprep.subr.bf16.mxu0 %v7306_v60 }
 0x181   :  { %v6775_v49 = vadd.f32 %v897_v46, %v8306_v40  ;;  %1439 = vmatpush1.bf16.msra.mxu1 %v7196_v27  ;;  %v941_v52 = vmax.f32 %v6773_v34, 0.0 }
 0x182   :  { %v942_v51 = vmax.f32 %v6774_v45, 0.0  ;;  %1440 = vmatprep.subr.bf16.mxu1 %v7201_v32 }
 0x183   :  { %v943_v53 = vmax.f32 %v6775_v49, 0.0  ;;  %v7225_v49 = vld [vmem:[%s10625_s5 + $0xc] ss:$24 sps:$4 sm:$0xff]  }
 0x184   :  { %v8497_v57 = vpack.c.bf16 %v942_v51, %v940_v50  ;;  %v7223_v50 = vld [vmem:[%s10625_s5 + $0x8] ss:$24 sps:$4 sm:$0xff]   ;;  %v7231_v51 = vld [vmem:[%s10625_s5 + $0x3c] ss:$24 sps:$4 sm:$0xff]  }
 0x185   :  { %v8505_v61 = vpack.c.bf16 %v943_v53, %v941_v52  ;;  %v901_v62 = vpop.f32.mrb[24].mxu0  ;;  %1441 = vmatpush1.bf16.msra.mxu1 %v7199_v42  ;;  %v7229_v52 = vld [vmem:[%s10625_s5 + $0x38] ss:$24 sps:$4 sm:$0xff]   ;;  %v7235_v53 = vld [vmem:[%s10625_s5 + $0x68] ss:$24 sps:$4 sm:$0xff]  }
 0x186   :  { %v6776_v63 = vadd.f32 %v901_v62, %v8303_v39  ;;  %v903_v0 = vpop.f32.mrb[25].mxu0  ;;  %1442 = vmatprep.subr.bf16.mxu1 %v7204_v47  ;;  %v7219_v47 = vld [vmem:[%s10623_s3 + $0x1ec] ss:$16 sps:$4 sm:$0xff]  }
 0x187   :  { %v6777_v3 = vadd.f32 %v903_v0, %v8306_v40  ;;  %v905_v4 = vpop.f32.mrb[26].mxu0  ;;  %1391 = vmatprep.mubr.bf16.mxu1 %v8505_v61  ;;  %v7267_v62 = vld [vmem:[%s10625_s5 + $0x15c] ss:$24 sps:$4 sm:$0xff]   ;;  %v7265_v0 = vld [vmem:[%s10625_s5 + $0x158] ss:$24 sps:$4 sm:$0xff]  }
 0x188   :  { %v6778_v8 = vadd.f32 %v905_v4, %v8303_v39  ;;  %v907_v9 = vpop.f32.mrb[27].mxu0  ;;  %1392 = vmatmul.mubr.bf16.gmra.mrb[20].mxu1 %v8497_v57  ;;  %v944_v13 = vmax.f32 %v6776_v63, 0.0  ;;  %v7312_v63 = vld [vmem:[%s10625_s5 + $0x2d4] ss:$24 sps:$4 sm:$0xff]   ;;  %v7271_v4 = vld [vmem:[%s10625_s5 + $0x188] ss:$24 sps:$4 sm:$0xff]  }
 0x189   :  { %v6779_v12 = vadd.f32 %v907_v9, %v8306_v40  ;;  %1443 = vmatpush1.bf16.msra.mxu1 %v7202_v54  ;;  %v945_v16 = vmax.f32 %v6777_v3, 0.0  ;;  %v7243_v54 = vld [vmem:[%s10625_s5 + $0x9c] ss:$24 sps:$4 sm:$0xff]   ;;  %v7310_v3 = vld [vmem:[%s10625_s5 + $0x2d0] ss:$24 sps:$4 sm:$0xff]  }
 0x18a   :  { %v946_v14 = vmax.f32 %v6778_v8, 0.0  ;;  %1444 = vmatprep.subr.bf16.mxu1 %v7207_v58  ;;  %v7255_v58 = vld [vmem:[%s10625_s5 + $0xfc] ss:$24 sps:$4 sm:$0xff]   ;;  %v7285_v8 = vld [vmem:[%s10625_s5 + $0x1ec] ss:$24 sps:$4 sm:$0xff]  }
 0x18b   :  { %v947_v17 = vmax.f32 %v6779_v12, 0.0  ;;  %v7283_v9 = vld [vmem:[%s10625_s5 + $0x1e8] ss:$24 sps:$4 sm:$0xff]   ;;  %v7301_v12 = vld [vmem:[%s10625_s5 + $0x278] ss:$24 sps:$4 sm:$0xff]  }
 0x18c   :  { %v8531_v21 = vpack.c.bf16 %v946_v14, %v944_v13  ;;  %v7309_v13 = vld [vmem:[%s10625_s5 + $0x2ac] ss:$24 sps:$4 sm:$0xff]   ;;  %v7307_v14 = vld [vmem:[%s10625_s5 + $0x2a8] ss:$24 sps:$4 sm:$0xff]  }
 0x18d   :  { %v8536_v23 = vpack.c.bf16 %v947_v17, %v945_v16  ;;  %v911_v24 = vpop.f32.mrb[28].mxu0  ;;  %1445 = vmatpush1.bf16.msra.mxu1 %v7205_v6  ;;  %v7279_v6 = vld [vmem:[%s10625_s5 + $0x1bc] ss:$24 sps:$4 sm:$0xff]   ;;  %v7313_v17 = vld [vmem:[%s10625_s5 + $0x2d8] ss:$24 sps:$4 sm:$0xff]  }
 0x18e   :  { %v6780_v25 = vadd.f32 %v911_v24, %v8303_v39  ;;  %v913_v27 = vpop.f32.mrb[29].mxu0  ;;  %1446 = vmatprep.subr.bf16.mxu1 %v7210_v10  ;;  %v7297_v10 = vld [vmem:[%s10625_s5 + $0x24c] ss:$24 sps:$4 sm:$0xff]   ;;  %v7315_v16 = vld [vmem:[%s10625_s5 + $0x2dc] ss:$24 sps:$4 sm:$0xff]  }
 0x18f   :  { %v6781_v29 = vadd.f32 %v913_v27, %v8306_v40  ;;  %v915_v30 = vpop.f32.mrb[30].mxu0  ;;  %1401 = vmatprep.mubr.bf16.mxu1 %v8536_v23 }
 0x190   :  { %v6782_v1 = vadd.f32 %v915_v30, %v8303_v39  ;;  %v917_v32 = vpop.f32.mrb[31].mxu0  ;;  %1402 = vmatmul.mubr.bf16.gmra.mrb[24].mxu1 %v8531_v21  ;;  %v948_v37 = vmax.f32 %v6780_v25, 0.0  ;;  %v7214_v39 = vld [vmem:[%s10623_s3 + $0x1c8] ss:$16 sps:$4 sm:$0xff]  }
 0x191   :  { %v6783_v34 = vadd.f32 %v917_v32, %v8306_v40  ;;  %1447 = vmatpush1.bf16.msra.mxu1 %v7208_v19  ;;  %v949_v43 = vmax.f32 %v6781_v29, 0.0  ;;  %v7217_v40 = vld [vmem:[%s10623_s3 + $0x1e8] ss:$16 sps:$4 sm:$0xff]   ;;  %v7321_v19 = vld [vmem:[%s10625_s5 + $0x30c] ss:$24 sps:$4 sm:$0xff]  }
 0x192   :  { %v950_v42 = vmax.f32 %v6782_v1, 0.0  ;;  %1448 = vmatprep.subr.bf16.mxu1 %v7213_v22  ;;  %v8706_v22 = vrot.slane %v8698_v20, %v8300_v38 }
 0x193   :  { %v951_v45 = vmax.f32 %v6783_v34, 0.0 }
 0x194   :  { %v8553_v46 = vpack.c.bf16 %v950_v42, %v948_v37 }
 0x195   :  { %v8558_v48 = vpack.c.bf16 %v951_v45, %v949_v43  ;;  %1449 = vmatpush1.bf16.msra.mxu1 %v7211_v31 }
 0x196   :  { %1450 = vmatprep.subr.bf16.mxu1 %v7216_v33 }
 0x197   :  { %1411 = vmatprep.mubr.bf16.mxu1 %v8558_v48 }
 0x198   :  { %1412 = vmatmul.mubr.bf16.gmra.mrb[28].mxu1 %v8553_v46 }
 0x199   :  { %1451 = vmatpush1.bf16.msra.mxu1 %v7214_v39  ;;  %1454 = vmatprep.mubr.bf16.mxu1 %v8326_v59  ;;  %v7237_v59 = vld [vmem:[%s10625_s5 + $0x6c] ss:$24 sps:$4 sm:$0xff]   ;;  %v7316_v39 = vld [vmem:[%s10625_s5 + $0x300] ss:$24 sps:$4 sm:$0xff]  }
 0x19a   :  { %1452 = vmatprep.subr.bf16.mxu1 %v7219_v47 }
 0x19d   :  { %1453 = vmatpush1.bf16.msra.mxu1 %v7217_v40  ;;  %v7324_v40 = vld [vmem:[%s10625_s5 + $0x334] ss:$24 sps:$4 sm:$0xff]  }
 0x19e   :  { %2848 = vmatprep.subr.bf16.mxu1 %v7225_v49  ;;  %v7327_v49 = vld [vmem:[%s10625_s5 + $0x33c] ss:$24 sps:$4 sm:$0xff]  }
 0x1a0   :  { %1455 = vmatmul.mubr.bf16.vlgmr.msra.gmra.mrb[32].mxu1 %v8318_v55  ;;  %v7241_v55 = vld [vmem:[%s10625_s5 + $0x98] ss:$24 sps:$4 sm:$0xff]  }
 0x1a1   :  { %1464 = vmatprep.mubr.bf16.mxu1 %v8363_v18  ;;  %2849 = vmatpush1.bf16.msra.mxu1 %v7223_v50  ;;  %v7249_v18 = vld [vmem:[%s10625_s5 + $0xcc] ss:$24 sps:$4 sm:$0xff]  }
 0x1a2   :  { %2850 = vmatprep.subr.bf16.mxu1 %v7231_v51 }
 0x1a5   :  { %2851 = vmatpush1.bf16.msra.mxu1 %v7229_v52 }
 0x1a6   :  { %2852 = vmatprep.subr.bf16.mxu1 %v7237_v59 }
 0x1a8   :  { %1465 = vmatmul.mubr.bf16.gmra.mrb[36].mxu1 %v8355_v15  ;;  %v7253_v15 = vld [vmem:[%s10625_s5 + $0xf8] ss:$24 sps:$4 sm:$0xff]  }
 0x1a9   :  { %1474 = vmatprep.mubr.bf16.mxu1 %v8397_v44  ;;  %2853 = vmatpush1.bf16.msra.mxu1 %v7235_v53  ;;  %v7261_v44 = vld [vmem:[%s10625_s5 + $0x12c] ss:$24 sps:$4 sm:$0xff]  }
 0x1aa   :  { %2854 = vmatprep.subr.bf16.mxu1 %v7243_v54  ;;  %v7322_v54 = vld [vmem:[%s10625_s5 + $0x330] ss:$24 sps:$4 sm:$0xff]  }
 0x1ad   :  { %2855 = vmatpush1.bf16.msra.mxu1 %v7241_v55  ;;  %v7325_v55 = vld [vmem:[%s10625_s5 + $0x338] ss:$24 sps:$4 sm:$0xff]  }
 0x1ae   :  { %2856 = vmatprep.subr.bf16.mxu1 %v7249_v18 }
 0x1b0   :  { %1475 = vmatmul.mubr.bf16.gmra.mrb[40].mxu1 %v8389_v41  ;;  %v7259_v41 = vld [vmem:[%s10625_s5 + $0x128] ss:$24 sps:$4 sm:$0xff]  }
 0x1b1   :  { %1484 = vmatprep.mubr.bf16.mxu1 %v8431_v5  ;;  %2857 = vmatpush1.bf16.msra.mxu1 %v7247_v56  ;;  %v7304_v5 = vld [vmem:[%s10625_s5 + $0x2a0] ss:$24 sps:$4 sm:$0xff]  }
 0x1b2   :  { %2858 = vmatprep.subr.bf16.mxu1 %v7255_v58  ;;  %2651 = vmatpush1.bf16.msra.mxu0 %v7304_v5  ;;  %v7330_v58 = vld [vmem:[%s10625_s5 + $0x364] ss:$24 sps:$4 sm:$0xff]  }
 0x1b3   :  { %2652 = vmatprep.subr.bf16.mxu0 %v7312_v63  ;;  %v7328_v63 = vld [vmem:[%s10625_s5 + $0x360] ss:$24 sps:$4 sm:$0xff]  }
 0x1b5   :  { %2859 = vmatpush1.bf16.msra.mxu1 %v7253_v15  ;;  %v7333_v15 = vld [vmem:[%s10625_s5 + $0x36c] ss:$24 sps:$4 sm:$0xff]  }
 0x1b6   :  { %2860 = vmatprep.subr.bf16.mxu1 %v7261_v44  ;;  %2653 = vmatpush1.bf16.msra.mxu0 %v7310_v3 }
 0x1b8   :  { %1485 = vmatmul.mubr.bf16.gmra.mrb[44].mxu1 %v8423_v2  ;;  %v7273_v2 = vld [vmem:[%s10625_s5 + $0x18c] ss:$24 sps:$4 sm:$0xff]  }
 0x1b9   :  { %1494 = vmatprep.mubr.bf16.mxu1 %v8462_v28  ;;  %2861 = vmatpush1.bf16.msra.mxu1 %v7259_v41  ;;  %v7318_v28 = vld [vmem:[%s10625_s5 + $0x304] ss:$24 sps:$4 sm:$0xff]  }
 0x1ba   :  { %2862 = vmatprep.subr.bf16.mxu1 %v7267_v62  ;;  %2735 = vmatprep.subr.bf16.mxu0 %v7318_v28  ;;  %v7336_v28 = vld [vmem:[%s10625_s5 + $0x394] ss:$24 sps:$4 sm:$0xff]  }
 0x1bd   :  { %2863 = vmatpush1.bf16.msra.mxu1 %v7265_v0  ;;  %v7331_v0 = vld [vmem:[%s10625_s5 + $0x368] ss:$24 sps:$4 sm:$0xff]  }
 0x1be   :  { %2864 = vmatprep.subr.bf16.mxu1 %v7273_v2 }
 0x1c0   :  { %1495 = vmatmul.mubr.bf16.gmra.mrb[48].mxu1 %v8457_v26  ;;  %v7291_v26 = vld [vmem:[%s10625_s5 + $0x21c] ss:$24 sps:$4 sm:$0xff]  }
 0x1c1   :  { %1504 = vmatprep.mubr.bf16.mxu1 %v8505_v61  ;;  %2865 = vmatpush1.bf16.msra.mxu1 %v7271_v4  ;;  %v7289_v61 = vld [vmem:[%s10625_s5 + $0x218] ss:$24 sps:$4 sm:$0xff]   ;;  %v7339_v4 = vld [vmem:[%s10625_s5 + $0x39c] ss:$24 sps:$4 sm:$0xff]  }
 0x1c2   :  { %2866 = vmatprep.subr.bf16.mxu1 %v7279_v6 }
 0x1c5   :  { %2867 = vmatpush1.bf16.msra.mxu1 %v7277_v7 }
 0x1c6   :  { %2868 = vmatprep.subr.bf16.mxu1 %v7285_v8 }
 0x1c8   :  { %1505 = vmatmul.mubr.bf16.gmra.mrb[52].mxu1 %v8497_v57  ;;  %v7303_v57 = vld [vmem:[%s10625_s5 + $0x27c] ss:$24 sps:$4 sm:$0xff]  }
 0x1c9   :  { %1514 = vmatprep.mubr.bf16.mxu1 %v8536_v23  ;;  %2869 = vmatpush1.bf16.msra.mxu1 %v7283_v9 }
 0x1ca   :  { %2870 = vmatprep.subr.bf16.mxu1 %v7291_v26 }
 0x1cd   :  { %2871 = vmatpush1.bf16.msra.mxu1 %v7289_v61  ;;  %v7334_v61 = vld [vmem:[%s10625_s5 + $0x390] ss:$24 sps:$4 sm:$0xff]  }
 0x1ce   :  { %2872 = vmatprep.subr.bf16.mxu1 %v7297_v10  ;;  %v7337_v10 = vld [vmem:[%s10625_s5 + $0x398] ss:$24 sps:$4 sm:$0xff]  }
 0x1d0   :  { %1515 = vmatmul.mubr.bf16.gmra.mrb[56].mxu1 %v8531_v21  ;;  %v8702_v21 = vrot.slane %v8698_v20, %v8294_v36 }
 0x1d1   :  { %1524 = vmatprep.mubr.bf16.mxu1 %v8558_v48  ;;  %2873 = vmatpush1.bf16.msra.mxu1 %v7295_v11 }
 0x1d2   :  { %2874 = vmatprep.subr.bf16.mxu1 %v7303_v57 }
 0x1d5   :  { %2875 = vmatpush1.bf16.msra.mxu1 %v7301_v12  ;;  %v7342_v12 = vld [vmem:[%s10625_s5 + $0x3c4] ss:$24 sps:$4 sm:$0xff]  }
 0x1d6   :  { %2876 = vmatprep.subr.bf16.mxu1 %v7309_v13  ;;  %v7345_v13 = vld [vmem:[%s10625_s5 + $0x3cc] ss:$24 sps:$4 sm:$0xff]  }
 0x1d8   :  { %1525 = vmatmul.mubr.bf16.gmra.mrb[60].mxu1 %v8553_v46  ;;  %v7319_v46 = vld [vmem:[%s10625_s5 + $0x308] ss:$24 sps:$4 sm:$0xff]  }
 0x1d9   :  { %2877 = vmatpush1.bf16.msra.mxu1 %v7307_v14 }
 0x1da   :  { %2878 = vmatprep.subr.bf16.mxu1 %v7315_v16 }
 0x1dd   :  { %2879 = vmatpush1.bf16.msra.mxu1 %v7313_v17 }
 0x1de   :  { %2961 = vmatprep.subr.bf16.mxu1 %v7321_v19 }
 0x233   :  { %v1343_v23 = vpop.f32.mrb[0].mxu1 }
 0x234   :  { %v1344_v24 = vadd.f32 %v1343_v23, %v8702_v21  ;;  %v1345_v25 = vpop.f32.mrb[1].mxu1 }
 0x235   :  { %v1346_v27 = vadd.f32 %v1345_v25, %v8706_v22  ;;  %v1347_v29 = vpop.f32.mrb[2].mxu1  ;;  %v7343_v25 = vld [vmem:[%s10625_s5 + $0x3c8] ss:$24 sps:$4 sm:$0xff]  }
 0x236   :  { %v1348_v30 = vadd.f32 %v1347_v29, %v8702_v21  ;;  %v1349_v31 = vpop.f32.mrb[3].mxu1  ;;  %v1535_v32 = vmax.f32 %v1344_v24, 0.0  ;;  %v7340_v24 = vld [vmem:[%s10625_s5 + $0x3c0] ss:$24 sps:$4 sm:$0xff]  }
 0x237   :  { %v1350_v1 = vadd.f32 %v1349_v31, %v8706_v22  ;;  %v1536_v34 = vmax.f32 %v1346_v27, 0.0  ;;  %v7351_v31 = vld [vmem:[%s10625_s5 + $0x3fc] ss:$24 sps:$4 sm:$0xff]  }
 0x238   :  { %v1539_v33 = vmax.f32 %v1348_v30, 0.0  ;;  %v7348_v30 = vld [vmem:[%s10625_s5 + $0x3f4] ss:$24 sps:$4 sm:$0xff]  }
 0x239   :  { %v1540_v37 = vmax.f32 %v1350_v1, 0.0 }
 0x23a   :  { %v8712_v42 = vpack.c.bf16 %v1539_v33, %v1535_v32 }
 0x23b   :  { %v8714_v43 = vpack.c.bf16 %v1540_v37, %v1536_v34  ;;  %v1353_v45 = vpop.f32.mrb[4].mxu1 }
 0x23c   :  { %v1354_v47 = vadd.f32 %v1353_v45, %v8702_v21  ;;  %v1355_v48 = vpop.f32.mrb[5].mxu1  ;;  %v7346_v45 = vld [vmem:[%s10625_s5 + $0x3f0] ss:$24 sps:$4 sm:$0xff]  }
 0x23d   :  { %v1356_v50 = vadd.f32 %v1355_v48, %v8706_v22  ;;  %v1357_v51 = vpop.f32.mrb[6].mxu1  ;;  %2654 = vmatprep.mubr.bf16.mxu0 %v8714_v43  ;;  %2880 = vmatprep.mubr.bf16.mxu1 %v8714_v43  ;;  %v7354_v48 = vld [vmem:[%s10625_s5 + $0x424] ss:$24 sps:$4 sm:$0xff]  }
 0x23e   :  { %v1358_v52 = vadd.f32 %v1357_v51, %v8702_v21  ;;  %v1359_v59 = vpop.f32.mrb[7].mxu1  ;;  %2655 = vmatmul.mubr.bf16.vlgmr.msra.gmra.mrb[32].mxu0 %v8712_v42  ;;  %2881 = vmatmul.mubr.bf16.vlgmr.msra.gmra.mrb[64].mxu1 %v8712_v42  ;;  %v1543_v18 = vmax.f32 %v1354_v47, 0.0 }
 0x23f   :  { %v1360_v53 = vadd.f32 %v1359_v59, %v8706_v22  ;;  %2736 = vmatpush1.bf16.msra.mxu0 %v7316_v39  ;;  %2962 = vmatpush1.bf16.msra.mxu1 %v7319_v46  ;;  %v1544_v44 = vmax.f32 %v1356_v50, 0.0  ;;  %v7349_v39 = vld [vmem:[%s10625_s5 + $0x3f8] ss:$24 sps:$4 sm:$0xff]  }
 0x240   :  { %v1547_v56 = vmax.f32 %v1358_v52, 0.0  ;;  %2737 = vmatprep.subr.bf16.mxu0 %v7324_v40  ;;  %2963 = vmatprep.subr.bf16.mxu1 %v7327_v49  ;;  %v7357_v40 = vld [vmem:[%s10625_s5 + $0x42c] ss:$24 sps:$4 sm:$0xff]  }
 0x241   :  { %v1548_v60 = vmax.f32 %v1360_v53, 0.0  ;;  %v7352_v53 = vld [vmem:[%s10625_s5 + $0x420] ss:$24 sps:$4 sm:$0xff]  }
 0x242   :  { %v8748_v41 = vpack.c.bf16 %v1547_v56, %v1543_v18  ;;  %v7360_v56 = vld [vmem:[%s10625_s5 + $0x454] ss:$24 sps:$4 sm:$0xff]  }
 0x243   :  { %v8750_v5 = vpack.c.bf16 %v1548_v60, %v1544_v44  ;;  %v1363_v62 = vpop.f32.mrb[8].mxu1  ;;  %2738 = vmatpush1.bf16.msra.mxu0 %v7322_v54  ;;  %2964 = vmatpush1.bf16.msra.mxu1 %v7325_v55  ;;  %v7355_v54 = vld [vmem:[%s10625_s5 + $0x428] ss:$24 sps:$4 sm:$0xff]  }
 0x244   :  { %v1364_v3 = vadd.f32 %v1363_v62, %v8702_v21  ;;  %v1365_v2 = vpop.f32.mrb[9].mxu1  ;;  %2739 = vmatprep.subr.bf16.mxu0 %v7330_v58  ;;  %2965 = vmatprep.subr.bf16.mxu1 %v7333_v15  ;;  %v7363_v58 = vld [vmem:[%s10625_s5 + $0x45c] ss:$24 sps:$4 sm:$0xff]  }
 0x245   :  { %v1366_v6 = vadd.f32 %v1365_v2, %v8706_v22  ;;  %v1367_v7 = vpop.f32.mrb[10].mxu1  ;;  %2664 = vmatprep.mubr.bf16.mxu0 %v8750_v5  ;;  %2890 = vmatprep.mubr.bf16.mxu1 %v8750_v5 }
 0x246   :  { %v1368_v8 = vadd.f32 %v1367_v7, %v8702_v21  ;;  %v1369_v9 = vpop.f32.mrb[11].mxu1  ;;  %2665 = vmatmul.mubr.bf16.gmra.mrb[36].mxu0 %v8748_v41  ;;  %2891 = vmatmul.mubr.bf16.gmra.mrb[68].mxu1 %v8748_v41  ;;  %v1551_v11 = vmax.f32 %v1364_v3, 0.0  ;;  %v7361_v3 = vld [vmem:[%s10625_s5 + $0x458] ss:$24 sps:$4 sm:$0xff]  }
 0x247   :  { %v1370_v26 = vadd.f32 %v1369_v9, %v8706_v22  ;;  %2740 = vmatpush1.bf16.msra.mxu0 %v7328_v63  ;;  %2966 = vmatpush1.bf16.msra.mxu1 %v7331_v0  ;;  %v1552_v14 = vmax.f32 %v1366_v6, 0.0  ;;  %v7358_v0 = vld [vmem:[%s10625_s5 + $0x450] ss:$24 sps:$4 sm:$0xff]   ;;  %v7369_v6 = vld [vmem:[%s10625_s5 + $0x48c] ss:$24 sps:$4 sm:$0xff]  }
 0x248   :  { %v1555_v57 = vmax.f32 %v1368_v8, 0.0  ;;  %2741 = vmatprep.subr.bf16.mxu0 %v7336_v28  ;;  %2967 = vmatprep.subr.bf16.mxu1 %v7339_v4  ;;  %v7366_v4 = vld [vmem:[%s10625_s5 + $0x484] ss:$24 sps:$4 sm:$0xff]  }
 0x249   :  { %v1556_v16 = vmax.f32 %v1370_v26, 0.0 }
 0x24a   :  { %v8784_v17 = vpack.c.bf16 %v1555_v57, %v1551_v11  ;;  %v7367_v11 = vld [vmem:[%s10625_s5 + $0x488] ss:$24 sps:$4 sm:$0xff]  }
 0x24b   :  { %v8786_v19 = vpack.c.bf16 %v1556_v16, %v1552_v14  ;;  %v1373_v23 = vpop.f32.mrb[12].mxu1  ;;  %2742 = vmatpush1.bf16.msra.mxu0 %v7334_v61  ;;  %2968 = vmatpush1.bf16.msra.mxu1 %v7337_v10  ;;  %v7364_v10 = vld [vmem:[%s10625_s5 + $0x480] ss:$24 sps:$4 sm:$0xff]   ;;  %v7375_v14 = vld [vmem:[%s10625_s5 + $0x4bc] ss:$24 sps:$4 sm:$0xff]  }
 0x24c   :  { %v1374_v27 = vadd.f32 %v1373_v23, %v8702_v21  ;;  %v1375_v29 = vpop.f32.mrb[13].mxu1  ;;  %2743 = vmatprep.subr.bf16.mxu0 %v7342_v12  ;;  %2969 = vmatprep.subr.bf16.mxu1 %v7345_v13  ;;  %v7372_v13 = vld [vmem:[%s10625_s5 + $0x4b4] ss:$24 sps:$4 sm:$0xff]  }
 0x24d   :  { %v1376_v1 = vadd.f32 %v1375_v29, %v8706_v22  ;;  %v1377_v32 = vpop.f32.mrb[14].mxu1  ;;  %2674 = vmatprep.mubr.bf16.mxu0 %v8786_v19  ;;  %2900 = vmatprep.mubr.bf16.mxu1 %v8786_v19  ;;  %v7370_v29 = vld [vmem:[%s10625_s5 + $0x4b0] ss:$24 sps:$4 sm:$0xff]  }
 0x24e   :  { %v1378_v33 = vadd.f32 %v1377_v32, %v8702_v21  ;;  %v1379_v34 = vpop.f32.mrb[15].mxu1  ;;  %2675 = vmatmul.mubr.bf16.gmra.mrb[40].mxu0 %v8784_v17  ;;  %2901 = vmatmul.mubr.bf16.gmra.mrb[72].mxu1 %v8784_v17  ;;  %v1559_v46 = vmax.f32 %v1374_v27, 0.0  ;;  %v7378_v32 = vld [vmem:[%s10625_s5 + $0x4e4] ss:$24 sps:$4 sm:$0xff]  }
 0x24f   :  { %v1380_v37 = vadd.f32 %v1379_v34, %v8706_v22  ;;  %2744 = vmatpush1.bf16.msra.mxu0 %v7340_v24  ;;  %2970 = vmatpush1.bf16.msra.mxu1 %v7343_v25  ;;  %v1560_v49 = vmax.f32 %v1376_v1, 0.0 }
 0x250   :  { %v1563_v47 = vmax.f32 %v1378_v33, 0.0  ;;  %2745 = vmatprep.subr.bf16.mxu0 %v7348_v30  ;;  %2971 = vmatprep.subr.bf16.mxu1 %v7351_v31  ;;  %v7373_v30 = vld [vmem:[%s10625_s5 + $0x4b8] ss:$24 sps:$4 sm:$0xff]   ;;  %v7381_v33 = vld [vmem:[%s10625_s5 + $0x4ec] ss:$24 sps:$4 sm:$0xff]  }
 0x251   :  { %v1564_v50 = vmax.f32 %v1380_v37, 0.0 }
 0x252   :  { %v8820_v51 = vpack.c.bf16 %v1563_v47, %v1559_v46  ;;  %v7376_v47 = vld [vmem:[%s10625_s5 + $0x4e0] ss:$24 sps:$4 sm:$0xff]  }
 0x253   :  { %v8822_v52 = vpack.c.bf16 %v1564_v50, %v1560_v49  ;;  %v1383_v59 = vpop.f32.mrb[16].mxu1  ;;  %2746 = vmatpush1.bf16.msra.mxu0 %v7346_v45  ;;  %2972 = vmatpush1.bf16.msra.mxu1 %v7349_v39  ;;  %v7384_v50 = vld [vmem:[%s10625_s5 + $0x514] ss:$24 sps:$4 sm:$0xff]  }
 0x254   :  { %v1384_v55 = vadd.f32 %v1383_v59, %v8702_v21  ;;  %v1385_v18 = vpop.f32.mrb[17].mxu1  ;;  %2747 = vmatprep.subr.bf16.mxu0 %v7354_v48  ;;  %2973 = vmatprep.subr.bf16.mxu1 %v7357_v40  ;;  %v7379_v48 = vld [vmem:[%s10625_s5 + $0x4e8] ss:$24 sps:$4 sm:$0xff]   ;;  %v7387_v59 = vld [vmem:[%s10625_s5 + $0x51c] ss:$24 sps:$4 sm:$0xff]  }
 0x255   :  { %v1386_v15 = vadd.f32 %v1385_v18, %v8706_v22  ;;  %v1387_v44 = vpop.f32.mrb[18].mxu1  ;;  %2684 = vmatprep.mubr.bf16.mxu0 %v8822_v52  ;;  %2910 = vmatprep.mubr.bf16.mxu1 %v8822_v52 }
 0x256   :  { %v1388_v60 = vadd.f32 %v1387_v44, %v8702_v21  ;;  %v1389_v62 = vpop.f32.mrb[19].mxu1  ;;  %2685 = vmatmul.mubr.bf16.gmra.mrb[44].mxu0 %v8820_v51  ;;  %2911 = vmatmul.mubr.bf16.gmra.mrb[76].mxu1 %v8820_v51  ;;  %v1567_v2 = vmax.f32 %v1384_v55, 0.0 }
 0x257   :  { %v1390_v63 = vadd.f32 %v1389_v62, %v8706_v22  ;;  %2748 = vmatpush1.bf16.msra.mxu0 %v7352_v53  ;;  %2974 = vmatpush1.bf16.msra.mxu1 %v7355_v54  ;;  %v1568_v7 = vmax.f32 %v1386_v15, 0.0  ;;  %v7385_v15 = vld [vmem:[%s10625_s5 + $0x518] ss:$24 sps:$4 sm:$0xff]   ;;  %v7390_v62 = vld [vmem:[%s10625_s5 + $0x544] ss:$24 sps:$4 sm:$0xff]  }
 0x258   :  { %v1571_v28 = vmax.f32 %v1388_v60, 0.0  ;;  %2749 = vmatprep.subr.bf16.mxu0 %v7360_v56  ;;  %2975 = vmatprep.subr.bf16.mxu1 %v7363_v58  ;;  %v7382_v58 = vld [vmem:[%s10625_s5 + $0x510] ss:$24 sps:$4 sm:$0xff]  }
 0x259   :  { %v1572_v8 = vmax.f32 %v1390_v63, 0.0  ;;  %v7393_v63 = vld [vmem:[%s10625_s5 + $0x54c] ss:$24 sps:$4 sm:$0xff]  }
 0x25a   :  { %v8856_v9 = vpack.c.bf16 %v1571_v28, %v1567_v2 }
 0x25b   :  { %v8858_v26 = vpack.c.bf16 %v1572_v8, %v1568_v7  ;;  %v1393_v61 = vpop.f32.mrb[20].mxu1  ;;  %2750 = vmatpush1.bf16.msra.mxu0 %v7358_v0  ;;  %2976 = vmatpush1.bf16.msra.mxu1 %v7361_v3  ;;  %v7391_v7 = vld [vmem:[%s10625_s5 + $0x548] ss:$24 sps:$4 sm:$0xff]  }
 0x25c   :  { %v1394_v57 = vadd.f32 %v1393_v61, %v8702_v21  ;;  %v1395_v12 = vpop.f32.mrb[21].mxu1  ;;  %2751 = vmatprep.subr.bf16.mxu0 %v7366_v4  ;;  %2977 = vmatprep.subr.bf16.mxu1 %v7369_v6  ;;  %v7388_v6 = vld [vmem:[%s10625_s5 + $0x540] ss:$24 sps:$4 sm:$0xff]  }
 0x25d   :  { %v1396_v16 = vadd.f32 %v1395_v12, %v8706_v22  ;;  %v1397_v23 = vpop.f32.mrb[22].mxu1  ;;  %2694 = vmatprep.mubr.bf16.mxu0 %v8858_v26  ;;  %2920 = vmatprep.mubr.bf16.mxu1 %v8858_v26 }
 0x25e   :  { %v1398_v24 = vadd.f32 %v1397_v23, %v8702_v21  ;;  %v1399_v25 = vpop.f32.mrb[23].mxu1  ;;  %2695 = vmatmul.mubr.bf16.gmra.mrb[48].mxu0 %v8856_v9  ;;  %2921 = vmatmul.mubr.bf16.gmra.mrb[80].mxu1 %v8856_v9  ;;  %v1575_v31 = vmax.f32 %v1394_v57, 0.0  ;;  %v8946_v57 = vsub.s32 2, %v8291_v35 }
 0x25f   :  { %v1400_v27 = vadd.f32 %v1399_v25, %v8706_v22  ;;  %2752 = vmatpush1.bf16.msra.mxu0 %v7364_v10  ;;  %2978 = vmatpush1.bf16.msra.mxu1 %v7367_v11  ;;  %v1576_v34 = vmax.f32 %v1396_v16, 0.0  ;;  %v7396_v10 = vld [vmem:[%s10625_s5 + $0x574] ss:$24 sps:$4 sm:$0xff]   ;;  %v7394_v25 = vld [vmem:[%s10625_s5 + $0x570] ss:$24 sps:$4 sm:$0xff]  }
 0x260   :  { %v1579_v1 = vmax.f32 %v1398_v24, 0.0  ;;  %2753 = vmatprep.subr.bf16.mxu0 %v7372_v13  ;;  %2979 = vmatprep.subr.bf16.mxu1 %v7375_v14  ;;  %v7399_v11 = vld [vmem:[%s10625_s5 + $0x57c] ss:$24 sps:$4 sm:$0xff]   ;;  %v8952_v14 = vsub.s32 3, %v8291_v35 }
 0x261   :  { %v1580_v37 = vmax.f32 %v1400_v27, 0.0  ;;  %v7397_v27 = vld [vmem:[%s10625_s5 + $0x578] ss:$24 sps:$4 sm:$0xff]  }
 0x262   :  { %v8892_v45 = vpack.c.bf16 %v1579_v1, %v1575_v31  ;;  %10638 = vst [vmem:[#allocation4_spill] sm:$0xff] %v8952_v14  ;;  %v7405_v31 = vld [vmem:[%s10625_s5 + $0x5ac] ss:$24 sps:$4 sm:$0xff]  }
 0x263   :  { %v8894_v39 = vpack.c.bf16 %v1580_v37, %v1576_v34  ;;  %v1403_v46 = vpop.f32.mrb[24].mxu1  ;;  %2754 = vmatpush1.bf16.msra.mxu0 %v7370_v29  ;;  %2980 = vmatpush1.bf16.msra.mxu1 %v7373_v30 }
 0x264   :  { %v1404_v40 = vadd.f32 %v1403_v46, %v8702_v21  ;;  %v1405_v49 = vpop.f32.mrb[25].mxu1  ;;  %2755 = vmatprep.subr.bf16.mxu0 %v7378_v32  ;;  %2981 = vmatprep.subr.bf16.mxu1 %v7381_v33  ;;  %v8976_v33 = vrot.slane %v8698_v20, %v8952_v14 }
 0x265   :  { %v1406_v53 = vadd.f32 %v1405_v49, %v8706_v22  ;;  %v1407_v54 = vpop.f32.mrb[26].mxu1  ;;  %2704 = vmatprep.mubr.bf16.mxu0 %v8894_v39  ;;  %2930 = vmatprep.mubr.bf16.mxu1 %v8894_v39 }
 0x266   :  { %v1408_v55 = vadd.f32 %v1407_v54, %v8702_v21  ;;  %v1409_v18 = vpop.f32.mrb[27].mxu1  ;;  %2705 = vmatmul.mubr.bf16.gmra.mrb[52].mxu0 %v8892_v45  ;;  %2931 = vmatmul.mubr.bf16.gmra.mrb[84].mxu1 %v8892_v45  ;;  %v1583_v44 = vmax.f32 %v1404_v40, 0.0 }
 0x267   :  { %v1410_v56 = vadd.f32 %v1409_v18, %v8706_v22  ;;  %2756 = vmatpush1.bf16.msra.mxu0 %v7376_v47  ;;  %2982 = vmatpush1.bf16.msra.mxu1 %v7379_v48  ;;  %v1584_v0 = vmax.f32 %v1406_v53, 0.0  ;;  %v7400_v47 = vld [vmem:[%s10625_s5 + $0x5a0] ss:$24 sps:$4 sm:$0xff]  }
 0x268   :  { %v1587_v60 = vmax.f32 %v1408_v55, 0.0  ;;  %2757 = vmatprep.subr.bf16.mxu0 %v7384_v50  ;;  %2983 = vmatprep.subr.bf16.mxu1 %v7387_v59  ;;  %v7403_v48 = vld [vmem:[%s10625_s5 + $0x5a8] ss:$24 sps:$4 sm:$0xff]   ;;  %v7411_v50 = vld [vmem:[%s10625_s5 + $0x5dc] ss:$24 sps:$4 sm:$0xff]  }
 0x269   :  { %v1588_v3 = vmax.f32 %v1410_v56, 0.0  ;;  %v7406_v56 = vld [vmem:[%s10625_s5 + $0x5d0] ss:$24 sps:$4 sm:$0xff]  }
 0x26a   :  { %v8928_v2 = vpack.c.bf16 %v1587_v60, %v1583_v44  ;;  %v7414_v60 = vld [vmem:[%s10625_s5 + $0x14] ss:$24 sps:$4 sm:$0xff]  }
 0x26b   :  { %v8930_v28 = vpack.c.bf16 %v1588_v3, %v1584_v0  ;;  %v1413_v4 = vpop.f32.mrb[28].mxu1  ;;  %2758 = vmatpush1.bf16.msra.mxu0 %v7382_v58  ;;  %2984 = vmatpush1.bf16.msra.mxu1 %v7385_v15  ;;  %v7409_v58 = vld [vmem:[%s10625_s5 + $0x5d8] ss:$24 sps:$4 sm:$0xff]  }
 0x26c   :  { %v1414_v8 = vadd.f32 %v1413_v4, %v8702_v21  ;;  %v1415_v61 = vpop.f32.mrb[29].mxu1  ;;  %2759 = vmatprep.subr.bf16.mxu0 %v7390_v62  ;;  %2985 = vmatprep.subr.bf16.mxu1 %v7393_v63 }
 0x26d   :  { %v1416_v12 = vadd.f32 %v1415_v61, %v8706_v22  ;;  %v1417_v13 = vpop.f32.mrb[30].mxu1  ;;  %2714 = vmatprep.mubr.bf16.mxu0 %v8930_v28  ;;  %2940 = vmatprep.mubr.bf16.mxu1 %v8930_v28  ;;  %v7417_v61 = vld [vmem:[%s10625_s5 + $0x44] ss:$24 sps:$4 sm:$0xff]  }
 0x26e   :  { %v1418_v16 = vadd.f32 %v1417_v13, %v8702_v21  ;;  %v1419_v23 = vpop.f32.mrb[31].mxu1  ;;  %2715 = vmatmul.mubr.bf16.gmra.mrb[56].mxu0 %v8928_v2  ;;  %2941 = vmatmul.mubr.bf16.gmra.mrb[88].mxu1 %v8928_v2  ;;  %v1591_v29 = vmax.f32 %v1414_v8, 0.0  ;;  %v8966_v21 = vrot.slane %v8698_v20, %v8946_v57  ;;  %v7408_v20 = vld [vmem:[%s10625_s5 + $0x5d4] ss:$24 sps:$4 sm:$0xff]  }
 0x26f   :  { %v1420_v24 = vadd.f32 %v1419_v23, %v8706_v22  ;;  %2760 = vmatpush1.bf16.msra.mxu0 %v7388_v6  ;;  %2986 = vmatpush1.bf16.msra.mxu1 %v7391_v7  ;;  %v7402_v22 = vld [vmem:[%s10625_s5 + $0x5a4] ss:$24 sps:$4 sm:$0xff]   ;;  %v1592_v1 = vmax.f32 %v1416_v12, 0.0  ;;  %v7412_v6 = vld [vmem:[%s10625_s5 + $0x10] ss:$24 sps:$4 sm:$0xff]  }
 0x270   :  { %v1595_v30 = vmax.f32 %v1418_v16, 0.0  ;;  %2761 = vmatprep.subr.bf16.mxu0 %v7396_v10  ;;  %2987 = vmatprep.subr.bf16.mxu1 %v7399_v11  ;;  %v7415_v23 = vld [vmem:[%s10625_s5 + $0x40] ss:$24 sps:$4 sm:$0xff]  }
 0x271   :  { %v1596_v32 = vmax.f32 %v1420_v24, 0.0 }
 0x272   :  { %v8978_v34 = vpack.c.bf16 %v1595_v30, %v1591_v29 }
 0x273   :  { %v8980_v37 = vpack.c.bf16 %v1596_v32, %v1592_v1  ;;  %v1456_v46 = vpop.f32.mrb[32].mxu1  ;;  %2762 = vmatpush1.bf16.msra.mxu0 %v7394_v25  ;;  %2988 = vmatpush1.bf16.msra.mxu1 %v7397_v27  ;;  %v7420_v27 = vld [vmem:[%s10625_s5 + $0x74] ss:$24 sps:$4 sm:$0xff]   ;;  %v7418_v32 = vld [vmem:[%s10625_s5 + $0x70] ss:$24 sps:$4 sm:$0xff]  }
 0x274   :  { %v1457_v40 = vadd.f32 %v1456_v46, %v8966_v21  ;;  %v1458_v49 = vpop.f32.mrb[33].mxu1  ;;  %2763 = vmatprep.subr.bf16.mxu0 %v7402_v22  ;;  %2989 = vmatprep.subr.bf16.mxu1 %v7405_v31 }
 0x275   :  { %v1459_v59 = vadd.f32 %v1458_v49, %v8976_v33  ;;  %v1460_v53 = vpop.f32.mrb[34].mxu1  ;;  %2724 = vmatprep.mubr.bf16.mxu0 %v8980_v37  ;;  %2950 = vmatprep.mubr.bf16.mxu1 %v8980_v37 }
 0x276   :  { %v1461_v54 = vadd.f32 %v1460_v53, %v8966_v21  ;;  %v1462_v55 = vpop.f32.mrb[35].mxu1  ;;  %2725 = vmatmul.mubr.bf16.gmra.mrb[60].mxu0 %v8978_v34  ;;  %2951 = vmatmul.mubr.bf16.gmra.mrb[92].mxu1 %v8978_v34  ;;  %v1537_v15 = vmax.f32 %v1457_v40, 0.0  ;;  %v7421_v53 = vld [vmem:[%s10625_s5 + $0xa0] ss:$24 sps:$4 sm:$0xff]  }
 0x277   :  { %v1463_v18 = vadd.f32 %v1462_v55, %v8976_v33  ;;  %2764 = vmatpush1.bf16.msra.mxu0 %v7400_v47  ;;  %2990 = vmatpush1.bf16.msra.mxu1 %v7403_v48  ;;  %v1538_v62 = vmax.f32 %v1459_v59, 0.0  ;;  %v7423_v48 = vld [vmem:[%s10625_s5 + $0xa4] ss:$24 sps:$4 sm:$0xff]  }
 0x278   :  { %v1541_v44 = vmax.f32 %v1461_v54, 0.0  ;;  %2765 = vmatprep.subr.bf16.mxu0 %v7408_v20  ;;  %2991 = vmatprep.subr.bf16.mxu1 %v7411_v50 }
 0x279   :  { %v1542_v63 = vmax.f32 %v1463_v18, 0.0  ;;  %v7426_v18 = vld [vmem:[%s10625_s5 + $0xd4] ss:$24 sps:$4 sm:$0xff]  }
 0x27a   :  { %v9011_v0 = vpack.c.bf16 %v1541_v44, %v1537_v15 }
 0x27b   :  { %v9013_v3 = vpack.c.bf16 %v1542_v63, %v1538_v62  ;;  %v1466_v4 = vpop.f32.mrb[36].mxu1  ;;  %2766 = vmatpush1.bf16.msra.mxu0 %v7406_v56  ;;  %2992 = vmatpush1.bf16.msra.mxu1 %v7409_v58  ;;  %v7424_v62 = vld [vmem:[%s10625_s5 + $0xd0] ss:$24 sps:$4 sm:$0xff]  }
 0x27c   :  { %v1467_v7 = vadd.f32 %v1466_v4, %v8966_v21  ;;  %v1468_v8 = vpop.f32.mrb[37].mxu1  ;;  %3074 = vmatprep.subr.bf16.mxu0 %v7414_v60 }
 0x27d   :  { %v1469_v10 = vadd.f32 %v1468_v8, %v8976_v33  ;;  %v1470_v11 = vpop.f32.mrb[38].mxu1  ;;  %2767 = vmatprep.mubr.bf16.mxu0 %v9013_v3  ;;  %2993 = vmatprep.mubr.bf16.mxu1 %v9013_v3 }
 0x27e   :  { %v1471_v12 = vadd.f32 %v1470_v11, %v8966_v21  ;;  %v1472_v13 = vpop.f32.mrb[39].mxu1  ;;  %2768 = vmatmul.mubr.bf16.vlgmr.msra.gmra.mrb[32].mxu0 %v9011_v0  ;;  %2994 = vmatmul.mubr.bf16.vlgmr.msra.gmra.mrb[64].mxu1 %v9011_v0  ;;  %v1545_v24 = vmax.f32 %v1467_v7, 0.0 }
 0x27f   :  { %v1473_v16 = vadd.f32 %v1472_v13, %v8976_v33  ;;  %3075 = vmatpush1.bf16.msra.mxu0 %v7412_v6  ;;  %v1546_v29 = vmax.f32 %v1469_v10, 0.0  ;;  %v7429_v6 = vld [vmem:[%s10625_s5 + $0x104] ss:$24 sps:$4 sm:$0xff]  }
 0x280   :  { %v1549_v25 = vmax.f32 %v1471_v12, 0.0  ;;  %3076 = vmatprep.subr.bf16.mxu0 %v7417_v61  ;;  %v7427_v12 = vld [vmem:[%s10625_s5 + $0x100] ss:$24 sps:$4 sm:$0xff]  }
 0x281   :  { %v1550_v30 = vmax.f32 %v1473_v16, 0.0 }
 0x282   :  { %v9035_v22 = vpack.c.bf16 %v1549_v25, %v1545_v24 }
 0x283   :  { %v9037_v31 = vpack.c.bf16 %v1550_v30, %v1546_v29  ;;  %v1476_v1 = vpop.f32.mrb[40].mxu1  ;;  %3077 = vmatpush1.bf16.msra.mxu0 %v7415_v23  ;;  %v7432_v23 = vld [vmem:[%s10625_s5 + $0x134] ss:$24 sps:$4 sm:$0xff]  }
 0x284   :  { %v1477_v46 = vadd.f32 %v1476_v1, %v8966_v21  ;;  %v1478_v47 = vpop.f32.mrb[41].mxu1  ;;  %3078 = vmatprep.subr.bf16.mxu0 %v7420_v27  ;;  %v7430_v1 = vld [vmem:[%s10625_s5 + $0x130] ss:$24 sps:$4 sm:$0xff]  }
 0x285   :  { %v1479_v40 = vadd.f32 %v1478_v47, %v8976_v33  ;;  %v1480_v49 = vpop.f32.mrb[42].mxu1  ;;  %2777 = vmatprep.mubr.bf16.mxu0 %v9037_v31  ;;  %3003 = vmatprep.mubr.bf16.mxu1 %v9037_v31  ;;  %v7435_v47 = vld [vmem:[%s10625_s5 + $0x164] ss:$24 sps:$4 sm:$0xff]  }
 0x286   :  { %v1481_v20 = vadd.f32 %v1480_v49, %v8966_v21  ;;  %v1482_v50 = vpop.f32.mrb[43].mxu1  ;;  %2778 = vmatmul.mubr.bf16.gmra.mrb[36].mxu0 %v9035_v22  ;;  %3004 = vmatmul.mubr.bf16.gmra.mrb[68].mxu1 %v9035_v22  ;;  %v1553_v54 = vmax.f32 %v1477_v46, 0.0 }
 0x287   :  { %v1483_v59 = vadd.f32 %v1482_v50, %v8976_v33  ;;  %3079 = vmatpush1.bf16.msra.mxu0 %v7418_v32  ;;  %v1554_v56 = vmax.f32 %v1479_v40, 0.0 }
 0x288   :  { %v1557_v55 = vmax.f32 %v1481_v20, 0.0  ;;  %3080 = vmatprep.subr.bf16.mxu0 %v7423_v48 }
 0x289   :  { %v1558_v58 = vmax.f32 %v1483_v59, 0.0  ;;  %v7433_v59 = vld [vmem:[%s10625_s5 + $0x160] ss:$24 sps:$4 sm:$0xff]  }
 0x28a   :  { %v9059_v15 = vpack.c.bf16 %v1557_v55, %v1553_v54  ;;  %v7438_v55 = vld [vmem:[%s10625_s5 + $0x194] ss:$24 sps:$4 sm:$0xff]  }
 0x28b   :  { %v9061_v44 = vpack.c.bf16 %v1558_v58, %v1554_v56  ;;  %v1486_v60 = vpop.f32.mrb[44].mxu1  ;;  %3081 = vmatpush1.bf16.msra.mxu0 %v7421_v53 }
 0x28c   :  { %v1487_v63 = vadd.f32 %v1486_v60, %v8966_v21  ;;  %v1488_v4 = vpop.f32.mrb[45].mxu1  ;;  %3082 = vmatprep.subr.bf16.mxu0 %v7426_v18 }
 0x28d   :  { %v1489_v7 = vadd.f32 %v1488_v4, %v8976_v33  ;;  %v1490_v8 = vpop.f32.mrb[46].mxu1  ;;  %2787 = vmatprep.mubr.bf16.mxu0 %v9061_v44  ;;  %3013 = vmatprep.mubr.bf16.mxu1 %v9061_v44 }
 0x28e   :  { %v1491_v61 = vadd.f32 %v1490_v8, %v8966_v21  ;;  %v1492_v10 = vpop.f32.mrb[47].mxu1  ;;  %2788 = vmatmul.mubr.bf16.gmra.mrb[40].mxu0 %v9059_v15  ;;  %3014 = vmatmul.mubr.bf16.gmra.mrb[72].mxu1 %v9059_v15  ;;  %v1561_v13 = vmax.f32 %v1487_v63, 0.0  ;;  %v7436_v63 = vld [vmem:[%s10625_s5 + $0x190] ss:$24 sps:$4 sm:$0xff]  }
 0x28f   :  { %v1493_v11 = vadd.f32 %v1492_v10, %v8976_v33  ;;  %3083 = vmatpush1.bf16.msra.mxu0 %v7424_v62  ;;  %v1562_v24 = vmax.f32 %v1489_v7, 0.0  ;;  %v7441_v7 = vld [vmem:[%s10625_s5 + $0x1c4] ss:$24 sps:$4 sm:$0xff]  }
 0x290   :  { %v1565_v16 = vmax.f32 %v1491_v61, 0.0  ;;  %3084 = vmatprep.subr.bf16.mxu0 %v7429_v6 }
 0x291   :  { %v1566_v25 = vmax.f32 %v1493_v11, 0.0 }
 0x292   :  { %v9083_v27 = vpack.c.bf16 %v1565_v16, %v1561_v13  ;;  %v7439_v13 = vld [vmem:[%s10625_s5 + $0x1c0] ss:$24 sps:$4 sm:$0xff]  }
 0x293   :  { %v9085_v29 = vpack.c.bf16 %v1566_v25, %v1562_v24  ;;  %v1496_v30 = vpop.f32.mrb[48].mxu1  ;;  %3085 = vmatpush1.bf16.msra.mxu0 %v7427_v12  ;;  %v7444_v24 = vld [vmem:[%s10625_s5 + $0x1f4] ss:$24 sps:$4 sm:$0xff]  }
 0x294   :  { %v1497_v32 = vadd.f32 %v1496_v30, %v8966_v21  ;;  %v1498_v46 = vpop.f32.mrb[49].mxu1  ;;  %3086 = vmatprep.subr.bf16.mxu0 %v7432_v23 }
 0x295   :  { %v1499_v48 = vadd.f32 %v1498_v46, %v8976_v33  ;;  %v1500_v40 = vpop.f32.mrb[50].mxu1  ;;  %2797 = vmatprep.mubr.bf16.mxu0 %v9085_v29  ;;  %3023 = vmatprep.mubr.bf16.mxu1 %v9085_v29 }
 0x296   :  { %v1501_v49 = vadd.f32 %v1500_v40, %v8966_v21  ;;  %v1502_v20 = vpop.f32.mrb[51].mxu1  ;;  %2798 = vmatmul.mubr.bf16.gmra.mrb[44].mxu0 %v9083_v27  ;;  %3024 = vmatmul.mubr.bf16.gmra.mrb[76].mxu1 %v9083_v27  ;;  %v1569_v53 = vmax.f32 %v1497_v32, 0.0 }
 0x297   :  { %v1503_v50 = vadd.f32 %v1502_v20, %v8976_v33  ;;  %3087 = vmatpush1.bf16.msra.mxu0 %v7430_v1  ;;  %v1570_v18 = vmax.f32 %v1499_v48, 0.0 }
 0x298   :  { %v1573_v54 = vmax.f32 %v1501_v49, 0.0  ;;  %3088 = vmatprep.subr.bf16.mxu0 %v7435_v47  ;;  %v7442_v47 = vld [vmem:[%s10625_s5 + $0x1f0] ss:$24 sps:$4 sm:$0xff]   ;;  %v7447_v49 = vld [vmem:[%s10625_s5 + $0x224] ss:$24 sps:$4 sm:$0xff]  }
 0x299   :  { %v1574_v56 = vmax.f32 %v1503_v50, 0.0 }
 0x29a   :  { %v9107_v58 = vpack.c.bf16 %v1573_v54, %v1569_v53 }
 0x29b   :  { %v9109_v60 = vpack.c.bf16 %v1574_v56, %v1570_v18  ;;  %v1506_v62 = vpop.f32.mrb[52].mxu1  ;;  %3089 = vmatpush1.bf16.msra.mxu0 %v7433_v59 }
 0x29c   :  { %v1507_v4 = vadd.f32 %v1506_v62, %v8966_v21  ;;  %v1508_v6 = vpop.f32.mrb[53].mxu1  ;;  %3090 = vmatprep.subr.bf16.mxu0 %v7438_v55  ;;  %v7445_v55 = vld [vmem:[%s10625_s5 + $0x220] ss:$24 sps:$4 sm:$0xff]   ;;  %v7450_v62 = vld [vmem:[%s10625_s5 + $0x254] ss:$24 sps:$4 sm:$0xff]  }
 0x29d   :  { %v1509_v8 = vadd.f32 %v1508_v6, %v8976_v33  ;;  %v1510_v61 = vpop.f32.mrb[54].mxu1  ;;  %2807 = vmatprep.mubr.bf16.mxu0 %v9109_v60  ;;  %3033 = vmatprep.mubr.bf16.mxu1 %v9109_v60 }
 0x29e   :  { %v1511_v10 = vadd.f32 %v1510_v61, %v8966_v21  ;;  %v1512_v11 = vpop.f32.mrb[55].mxu1  ;;  %2808 = vmatmul.mubr.bf16.gmra.mrb[48].mxu0 %v9107_v58  ;;  %3034 = vmatmul.mubr.bf16.gmra.mrb[80].mxu1 %v9107_v58  ;;  %v1577_v16 = vmax.f32 %v1507_v4, 0.0  ;;  %v7448_v61 = vld [vmem:[%s10625_s5 + $0x250] ss:$24 sps:$4 sm:$0xff]  }
 0x29f   :  { %v1513_v12 = vadd.f32 %v1512_v11, %v8976_v33  ;;  %3091 = vmatpush1.bf16.msra.mxu0 %v7436_v63  ;;  %v1578_v25 = vmax.f32 %v1509_v8, 0.0 }
 0x2a0   :  { %v1581_v23 = vmax.f32 %v1511_v10, 0.0  ;;  %3092 = vmatprep.subr.bf16.mxu0 %v7441_v7 }
 0x2a1   :  { %v1582_v30 = vmax.f32 %v1513_v12, 0.0  ;;  %v7453_v12 = vld [vmem:[%s10625_s5 + $0x284] ss:$24 sps:$4 sm:$0xff]  }
 0x2a2   :  { %v9131_v1 = vpack.c.bf16 %v1581_v23, %v1577_v16 }
 0x2a3   :  { %v9133_v32 = vpack.c.bf16 %v1582_v30, %v1578_v25  ;;  %v1516_v46 = vpop.f32.mrb[56].mxu1  ;;  %3093 = vmatpush1.bf16.msra.mxu0 %v7439_v13  ;;  %v7451_v30 = vld [vmem:[%s10625_s5 + $0x280] ss:$24 sps:$4 sm:$0xff]  }
 0x2a4   :  { %v1517_v48 = vadd.f32 %v1516_v46, %v8966_v21  ;;  %v1518_v40 = vpop.f32.mrb[57].mxu1  ;;  %3094 = vmatprep.subr.bf16.mxu0 %v7444_v24 }
 0x2a5   :  { %v1519_v20 = vadd.f32 %v1518_v40, %v8976_v33  ;;  %v1520_v50 = vpop.f32.mrb[58].mxu1  ;;  %2817 = vmatprep.mubr.bf16.mxu0 %v9133_v32  ;;  %3043 = vmatprep.mubr.bf16.mxu1 %v9133_v32 }
 0x2a6   :  { %v1521_v59 = vadd.f32 %v1520_v50, %v8966_v21  ;;  %v1522_v53 = vpop.f32.mrb[59].mxu1  ;;  %2818 = vmatmul.mubr.bf16.gmra.mrb[52].mxu0 %v9131_v1  ;;  %3044 = vmatmul.mubr.bf16.gmra.mrb[84].mxu1 %v9131_v1  ;;  %v1585_v18 = vmax.f32 %v1517_v48, 0.0  ;;  %v7456_v48 = vld [vmem:[%s10625_s5 + $0x2b4] ss:$24 sps:$4 sm:$0xff]   ;;  %v7459_v50 = vld [vmem:[%s10625_s5 + $0x2e4] ss:$24 sps:$4 sm:$0xff]  }
 0x2a7   :  { %v1523_v54 = vadd.f32 %v1522_v53, %v8976_v33  ;;  %3095 = vmatpush1.bf16.msra.mxu0 %v7442_v47  ;;  %v1586_v63 = vmax.f32 %v1519_v20, 0.0  ;;  %v7462_v53 = vld [vmem:[%s10625_s5 + $0x314] ss:$24 sps:$4 sm:$0xff]  }
 0x2a8   :  { %v1589_v56 = vmax.f32 %v1521_v59, 0.0  ;;  %3096 = vmatprep.subr.bf16.mxu0 %v7447_v49  ;;  %v7457_v59 = vld [vmem:[%s10625_s5 + $0x2e0] ss:$24 sps:$4 sm:$0xff]  }
 0x2a9   :  { %v1590_v4 = vmax.f32 %v1523_v54, 0.0  ;;  %v7460_v54 = vld [vmem:[%s10625_s5 + $0x310] ss:$24 sps:$4 sm:$0xff]  }
 0x2aa   :  { %v9155_v6 = vpack.c.bf16 %v1589_v56, %v1585_v18  ;;  %v7468_v18 = vld [vmem:[%s10625_s5 + $0x374] ss:$24 sps:$4 sm:$0xff]   ;;  %v7466_v56 = vld [vmem:[%s10625_s5 + $0x370] ss:$24 sps:$4 sm:$0xff]  }
 0x2ab   :  { %v9157_v7 = vpack.c.bf16 %v1590_v4, %v1586_v63  ;;  %v1526_v8 = vpop.f32.mrb[60].mxu1  ;;  %3097 = vmatpush1.bf16.msra.mxu0 %v7445_v55  ;;  %v7465_v55 = vld [vmem:[%s10625_s5 + $0x344] ss:$24 sps:$4 sm:$0xff]   ;;  %v7472_v63 = vld [vmem:[%s10625_s5 + $0x3d0] ss:$24 sps:$4 sm:$0xff]  }
 0x2ac   :  { %v1527_v10 = vadd.f32 %v1526_v8, %v8966_v21  ;;  %v1528_v11 = vpop.f32.mrb[61].mxu1  ;;  %3098 = vmatprep.subr.bf16.mxu0 %v7450_v62  ;;  %v7474_v62 = vld [vmem:[%s10625_s5 + $0x3d4] ss:$24 sps:$4 sm:$0xff]   ;;  %v7478_v8 = vld [vmem:[%s10625_s5 + $0x430] ss:$24 sps:$4 sm:$0xff]  }
 0x2ad   :  { %v1529_v13 = vadd.f32 %v1528_v11, %v8976_v33  ;;  %v1530_v16 = vpop.f32.mrb[62].mxu1  ;;  %2827 = vmatprep.mubr.bf16.mxu0 %v9157_v7  ;;  %3053 = vmatprep.mubr.bf16.mxu1 %v9157_v7  ;;  %v7480_v4 = vld [vmem:[%s10625_s5 + $0x434] ss:$24 sps:$4 sm:$0xff]  }
 0x2ae   :  { %v1531_v23 = vadd.f32 %v1530_v16, %v8966_v21  ;;  %v1532_v24 = vpop.f32.mrb[63].mxu1  ;;  %2828 = vmatmul.mubr.bf16.gmra.mrb[56].mxu0 %v9155_v6  ;;  %3054 = vmatmul.mubr.bf16.gmra.mrb[88].mxu1 %v9155_v6  ;;  %v1593_v46 = vmax.f32 %v1527_v10, 0.0  ;;  %v7484_v10 = vld [vmem:[%s10625_s5 + $0x490] ss:$24 sps:$4 sm:$0xff]   ;;  %v7492_v11 = vld [vmem:[%s10625_s5 + $0x4f4] ss:$24 sps:$4 sm:$0xff]  }
 0x2af   :  { %v1533_v25 = vadd.f32 %v1532_v24, %v8976_v33  ;;  %3099 = vmatpush1.bf16.msra.mxu0 %v7448_v61  ;;  %v1594_v21 = vmax.f32 %v1529_v13, 0.0  ;;  %v7454_v33 = vld [vmem:[%s10625_s5 + $0x2b0] ss:$24 sps:$4 sm:$0xff]   ;;  %v7486_v61 = vld [vmem:[%s10625_s5 + $0x494] ss:$24 sps:$4 sm:$0xff]  }
 0x2b0   :  { %v1597_v47 = vmax.f32 %v1531_v23, 0.0  ;;  %3100 = vmatprep.subr.bf16.mxu0 %v7453_v12  ;;  %v7490_v12 = vld [vmem:[%s10625_s5 + $0x4f0] ss:$24 sps:$4 sm:$0xff]   ;;  %v7498_v13 = vld [vmem:[%s10625_s5 + $0x554] ss:$24 sps:$4 sm:$0xff]  }
 0x2b1   :  { %v1598_v40 = vmax.f32 %v1533_v25, 0.0  ;;  %v7496_v16 = vld [vmem:[%s10625_s5 + $0x550] ss:$24 sps:$4 sm:$0xff]   ;;  %v7510_v23 = vld [vmem:[%s10627_s7 + $0x4] ss:$24 sps:$4 sm:$0xff]  }
 0x2b2   :  { %v9179_v49 = vpack.c.bf16 %v1597_v47, %v1593_v46  ;;  %v7508_v24 = vld [vmem:[%s10627_s7] ss:$24 sps:$4 sm:$0xff]   ;;  %v7504_v25 = vld [vmem:[%s10625_s5 + $0x5b4] ss:$24 sps:$4 sm:$0xff]   ;;  %5697 = vmatprep.subr.bf16.mxu1 %v7510_v23  ;;  %v7514_v47 = vld [vmem:[%s10627_s7 + $0x30] ss:$24 sps:$4 sm:$0xff]  }
 0x2b3   :  { %v9181_v20 = vpack.c.bf16 %v1598_v40, %v1594_v21  ;;  %3101 = vmatpush1.bf16.msra.mxu0 %v7451_v30  ;;  %5698 = vmatpush1.bf16.msra.mxu1 %v7508_v24  ;;  %v7516_v30 = vld [vmem:[%s10627_s7 + $0x34] ss:$24 sps:$4 sm:$0xff]   ;;  %v7505_v46 = vld [vmem:[%s10625_s5 + $0x5e0] ss:$24 sps:$4 sm:$0xff]   ;;  %v7522_v40 = vld [vmem:[%s10627_s7 + $0x64] ss:$24 sps:$4 sm:$0xff]  }
 0x2b4   :  { %3102 = vmatprep.subr.bf16.mxu0 %v7456_v48  ;;  %v7513_v48 = vld [vmem:[%s10627_s7 + $0xc] ss:$24 sps:$4 sm:$0xff]   ;;  %5699 = vmatprep.subr.bf16.mxu1 %v7516_v30  ;;  %v7511_v21 = vld [vmem:[%s10627_s7 + $0x8] ss:$24 sps:$4 sm:$0xff]   ;;  %v7589_v23 = vld [vmem:[%s10627_s7 + $0x278] ss:$24 sps:$4 sm:$0xff]  }
 0x2b5   :  { %2837 = vmatprep.mubr.bf16.mxu0 %v9181_v20  ;;  %3063 = vmatprep.mubr.bf16.mxu1 %v9181_v20  ;;  %v7594_v24 = vld [vmem:[%s10627_s7 + $0x2a4] ss:$24 sps:$4 sm:$0xff]   ;;  %v7598_v30 = vld [vmem:[%s10627_s7 + $0x2d0] ss:$24 sps:$4 sm:$0xff]  }
 0x2b6   :  { %2838 = vmatmul.mubr.bf16.gmra.mrb[60].mxu0 %v9179_v49  ;;  %3064 = vmatmul.mubr.bf16.gmra.mrb[92].mxu1 %v9179_v49 }
 0x2b7   :  { %3103 = vmatpush1.bf16.msra.mxu0 %v7454_v33  ;;  %3106 = vmatprep.mubr.bf16.mxu0 %v8714_v43  ;;  %v7463_v43 = vld [vmem:[%s10625_s5 + $0x340] ss:$24 sps:$4 sm:$0xff]  }
 0x2b8   :  { %3104 = vmatprep.subr.bf16.mxu0 %v7459_v50  ;;  %5700 = vmatpush1.bf16.msra.mxu1 %v7514_v47  ;;  %v7520_v33 = vld [vmem:[%s10627_s7 + $0x60] ss:$24 sps:$4 sm:$0xff]   ;;  %v7525_v50 = vld [vmem:[%s10627_s7 + $0x6c] ss:$24 sps:$4 sm:$0xff]  }
 0x2b9   :  { %5701 = vmatprep.subr.bf16.mxu1 %v7522_v40  ;;  %v7601_v47 = vld [vmem:[%s10627_s7 + $0x2d8] ss:$24 sps:$4 sm:$0xff]   ;;  %v7606_v40 = vld [vmem:[%s10627_s7 + $0x304] ss:$24 sps:$4 sm:$0xff]  }
 0x2bb   :  { %3105 = vmatpush1.bf16.msra.mxu0 %v7457_v59  ;;  %v7523_v59 = vld [vmem:[%s10627_s7 + $0x68] ss:$24 sps:$4 sm:$0xff]  }
 0x2bc   :  { %3187 = vmatprep.subr.bf16.mxu0 %v7462_v53  ;;  %5702 = vmatpush1.bf16.msra.mxu1 %v7520_v33  ;;  %v7528_v53 = vld [vmem:[%s10627_s7 + $0x94] ss:$24 sps:$4 sm:$0xff]  }
 0x2bd   :  { %5703 = vmatprep.subr.bf16.mxu1 %v7528_v53 }
 0x2be   :  { %3107 = vmatmul.mubr.bf16.vlgmr.msra.gmra.mrb[64].mxu0 %v8712_v42  ;;  %v7471_v42 = vld [vmem:[%s10625_s5 + $0x3a4] ss:$24 sps:$4 sm:$0xff]  }
 0x2bf   :  { %3116 = vmatprep.mubr.bf16.mxu0 %v8750_v5  ;;  %3188 = vmatpush1.bf16.msra.mxu0 %v7460_v54  ;;  %v7469_v5 = vld [vmem:[%s10625_s5 + $0x3a0] ss:$24 sps:$4 sm:$0xff]  }
 0x2c0   :  { %3189 = vmatprep.subr.bf16.mxu0 %v7465_v55  ;;  %v7529_v54 = vld [vmem:[%s10627_s7 + $0x98] ss:$24 sps:$4 sm:$0xff]   ;;  %v7534_v55 = vld [vmem:[%s10627_s7 + $0xc4] ss:$24 sps:$4 sm:$0xff]  }
 0x2c3   :  { %3190 = vmatpush1.bf16.msra.mxu0 %v7463_v43  ;;  %v7537_v43 = vld [vmem:[%s10627_s7 + $0xcc] ss:$24 sps:$4 sm:$0xff]  }
 0x2c4   :  { %3191 = vmatprep.subr.bf16.mxu0 %v7468_v18  ;;  %v7532_v18 = vld [vmem:[%s10627_s7 + $0xc0] ss:$24 sps:$4 sm:$0xff]  }
 0x2c6   :  { %3117 = vmatmul.mubr.bf16.gmra.mrb[68].mxu0 %v8748_v41  ;;  %v7477_v41 = vld [vmem:[%s10625_s5 + $0x404] ss:$24 sps:$4 sm:$0xff]  }
 0x2c7   :  { %3126 = vmatprep.mubr.bf16.mxu0 %v8786_v19  ;;  %3192 = vmatpush1.bf16.msra.mxu0 %v7466_v56  ;;  %v7475_v19 = vld [vmem:[%s10625_s5 + $0x400] ss:$24 sps:$4 sm:$0xff]   ;;  %v7543_v56 = vld [vmem:[%s10627_s7 + $0xfc] ss:$24 sps:$4 sm:$0xff]  }
 0x2c8   :  { %3193 = vmatprep.subr.bf16.mxu0 %v7471_v42  ;;  %v7538_v42 = vld [vmem:[%s10627_s7 + $0xf0] ss:$24 sps:$4 sm:$0xff]  }
 0x2cb   :  { %3194 = vmatpush1.bf16.msra.mxu0 %v7469_v5  ;;  %v7541_v5 = vld [vmem:[%s10627_s7 + $0xf8] ss:$24 sps:$4 sm:$0xff]  }
 0x2cc   :  { %3195 = vmatprep.subr.bf16.mxu0 %v7474_v62  ;;  %v7544_v62 = vld [vmem:[%s10627_s7 + $0x120] ss:$24 sps:$4 sm:$0xff]  }
 0x2ce   :  { %3127 = vmatmul.mubr.bf16.gmra.mrb[72].mxu0 %v8784_v17  ;;  %v7483_v17 = vld [vmem:[%s10625_s5 + $0x464] ss:$24 sps:$4 sm:$0xff]  }
 0x2cf   :  { %3136 = vmatprep.mubr.bf16.mxu0 %v8822_v52  ;;  %3196 = vmatpush1.bf16.msra.mxu0 %v7472_v63  ;;  %v7481_v52 = vld [vmem:[%s10625_s5 + $0x460] ss:$24 sps:$4 sm:$0xff]  }
 0x2d0   :  { %3197 = vmatprep.subr.bf16.mxu0 %v7477_v41  ;;  %v7547_v63 = vld [vmem:[%s10627_s7 + $0x128] ss:$24 sps:$4 sm:$0xff]   ;;  %v7555_v41 = vld [vmem:[%s10627_s7 + $0x15c] ss:$24 sps:$4 sm:$0xff]  }
 0x2d3   :  { %3198 = vmatpush1.bf16.msra.mxu0 %v7475_v19  ;;  %v7553_v19 = vld [vmem:[%s10627_s7 + $0x158] ss:$24 sps:$4 sm:$0xff]  }
 0x2d4   :  { %3199 = vmatprep.subr.bf16.mxu0 %v7480_v4  ;;  %v7556_v4 = vld [vmem:[%s10627_s7 + $0x180] ss:$24 sps:$4 sm:$0xff]  }
 0x2d6   :  { %3137 = vmatmul.mubr.bf16.gmra.mrb[76].mxu0 %v8820_v51  ;;  %v7489_v51 = vld [vmem:[%s10625_s5 + $0x4c4] ss:$24 sps:$4 sm:$0xff]  }
 0x2d7   :  { %3146 = vmatprep.mubr.bf16.mxu0 %v8858_v26  ;;  %3200 = vmatpush1.bf16.msra.mxu0 %v7478_v8  ;;  %v7487_v26 = vld [vmem:[%s10625_s5 + $0x4c0] ss:$24 sps:$4 sm:$0xff]  }
 0x2d8   :  { %3201 = vmatprep.subr.bf16.mxu0 %v7483_v17  ;;  %v7559_v8 = vld [vmem:[%s10627_s7 + $0x188] ss:$24 sps:$4 sm:$0xff]   ;;  %v7564_v17 = vld [vmem:[%s10627_s7 + $0x1b4] ss:$24 sps:$4 sm:$0xff]  }
 0x2db   :  { %3202 = vmatpush1.bf16.msra.mxu0 %v7481_v52  ;;  %v7562_v52 = vld [vmem:[%s10627_s7 + $0x1b0] ss:$24 sps:$4 sm:$0xff]  }
 0x2dc   :  { %3203 = vmatprep.subr.bf16.mxu0 %v7486_v61  ;;  %v7570_v61 = vld [vmem:[%s10627_s7 + $0x1e4] ss:$24 sps:$4 sm:$0xff]  }
 0x2de   :  { %3147 = vmatmul.mubr.bf16.gmra.mrb[80].mxu0 %v8856_v9  ;;  %v7495_v9 = vld [vmem:[%s10625_s5 + $0x524] ss:$24 sps:$4 sm:$0xff]  }
 0x2df   :  { %3156 = vmatprep.mubr.bf16.mxu0 %v8894_v39  ;;  %3204 = vmatpush1.bf16.msra.mxu0 %v7484_v10  ;;  %v7493_v39 = vld [vmem:[%s10625_s5 + $0x520] ss:$24 sps:$4 sm:$0xff]   ;;  %v7573_v10 = vld [vmem:[%s10627_s7 + $0x1ec] ss:$24 sps:$4 sm:$0xff]  }
 0x2e0   :  { %3205 = vmatprep.subr.bf16.mxu0 %v7489_v51  ;;  %v7568_v51 = vld [vmem:[%s10627_s7 + $0x1e0] ss:$24 sps:$4 sm:$0xff]  }
 0x2e3   :  { %3206 = vmatpush1.bf16.msra.mxu0 %v7487_v26  ;;  %v7571_v26 = vld [vmem:[%s10627_s7 + $0x1e8] ss:$24 sps:$4 sm:$0xff]  }
 0x2e4   :  { %3207 = vmatprep.subr.bf16.mxu0 %v7492_v11  ;;  %v7574_v11 = vld [vmem:[%s10627_s7 + $0x210] ss:$24 sps:$4 sm:$0xff]  }
 0x2e6   :  { %3157 = vmatmul.mubr.bf16.gmra.mrb[84].mxu0 %v8892_v45  ;;  %v7501_v45 = vld [vmem:[%s10625_s5 + $0x584] ss:$24 sps:$4 sm:$0xff]  }
 0x2e7   :  { %3166 = vmatprep.mubr.bf16.mxu0 %v8930_v28  ;;  %3208 = vmatpush1.bf16.msra.mxu0 %v7490_v12  ;;  %v7499_v28 = vld [vmem:[%s10625_s5 + $0x580] ss:$24 sps:$4 sm:$0xff]  }
 0x2e8   :  { %3209 = vmatprep.subr.bf16.mxu0 %v7495_v9  ;;  %v7577_v12 = vld [vmem:[%s10627_s7 + $0x218] ss:$24 sps:$4 sm:$0xff]   ;;  %v7582_v9 = vld [vmem:[%s10627_s7 + $0x244] ss:$24 sps:$4 sm:$0xff]  }
 0x2eb   :  { %3210 = vmatpush1.bf16.msra.mxu0 %v7493_v39  ;;  %v7585_v39 = vld [vmem:[%s10627_s7 + $0x24c] ss:$24 sps:$4 sm:$0xff]  }
 0x2ec   :  { %3211 = vmatprep.subr.bf16.mxu0 %v7498_v13  ;;  %v7580_v13 = vld [vmem:[%s10627_s7 + $0x240] ss:$24 sps:$4 sm:$0xff]  }
 0x2ee   :  { %3167 = vmatmul.mubr.bf16.gmra.mrb[88].mxu0 %v8928_v2  ;;  %v7502_v2 = vld [vmem:[%s10625_s5 + $0x5b0] ss:$24 sps:$4 sm:$0xff]  }
 0x2ef   :  { %3176 = vmatprep.mubr.bf16.mxu0 %v8980_v37  ;;  %3212 = vmatpush1.bf16.msra.mxu0 %v7496_v16  ;;  %v7507_v37 = vld [vmem:[%s10625_s5 + $0x5e4] ss:$24 sps:$4 sm:$0xff]   ;;  %v7588_v16 = vld [vmem:[%s10627_s7 + $0x274] ss:$24 sps:$4 sm:$0xff]  }
 0x2f0   :  { %3213 = vmatprep.subr.bf16.mxu0 %v7501_v45  ;;  %v7591_v45 = vld [vmem:[%s10627_s7 + $0x27c] ss:$24 sps:$4 sm:$0xff]  }
 0x2f3   :  { %3214 = vmatpush1.bf16.msra.mxu0 %v7499_v28  ;;  %v7586_v28 = vld [vmem:[%s10627_s7 + $0x270] ss:$24 sps:$4 sm:$0xff]  }
 0x2f4   :  { %3215 = vmatprep.subr.bf16.mxu0 %v7504_v25  ;;  %v7597_v25 = vld [vmem:[%s10627_s7 + $0x2ac] ss:$24 sps:$4 sm:$0xff]  }
 0x2f6   :  { %3177 = vmatmul.mubr.bf16.gmra.mrb[92].mxu0 %v8978_v34  ;;  %v7519_v34 = vld [vmem:[%s10627_s7 + $0x3c] ss:$24 sps:$4 sm:$0xff]  }
 0x2f7   :  { %3216 = vmatpush1.bf16.msra.mxu0 %v7502_v2  ;;  %3219 = vmatprep.mubr.bf16.mxu0 %v9013_v3  ;;  %v7517_v3 = vld [vmem:[%s10627_s7 + $0x38] ss:$24 sps:$4 sm:$0xff]  }
 0x2f8   :  { %3217 = vmatprep.subr.bf16.mxu0 %v7507_v37  ;;  %v7592_v2 = vld [vmem:[%s10627_s7 + $0x2a0] ss:$24 sps:$4 sm:$0xff]  }
 0x2f9   :  { %v7595_v37 = vld [vmem:[%s10627_s7 + $0x2a8] ss:$24 sps:$4 sm:$0xff]  }
 0x2fb   :  { %3218 = vmatpush1.bf16.msra.mxu0 %v7505_v46  ;;  %v7600_v46 = vld [vmem:[%s10627_s7 + $0x2d4] ss:$24 sps:$4 sm:$0xff]  }
 0x2fc   :  { %5820 = vmatprep.subr.bf16.mxu0 %v7513_v48  ;;  %v7603_v48 = vld [vmem:[%s10627_s7 + $0x2dc] ss:$24 sps:$4 sm:$0xff]  }
 0x2fe   :  { %3220 = vmatmul.mubr.bf16.vlgmr.msra.gmra.mrb[64].mxu0 %v9011_v0  ;;  %v7531_v0 = vld [vmem:[%s10627_s7 + $0x9c] ss:$24 sps:$4 sm:$0xff]  }
 0x2ff   :  { %3229 = vmatprep.mubr.bf16.mxu0 %v9037_v31  ;;  %5821 = vmatpush1.bf16.msra.mxu0 %v7511_v21  ;;  %v7526_v31 = vld [vmem:[%s10627_s7 + $0x90] ss:$24 sps:$4 sm:$0xff]   ;;  %v330_v21 = vld [vmem:[%s10628_s6] sm:$0x3f] }
 0x300   :  { %5822 = vmatprep.subr.bf16.mxu0 %v7519_v34  ;;  %5704 = vmatpush1.bf16.msra.mxu1 %v7526_v31  ;;  %v7609_v34 = vld [vmem:[%s10627_s7 + $0x30c] ss:$24 sps:$4 sm:$0xff]   ;;  %v9526_v33 = vrot.slane %v330_v21, %v8294_v36 }
 0x301   :  { %5705 = vmatprep.subr.bf16.mxu1 %v7534_v55 }
 0x303   :  { %5823 = vmatpush1.bf16.msra.mxu0 %v7517_v3  ;;  %v9529_v3 = vrot.slane %v330_v21, %v8946_v57 }
 0x304   :  { %5824 = vmatprep.subr.bf16.mxu0 %v7525_v50  ;;  %5706 = vmatpush1.bf16.msra.mxu1 %v7532_v18  ;;  %v9532_v50 = vrot.slane %v330_v21, %v8300_v38 }
 0x306   :  { %3230 = vmatmul.mubr.bf16.gmra.mrb[68].mxu0 %v9035_v22  ;;  %v7535_v22 = vld [vmem:[%s10627_s7 + $0xc8] ss:$24 sps:$4 sm:$0xff]  }
 0x307   :  { %3239 = vmatprep.mubr.bf16.mxu0 %v9061_v44  ;;  %5825 = vmatpush1.bf16.msra.mxu0 %v7523_v59  ;;  %v7540_v44 = vld [vmem:[%s10627_s7 + $0xf4] ss:$24 sps:$4 sm:$0xff]   ;;  %v9535_v59 = vrot.slane %v330_v21, %v8952_v14 }
 0x308   :  { %5826 = vmatprep.subr.bf16.mxu0 %v7531_v0  ;;  %5707 = vmatprep.subr.bf16.mxu1 %v7540_v44 }
 0x309   :  { %5708 = vmatpush1.bf16.msra.mxu1 %v7538_v42 }
 0x30b   :  { %5827 = vmatpush1.bf16.msra.mxu0 %v7529_v54 }
 0x30c   :  { %5828 = vmatprep.subr.bf16.mxu0 %v7537_v43 }
 0x30e   :  { %3240 = vmatmul.mubr.bf16.gmra.mrb[72].mxu0 %v9059_v15  ;;  %v7546_v15 = vld [vmem:[%s10627_s7 + $0x124] ss:$24 sps:$4 sm:$0xff]  }
 0x30f   :  { %3249 = vmatprep.mubr.bf16.mxu0 %v9085_v29  ;;  %5829 = vmatpush1.bf16.msra.mxu0 %v7535_v22  ;;  %v7549_v29 = vld [vmem:[%s10627_s7 + $0x12c] ss:$24 sps:$4 sm:$0xff]  }
 0x310   :  { %5830 = vmatprep.subr.bf16.mxu0 %v7543_v56  ;;  %5709 = vmatprep.subr.bf16.mxu1 %v7546_v15 }
 0x311   :  { %5710 = vmatpush1.bf16.msra.mxu1 %v7544_v62 }
 0x313   :  { %5831 = vmatpush1.bf16.msra.mxu0 %v7541_v5 }
 0x314   :  { %5832 = vmatprep.subr.bf16.mxu0 %v7549_v29 }
 0x316   :  { %3250 = vmatmul.mubr.bf16.gmra.mrb[76].mxu0 %v9083_v27  ;;  %v7552_v27 = vld [vmem:[%s10627_s7 + $0x154] ss:$24 sps:$4 sm:$0xff]  }
 0x317   :  { %3259 = vmatprep.mubr.bf16.mxu0 %v9109_v60  ;;  %5833 = vmatpush1.bf16.msra.mxu0 %v7547_v63  ;;  %v7550_v60 = vld [vmem:[%s10627_s7 + $0x150] ss:$24 sps:$4 sm:$0xff]  }
 0x318   :  { %5711 = vmatprep.subr.bf16.mxu1 %v7552_v27  ;;  %5834 = vmatprep.subr.bf16.mxu0 %v7555_v41 }
 0x319   :  { %5712 = vmatpush1.bf16.msra.mxu1 %v7550_v60 }
 0x31b   :  { %5835 = vmatpush1.bf16.msra.mxu0 %v7553_v19 }
 0x31e   :  { %3260 = vmatmul.mubr.bf16.gmra.mrb[80].mxu0 %v9107_v58  ;;  %v7558_v58 = vld [vmem:[%s10627_s7 + $0x184] ss:$24 sps:$4 sm:$0xff]  }
 0x31f   :  { %3269 = vmatprep.mubr.bf16.mxu0 %v9133_v32  ;;  %v7561_v32 = vld [vmem:[%s10627_s7 + $0x18c] ss:$24 sps:$4 sm:$0xff]   ;;  %5713 = vmatprep.subr.bf16.mxu1 %v7558_v58 }
 0x320   :  { %5836 = vmatprep.subr.bf16.mxu0 %v7561_v32  ;;  %5714 = vmatpush1.bf16.msra.mxu1 %v7556_v4 }
 0x321   :  { %5837 = vmatpush1.bf16.msra.mxu0 %v7559_v8  ;;  %5715 = vmatprep.subr.bf16.mxu1 %v7564_v17 }
 0x324   :  { %5716 = vmatpush1.bf16.msra.mxu1 %v7562_v52 }
 0x325   :  { %5717 = vmatprep.subr.bf16.mxu1 %v7570_v61 }
 0x326   :  { %3270 = vmatmul.mubr.bf16.gmra.mrb[84].mxu0 %v9131_v1  ;;  %v7567_v1 = vld [vmem:[%s10627_s7 + $0x1bc] ss:$24 sps:$4 sm:$0xff]  }
 0x327   :  { %3279 = vmatprep.mubr.bf16.mxu0 %v9157_v7  ;;  %v7565_v7 = vld [vmem:[%s10627_s7 + $0x1b8] ss:$24 sps:$4 sm:$0xff]   ;;  %5838 = vmatprep.subr.bf16.mxu0 %v7567_v1 }
 0x328   :  { %5839 = vmatpush1.bf16.msra.mxu0 %v7565_v7  ;;  %5718 = vmatpush1.bf16.msra.mxu1 %v7568_v51 }
 0x329   :  { %5840 = vmatprep.subr.bf16.mxu0 %v7573_v10 }
 0x32c   :  { %5841 = vmatpush1.bf16.msra.mxu0 %v7571_v26 }
 0x32e   :  { %3280 = vmatmul.mubr.bf16.gmra.mrb[88].mxu0 %v9155_v6  ;;  %v7576_v6 = vld [vmem:[%s10627_s7 + $0x214] ss:$24 sps:$4 sm:$0xff]  }
 0x32f   :  { %3289 = vmatprep.mubr.bf16.mxu0 %v9181_v20  ;;  %v7579_v20 = vld [vmem:[%s10627_s7 + $0x21c] ss:$24 sps:$4 sm:$0xff]   ;;  %5719 = vmatprep.subr.bf16.mxu1 %v7576_v6 }
 0x330   :  { %5842 = vmatprep.subr.bf16.mxu0 %v7579_v20  ;;  %5720 = vmatpush1.bf16.msra.mxu1 %v7574_v11 }
 0x331   :  { %5843 = vmatpush1.bf16.msra.mxu0 %v7577_v12  ;;  %5721 = vmatprep.subr.bf16.mxu1 %v7582_v9 }
 0x332   :  { %5844 = vmatprep.subr.bf16.mxu0 %v7585_v39 }
 0x334   :  { %5722 = vmatpush1.bf16.msra.mxu1 %v7580_v13 }
 0x335   :  { %5723 = vmatprep.subr.bf16.mxu1 %v7588_v16 }
 0x336   :  { %3290 = vmatmul.mubr.bf16.gmra.mrb[92].mxu0 %v9179_v49  ;;  %v7583_v49 = vld [vmem:[%s10627_s7 + $0x248] ss:$24 sps:$4 sm:$0xff]  }
 0x337   :  { %5845 = vmatpush1.bf16.msra.mxu0 %v7583_v49 }
 0x338   :  { %5846 = vmatprep.subr.bf16.mxu0 %v7591_v45  ;;  %5724 = vmatpush1.bf16.msra.mxu1 %v7586_v28 }
 0x339   :  { %5725 = vmatprep.subr.bf16.mxu1 %v7594_v24 }
 0x33b   :  { %5847 = vmatpush1.bf16.msra.mxu0 %v7589_v23 }
 0x33c   :  { %5848 = vmatprep.subr.bf16.mxu0 %v7597_v25  ;;  %5726 = vmatpush1.bf16.msra.mxu1 %v7592_v2 }
 0x33d   :  { %5727 = vmatprep.subr.bf16.mxu1 %v7600_v46 }
 0x33f   :  { %5849 = vmatpush1.bf16.msra.mxu0 %v7595_v37 }
 0x340   :  { %5850 = vmatprep.subr.bf16.mxu0 %v7603_v48  ;;  %5728 = vmatpush1.bf16.msra.mxu1 %v7598_v30 }
 0x341   :  { %5738 = vmatprep.subr.bf16.mxu1 %v7606_v40 }
 0x343   :  { %5851 = vmatpush1.bf16.msra.mxu0 %v7601_v47 }
 0x344   :  { %5861 = vmatprep.subr.bf16.mxu0 %v7609_v34 }
 0x351   :  { %v2769_v53 = vpop.f32.mrb[32].mxu0  ;;  %v2995_v0 = vpop.f32.mrb[64].mxu1 }
 0x352   :  { %v6784_v31 = vadd.f32 %v2769_v53, %v9526_v33  ;;  %v6816_v54 = vadd.f32 %v2995_v0, %v9529_v3  ;;  %v2771_v55 = vpop.f32.mrb[33].mxu0  ;;  %v2997_v43 = vpop.f32.mrb[65].mxu1 }
 0x353   :  { %v6785_v18 = vadd.f32 %v2771_v55, %v9532_v50  ;;  %v6817_v22 = vadd.f32 %v2997_v43, %v9535_v59  ;;  %v2773_v44 = vpop.f32.mrb[34].mxu0  ;;  %v2999_v56 = vpop.f32.mrb[66].mxu1 }
 0x354   :  { %v6786_v42 = vadd.f32 %v2773_v44, %v9526_v33  ;;  %v6818_v5 = vadd.f32 %v2999_v56, %v9529_v3  ;;  %v2775_v15 = vpop.f32.mrb[35].mxu0  ;;  %v3001_v29 = vpop.f32.mrb[67].mxu1  ;;  %v3300_v62 = vmax.f32 %v6784_v31, 0.0  ;;  %v3302_v41 = vmax.f32 %v6816_v54, 0.0 }
 0x355   :  { %v6787_v63 = vadd.f32 %v2775_v15, %v9532_v50  ;;  %v6819_v27 = vadd.f32 %v3001_v29, %v9535_v59  ;;  %v3301_v58 = vmax.f32 %v6785_v18, 0.0  ;;  %v3303_v32 = vmax.f32 %v6817_v22, 0.0 }
 0x356   :  { %v3306_v60 = vmax.f32 %v6786_v42, 0.0  ;;  %v3308_v19 = vmax.f32 %v6818_v5, 0.0 }
 0x357   :  { %v3307_v4 = vmax.f32 %v6787_v63, 0.0  ;;  %v3309_v8 = vmax.f32 %v6819_v27, 0.0 }
 0x358   :  { %v3396_v17 = vmax.f32 %v3300_v62, %v3306_v60  ;;  %v3410_v1 = vmax.f32 %v3302_v41, %v3308_v19 }
 0x359   :  { %v3403_v52 = vmax.f32 %v3301_v58, %v3307_v4  ;;  %v3417_v7 = vmax.f32 %v3303_v32, %v3309_v8  ;;  %v2779_v61 = vpop.f32.mrb[36].mxu0  ;;  %v3005_v10 = vpop.f32.mrb[68].mxu1 }
 0x35a   :  { %v3397_v51 = vrot.slane %v3396_v17, 4  ;;  %v3411_v26 = vrot.slane %v3410_v1, 4  ;;  %v6788_v6 = vadd.f32 %v2779_v61, %v9526_v33  ;;  %v6820_v20 = vadd.f32 %v3005_v10, %v9529_v3  ;;  %v2781_v11 = vpop.f32.mrb[37].mxu0  ;;  %v3007_v12 = vpop.f32.mrb[69].mxu1 }
 0x35b   :  { %v3404_v9 = vrot.slane %v3403_v52, 4  ;;  %v3418_v39 = vrot.slane %v3417_v7, 4  ;;  %v6789_v13 = vadd.f32 %v2781_v11, %v9532_v50  ;;  %v6821_v49 = vadd.f32 %v3007_v12, %v9535_v59  ;;  %v2783_v16 = vpop.f32.mrb[38].mxu0  ;;  %v3009_v45 = vpop.f32.mrb[70].mxu1 }
 0x35c   :  { %v3398_v28 = vmax.f32 %v3396_v17, %v3397_v51  ;;  %v3412_v23 = vmax.f32 %v3410_v1, %v3411_v26  ;;  %v3312_v24 = vmax.f32 %v6788_v6, 0.0  ;;  %v3314_v25 = vmax.f32 %v6820_v20, 0.0  ;;  %v2785_v2 = vpop.f32.mrb[39].mxu0  ;;  %v3011_v37 = vpop.f32.mrb[71].mxu1 }
 0x35d   :  { %v3405_v30 = vmax.f32 %v3403_v52, %v3404_v9  ;;  %v3419_v46 = vmax.f32 %v3417_v7, %v3418_v39  ;;  %v3313_v47 = vmax.f32 %v6789_v13, 0.0  ;;  %v3315_v48 = vmax.f32 %v6821_v49, 0.0 }
 0x35e   :  { %v3399_v21 = vrot.slane %v3398_v28, 2  ;;  %v3413_v40 = vrot.slane %v3412_v23, 2  ;;  %v6790_v34 = vadd.f32 %v2783_v16, %v9526_v33  ;;  %v6822_v53 = vadd.f32 %v3009_v45, %v9529_v3 }
 0x35f   :  { %v3406_v0 = vrot.slane %v3405_v30, 2  ;;  %v3420_v31 = vrot.slane %v3419_v46, 2  ;;  %v6791_v54 = vadd.f32 %v2785_v2, %v9532_v50  ;;  %v6823_v55 = vadd.f32 %v3011_v37, %v9535_v59 }
 0x360   :  { %v3400_v43 = vmax.f32 %v3398_v28, %v3399_v21  ;;  %v3414_v18 = vmax.f32 %v3412_v23, %v3413_v40  ;;  %v3318_v22 = vmax.f32 %v6790_v34, 0.0  ;;  %v3320_v44 = vmax.f32 %v6822_v53, 0.0 }
 0x361   :  { %v3407_v56 = vmax.f32 %v3405_v30, %v3406_v0  ;;  %v3421_v42 = vmax.f32 %v3419_v46, %v3420_v31  ;;  %v3319_v5 = vmax.f32 %v6791_v54, 0.0  ;;  %v3321_v15 = vmax.f32 %v6823_v55, 0.0  ;;  %v2789_v29 = vpop.f32.mrb[40].mxu0  ;;  %v3015_v62 = vpop.f32.mrb[72].mxu1 }
 0x362   :  { %v3401_v63 = vrot.slane %v3400_v43, 1  ;;  %v3415_v27 = vrot.slane %v3414_v18, 1  ;;  %v3438_v41 = vmax.f32 %v3312_v24, %v3318_v22  ;;  %v3452_v60 = vmax.f32 %v3314_v25, %v3320_v44  ;;  %v2791_v19 = vpop.f32.mrb[41].mxu0  ;;  %v3017_v58 = vpop.f32.mrb[73].mxu1 }
 0x363   :  { %v3408_v32 = vrot.slane %v3407_v56, 1  ;;  %v3422_v4 = vrot.slane %v3421_v42, 1  ;;  %v3445_v8 = vmax.f32 %v3313_v47, %v3319_v5  ;;  %v3459_v17 = vmax.f32 %v3315_v48, %v3321_v15  ;;  %v2793_v1 = vpop.f32.mrb[42].mxu0  ;;  %v3019_v52 = vpop.f32.mrb[74].mxu1 }
 0x364   :  { %v3402_v7 = vmax.f32 %v3400_v43, %v3401_v63  ;;  %v3416_v61 = vmax.f32 %v3414_v18, %v3415_v27  ;;  %v3439_v10 = vrot.slane %v3438_v41, 4  ;;  %v3453_v51 = vrot.slane %v3452_v60, 4  ;;  %v2795_v26 = vpop.f32.mrb[43].mxu0  ;;  %v3021_v6 = vpop.f32.mrb[75].mxu1 }
 0x365   :  { %v3409_v20 = vmax.f32 %v3407_v56, %v3408_v32  ;;  %v3423_v11 = vmax.f32 %v3421_v42, %v3422_v4  ;;  %v3446_v12 = vrot.slane %v3445_v8, 4  ;;  %v3460_v9 = vrot.slane %v3459_v17, 4 }
 0x366   :  { %v3732_v39 = vpack.c.bf16 %v3402_v7, %v3402_v7  ;;  %v3734_v13 = vpack.c.bf16 %v3416_v61, %v3416_v61  ;;  %v3440_v49 = vmax.f32 %v3438_v41, %v3439_v10  ;;  %v3454_v16 = vmax.f32 %v3452_v60, %v3453_v51 }
 0x367   :  { %v3733_v45 = vpack.c.bf16 %v3409_v20, %v3409_v20  ;;  %v3735_v28 = vpack.c.bf16 %v3423_v11, %v3423_v11  ;;  %v3447_v23 = vmax.f32 %v3445_v8, %v3446_v12  ;;  %v3461_v24 = vmax.f32 %v3459_v17, %v3460_v9 }
 0x368   :  { %v9553_v25 = vunpack.c.l.b16 %v3732_v39  ;;  %v9555_v2 = vunpack.c.l.b16 %v3734_v13  ;;  %v3441_v37 = vrot.slane %v3440_v49, 2  ;;  %v3455_v30 = vrot.slane %v3454_v16, 2 }
 0x369   :  { %v9557_v46 = vunpack.c.l.b16 %v3733_v45  ;;  %v9559_v47 = vunpack.c.l.b16 %v3735_v28  ;;  %v3448_v48 = vrot.slane %v3447_v23, 2  ;;  %v3462_v21 = vrot.slane %v3461_v24, 2  ;;  %v9561_v40 = vpop.f32.mrb[44].mxu0  ;;  %v9563_v34 = vpop.f32.mrb[76].mxu1 }
 0x36a   :  { %v3442_v53 = vmax.f32 %v3440_v49, %v3441_v37  ;;  %v3456_v0 = vmax.f32 %v3454_v16, %v3455_v30  ;;  %v6792_v31 = vadd.f32 %v2789_v29, %v9526_v33  ;;  %v6824_v54 = vadd.f32 %v3015_v62, %v9529_v3  ;;  %v9567_v55 = vpop.f32.mrb[45].mxu0  ;;  %v9569_v43 = vpop.f32.mrb[77].mxu1 }
 0x36b   :  { %v3449_v18 = vmax.f32 %v3447_v23, %v3448_v48  ;;  %v3463_v22 = vmax.f32 %v3461_v24, %v3462_v21  ;;  %v6793_v44 = vadd.f32 %v2791_v19, %v9532_v50  ;;  %v6825_v56 = vadd.f32 %v3017_v58, %v9535_v59  ;;  %v9573_v42 = vpop.f32.mrb[46].mxu0  ;;  %v9575_v5 = vpop.f32.mrb[78].mxu1 }
 0x36c   :  { %v3443_v15 = vrot.slane %v3442_v53, 1  ;;  %v3457_v63 = vrot.slane %v3456_v0, 1  ;;  %v3324_v27 = vmax.f32 %v6792_v31, 0.0  ;;  %v3326_v29 = vmax.f32 %v6824_v54, 0.0  ;;  %v9577_v41 = vpop.f32.mrb[47].mxu0  ;;  %v9579_v62 = vpop.f32.mrb[79].mxu1 }
 0x36d   :  { %v3450_v60 = vrot.slane %v3449_v18, 1  ;;  %v3464_v32 = vrot.slane %v3463_v22, 1  ;;  %v3325_v4 = vmax.f32 %v6793_v44, 0.0  ;;  %v3327_v8 = vmax.f32 %v6825_v56, 0.0 }
 0x36e   :  { %v3444_v17 = vmax.f32 %v3442_v53, %v3443_v15  ;;  %v3458_v19 = vmax.f32 %v3456_v0, %v3457_v63  ;;  %v6794_v58 = vadd.f32 %v2793_v1, %v9526_v33  ;;  %v6826_v7 = vadd.f32 %v3019_v52, %v9529_v3 }
 0x36f   :  { %v3451_v61 = vmax.f32 %v3449_v18, %v3450_v60  ;;  %v3465_v10 = vmax.f32 %v3463_v22, %v3464_v32  ;;  %v6795_v51 = vadd.f32 %v2795_v26, %v9532_v50  ;;  %v6827_v20 = vadd.f32 %v3021_v6, %v9535_v59 }
 0x370   :  { %v3738_v11 = vpack.c.bf16 %v3444_v17, %v3444_v17  ;;  %v3740_v12 = vpack.c.bf16 %v3458_v19, %v3458_v19  ;;  %v3330_v9 = vmax.f32 %v6794_v58, 0.0  ;;  %v3332_v39 = vmax.f32 %v6826_v7, 0.0 }
 0x371   :  { %v3739_v13 = vpack.c.bf16 %v3451_v61, %v3451_v61  ;;  %v3741_v49 = vpack.c.bf16 %v3465_v10, %v3465_v10  ;;  %v3331_v16 = vmax.f32 %v6795_v51, 0.0  ;;  %v3333_v45 = vmax.f32 %v6827_v20, 0.0  ;;  %v9585_v28 = vpop.f32.mrb[48].mxu0  ;;  %v9587_v23 = vpop.f32.mrb[80].mxu1 }
 0x372   :  { %v4154_v1 = vunpack.c.l.b16 %v3738_v11  ;;  %v4156_v52 = vunpack.c.l.b16 %v3740_v12  ;;  %v3480_v24 = vmax.f32 %v3324_v27, %v3330_v9  ;;  %v3494_v37 = vmax.f32 %v3326_v29, %v3332_v39  ;;  %v9589_v30 = vpop.f32.mrb[49].mxu0  ;;  %v9591_v26 = vpop.f32.mrb[81].mxu1 }
 0x373   :  { %v4155_v6 = vunpack.c.l.b16 %v3739_v13  ;;  %v4157_v48 = vunpack.c.l.b16 %v3741_v49  ;;  %v3487_v21 = vmax.f32 %v3325_v4, %v3331_v16  ;;  %v3501_v53 = vmax.f32 %v3327_v8, %v3333_v45  ;;  %v9593_v0 = vpop.f32.mrb[50].mxu0  ;;  %v9595_v31 = vpop.f32.mrb[82].mxu1 }
 0x374   :  { %v9599_v54 = vsel %vm4196_vm3, %v4154_v1, %v9553_v25  ;;  %v9603_v18 = vsel %vm4196_vm3, %v4156_v52, %v9555_v2  ;;  %v3481_v22 = vrot.slane %v3480_v24, 4  ;;  %v3495_v44 = vrot.slane %v3494_v37, 4  ;;  %v9605_v56 = vpop.f32.mrb[51].mxu0  ;;  %v9607_v15 = vpop.f32.mrb[83].mxu1 }
 0x375   :  { %v9611_v63 = vsel %vm4196_vm3, %v4155_v6, %v9557_v46  ;;  %v9615_v27 = vsel %vm4196_vm3, %v4157_v48, %v9559_v47  ;;  %v3488_v25 = vrot.slane %v3487_v21, 4  ;;  %v3502_v29 = vrot.slane %v3501_v53, 4 }
 0x376   :  { %v3482_v60 = vmax.f32 %v3480_v24, %v3481_v22  ;;  %v3496_v32 = vmax.f32 %v3494_v37, %v3495_v44  ;;  %v6796_v2 = vadd.f32 %v9561_v40, %v9526_v33  ;;  %v6828_v4 = vadd.f32 %v9563_v34, %v9529_v3 }
 0x377   :  { %v3489_v8 = vmax.f32 %v3487_v21, %v3488_v25  ;;  %v3503_v17 = vmax.f32 %v3501_v53, %v3502_v29  ;;  %v6797_v46 = vadd.f32 %v9567_v55, %v9532_v50  ;;  %v6829_v19 = vadd.f32 %v9569_v43, %v9535_v59 }
 0x378   :  { %v3483_v47 = vrot.slane %v3482_v60, 2  ;;  %v3497_v58 = vrot.slane %v3496_v32, 2  ;;  %v3336_v7 = vmax.f32 %v6796_v2, 0.0  ;;  %v3338_v61 = vmax.f32 %v6828_v4, 0.0 }
 0x379   :  { %v3490_v10 = vrot.slane %v3489_v8, 2  ;;  %v3504_v51 = vrot.slane %v3503_v17, 2  ;;  %v3337_v20 = vmax.f32 %v6797_v46, 0.0  ;;  %v3339_v40 = vmax.f32 %v6829_v19, 0.0  ;;  %v9625_v11 = vpop.f32.mrb[52].mxu0  ;;  %v9627_v34 = vpop.f32.mrb[84].mxu1 }
 0x37a   :  { %v3484_v12 = vmax.f32 %v3482_v60, %v3483_v47  ;;  %v3498_v9 = vmax.f32 %v3496_v32, %v3497_v58  ;;  %v6798_v55 = vadd.f32 %v9573_v42, %v9526_v33  ;;  %v6830_v43 = vadd.f32 %v9575_v5, %v9529_v3  ;;  %v9633_v39 = vpop.f32.mrb[53].mxu0  ;;  %v9635_v13 = vpop.f32.mrb[85].mxu1 }
 0x37b   :  { %v3491_v49 = vmax.f32 %v3489_v8, %v3490_v10  ;;  %v3505_v16 = vmax.f32 %v3503_v17, %v3504_v51  ;;  %v6799_v45 = vadd.f32 %v9577_v41, %v9532_v50  ;;  %v6831_v1 = vadd.f32 %v9579_v62, %v9535_v59  ;;  %v9641_v52 = vpop.f32.mrb[54].mxu0  ;;  %v9643_v24 = vpop.f32.mrb[86].mxu1 }
 0x37c   :  { %v3485_v42 = vrot.slane %v3484_v12, 1  ;;  %v3499_v37 = vrot.slane %v3498_v9, 1  ;;  %v3342_v6 = vmax.f32 %v6798_v55, 0.0  ;;  %v3344_v5 = vmax.f32 %v6830_v43, 0.0  ;;  %v9645_v48 = vpop.f32.mrb[55].mxu0  ;;  %v9647_v21 = vpop.f32.mrb[87].mxu1 }
 0x37d   :  { %v3492_v53 = vrot.slane %v3491_v49, 1  ;;  %v3506_v22 = vrot.slane %v3505_v16, 1  ;;  %v3343_v44 = vmax.f32 %v6799_v45, 0.0  ;;  %v3345_v25 = vmax.f32 %v6831_v1, 0.0 }
 0x37e   :  { %v3486_v41 = vmax.f32 %v3484_v12, %v3485_v42  ;;  %v3500_v29 = vmax.f32 %v3498_v9, %v3499_v37  ;;  %v3522_v60 = vmax.f32 %v3336_v7, %v3342_v6  ;;  %v3536_v62 = vmax.f32 %v3338_v61, %v3344_v5 }
 0x37f   :  { %v3493_v32 = vmax.f32 %v3491_v49, %v3492_v53  ;;  %v3507_v2 = vmax.f32 %v3505_v16, %v3506_v22  ;;  %v3529_v4 = vmax.f32 %v3337_v20, %v3343_v44  ;;  %v3543_v8 = vmax.f32 %v3339_v40, %v3345_v25 }
 0x380   :  { %v3744_v17 = vpack.c.bf16 %v3486_v41, %v3486_v41  ;;  %v3746_v46 = vpack.c.bf16 %v3500_v29, %v3500_v29  ;;  %v3523_v19 = vrot.slane %v3522_v60, 4  ;;  %v3537_v47 = vrot.slane %v3536_v62, 4 }
 0x381   :  { %v3745_v58 = vpack.c.bf16 %v3493_v32, %v3493_v32  ;;  %v3747_v10 = vpack.c.bf16 %v3507_v2, %v3507_v2  ;;  %v3530_v51 = vrot.slane %v3529_v4, 4  ;;  %v3544_v55 = vrot.slane %v3543_v8, 4  ;;  %v9649_v43 = vpop.f32.mrb[56].mxu0  ;;  %v9651_v45 = vpop.f32.mrb[88].mxu1 }
 0x382   :  { %v4160_v12 = vunpack.c.l.b16 %v3744_v17  ;;  %v4162_v9 = vunpack.c.l.b16 %v3746_v46  ;;  %v3524_v7 = vmax.f32 %v3522_v60, %v3523_v19  ;;  %v3538_v61 = vmax.f32 %v3536_v62, %v3537_v47  ;;  %v9653_v49 = vpop.f32.mrb[57].mxu0  ;;  %v9655_v20 = vpop.f32.mrb[89].mxu1 }
 0x383   :  { %v4161_v40 = vunpack.c.l.b16 %v3745_v58  ;;  %v4163_v16 = vunpack.c.l.b16 %v3747_v10  ;;  %v3531_v1 = vmax.f32 %v3529_v4, %v3530_v51  ;;  %v3545_v42 = vmax.f32 %v3543_v8, %v3544_v55  ;;  %v9657_v37 = vpop.f32.mrb[58].mxu0  ;;  %v9659_v6 = vpop.f32.mrb[90].mxu1 }
 0x384   :  { %v4199_v5 = vsel %vm4198_vm4, %v4160_v12, %v9599_v54  ;;  %v4218_v53 = vsel %vm4198_vm4, %v4162_v9, %v9603_v18  ;;  %v3525_v22 = vrot.slane %v3524_v7, 2  ;;  %v3539_v44 = vrot.slane %v3538_v61, 2  ;;  %v9665_v25 = vpop.f32.mrb[59].mxu0  ;;  %v9667_v41 = vpop.f32.mrb[91].mxu1 }
 0x385   :  { %v9671_v29 = vsel %vm4198_vm4, %v4161_v40, %v9611_v63  ;;  %v9675_v60 = vsel %vm4198_vm4, %v4163_v16, %v9615_v27  ;;  %v3532_v62 = vrot.slane %v3531_v1, 2  ;;  %v3546_v32 = vrot.slane %v3545_v42, 2 }
 0x386   :  { %v3526_v54 = vmax.f32 %v3524_v7, %v3525_v22  ;;  %v3540_v2 = vmax.f32 %v3538_v61, %v3539_v44  ;;  %v6800_v18 = vadd.f32 %v9585_v28, %v9526_v33  ;;  %v6832_v4 = vadd.f32 %v9587_v23, %v9529_v3 }
 0x387   :  { %v3533_v8 = vmax.f32 %v3531_v1, %v3532_v62  ;;  %v3547_v17 = vmax.f32 %v3545_v42, %v3546_v32  ;;  %v6801_v63 = vadd.f32 %v9589_v30, %v9532_v50  ;;  %v6833_v47 = vadd.f32 %v9591_v26, %v9535_v59 }
 0x388   :  { %v3527_v46 = vrot.slane %v3526_v54, 1  ;;  %v3541_v19 = vrot.slane %v3540_v2, 1  ;;  %v3348_v27 = vmax.f32 %v6800_v18, 0.0  ;;  %v3350_v51 = vmax.f32 %v6832_v4, 0.0 }
 0x389   :  { %v3534_v58 = vrot.slane %v3533_v8, 1  ;;  %v3548_v10 = vrot.slane %v3547_v17, 1  ;;  %v3349_v55 = vmax.f32 %v6801_v63, 0.0  ;;  %v9685_v28 = vpop.f32.mrb[60].mxu0  ;;  %v9687_v12 = vpop.f32.mrb[92].mxu1  ;;  %v6802_v7 = vadd.f32 %v9593_v0, %v9526_v33 }
 0x38a   :  { %v3528_v23 = vmax.f32 %v3526_v54, %v3527_v46  ;;  %v3542_v9 = vmax.f32 %v3540_v2, %v3541_v19  ;;  %v6834_v30 = vadd.f32 %v9595_v31, %v9529_v3  ;;  %v9693_v61 = vpop.f32.mrb[61].mxu0  ;;  %v9695_v40 = vpop.f32.mrb[93].mxu1  ;;  %v6803_v1 = vadd.f32 %v9605_v56, %v9532_v50 }
 0x38b   :  { %v3535_v26 = vmax.f32 %v3533_v8, %v3534_v58  ;;  %v9697_v16 = vmax.f32 %v3547_v17, %v3548_v10  ;;  %v6835_v42 = vadd.f32 %v9607_v15, %v9535_v59  ;;  %v9703_v22 = vpop.f32.mrb[62].mxu0  ;;  %v9705_v44 = vpop.f32.mrb[94].mxu1  ;;  %v3354_v31 = vmax.f32 %v6802_v7, 0.0 }
 0x38c   :  { %v3750_v0 = vpack.c.bf16 %v3528_v23, %v3528_v23  ;;  %v3752_v62 = vpack.c.bf16 %v3542_v9, %v3542_v9  ;;  %v3356_v32 = vmax.f32 %v6834_v30, 0.0  ;;  %v9707_v54 = vpop.f32.mrb[63].mxu0  ;;  %v9709_v2 = vpop.f32.mrb[95].mxu1  ;;  %v3351_v4 = vmax.f32 %v6833_v47, 0.0 }
 0x38d   :  { %v3751_v18 = vpack.c.bf16 %v3535_v26, %v3535_v26  ;;  %v3355_v8 = vmax.f32 %v6803_v1, 0.0  ;;  %v3357_v17 = vmax.f32 %v6835_v42, 0.0  ;;  %v3564_v46 = vmax.f32 %v3348_v27, %v3354_v31 }
 0x38e   :  { %v4166_v56 = vunpack.c.l.b16 %v3750_v0  ;;  %v4168_v63 = vunpack.c.l.b16 %v3752_v62  ;;  %v3578_v15 = vmax.f32 %v3350_v51, %v3356_v32  ;;  %v3753_v58 = vpack.c.bf16 %v9697_v16, %v9697_v16 }
 0x38f   :  { %v9711_v19 = vunpack.c.l.b16 %v3751_v18  ;;  %v3571_v10 = vmax.f32 %v3349_v55, %v3355_v8  ;;  %v3585_v23 = vmax.f32 %v3351_v4, %v3357_v17  ;;  %v3565_v47 = vrot.slane %v3564_v46, 4 }
 0x390   :  { %v9716_v9 = vsel %vm4200_vm5, %v4166_v56, %v4199_v5  ;;  %v9719_v7 = vsel %vm4200_vm5, %v4168_v63, %v4218_v53  ;;  %v3579_v30 = vrot.slane %v3578_v15, 4  ;;  %v6804_v27 = vadd.f32 %v9625_v11, %v9526_v33 }
 0x391   :  { %v3572_v26 = vrot.slane %v3571_v10, 4  ;;  %v3586_v1 = vrot.slane %v3585_v23, 4  ;;  %v6836_v51 = vadd.f32 %v9627_v34, %v9529_v3  ;;  %v3566_v42 = vmax.f32 %v3564_v46, %v3565_v47 }
 0x392   :  { %v3580_v16 = vmax.f32 %v3578_v15, %v3579_v30  ;;  %v6805_v55 = vadd.f32 %v9633_v39, %v9532_v50  ;;  %v6837_v5 = vadd.f32 %v9635_v13, %v9535_v59  ;;  %v3360_v62 = vmax.f32 %v6804_v27, 0.0 }
 0x393   :  { %v3573_v53 = vmax.f32 %v3571_v10, %v3572_v26  ;;  %v3587_v0 = vmax.f32 %v3585_v23, %v3586_v1  ;;  %v3362_v31 = vmax.f32 %v6836_v51, 0.0  ;;  %v3567_v32 = vrot.slane %v3566_v42, 2 }
 0x394   :  { %v3581_v18 = vrot.slane %v3580_v16, 2  ;;  %v3361_v4 = vmax.f32 %v6805_v55, 0.0  ;;  %v3363_v8 = vmax.f32 %v6837_v5, 0.0  ;;  %v6806_v34 = vadd.f32 %v9641_v52, %v9526_v33 }
 0x395   :  { %v3574_v11 = vrot.slane %v3573_v53, 2  ;;  %v3588_v17 = vrot.slane %v3587_v0, 2  ;;  %v6838_v39 = vadd.f32 %v9643_v24, %v9529_v3  ;;  %v3568_v56 = vmax.f32 %v3566_v42, %v3567_v32 }
 0x396   :  { %v3582_v63 = vmax.f32 %v3580_v16, %v3581_v18  ;;  %v6807_v13 = vadd.f32 %v9645_v48, %v9532_v50  ;;  %v6839_v46 = vadd.f32 %v9647_v21, %v9535_v59  ;;  %v3366_v23 = vmax.f32 %v6806_v34, 0.0 }
 0x397   :  { %v3575_v15 = vmax.f32 %v3573_v53, %v3574_v11  ;;  %v3589_v10 = vmax.f32 %v3587_v0, %v3588_v17  ;;  %v3368_v47 = vmax.f32 %v6838_v39, 0.0  ;;  %v3569_v30 = vrot.slane %v3568_v56, 1 }
 0x398   :  { %v3583_v26 = vrot.slane %v3582_v63, 1  ;;  %v3367_v1 = vmax.f32 %v6807_v13, 0.0  ;;  %v3369_v27 = vmax.f32 %v6839_v46, 0.0  ;;  %v3606_v55 = vmax.f32 %v3360_v62, %v3366_v23 }
 0x399   :  { %v3576_v52 = vrot.slane %v3575_v15, 1  ;;  %v3590_v51 = vrot.slane %v3589_v10, 1  ;;  %v3620_v24 = vmax.f32 %v3362_v31, %v3368_v47  ;;  %v3570_v42 = vmax.f32 %v3568_v56, %v3569_v30 }
 0x39a   :  { %v3584_v16 = vmax.f32 %v3582_v63, %v3583_v26  ;;  %v3613_v5 = vmax.f32 %v3361_v4, %v3367_v1  ;;  %v3627_v32 = vmax.f32 %v3363_v8, %v3369_v27  ;;  %v3607_v14 = vrot.slane %v3606_v55, 4 }
 0x39b   :  { %v3577_v48 = vmax.f32 %v3575_v15, %v3576_v52  ;;  %v3591_v18 = vmax.f32 %v3589_v10, %v3590_v51  ;;  %v3621_v21 = vrot.slane %v3620_v24, 4  ;;  %v3756_v53 = vpack.c.bf16 %v3570_v42, %v3570_v42 }
 0x39c   :  { %v3758_v0 = vpack.c.bf16 %v3584_v16, %v3584_v16  ;;  %v3614_v11 = vrot.slane %v3613_v5, 4  ;;  %v3628_v17 = vrot.slane %v3627_v32, 4  ;;  %v9737_v34 = vunpack.c.l.b16 %v3753_v58 }
 0x39d   :  { %v3757_v39 = vpack.c.bf16 %v3577_v48, %v3577_v48  ;;  %v3608_v13 = vmax.f32 %v3606_v55, %v3607_v14  ;;  %v3622_v46 = vmax.f32 %v3620_v24, %v3621_v21  ;;  %v4172_v38 = vunpack.c.l.b16 %v3756_v53 }
 0x39e   :  { %v3759_v62 = vpack.c.bf16 %v3591_v18, %v3591_v18  ;;  %v3615_v31 = vmax.f32 %v3613_v5, %v3614_v11  ;;  %v3629_v56 = vmax.f32 %v3627_v32, %v3628_v17  ;;  %v9739_v63 = vunpack.c.l.b16 %v3758_v0 }
 0x39f   :  { %v9741_v4 = vunpack.c.l.b16 %v3757_v39  ;;  %v3609_v8 = vrot.slane %v3608_v13, 2  ;;  %v3623_v15 = vrot.slane %v3622_v46, 2  ;;  %v4203_v10 = vsel %vm4202_vm6, %v4172_v38, %v9716_v9 }
 0x3a0   :  { %v3616_v23 = vrot.slane %v3615_v31, 2  ;;  %v3630_v58 = vrot.slane %v3629_v56, 2  ;;  %v6808_v14 = vadd.f32 %v9649_v43, %v9526_v33  ;;  %v6840_v26 = vadd.f32 %v9651_v45, %v9529_v3 }
 0x3a1   :  { %v3610_v47 = vmax.f32 %v3608_v13, %v3609_v8  ;;  %v3624_v30 = vmax.f32 %v3622_v46, %v3623_v15  ;;  %v6809_v1 = vadd.f32 %v9653_v49, %v9532_v50  ;;  %v9751_v27 = vunpack.c.l.b16 %v3759_v62 }
 0x3a2   :  { %v3617_v52 = vmax.f32 %v3615_v31, %v3616_v23  ;;  %v3631_v51 = vmax.f32 %v3629_v56, %v3630_v58  ;;  %v3372_v55 = vmax.f32 %v6808_v14, 0.0  ;;  %v3374_v24 = vmax.f32 %v6840_v26, 0.0 }
 0x3a3   :  { %v3611_v38 = vrot.slane %v3610_v47, 1  ;;  %v3625_v9 = vrot.slane %v3624_v30, 1  ;;  %v6841_v42 = vadd.f32 %v9655_v20, %v9535_v59  ;;  %v3373_v5 = vmax.f32 %v6809_v1, 0.0 }
 0x3a4   :  { %v3618_v43 = vrot.slane %v3617_v52, 1  ;;  %v3632_v16 = vrot.slane %v3631_v51, 1  ;;  %v6810_v45 = vadd.f32 %v9657_v37, %v9526_v33  ;;  %v6842_v49 = vadd.f32 %v9659_v6, %v9529_v3 }
 0x3a5   :  { %v3612_v32 = vmax.f32 %v3610_v47, %v3611_v38  ;;  %v3626_v48 = vmax.f32 %v3624_v30, %v3625_v9  ;;  %v6811_v18 = vadd.f32 %v9665_v25, %v9532_v50  ;;  %v6843_v20 = vadd.f32 %v9667_v41, %v9535_v59 }
 0x3a6   :  { %v3619_v21 = vmax.f32 %v3617_v52, %v3618_v43  ;;  %v9761_v53 = vmax.f32 %v3631_v51, %v3632_v16  ;;  %v3378_v0 = vmax.f32 %v6810_v45, 0.0  ;;  %v3380_v39 = vmax.f32 %v6842_v49, 0.0 }
 0x3a7   :  { %v3762_v11 = vpack.c.bf16 %v3612_v32, %v3612_v32  ;;  %v3764_v17 = vpack.c.bf16 %v3626_v48, %v3626_v48  ;;  %v3379_v13 = vmax.f32 %v6811_v18, 0.0  ;;  %v3375_v46 = vmax.f32 %v6841_v42, 0.0 }
 0x3a8   :  { %v3763_v37 = vpack.c.bf16 %v3619_v21, %v3619_v21  ;;  %v3648_v62 = vmax.f32 %v3372_v55, %v3378_v0  ;;  %v3381_v31 = vmax.f32 %v6843_v20, 0.0  ;;  %v3765_v6 = vpack.c.bf16 %v9761_v53, %v9761_v53 }
 0x3a9   :  { %v4178_v56 = vunpack.c.l.b16 %v3762_v11  ;;  %v3662_v25 = vmax.f32 %v3374_v24, %v3380_v39  ;;  %v3655_v8 = vmax.f32 %v3373_v5, %v3379_v13  ;;  %v9767_v15 = vunpack.c.l.b16 %v3764_v17 }
 0x3aa   :  { %v9769_v23 = vunpack.c.l.b16 %v3763_v37  ;;  %v3649_v58 = vrot.slane %v3648_v62, 4  ;;  %v3669_v41 = vmax.f32 %v3375_v46, %v3381_v31  ;;  %v6812_v26 = vadd.f32 %v9685_v28, %v9526_v33 }
 0x3ab   :  { %v9772_v14 = vsel %vm4204_vm7, %v4178_v56, %v4203_v10  ;;  %v3663_v47 = vrot.slane %v3662_v25, 4  ;;  %v3656_v30 = vrot.slane %v3655_v8, 4  ;;  %v6844_v51 = vadd.f32 %v9687_v12, %v9529_v3 }
 0x3ac   :  { %v3650_v1 = vmax.f32 %v3648_v62, %v3649_v58  ;;  %v3670_v52 = vrot.slane %v3669_v41, 4  ;;  %v6813_v55 = vadd.f32 %v9693_v61, %v9532_v50  ;;  %v3384_v24 = vmax.f32 %v6812_v26, 0.0 }
 0x3ad   :  { %v3664_v38 = vmax.f32 %v3662_v25, %v3663_v47  ;;  %v3657_v9 = vmax.f32 %v3655_v8, %v3656_v30  ;;  %v6845_v10 = vadd.f32 %v9695_v40, %v9535_v59  ;;  %v3386_v16 = vmax.f32 %v6844_v51, 0.0 }
 0x3ae   :  { %v3651_v42 = vrot.slane %v3650_v1, 2  ;;  %v3671_v43 = vmax.f32 %v3669_v41, %v3670_v52  ;;  %v3385_v5 = vmax.f32 %v6813_v55, 0.0  ;;  %v6814_v48 = vadd.f32 %v9703_v22, %v9526_v33 }
 0x3af   :  { %v3665_v45 = vrot.slane %v3664_v38, 2  ;;  %v3658_v28 = vrot.slane %v3657_v9, 2  ;;  %v3387_v32 = vmax.f32 %v6845_v10, 0.0  ;;  %v6846_v61 = vadd.f32 %v9705_v44, %v9529_v3 }
 0x3b0   :  { %v3652_v12 = vmax.f32 %v3650_v1, %v3651_v42  ;;  %v3672_v49 = vrot.slane %v3671_v43, 2  ;;  %v6815_v18 = vadd.f32 %v9707_v54, %v9532_v50  ;;  %v3390_v53 = vmax.f32 %v6814_v48, 0.0 }
 0x3b1   :  { %v3666_v40 = vmax.f32 %v3664_v38, %v3665_v45  ;;  %v3659_v21 = vmax.f32 %v3657_v9, %v3658_v28  ;;  %v6847_v0 = vadd.f32 %v9709_v2, %v9535_v59  ;;  %v3392_v17 = vmax.f32 %v6846_v61, 0.0 }
 0x3b2   :  { %v3653_v20 = vrot.slane %v3652_v12, 1  ;;  %v3673_v11 = vmax.f32 %v3671_v43, %v3672_v49  ;;  %v3391_v39 = vmax.f32 %v6815_v18, 0.0  ;;  %v3690_v13 = vmax.f32 %v3384_v24, %v3390_v53 }
 0x3b3   :  { %v3667_v33 = vrot.slane %v3666_v40, 1  ;;  %v3660_v22 = vrot.slane %v3659_v21, 1  ;;  %v3393_v37 = vmax.f32 %v6847_v0, 0.0  ;;  %v3704_v44 = vmax.f32 %v3386_v16, %v3392_v17 }
 0x3b4   :  { %v3654_v46 = vmax.f32 %v3652_v12, %v3653_v20  ;;  %v3674_v3 = vrot.slane %v3673_v11, 1  ;;  %v3697_v62 = vmax.f32 %v3385_v5, %v3391_v39  ;;  %v3691_v31 = vrot.slane %v3690_v13, 4 }
 0x3b5   :  { %v3668_v50 = vmax.f32 %v3666_v40, %v3667_v33  ;;  %v3661_v54 = vmax.f32 %v3659_v21, %v3660_v22  ;;  %v3711_v56 = vmax.f32 %v3387_v32, %v3393_v37  ;;  %v3705_v58 = vrot.slane %v3704_v44, 4 }
 0x3b6   :  { %v3768_v25 = vpack.c.bf16 %v3654_v46, %v3654_v46  ;;  %v3675_v8 = vmax.f32 %v3673_v11, %v3674_v3  ;;  %v3698_v59 = vrot.slane %v3697_v62, 4  ;;  %v4181_v2 = vunpack.c.l.b16 %v3765_v6 }
 0x3b7   :  { %v3769_v41 = vpack.c.bf16 %v3661_v54, %v3661_v54  ;;  %v3692_v47 = vmax.f32 %v3690_v13, %v3691_v31  ;;  %v3712_v30 = vrot.slane %v3711_v56, 4  ;;  %v3706_v52 = vmax.f32 %v3704_v44, %v3705_v58  ;;  %v7607_v54 = vld [vmem:[%s10627_s7 + $0x308] ss:$24 sps:$4 sm:$0xff]  }
 0x3b8   :  { %v4184_v26 = vunpack.c.l.b16 %v3768_v25  ;;  %v3771_v1 = vpack.c.bf16 %v3675_v8, %v3675_v8  ;;  %v3699_v51 = vmax.f32 %v3697_v62, %v3698_v59  ;;  %v3770_v55 = vpack.c.bf16 %v3668_v50, %v3668_v50  ;;  %v7612_v25 = vld [vmem:[%s10627_s7 + $0x334] ss:$24 sps:$4 sm:$0xff]  }
 0x3b9   :  { %v4185_v38 = vunpack.c.l.b16 %v3769_v41  ;;  %v3693_v9 = vrot.slane %v3692_v47, 2  ;;  %v3713_v24 = vmax.f32 %v3711_v56, %v3712_v30  ;;  %v3707_v42 = vrot.slane %v3706_v52, 2  ;;  %v7615_v8 = vld [vmem:[%s10627_s7 + $0x33c] ss:$24 sps:$4 sm:$0xff]   ;;  %v7613_v41 = vld [vmem:[%s10627_s7 + $0x338] ss:$24 sps:$4 sm:$0xff]  }
 0x3ba   :  { %v4187_v10 = vunpack.c.l.b16 %v3771_v1  ;;  %v3700_v43 = vrot.slane %v3699_v51, 2  ;;  %v4212_v16 = vsel %vm4200_vm5, %v9711_v19, %v9671_v29  ;;  %v4207_v28 = vsel %vm4206_vm8, %v4184_v26, %v9772_v14  ;;  %v7618_v30 = vld [vmem:[%s10627_s7 + $0x364] ss:$24 sps:$4 sm:$0xff]  }
 0x3bb   :  { %v3694_v5 = vmax.f32 %v3692_v47, %v3693_v9  ;;  %v3714_v6 = vrot.slane %v3713_v24, 2  ;;  %v4213_v45 = vsel %vm4202_vm6, %v9741_v4, %v4212_v16  ;;  %v3708_v32 = vmax.f32 %v3706_v52, %v3707_v42  ;;  %v7621_v26 = vld [vmem:[%s10627_s7 + $0x36c] ss:$24 sps:$4 sm:$0xff]   ;;  %v7616_v52 = vld [vmem:[%s10627_s7 + $0x360] ss:$24 sps:$4 sm:$0xff]  }
 0x3bc   :  { %v3701_v48 = vmax.f32 %v3699_v51, %v3700_v43  ;;  %v4214_v12 = vsel %vm4204_vm7, %v9769_v23, %v4213_v45  ;;  %v4226_v49 = vsel %vm4200_vm5, %v9737_v34, %v9675_v60  ;;  %v4186_v4 = vunpack.c.l.b16 %v3770_v55  ;;  %v7940_v1 = vld [vmem:[%s10628_s6] sm:$0x3f]  ;;  %v7627_v9 = vld [vmem:[%s10627_s7 + $0x39c] ss:$24 sps:$4 sm:$0xff]   ;;  %v7622_v43 = vld [vmem:[%s10627_s7 + $0x390] ss:$24 sps:$4 sm:$0xff]  }
 0x3bd   :  { %v3695_v61 = vrot.slane %v3694_v5, 1  ;;  %v3715_v18 = vmax.f32 %v3713_v24, %v3714_v6  ;;  %v4215_v29 = vsel %vm4206_vm8, %v4185_v38, %v4214_v12  ;;  %v4227_v19 = vsel %vm4202_vm6, %v9751_v27, %v4226_v49  ;;  %v7619_v51 = vld [vmem:[%s10627_s7 + $0x368] ss:$24 sps:$4 sm:$0xff]   ;;  %v7624_v38 = vld [vmem:[%s10627_s7 + $0x394] ss:$24 sps:$4 sm:$0xff]  }
 0x3be   :  { %v3709_v40 = vrot.slane %v3708_v32, 1  ;;  %v3702_v21 = vrot.slane %v3701_v48, 1  ;;  %v4228_v14 = vsel %vm4204_vm7, %v4181_v2, %v4227_v19  ;;  %v4220_v60 = vsel %vm4202_vm6, %v9739_v63, %v9719_v7  ;;  %v7610_v2 = vld [vmem:[%s10627_s7 + $0x330] ss:$24 sps:$4 sm:$0xff]   ;;  %v7630_v45 = vld [vmem:[%s10627_s7 + $0x3c4] ss:$24 sps:$4 sm:$0xff]  }
 0x3bf   :  { %v3696_v53 = vmax.f32 %v3694_v5, %v3695_v61  ;;  %v3716_v0 = vrot.slane %v3715_v18, 1  ;;  %v4229_v23 = vsel %vm4206_vm8, %v4187_v10, %v4228_v14  ;;  %v4221_v27 = vsel %vm4204_vm7, %v9767_v15, %v4220_v60  ;;  %v7604_v15 = vld [vmem:[%s10627_s7 + $0x300] ss:$24 sps:$4 sm:$0xff]   ;;  %v7634_v60 = vld [vmem:[%s10627_s7 + $0x3f0] ss:$24 sps:$4 sm:$0xff]  }
 0x3c0   :  { %v3710_v20 = vmax.f32 %v3708_v32, %v3709_v40  ;;  %v3703_v11 = vmax.f32 %v3701_v48, %v3702_v21  ;;  %v4222_v22 = vsel %vm4206_vm8, %v4186_v4, %v4221_v27  ;;  %v9842_v59 = vsub.s32 4, %v8291_v35  ;;  %v7625_v16 = vld [vmem:[%s10627_s7 + $0x398] ss:$24 sps:$4 sm:$0xff]   ;;  %v7636_v40 = vld [vmem:[%s10627_s7 + $0x3f4] ss:$24 sps:$4 sm:$0xff]  }
 0x3c1   :  { %v3774_v34 = vpack.c.bf16 %v3696_v53, %v3696_v53  ;;  %v3717_v17 = vmax.f32 %v3715_v18, %v3716_v0  ;;  %v9851_v47 = vsub.s32 5, %v8291_v35  ;;  %v7628_v18 = vld [vmem:[%s10627_s7 + $0x3c0] ss:$24 sps:$4 sm:$0xff]   ;;  %v7639_v21 = vld [vmem:[%s10627_s7 + $0x3fc] ss:$24 sps:$4 sm:$0xff]  }
 0x3c2   :  { %v3776_v39 = vpack.c.bf16 %v3710_v20, %v3710_v20  ;;  %v3775_v33 = vpack.c.bf16 %v3703_v11, %v3703_v11  ;;  %v9865_v35 = vrot.slane %v7940_v1, %v9842_v59 }
 0x3c3   :  { %v4190_v13 = vunpack.c.l.b16 %v3774_v34  ;;  %v3777_v37 = vpack.c.bf16 %v3717_v17, %v3717_v17  ;;  %v9874_v55 = vrot.slane %v7940_v1, %v9851_v47  ;;  %v7637_v34 = vld [vmem:[%s10627_s7 + $0x3f8] ss:$24 sps:$4 sm:$0xff]  }
 0x3c4   :  { %v4192_v46 = vunpack.c.l.b16 %v3776_v39  ;;  %v4191_v3 = vunpack.c.l.b16 %v3775_v33  ;;  %v7642_v33 = vld [vmem:[%s10627_s7 + $0x424] ss:$24 sps:$4 sm:$0xff]  }
 0x3c5   :  { %v4209_v44 = vsel %vm4208_vm9, %v4190_v13, %v4207_v28  ;;  %v4193_v62 = vunpack.c.l.b16 %v3777_v37  ;;  %v7633_v28 = vld [vmem:[%s10627_s7 + $0x3cc] ss:$24 sps:$4 sm:$0xff]  }
 0x3c6   :  { %v4216_v50 = vsel %vm4208_vm9, %v4191_v3, %v4215_v29  ;;  %v9816_v7 = vsel %vm4208_vm9, %v4192_v46, %v4222_v22  ;;  %v9827_v56 = vpack.c.b16 %v4209_v44, %v4209_v44  ;;  %v7631_v29 = vld [vmem:[%s10627_s7 + $0x3c8] ss:$24 sps:$4 sm:$0xff]   ;;  %v7645_v22 = vld [vmem:[%s10627_s7 + $0x42c] ss:$24 sps:$4 sm:$0xff]  }
 0x3c7   :  { %v9818_v63 = vpack.c.b16 %v4216_v50, %v4216_v50  ;;  %v4230_v31 = vsel %vm4208_vm9, %v4193_v62, %v4229_v23  ;;  %v7640_v62 = vld [vmem:[%s10627_s7 + $0x420] ss:$24 sps:$4 sm:$0xff]  }
 0x3c8   :  { %v9839_v58 = vpack.c.b16 %v4230_v31, %v4230_v31  ;;  %v7643_v31 = vld [vmem:[%s10627_s7 + $0x428] ss:$24 sps:$4 sm:$0xff]  }
 0x3c9   :  { %5729 = vmatprep.mubr.bf16.mxu1 %v9818_v63  ;;  %5852 = vmatprep.mubr.bf16.mxu0 %v9818_v63 }
 0x3ca   :  { %5730 = vmatmul.mubr.bf16.vlgmr.msra.gmra.mrb[96].mxu1 %v9827_v56  ;;  %5853 = vmatmul.mubr.bf16.vlgmr.msra.gmra.mrb[96].mxu0 %v9827_v56 }
 0x3cb   :  { %5739 = vmatpush1.bf16.msra.mxu1 %v7604_v15  ;;  %5862 = vmatpush1.bf16.msra.mxu0 %v7607_v54 }
 0x3cc   :  { %5770 = vmatprep.mubr.bf16.mxu1 %v9839_v58  ;;  %5893 = vmatprep.mubr.bf16.mxu0 %v9839_v58 }
 0x3cd   :  { %5740 = vmatprep.subr.bf16.mxu1 %v7612_v25  ;;  %5863 = vmatprep.subr.bf16.mxu0 %v7615_v8 }
 0x3cf   :  { %5741 = vmatpush1.bf16.msra.mxu1 %v7610_v2  ;;  %5864 = vmatpush1.bf16.msra.mxu0 %v7613_v41  ;;  %v7648_v41 = vld [vmem:[%s10627_s7 + $0x454] ss:$24 sps:$4 sm:$0xff]  }
 0x3d0   :  { %5742 = vmatprep.subr.bf16.mxu1 %v7618_v30  ;;  %5865 = vmatprep.subr.bf16.mxu0 %v7621_v26  ;;  %v7651_v30 = vld [vmem:[%s10627_s7 + $0x45c] ss:$24 sps:$4 sm:$0xff]  }
 0x3d1   :  { %v3221_v24 = vpop.f32.mrb[64].mxu0 }
 0x3d2   :  { %v6848_v10 = vadd.f32 %v3221_v24, %v9865_v35  ;;  %v3223_v42 = vpop.f32.mrb[65].mxu0 }
 0x3d3   :  { %5743 = vmatpush1.bf16.msra.mxu1 %v7616_v52  ;;  %5866 = vmatpush1.bf16.msra.mxu0 %v7619_v51  ;;  %v6849_v5 = vadd.f32 %v3223_v42, %v9874_v55  ;;  %v3225_v6 = vpop.f32.mrb[66].mxu0 }
 0x3d4   :  { %5744 = vmatprep.subr.bf16.mxu1 %v7624_v38  ;;  %5867 = vmatprep.subr.bf16.mxu0 %v7627_v9  ;;  %v6850_v32 = vadd.f32 %v3225_v6, %v9865_v35  ;;  %v3227_v48 = vpop.f32.mrb[67].mxu0  ;;  %v3304_v49 = vmax.f32 %v6848_v10, 0.0  ;;  %v7646_v9 = vld [vmem:[%s10627_s7 + $0x450] ss:$24 sps:$4 sm:$0xff]  }
 0x3d5   :  { %v6851_v12 = vadd.f32 %v3227_v48, %v9874_v55  ;;  %v3305_v19 = vmax.f32 %v6849_v5, 0.0 }
 0x3d6   :  { %v3310_v61 = vmax.f32 %v6850_v32, 0.0  ;;  %v7657_v32 = vld [vmem:[%s10627_s7 + $0x48c] ss:$24 sps:$4 sm:$0xff]  }
 0x3d7   :  { %5745 = vmatpush1.bf16.msra.mxu1 %v7622_v43  ;;  %5868 = vmatpush1.bf16.msra.mxu0 %v7625_v16  ;;  %v3311_v4 = vmax.f32 %v6851_v12, 0.0  ;;  %v7649_v43 = vld [vmem:[%s10627_s7 + $0x458] ss:$24 sps:$4 sm:$0xff]  }
 0x3d8   :  { %5746 = vmatprep.subr.bf16.mxu1 %v7630_v45  ;;  %5869 = vmatprep.subr.bf16.mxu0 %v7633_v28  ;;  %v3424_v14 = vmax.f32 %v3304_v49, %v3310_v61  ;;  %v7654_v28 = vld [vmem:[%s10627_s7 + $0x484] ss:$24 sps:$4 sm:$0xff]  }
 0x3d9   :  { %v3431_v53 = vmax.f32 %v3305_v19, %v3311_v4  ;;  %v3231_v0 = vpop.f32.mrb[68].mxu0  ;;  %v7652_v19 = vld [vmem:[%s10627_s7 + $0x480] ss:$24 sps:$4 sm:$0xff]  }
 0x3da   :  { %v3425_v23 = vrot.slane %v3424_v14, 4  ;;  %v6852_v20 = vadd.f32 %v3231_v0, %v9865_v35  ;;  %v3233_v11 = vpop.f32.mrb[69].mxu0 }
 0x3db   :  { %5747 = vmatpush1.bf16.msra.mxu1 %v7628_v18  ;;  %5870 = vmatpush1.bf16.msra.mxu0 %v7631_v29  ;;  %v3432_v17 = vrot.slane %v3431_v53, 4  ;;  %v6853_v27 = vadd.f32 %v3233_v11, %v9874_v55  ;;  %v3235_v39 = vpop.f32.mrb[70].mxu0  ;;  %v7660_v11 = vld [vmem:[%s10627_s7 + $0x4b4] ss:$24 sps:$4 sm:$0xff]  }
 0x3dc   :  { %5748 = vmatprep.subr.bf16.mxu1 %v7636_v40  ;;  %5871 = vmatprep.subr.bf16.mxu0 %v7639_v21  ;;  %v3426_v13 = vmax.f32 %v3424_v14, %v3425_v23  ;;  %v6854_v37 = vadd.f32 %v3235_v39, %v9865_v35  ;;  %v3237_v46 = vpop.f32.mrb[71].mxu0  ;;  %v3316_v15 = vmax.f32 %v6852_v20, 0.0  ;;  %v7655_v14 = vld [vmem:[%s10627_s7 + $0x488] ss:$24 sps:$4 sm:$0xff]  }
 0x3dd   :  { %v3433_v3 = vmax.f32 %v3431_v53, %v3432_v17  ;;  %v6855_v44 = vadd.f32 %v3237_v46, %v9874_v55  ;;  %v3317_v8 = vmax.f32 %v6853_v27, 0.0 }
 0x3de   :  { %v3427_v50 = vrot.slane %v3426_v13, 2  ;;  %v3322_v54 = vmax.f32 %v6854_v37, 0.0 }
 0x3df   :  { %5749 = vmatpush1.bf16.msra.mxu1 %v7634_v60  ;;  %5872 = vmatpush1.bf16.msra.mxu0 %v7637_v34  ;;  %v3434_v25 = vrot.slane %v3433_v3, 2  ;;  %v3323_v2 = vmax.f32 %v6855_v44, 0.0  ;;  %v7663_v60 = vld [vmem:[%s10627_s7 + $0x4bc] ss:$24 sps:$4 sm:$0xff]  }
 0x3e0   :  { %5750 = vmatprep.subr.bf16.mxu1 %v7642_v33  ;;  %5873 = vmatprep.subr.bf16.mxu0 %v7645_v22  ;;  %v3428_v26 = vmax.f32 %v3426_v13, %v3427_v50  ;;  %v3466_v1 = vmax.f32 %v3316_v15, %v3322_v54  ;;  %v7658_v13 = vld [vmem:[%s10627_s7 + $0x4b0] ss:$24 sps:$4 sm:$0xff]  }
 0x3e1   :  { %v3435_v52 = vmax.f32 %v3433_v3, %v3434_v25  ;;  %v3473_v51 = vmax.f32 %v3317_v8, %v3323_v2  ;;  %v3241_v38 = vpop.f32.mrb[72].mxu0  ;;  %v7666_v8 = vld [vmem:[%s10627_s7 + $0x4e4] ss:$24 sps:$4 sm:$0xff]  }
 0x3e2   :  { %v3467_v24 = vrot.slane %v3466_v1, 4  ;;  %v6856_v10 = vadd.f32 %v3241_v38, %v9865_v35  ;;  %v3243_v42 = vpop.f32.mrb[73].mxu0  ;;  %v3429_v16 = vrot.slane %v3428_v26, 1  ;;  %v7669_v2 = vld [vmem:[%s10627_s7 + $0x4ec] ss:$24 sps:$4 sm:$0xff]  }
 0x3e3   :  { %5751 = vmatpush1.bf16.msra.mxu1 %v7640_v62  ;;  %5874 = vmatpush1.bf16.msra.mxu0 %v7643_v31  ;;  %v3474_v5 = vrot.slane %v3473_v51, 4  ;;  %v6857_v6 = vadd.f32 %v3243_v42, %v9874_v55  ;;  %v3245_v45 = vpop.f32.mrb[74].mxu0  ;;  %v3436_v61 = vrot.slane %v3435_v52, 1  ;;  %v7661_v62 = vld [vmem:[%s10627_s7 + $0x4b8] ss:$24 sps:$4 sm:$0xff]  }
 0x3e4   :  { %5752 = vmatprep.subr.bf16.mxu1 %v7648_v41  ;;  %5875 = vmatprep.subr.bf16.mxu0 %v7651_v30  ;;  %v3468_v48 = vmax.f32 %v3466_v1, %v3467_v24  ;;  %v6858_v12 = vadd.f32 %v3245_v45, %v9865_v35  ;;  %v3247_v49 = vpop.f32.mrb[75].mxu0  ;;  %v3328_v40 = vmax.f32 %v6856_v10, 0.0  ;;  %v3430_v53 = vmax.f32 %v3428_v26, %v3429_v16  ;;  %v7664_v24 = vld [vmem:[%s10627_s7 + $0x4e0] ss:$24 sps:$4 sm:$0xff]  }
 0x3e5   :  { %v3475_v18 = vmax.f32 %v3473_v51, %v3474_v5  ;;  %v6859_v29 = vadd.f32 %v3247_v49, %v9874_v55  ;;  %v3329_v23 = vmax.f32 %v6857_v6, 0.0  ;;  %v3437_v27 = vmax.f32 %v3435_v52, %v3436_v61  ;;  %v7667_v5 = vld [vmem:[%s10627_s7 + $0x4e8] ss:$24 sps:$4 sm:$0xff]  }
 0x3e6   :  { %v3469_v4 = vrot.slane %v3468_v48, 2  ;;  %v3334_v21 = vmax.f32 %v6858_v12, 0.0  ;;  %v3736_v50 = vpack.c.bf16 %v3430_v53, %v3430_v53  ;;  %v7675_v12 = vld [vmem:[%s10627_s7 + $0x51c] ss:$24 sps:$4 sm:$0xff]   ;;  %v7670_v53 = vld [vmem:[%s10627_s7 + $0x510] ss:$24 sps:$4 sm:$0xff]  }
 0x3e7   :  { %5753 = vmatpush1.bf16.msra.mxu1 %v7646_v9  ;;  %5876 = vmatpush1.bf16.msra.mxu0 %v7649_v43  ;;  %v3476_v0 = vrot.slane %v3475_v18, 2  ;;  %v3335_v20 = vmax.f32 %v6859_v29, 0.0  ;;  %v3737_v52 = vpack.c.bf16 %v3437_v27, %v3437_v27 }
 0x3e8   :  { %5754 = vmatprep.subr.bf16.mxu1 %v7654_v28  ;;  %5877 = vmatprep.subr.bf16.mxu0 %v7657_v32  ;;  %v3470_v34 = vmax.f32 %v3468_v48, %v3469_v4  ;;  %v3508_v17 = vmax.f32 %v3328_v40, %v3334_v21  ;;  %v7672_v48 = vld [vmem:[%s10627_s7 + $0x514] ss:$24 sps:$4 sm:$0xff]   ;;  %v4152_v49 = vunpack.c.l.b16 %v3736_v50 }
 0x3e9   :  { %v3477_v39 = vmax.f32 %v3475_v18, %v3476_v0  ;;  %v3515_v33 = vmax.f32 %v3329_v23, %v3335_v20  ;;  %v3251_v22 = vpop.f32.mrb[76].mxu0 }
 0x3ea   :  { %v3471_v37 = vrot.slane %v3470_v34, 1  ;;  %v3509_v46 = vrot.slane %v3508_v17, 4  ;;  %v6860_v3 = vadd.f32 %v3251_v22, %v9865_v35  ;;  %v3253_v44 = vpop.f32.mrb[77].mxu0 }
 0x3eb   :  { %5755 = vmatpush1.bf16.msra.mxu1 %v7652_v19  ;;  %5878 = vmatpush1.bf16.msra.mxu0 %v7655_v14  ;;  %v3478_v15 = vrot.slane %v3477_v39, 1  ;;  %v3516_v54 = vrot.slane %v3515_v33, 4  ;;  %v6861_v31 = vadd.f32 %v3253_v44, %v9874_v55  ;;  %v3255_v25 = vpop.f32.mrb[78].mxu0  ;;  %v4153_v19 = vunpack.c.l.b16 %v3737_v52 }
 0x3ec   :  { %5756 = vmatprep.subr.bf16.mxu1 %v7660_v11  ;;  %5879 = vmatprep.subr.bf16.mxu0 %v7663_v60  ;;  %v3472_v41 = vmax.f32 %v3470_v34, %v3471_v37  ;;  %v3510_v30 = vmax.f32 %v3508_v17, %v3509_v46  ;;  %v6862_v26 = vadd.f32 %v3255_v25, %v9865_v35  ;;  %v3257_v1 = vpop.f32.mrb[79].mxu0  ;;  %v3340_v43 = vmax.f32 %v6860_v3, 0.0  ;;  %v7673_v34 = vld [vmem:[%s10627_s7 + $0x518] ss:$24 sps:$4 sm:$0xff]   ;;  %v7681_v37 = vld [vmem:[%s10627_s7 + $0x54c] ss:$24 sps:$4 sm:$0xff]  }
 0x3ed   :  { %v3479_v51 = vmax.f32 %v3477_v39, %v3478_v15  ;;  %v3517_v38 = vmax.f32 %v3515_v33, %v3516_v54  ;;  %v6863_v9 = vadd.f32 %v3257_v1, %v9874_v55  ;;  %v3341_v28 = vmax.f32 %v6861_v31, 0.0  ;;  %v7676_v31 = vld [vmem:[%s10627_s7 + $0x540] ss:$24 sps:$4 sm:$0xff]  }
 0x3ee   :  { %v3742_v10 = vpack.c.bf16 %v3472_v41, %v3472_v41  ;;  %v3511_v42 = vrot.slane %v3510_v30, 2  ;;  %v3346_v16 = vmax.f32 %v6862_v26, 0.0 }
 0x3ef   :  { %5757 = vmatpush1.bf16.msra.mxu1 %v7658_v13  ;;  %5880 = vmatpush1.bf16.msra.mxu0 %v7661_v62  ;;  %v3743_v6 = vpack.c.bf16 %v3479_v51, %v3479_v51  ;;  %v3518_v45 = vrot.slane %v3517_v38, 2  ;;  %v3347_v32 = vmax.f32 %v6863_v9, 0.0  ;;  %v7678_v13 = vld [vmem:[%s10627_s7 + $0x544] ss:$24 sps:$4 sm:$0xff]  }
 0x3f0   :  { %5758 = vmatprep.subr.bf16.mxu1 %v7666_v8  ;;  %5881 = vmatprep.subr.bf16.mxu0 %v7669_v2  ;;  %v4158_v61 = vunpack.c.l.b16 %v3742_v10  ;;  %v3512_v18 = vmax.f32 %v3510_v30, %v3511_v42  ;;  %v3550_v29 = vmax.f32 %v3340_v43, %v3346_v16  ;;  %v7679_v30 = vld [vmem:[%s10627_s7 + $0x548] ss:$24 sps:$4 sm:$0xff]   ;;  %v7687_v9 = vld [vmem:[%s10627_s7 + $0x57c] ss:$24 sps:$4 sm:$0xff]  }
 0x3f1   :  { %v4159_v4 = vunpack.c.l.b16 %v3743_v6  ;;  %v3519_v40 = vmax.f32 %v3517_v38, %v3518_v45  ;;  %v3557_v21 = vmax.f32 %v3341_v28, %v3347_v32  ;;  %v3261_v14 = vpop.f32.mrb[80].mxu0  ;;  %v7684_v38 = vld [vmem:[%s10627_s7 + $0x574] ss:$24 sps:$4 sm:$0xff]   ;;  %v7682_v45 = vld [vmem:[%s10627_s7 + $0x570] ss:$24 sps:$4 sm:$0xff]  }
 0x3f2   :  { %v4231_v0 = vsel %vm4196_vm3, %v4158_v61, %v4152_v49  ;;  %v3513_v23 = vrot.slane %v3512_v18, 1  ;;  %v3551_v20 = vrot.slane %v3550_v29, 4  ;;  %v6864_v11 = vadd.f32 %v3261_v14, %v9865_v35  ;;  %v3263_v60 = vpop.f32.mrb[81].mxu0  ;;  %v7685_v61 = vld [vmem:[%s10627_s7 + $0x578] ss:$24 sps:$4 sm:$0xff]  }
 0x3f3   :  { %5759 = vmatpush1.bf16.msra.mxu1 %v7664_v24  ;;  %5882 = vmatpush1.bf16.msra.mxu0 %v7667_v5  ;;  %v4238_v17 = vsel %vm4196_vm3, %v4159_v4, %v4153_v19  ;;  %v3520_v27 = vrot.slane %v3519_v40, 1  ;;  %v3558_v39 = vrot.slane %v3557_v21, 4  ;;  %v6865_v33 = vadd.f32 %v3263_v60, %v9874_v55  ;;  %v3265_v22 = vpop.f32.mrb[82].mxu0  ;;  %v7693_v14 = vld [vmem:[%s10627_s7 + $0x5ac] ss:$24 sps:$4 sm:$0xff]  }
 0x3f4   :  { %5760 = vmatprep.subr.bf16.mxu1 %v7672_v48  ;;  %5883 = vmatprep.subr.bf16.mxu0 %v7675_v12  ;;  %v3514_v46 = vmax.f32 %v3512_v18, %v3513_v23  ;;  %v3552_v3 = vmax.f32 %v3550_v29, %v3551_v20  ;;  %v6866_v44 = vadd.f32 %v3265_v22, %v9865_v35  ;;  %v3267_v62 = vpop.f32.mrb[83].mxu0  ;;  %v3352_v2 = vmax.f32 %v6864_v11, 0.0 }
 0x3f5   :  { %v3521_v50 = vmax.f32 %v3519_v40, %v3520_v27  ;;  %v3559_v15 = vmax.f32 %v3557_v21, %v3558_v39  ;;  %v6867_v54 = vadd.f32 %v3267_v62, %v9874_v55  ;;  %v3353_v52 = vmax.f32 %v6865_v33, 0.0  ;;  %v7690_v21 = vld [vmem:[%s10627_s7 + $0x5a4] ss:$24 sps:$4 sm:$0xff]   ;;  %v7696_v62 = vld [vmem:[%s10627_s7 + $0x5d4] ss:$24 sps:$4 sm:$0xff]  }
 0x3f6   :  { %v3748_v25 = vpack.c.bf16 %v3514_v46, %v3514_v46  ;;  %v3553_v8 = vrot.slane %v3552_v3, 2  ;;  %v3358_v41 = vmax.f32 %v6866_v44, 0.0 }
 0x3f7   :  { %5761 = vmatpush1.bf16.msra.mxu1 %v7670_v53  ;;  %5884 = vmatpush1.bf16.msra.mxu0 %v7673_v34  ;;  %v3749_v26 = vpack.c.bf16 %v3521_v50, %v3521_v50  ;;  %v3560_v1 = vrot.slane %v3559_v15, 2  ;;  %v3359_v51 = vmax.f32 %v6867_v54, 0.0  ;;  %v7699_v50 = vld [vmem:[%s10627_s7 + $0x5dc] ss:$24 sps:$4 sm:$0xff]  }
 0x3f8   :  { %5762 = vmatprep.subr.bf16.mxu1 %v7678_v13  ;;  %5885 = vmatprep.subr.bf16.mxu0 %v7681_v37  ;;  %v4164_v24 = vunpack.c.l.b16 %v3748_v25  ;;  %v3554_v10 = vmax.f32 %v3552_v3, %v3553_v8  ;;  %v3592_v42 = vmax.f32 %v3352_v2, %v3358_v41  ;;  %v7691_v13 = vld [vmem:[%s10627_s7 + $0x5a8] ss:$24 sps:$4 sm:$0xff]  }
 0x3f9   :  { %v4165_v43 = vunpack.c.l.b16 %v3749_v26  ;;  %v3561_v16 = vmax.f32 %v3559_v15, %v3560_v1  ;;  %v3599_v5 = vmax.f32 %v3353_v52, %v3359_v51  ;;  %v3271_v6 = vpop.f32.mrb[84].mxu0 }
 0x3fa   :  { %v4232_v28 = vsel %vm4198_vm4, %v4164_v24, %v4231_v0  ;;  %v3555_v32 = vrot.slane %v3554_v10, 1  ;;  %v3593_v48 = vrot.slane %v3592_v42, 4  ;;  %v6868_v12 = vadd.f32 %v3271_v6, %v9865_v35  ;;  %v3273_v49 = vpop.f32.mrb[85].mxu0  ;;  %v7705_v6 = vld [vmem:[%s10627_s7 + $0x60c] ss:$24 sps:$4 sm:$0xff]  }
 0x3fb   :  { %5763 = vmatpush1.bf16.msra.mxu1 %v7676_v31  ;;  %5886 = vmatpush1.bf16.msra.mxu0 %v7679_v30  ;;  %v4239_v18 = vsel %vm4198_vm4, %v4165_v43, %v4238_v17  ;;  %v3562_v29 = vrot.slane %v3561_v16, 1  ;;  %v3600_v19 = vrot.slane %v3599_v5, 4  ;;  %v6869_v4 = vadd.f32 %v3273_v49, %v9874_v55  ;;  %v3275_v40 = vpop.f32.mrb[86].mxu0  ;;  %v7688_v17 = vld [vmem:[%s10627_s7 + $0x5a0] ss:$24 sps:$4 sm:$0xff]  }
 0x3fc   :  { %5764 = vmatprep.subr.bf16.mxu1 %v7684_v38  ;;  %5887 = vmatprep.subr.bf16.mxu0 %v7687_v9  ;;  %v3556_v53 = vmax.f32 %v3554_v10, %v3555_v32  ;;  %v3594_v0 = vmax.f32 %v3592_v42, %v3593_v48  ;;  %v6870_v23 = vadd.f32 %v3275_v40, %v9865_v35  ;;  %v3277_v20 = vpop.f32.mrb[87].mxu0  ;;  %v3364_v33 = vmax.f32 %v6868_v12, 0.0  ;;  %v7694_v30 = vld [vmem:[%s10627_s7 + $0x5d0] ss:$24 sps:$4 sm:$0xff]  }
 0x3fd   :  { %v3563_v11 = vmax.f32 %v3561_v16, %v3562_v29  ;;  %v3601_v60 = vmax.f32 %v3599_v5, %v3600_v19  ;;  %v6871_v34 = vadd.f32 %v3277_v20, %v9874_v55  ;;  %v3365_v3 = vmax.f32 %v6869_v4, 0.0  ;;  %v7697_v9 = vld [vmem:[%s10627_s7 + $0x5d8] ss:$24 sps:$4 sm:$0xff]   ;;  %v7702_v5 = vld [vmem:[%s10627_s7 + $0x604] ss:$24 sps:$4 sm:$0xff]  }
 0x3fe   :  { %v3754_v27 = vpack.c.bf16 %v3556_v53, %v3556_v53  ;;  %v3595_v39 = vrot.slane %v3594_v0, 2  ;;  %v3370_v22 = vmax.f32 %v6870_v23, 0.0  ;;  %v10080_v20 = vpack.c.b16 %v9816_v7, %v9816_v7  ;;  %v7706_v7 = vld [vmem:[%s10627_s7 + $0x630] ss:$24 sps:$4 sm:$0xff]  }
 0x3ff   :  { %5765 = vmatpush1.bf16.msra.mxu1 %v7682_v45  ;;  %5888 = vmatpush1.bf16.msra.mxu0 %v7685_v61  ;;  %v3755_v37 = vpack.c.bf16 %v3563_v11, %v3563_v11  ;;  %v3602_v46 = vrot.slane %v3601_v60, 2  ;;  %v3371_v44 = vmax.f32 %v6871_v34, 0.0  ;;  %v7708_v11 = vld [vmem:[%s10627_s7 + $0x634] ss:$24 sps:$4 sm:$0xff]  }
 0x400   :  { %5766 = vmatprep.subr.bf16.mxu1 %v7690_v21  ;;  %5889 = vmatprep.subr.bf16.mxu0 %v7693_v14  ;;  %v4170_v15 = vunpack.c.l.b16 %v3754_v27  ;;  %v3596_v54 = vmax.f32 %v3594_v0, %v3595_v39  ;;  %v3634_v31 = vmax.f32 %v3364_v33, %v3370_v22  ;;  %v7703_v21 = vld [vmem:[%s10627_s7 + $0x608] ss:$24 sps:$4 sm:$0xff]  }
 0x401   :  { %v4171_v25 = vunpack.c.l.b16 %v3755_v37  ;;  %v3603_v8 = vmax.f32 %v3601_v60, %v3602_v46  ;;  %v3641_v2 = vmax.f32 %v3365_v3, %v3371_v44  ;;  %v3281_v41 = vpop.f32.mrb[88].mxu0  ;;  %v7711_v60 = vld [vmem:[%s10627_s7 + $0x63c] ss:$24 sps:$4 sm:$0xff]  }
 0x402   :  { %v4233_v26 = vsel %vm4200_vm5, %v4170_v15, %v4232_v28  ;;  %v3597_v1 = vrot.slane %v3596_v54, 1  ;;  %v3635_v52 = vrot.slane %v3634_v31, 4  ;;  %v6872_v51 = vadd.f32 %v3281_v41, %v9865_v35  ;;  %v3283_v38 = vpop.f32.mrb[89].mxu0  ;;  %v7717_v41 = vld [vmem:[%s10627_s7 + $0x66c] ss:$24 sps:$4 sm:$0xff]  }
 0x403   :  { %5767 = vmatpush1.bf16.msra.mxu1 %v7688_v17  ;;  %5890 = vmatpush1.bf16.msra.mxu0 %v7691_v13  ;;  %v3604_v24 = vrot.slane %v3603_v8, 1  ;;  %v3642_v10 = vrot.slane %v3641_v2, 4  ;;  %v6873_v42 = vadd.f32 %v3283_v38, %v9874_v55  ;;  %v3285_v43 = vpop.f32.mrb[90].mxu0  ;;  %v4240_v16 = vsel %vm4200_vm5, %v4171_v25, %v4239_v18  ;;  %v7700_v18 = vld [vmem:[%s10627_s7 + $0x600] ss:$24 sps:$4 sm:$0xff]  }
 0x404   :  { %5768 = vmatprep.subr.bf16.mxu1 %v7696_v62  ;;  %5891 = vmatprep.subr.bf16.mxu0 %v7699_v50  ;;  %v3598_v45 = vmax.f32 %v3596_v54, %v3597_v1  ;;  %v3636_v28 = vmax.f32 %v3634_v31, %v3635_v52  ;;  %v6874_v32 = vadd.f32 %v3285_v43, %v9865_v35  ;;  %v3287_v48 = vpop.f32.mrb[91].mxu0  ;;  %v3376_v4 = vmax.f32 %v6872_v51, 0.0  ;;  %v7709_v50 = vld [vmem:[%s10627_s7 + $0x638] ss:$24 sps:$4 sm:$0xff]  }
 0x405   :  { %v3605_v12 = vmax.f32 %v3603_v8, %v3604_v24  ;;  %v3643_v49 = vmax.f32 %v3641_v2, %v3642_v10  ;;  %v6875_v61 = vadd.f32 %v3287_v48, %v9874_v55  ;;  %v3377_v0 = vmax.f32 %v6873_v42, 0.0  ;;  %v7714_v2 = vld [vmem:[%s10627_s7 + $0x664] ss:$24 sps:$4 sm:$0xff]   ;;  %v7712_v24 = vld [vmem:[%s10627_s7 + $0x660] ss:$24 sps:$4 sm:$0xff]  }
 0x406   :  { %v3760_v29 = vpack.c.bf16 %v3598_v45, %v3598_v45  ;;  %v3637_v19 = vrot.slane %v3636_v28, 2  ;;  %v3382_v40 = vmax.f32 %v6874_v32, 0.0  ;;  %v7723_v32 = vld [vmem:[%s10627_s7 + $0x69c] ss:$24 sps:$4 sm:$0xff]  }
 0x407   :  { %5769 = vmatpush1.bf16.msra.mxu1 %v7694_v30  ;;  %5892 = vmatpush1.bf16.msra.mxu0 %v7697_v9  ;;  %v3761_v14 = vpack.c.bf16 %v3605_v12, %v3605_v12  ;;  %v3644_v53 = vrot.slane %v3643_v49, 2  ;;  %v3383_v23 = vmax.f32 %v6875_v61, 0.0 }
 0x408   :  { %5779 = vmatprep.subr.bf16.mxu1 %v7702_v5  ;;  %5902 = vmatprep.subr.bf16.mxu0 %v7705_v6  ;;  %v4176_v34 = vunpack.c.l.b16 %v3760_v29  ;;  %v3638_v17 = vmax.f32 %v3636_v28, %v3637_v19  ;;  %v3676_v27 = vmax.f32 %v3376_v4, %v3382_v40  ;;  %v7715_v5 = vld [vmem:[%s10627_s7 + $0x668] ss:$24 sps:$4 sm:$0xff]  }
 0x409   :  { %v4177_v39 = vunpack.c.l.b16 %v3761_v14  ;;  %v3645_v33 = vmax.f32 %v3643_v49, %v3644_v53  ;;  %v3683_v22 = vmax.f32 %v3377_v0, %v3383_v23  ;;  %v3291_v13 = vpop.f32.mrb[92].mxu0  ;;  %v7721_v14 = vld [vmem:[%s10627_s7 + $0x698] ss:$24 sps:$4 sm:$0xff]  }
 0x40a   :  { %5771 = vmatmul.mubr.bf16.vlgmr.msra.gmra.mrb[96].mxu1 %v10080_v20  ;;  %5894 = vmatmul.mubr.bf16.vlgmr.msra.gmra.mrb[96].mxu0 %v10080_v20  ;;  %v3639_v37 = vrot.slane %v3638_v17, 1  ;;  %v3677_v46 = vrot.slane %v3676_v27, 4  ;;  %v6876_v3 = vadd.f32 %v3291_v13, %v9865_v35  ;;  %v3293_v44 = vpop.f32.mrb[93].mxu0  ;;  %v4234_v62 = vsel %vm4202_vm6, %v4176_v34, %v4233_v26  ;;  %v7724_v13 = vld [vmem:[%s10627_s7 + $0x6c0] ss:$24 sps:$4 sm:$0xff]  }
 0x40b   :  { %5780 = vmatpush1.bf16.msra.mxu1 %v7700_v18  ;;  %5903 = vmatpush1.bf16.msra.mxu0 %v7703_v21  ;;  %v3646_v15 = vrot.slane %v3645_v33, 1  ;;  %v3684_v54 = vrot.slane %v3683_v22, 4  ;;  %v6877_v31 = vadd.f32 %v3293_v44, %v9874_v55  ;;  %v3295_v25 = vpop.f32.mrb[94].mxu0  ;;  %v4241_v8 = vsel %vm4202_vm6, %v4177_v39, %v4240_v16  ;;  %v7718_v21 = vld [vmem:[%s10627_s7 + $0x690] ss:$24 sps:$4 sm:$0xff]  }
 0x40c   :  { %5781 = vmatprep.subr.bf16.mxu1 %v7708_v11  ;;  %5904 = vmatprep.subr.bf16.mxu0 %v7711_v60  ;;  %v3640_v30 = vmax.f32 %v3638_v17, %v3639_v37  ;;  %v3678_v26 = vmax.f32 %v3676_v27, %v3677_v46  ;;  %v6878_v1 = vadd.f32 %v3295_v25, %v9865_v35  ;;  %v3297_v52 = vpop.f32.mrb[95].mxu0  ;;  %v3388_v43 = vmax.f32 %v6876_v3, 0.0  ;;  %v7726_v11 = vld [vmem:[%s10627_s7 + $0x6c4] ss:$24 sps:$4 sm:$0xff]   ;;  %v7732_v3 = vld [vmem:[%s10627_s7 + $0x6f4] ss:$24 sps:$4 sm:$0xff]  }
 0x40d   :  { %v3647_v51 = vmax.f32 %v3645_v33, %v3646_v15  ;;  %v3685_v38 = vmax.f32 %v3683_v22, %v3684_v54  ;;  %v6879_v9 = vadd.f32 %v3297_v52, %v9874_v55  ;;  %v3389_v45 = vmax.f32 %v6877_v31, 0.0  ;;  %v7720_v55 = vld [vmem:[%s10627_s7 + $0x694] ss:$24 sps:$4 sm:$0xff]  }
 0x40e   :  { %v3766_v10 = vpack.c.bf16 %v3640_v30, %v3640_v30  ;;  %v3679_v42 = vrot.slane %v3678_v26, 2  ;;  %v3394_v16 = vmax.f32 %v6878_v1, 0.0  ;;  %v7729_v60 = vld [vmem:[%s10627_s7 + $0x6cc] ss:$24 sps:$4 sm:$0xff]   ;;  %v7735_v44 = vld [vmem:[%s10627_s7 + $0x6fc] ss:$24 sps:$4 sm:$0xff]  }
 0x40f   :  { %5782 = vmatpush1.bf16.msra.mxu1 %v7706_v7  ;;  %5905 = vmatpush1.bf16.msra.mxu0 %v7709_v50  ;;  %v3767_v35 = vpack.c.bf16 %v3647_v51, %v3647_v51  ;;  %v3686_v6 = vrot.slane %v3685_v38, 2  ;;  %v3395_v28 = vmax.f32 %v6879_v9, 0.0  ;;  %v7727_v7 = vld [vmem:[%s10627_s7 + $0x6c8] ss:$24 sps:$4 sm:$0xff]   ;;  %v7741_v1 = vld [vmem:[%s10627_s7 + $0x72c] ss:$24 sps:$4 sm:$0xff]  }
 0x410   :  { %5783 = vmatprep.subr.bf16.mxu1 %v7714_v2  ;;  %5906 = vmatprep.subr.bf16.mxu0 %v7717_v41  ;;  %v4182_v48 = vunpack.c.l.b16 %v3766_v10  ;;  %v3680_v12 = vmax.f32 %v3678_v26, %v3679_v42  ;;  %v3718_v49 = vmax.f32 %v3388_v43, %v3394_v16  ;;  %v7733_v2 = vld [vmem:[%s10627_s7 + $0x6f8] ss:$24 sps:$4 sm:$0xff]   ;;  %v7738_v26 = vld [vmem:[%s10627_s7 + $0x724] ss:$24 sps:$4 sm:$0xff]   ;;  %v7739_v43 = vld [vmem:[%s10627_s7 + $0x728] ss:$24 sps:$4 sm:$0xff]  }
 0x411   :  { %v4183_v61 = vunpack.c.l.b16 %v3767_v35  ;;  %v3687_v18 = vmax.f32 %v3685_v38, %v3686_v6  ;;  %v3725_v29 = vmax.f32 %v3389_v45, %v3395_v28  ;;  %v6066_v51 = vld [vmem:[%s10629_s9] sm:$0xff]  ;;  %v7747_v35 = vld [vmem:[%s10627_s7 + $0x75c] ss:$24 sps:$4 sm:$0xff]  }
 0x412   :  { %v3681_v19 = vrot.slane %v3680_v12, 1  ;;  %v3719_v4 = vrot.slane %v3718_v49, 4  ;;  %v4235_v40 = vsel %vm4204_vm7, %v4182_v48, %v4234_v62  ;;  %vm6067_vm10 = vcmp.gt.f32.partialorder %v6066_v51, 0.0  ;;  %v7736_v42 = vld [vmem:[%s10627_s7 + $0x720] ss:$24 sps:$4 sm:$0xff]  }
 0x413   :  { %5784 = vmatpush1.bf16.msra.mxu1 %v7712_v24  ;;  %5907 = vmatpush1.bf16.msra.mxu0 %v7715_v5  ;;  %v3688_v53 = vrot.slane %v3687_v18, 1  ;;  %v3726_v0 = vrot.slane %v3725_v29, 4  ;;  %v4242_v23 = vsel %vm4204_vm7, %v4183_v61, %v4241_v8  ;;  %v7730_v8 = vld [vmem:[%s10627_s7 + $0x6f0] ss:$24 sps:$4 sm:$0xff]   ;;  %v7943_v24 = vmov 0.0  }
 0x414   :  { %5785 = vmatprep.subr.bf16.mxu1 %v7720_v55  ;;  %5908 = vmatprep.subr.bf16.mxu0 %v7723_v32  ;;  %v3682_v34 = vmax.f32 %v3680_v12, %v3681_v19  ;;  %v3720_v17 = vmax.f32 %v3718_v49, %v3719_v4  ;;  %v6751_v10 = vsel %vm6067_vm10, 1.0, %v7943_v24  ;;  %v7744_v5 = vld [vmem:[%s10627_s7 + $0x754] ss:$24 sps:$4 sm:$0xff]   ;;  %v7742_v32 = vld [vmem:[%s10627_s7 + $0x750] ss:$24 sps:$4 sm:$0xff]  }
 0x415   :  { %v3689_v27 = vmax.f32 %v3687_v18, %v3688_v53  ;;  %v3727_v39 = vmax.f32 %v3725_v29, %v3726_v0  ;;  %6072 = vperm.xlu0 %7041, %v6751_v10   ;;  %v6082_v28 = vsub.f32 1.0, %v6751_v10  ;;  %v7745_v48 = vld [vmem:[%s10627_s7 + $0x758] ss:$24 sps:$4 sm:$0xff]   ;;  %v7750_v49 = vld [vmem:[%s10627_s7 + $0x784] ss:$24 sps:$4 sm:$0xff]  }
 0x416   :  { %v3772_v33 = vpack.c.bf16 %v3682_v34, %v3682_v34  ;;  %v3721_v22 = vrot.slane %v3720_v17, 2  ;;  %v7753_v61 = vld [vmem:[%s10627_s7 + $0x78c] ss:$24 sps:$4 sm:$0xff]   ;;  %v7748_v29 = vld [vmem:[%s10627_s7 + $0x780] ss:$24 sps:$4 sm:$0xff]  }
 0x417   :  { %5786 = vmatpush1.bf16.msra.mxu1 %v7718_v21  ;;  %5909 = vmatpush1.bf16.msra.mxu0 %v7721_v14  ;;  %v3773_v37 = vpack.c.bf16 %v3689_v27, %v3689_v27  ;;  %v3728_v46 = vrot.slane %v3727_v39, 2  ;;  %v7751_v19 = vld [vmem:[%s10627_s7 + $0x788] ss:$24 sps:$4 sm:$0xff]   ;;  %v7756_v4 = vld [vmem:[%s10627_s7 + $0x7b4] ss:$24 sps:$4 sm:$0xff]  }
 0x418   :  { %5787 = vmatprep.subr.bf16.mxu1 %v7726_v11  ;;  %5910 = vmatprep.subr.bf16.mxu0 %v7729_v60  ;;  %v4188_v62 = vunpack.c.l.b16 %v3772_v33  ;;  %v3722_v50 = vmax.f32 %v3720_v17, %v3721_v22  ;;  %v7754_v21 = vld [vmem:[%s10627_s7 + $0x7b0] ss:$24 sps:$4 sm:$0xff]   ;;  %v7762_v53 = vld [vmem:[%s10627_s7 + $0x7e4] ss:$24 sps:$4 sm:$0xff]   ;;  %v7768_v60 = vld [vmem:[%s10627_s7 + $0x814] ss:$24 sps:$4 sm:$0xff]  }
 0x419   :  { %v4189_v15 = vunpack.c.l.b16 %v3773_v37  ;;  %v3729_v54 = vmax.f32 %v3727_v39, %v3728_v46  ;;  %6116 = vperm.xlu0 %7041, %v6082_v28   ;;  %v7757_v14 = vld [vmem:[%s10627_s7 + $0x7b8] ss:$24 sps:$4 sm:$0xff]   ;;  %v7765_v0 = vld [vmem:[%s10627_s7 + $0x7ec] ss:$24 sps:$4 sm:$0xff]   ;;  %v7763_v11 = vld [vmem:[%s10627_s7 + $0x7e8] ss:$24 sps:$4 sm:$0xff]  }
 0x41a   :  { %v3723_v31 = vrot.slane %v3722_v50, 1  ;;  %v4236_v25 = vsel %vm4206_vm8, %v4188_v62, %v4235_v40  ;;  %v7759_v40 = vld [vmem:[%s10627_s7 + $0x7bc] ss:$24 sps:$4 sm:$0xff]   ;;  %v7766_v17 = vld [vmem:[%s10627_s7 + $0x810] ss:$24 sps:$4 sm:$0xff]  }
 0x41b   :  { %5788 = vmatpush1.bf16.msra.mxu1 %v7724_v13  ;;  %5911 = vmatpush1.bf16.msra.mxu0 %v7727_v7  ;;  %v3730_v41 = vrot.slane %v3729_v54, 1  ;;  %v4243_v30 = vsel %vm4206_vm8, %v4189_v15, %v4242_v23  ;;  %v7760_v23 = vld [vmem:[%s10627_s7 + $0x7e0] ss:$24 sps:$4 sm:$0xff]   ;;  %v7771_v34 = vld [vmem:[%s10627_s7 + $0x81c] ss:$24 sps:$4 sm:$0xff]  }
 0x41c   :  { %5789 = vmatprep.subr.bf16.mxu1 %v7732_v3  ;;  %5912 = vmatprep.subr.bf16.mxu0 %v7735_v44  ;;  %v3724_v52 = vmax.f32 %v3722_v50, %v3723_v31  ;;  %v7769_v27 = vld [vmem:[%s10627_s7 + $0x818] ss:$24 sps:$4 sm:$0xff]   ;;  %v7774_v39 = vld [vmem:[%s10627_s7 + $0x844] ss:$24 sps:$4 sm:$0xff]   ;;  %v7775_v13 = vld [vmem:[%s10627_s7 + $0x848] ss:$24 sps:$4 sm:$0xff]  }
 0x41d   :  { %v3731_v38 = vmax.f32 %v3729_v54, %v3730_v41  ;;  %v7777_v33 = vld [vmem:[%s10627_s7 + $0x84c] ss:$24 sps:$4 sm:$0xff]   ;;  %v7772_v22 = vld [vmem:[%s10627_s7 + $0x840] ss:$24 sps:$4 sm:$0xff]   ;;  %v7783_v37 = vld [vmem:[%s10627_s7 + $0x87c] ss:$24 sps:$4 sm:$0xff]  }
 0x41e   :  { %v3778_v9 = vpack.c.bf16 %v3724_v52, %v3724_v52  ;;  %v7780_v7 = vld [vmem:[%s10627_s7 + $0x874] ss:$24 sps:$4 sm:$0xff]   ;;  %v7778_v46 = vld [vmem:[%s10627_s7 + $0x870] ss:$24 sps:$4 sm:$0xff]   ;;  %v7786_v44 = vld [vmem:[%s10627_s7 + $0x8a4] ss:$24 sps:$4 sm:$0xff]  }
 0x41f   :  { %5790 = vmatpush1.bf16.msra.mxu1 %v7730_v8  ;;  %5913 = vmatpush1.bf16.msra.mxu0 %v7733_v2  ;;  %v3779_v16 = vpack.c.bf16 %v3731_v38, %v3731_v38  ;;  %v7781_v3 = vld [vmem:[%s10627_s7 + $0x878] ss:$24 sps:$4 sm:$0xff]   ;;  %v7789_v62 = vld [vmem:[%s10627_s7 + $0x8ac] ss:$24 sps:$4 sm:$0xff]   ;;  %v7787_v15 = vld [vmem:[%s10627_s7 + $0x8a8] ss:$24 sps:$4 sm:$0xff]  }
 0x420   :  { %5791 = vmatprep.subr.bf16.mxu1 %v7738_v26  ;;  %5914 = vmatprep.subr.bf16.mxu0 %v7741_v1  ;;  %v4194_v6 = vunpack.c.l.b16 %v3778_v9  ;;  %v7784_v50 = vld [vmem:[%s10627_s7 + $0x8a0] ss:$24 sps:$4 sm:$0xff]   ;;  %v7792_v54 = vld [vmem:[%s10627_s7 + $0x8d4] ss:$24 sps:$4 sm:$0xff]   ;;  %v7796_v41 = vld [vmem:[%s10627_s7 + $0x10] ss:$24 sps:$4 sm:$0xff]  }
 0x421   :  { %v4195_v45 = vunpack.c.l.b16 %v3779_v16  ;;  %v7795_v31 = vld [vmem:[%s10627_s7 + $0x8dc] ss:$24 sps:$4 sm:$0xff]   ;;  %v7793_v8 = vld [vmem:[%s10627_s7 + $0x8d8] ss:$24 sps:$4 sm:$0xff]  }
 0x422   :  { %v10176_v55 = vsel %vm4208_vm9, %v4194_v6, %v4236_v25  ;;  %v7790_v25 = vld [vmem:[%s10627_s7 + $0x8d0] ss:$24 sps:$4 sm:$0xff]   ;;  %v7798_v2 = vld [vmem:[%s10627_s7 + $0x14] ss:$24 sps:$4 sm:$0xff]   ;;  %v7801_v26 = vld [vmem:[%s10627_s7 + $0x44] ss:$24 sps:$4 sm:$0xff]  }
 0x423   :  { %5792 = vmatpush1.bf16.msra.mxu1 %v7736_v42  ;;  %5915 = vmatpush1.bf16.msra.mxu0 %v7739_v43  ;;  %v4244_v12 = vsel %vm4208_vm9, %v4195_v45, %v4243_v30  ;;  %v10293_v30 = vpack.c.b16 %v10176_v55, %v10176_v55  ;;  %v7799_v1 = vld [vmem:[%s10627_s7 + $0x40] ss:$24 sps:$4 sm:$0xff]   ;;  %v7804_v52 = vld [vmem:[%s10627_s7 + $0x74] ss:$24 sps:$4 sm:$0xff]   ;;  %v7802_v51 = vld [vmem:[%s10627_s7 + $0x70] ss:$24 sps:$4 sm:$0xff]  }
 0x424   :  { %5793 = vmatprep.subr.bf16.mxu1 %v7744_v5  ;;  %5916 = vmatprep.subr.bf16.mxu0 %v7747_v35  ;;  %v10191_v18 = vpack.c.b16 %v4244_v12, %v4244_v12  ;;  %v7807_v38 = vld [vmem:[%s10627_s7 + $0xa4] ss:$24 sps:$4 sm:$0xff]   ;;  %v7810_v9 = vld [vmem:[%s10627_s7 + $0xd4] ss:$24 sps:$4 sm:$0xff]   ;;  %v7808_v24 = vld [vmem:[%s10627_s7 + $0xd0] ss:$24 sps:$4 sm:$0xff]  }
 0x425   :  { %v7813_v10 = vld [vmem:[%s10627_s7 + $0x104] ss:$24 sps:$4 sm:$0xff]   ;;  %v7811_v42 = vld [vmem:[%s10627_s7 + $0x100] ss:$24 sps:$4 sm:$0xff]   ;;  %v7816_v43 = vld [vmem:[%s10627_s7 + $0x134] ss:$24 sps:$4 sm:$0xff]  }
 0x426   :  { %5811 = vmatprep.mubr.bf16.mxu1 %v10191_v18  ;;  %5934 = vmatprep.mubr.bf16.mxu0 %v10191_v18  ;;  %v7814_v16 = vld [vmem:[%s10627_s7 + $0x130] ss:$24 sps:$4 sm:$0xff]   ;;  %v7819_v5 = vld [vmem:[%s10627_s7 + $0x164] ss:$24 sps:$4 sm:$0xff]   ;;  %v7817_v35 = vld [vmem:[%s10627_s7 + $0x160] ss:$24 sps:$4 sm:$0xff]  }
 0x427   :  { %5794 = vmatpush1.bf16.msra.mxu1 %v7742_v32  ;;  %5917 = vmatpush1.bf16.msra.mxu0 %v7745_v48  ;;  %v7822_v6 = vld [vmem:[%s10627_s7 + $0x194] ss:$24 sps:$4 sm:$0xff]   ;;  %v7820_v45 = vld [vmem:[%s10627_s7 + $0x190] ss:$24 sps:$4 sm:$0xff]   ;;  %v7825_v28 = vld [vmem:[%s10627_s7 + $0x1c4] ss:$24 sps:$4 sm:$0xff]  }
 0x428   :  { %5795 = vmatprep.subr.bf16.mxu1 %v7750_v49  ;;  %5918 = vmatprep.subr.bf16.mxu0 %v7753_v61  ;;  %v7823_v55 = vld [vmem:[%s10627_s7 + $0x1c0] ss:$24 sps:$4 sm:$0xff]   ;;  %v7828_v32 = vld [vmem:[%s10627_s7 + $0x1f4] ss:$24 sps:$4 sm:$0xff]   ;;  %v7826_v48 = vld [vmem:[%s10627_s7 + $0x1f0] ss:$24 sps:$4 sm:$0xff]  }
 0x429   :  { %v7831_v12 = vld [vmem:[%s10627_s7 + $0x224] ss:$24 sps:$4 sm:$0xff]   ;;  %v7829_v49 = vld [vmem:[%s10627_s7 + $0x220] ss:$24 sps:$4 sm:$0xff]   ;;  %v7834_v61 = vld [vmem:[%s10627_s7 + $0x254] ss:$24 sps:$4 sm:$0xff]  }
 0x42b   :  { %5796 = vmatpush1.bf16.msra.mxu1 %v7748_v29  ;;  %5919 = vmatpush1.bf16.msra.mxu0 %v7751_v19  ;;  %v7832_v29 = vld [vmem:[%s10627_s7 + $0x250] ss:$24 sps:$4 sm:$0xff]   ;;  %v7837_v19 = vld [vmem:[%s10627_s7 + $0x284] ss:$24 sps:$4 sm:$0xff]  }
 0x42c   :  { %5797 = vmatprep.subr.bf16.mxu1 %v7756_v4  ;;  %5920 = vmatprep.subr.bf16.mxu0 %v7759_v40  ;;  %v7835_v4 = vld [vmem:[%s10627_s7 + $0x280] ss:$24 sps:$4 sm:$0xff]   ;;  %v7840_v40 = vld [vmem:[%s10627_s7 + $0x2b4] ss:$24 sps:$4 sm:$0xff]  }
 0x42f   :  { %5798 = vmatpush1.bf16.msra.mxu1 %v7754_v21  ;;  %5921 = vmatpush1.bf16.msra.mxu0 %v7757_v14  ;;  %v7838_v21 = vld [vmem:[%s10627_s7 + $0x2b0] ss:$24 sps:$4 sm:$0xff]   ;;  %v7843_v14 = vld [vmem:[%s10627_s7 + $0x2e4] ss:$24 sps:$4 sm:$0xff]  }
 0x430   :  { %5799 = vmatprep.subr.bf16.mxu1 %v7762_v53  ;;  %5922 = vmatprep.subr.bf16.mxu0 %v7765_v0  ;;  %v7841_v53 = vld [vmem:[%s10627_s7 + $0x2e0] ss:$24 sps:$4 sm:$0xff]   ;;  %v7846_v0 = vld [vmem:[%s10627_s7 + $0x314] ss:$24 sps:$4 sm:$0xff]  }
 0x433   :  { %5800 = vmatpush1.bf16.msra.mxu1 %v7760_v23  ;;  %5923 = vmatpush1.bf16.msra.mxu0 %v7763_v11  ;;  %v7844_v23 = vld [vmem:[%s10627_s7 + $0x310] ss:$24 sps:$4 sm:$0xff]   ;;  %v7849_v11 = vld [vmem:[%s10627_s7 + $0x344] ss:$24 sps:$4 sm:$0xff]  }
 0x434   :  { %5801 = vmatprep.subr.bf16.mxu1 %v7768_v60  ;;  %5924 = vmatprep.subr.bf16.mxu0 %v7771_v34  ;;  %v7847_v60 = vld [vmem:[%s10627_s7 + $0x340] ss:$24 sps:$4 sm:$0xff]   ;;  %v7852_v34 = vld [vmem:[%s10627_s7 + $0x374] ss:$24 sps:$4 sm:$0xff]  }
 0x437   :  { %5802 = vmatpush1.bf16.msra.mxu1 %v7766_v17  ;;  %5925 = vmatpush1.bf16.msra.mxu0 %v7769_v27  ;;  %v7850_v17 = vld [vmem:[%s10627_s7 + $0x370] ss:$24 sps:$4 sm:$0xff]   ;;  %v7858_v27 = vld [vmem:[%s10627_s7 + $0x3d4] ss:$24 sps:$4 sm:$0xff]  }
 0x438   :  { %5803 = vmatprep.subr.bf16.mxu1 %v7774_v39  ;;  %5926 = vmatprep.subr.bf16.mxu0 %v7777_v33  ;;  %v7856_v39 = vld [vmem:[%s10627_s7 + $0x3d0] ss:$24 sps:$4 sm:$0xff]   ;;  %v7861_v33 = vld [vmem:[%s10627_s7 + $0x404] ss:$24 sps:$4 sm:$0xff]  }
 0x43b   :  { %5804 = vmatpush1.bf16.msra.mxu1 %v7772_v22  ;;  %5927 = vmatpush1.bf16.msra.mxu0 %v7775_v13  ;;  %v7859_v22 = vld [vmem:[%s10627_s7 + $0x400] ss:$24 sps:$4 sm:$0xff]   ;;  %v7864_v13 = vld [vmem:[%s10627_s7 + $0x434] ss:$24 sps:$4 sm:$0xff]  }
 0x43c   :  { %5805 = vmatprep.subr.bf16.mxu1 %v7780_v7  ;;  %5928 = vmatprep.subr.bf16.mxu0 %v7783_v37  ;;  %v7862_v7 = vld [vmem:[%s10627_s7 + $0x430] ss:$24 sps:$4 sm:$0xff]   ;;  %v7867_v37 = vld [vmem:[%s10627_s7 + $0x464] ss:$24 sps:$4 sm:$0xff]  }
 0x43f   :  { %5806 = vmatpush1.bf16.msra.mxu1 %v7778_v46  ;;  %5929 = vmatpush1.bf16.msra.mxu0 %v7781_v3  ;;  %v7865_v46 = vld [vmem:[%s10627_s7 + $0x460] ss:$24 sps:$4 sm:$0xff]   ;;  %v7870_v3 = vld [vmem:[%s10627_s7 + $0x494] ss:$24 sps:$4 sm:$0xff]  }
 0x440   :  { %5807 = vmatprep.subr.bf16.mxu1 %v7786_v44  ;;  %5930 = vmatprep.subr.bf16.mxu0 %v7789_v62  ;;  %v7868_v44 = vld [vmem:[%s10627_s7 + $0x490] ss:$24 sps:$4 sm:$0xff]   ;;  %v7873_v62 = vld [vmem:[%s10627_s7 + $0x4c4] ss:$24 sps:$4 sm:$0xff]  }
 0x443   :  { %5808 = vmatpush1.bf16.msra.mxu1 %v7784_v50  ;;  %5931 = vmatpush1.bf16.msra.mxu0 %v7787_v15  ;;  %v7871_v50 = vld [vmem:[%s10627_s7 + $0x4c0] ss:$24 sps:$4 sm:$0xff]   ;;  %v7876_v15 = vld [vmem:[%s10627_s7 + $0x4f4] ss:$24 sps:$4 sm:$0xff]  }
 0x444   :  { %5809 = vmatprep.subr.bf16.mxu1 %v7792_v54  ;;  %5932 = vmatprep.subr.bf16.mxu0 %v7795_v31  ;;  %v7874_v54 = vld [vmem:[%s10627_s7 + $0x4f0] ss:$24 sps:$4 sm:$0xff]   ;;  %v7879_v31 = vld [vmem:[%s10627_s7 + $0x524] ss:$24 sps:$4 sm:$0xff]  }
 0x447   :  { %5810 = vmatpush1.bf16.msra.mxu1 %v7790_v25  ;;  %5933 = vmatpush1.bf16.msra.mxu0 %v7793_v8  ;;  %v7877_v25 = vld [vmem:[%s10627_s7 + $0x520] ss:$24 sps:$4 sm:$0xff]   ;;  %v7882_v8 = vld [vmem:[%s10627_s7 + $0x554] ss:$24 sps:$4 sm:$0xff]  }
 0x448   :  { %5943 = vmatprep.subr.bf16.mxu1 %v7798_v2  ;;  %v7880_v2 = vld [vmem:[%s10627_s7 + $0x550] ss:$24 sps:$4 sm:$0xff]  }
 0x44a   :  { %5812 = vmatmul.mubr.bf16.vlgmr.msra.gmra.mrb[96].mxu1 %v10293_v30  ;;  %5935 = vmatmul.mubr.bf16.vlgmr.msra.gmra.mrb[96].mxu0 %v10293_v30 }
 0x44b   :  { %5944 = vmatpush1.bf16.msra.mxu1 %v7796_v41  ;;  %5975 = vmatprep.mubr.bf16.mxu1 %v9818_v63  ;;  %v7805_v63 = vld [vmem:[%s10627_s7 + $0xa0] ss:$24 sps:$4 sm:$0xff]   ;;  %v7885_v41 = vld [vmem:[%s10627_s7 + $0x584] ss:$24 sps:$4 sm:$0xff]  }
 0x44c   :  { %5945 = vmatprep.subr.bf16.mxu1 %v7801_v26  ;;  %v7883_v26 = vld [vmem:[%s10627_s7 + $0x580] ss:$24 sps:$4 sm:$0xff]  }
 0x44f   :  { %5946 = vmatpush1.bf16.msra.mxu1 %v7799_v1  ;;  %v7888_v1 = vld [vmem:[%s10627_s7 + $0x5b4] ss:$24 sps:$4 sm:$0xff]  }
 0x450   :  { %5947 = vmatprep.subr.bf16.mxu1 %v7804_v52  ;;  %v7886_v52 = vld [vmem:[%s10627_s7 + $0x5b0] ss:$24 sps:$4 sm:$0xff]  }
 0x453   :  { %5948 = vmatpush1.bf16.msra.mxu1 %v7802_v51  ;;  %v7891_v51 = vld [vmem:[%s10627_s7 + $0x5e4] ss:$24 sps:$4 sm:$0xff]  }
 0x454   :  { %5949 = vmatprep.subr.bf16.mxu1 %v7807_v38  ;;  %v7889_v38 = vld [vmem:[%s10627_s7 + $0x5e0] ss:$24 sps:$4 sm:$0xff]  }
 0x457   :  { %5950 = vmatpush1.bf16.msra.mxu1 %v7805_v63  ;;  %v7894_v63 = vld [vmem:[%s10627_s7 + $0x614] ss:$24 sps:$4 sm:$0xff]  }
 0x458   :  { %5951 = vmatprep.subr.bf16.mxu1 %v7810_v9  ;;  %v7892_v9 = vld [vmem:[%s10627_s7 + $0x610] ss:$24 sps:$4 sm:$0xff]  }
 0x45b   :  { %5952 = vmatpush1.bf16.msra.mxu1 %v7808_v24  ;;  %v7897_v24 = vld [vmem:[%s10627_s7 + $0x644] ss:$24 sps:$4 sm:$0xff]  }
 0x45c   :  { %5953 = vmatprep.subr.bf16.mxu1 %v7813_v10  ;;  %v7895_v10 = vld [vmem:[%s10627_s7 + $0x640] ss:$24 sps:$4 sm:$0xff]  }
 0x45f   :  { %5954 = vmatpush1.bf16.msra.mxu1 %v7811_v42  ;;  %v7900_v42 = vld [vmem:[%s10627_s7 + $0x674] ss:$24 sps:$4 sm:$0xff]  }
 0x460   :  { %5955 = vmatprep.subr.bf16.mxu1 %v7816_v43  ;;  %v7898_v43 = vld [vmem:[%s10627_s7 + $0x670] ss:$24 sps:$4 sm:$0xff]  }
 0x463   :  { %5956 = vmatpush1.bf16.msra.mxu1 %v7814_v16  ;;  %v7906_v16 = vld [vmem:[%s10627_s7 + $0x6d4] ss:$24 sps:$4 sm:$0xff]  }
 0x464   :  { %5957 = vmatprep.subr.bf16.mxu1 %v7819_v5  ;;  %v7904_v5 = vld [vmem:[%s10627_s7 + $0x6d0] ss:$24 sps:$4 sm:$0xff]  }
 0x467   :  { %5958 = vmatpush1.bf16.msra.mxu1 %v7817_v35  ;;  %v7909_v35 = vld [vmem:[%s10627_s7 + $0x704] ss:$24 sps:$4 sm:$0xff]  }
 0x468   :  { %5959 = vmatprep.subr.bf16.mxu1 %v7822_v6  ;;  %v7907_v6 = vld [vmem:[%s10627_s7 + $0x700] ss:$24 sps:$4 sm:$0xff]  }
 0x46b   :  { %5960 = vmatpush1.bf16.msra.mxu1 %v7820_v45  ;;  %v7912_v45 = vld [vmem:[%s10627_s7 + $0x734] ss:$24 sps:$4 sm:$0xff]  }
 0x46c   :  { %5961 = vmatprep.subr.bf16.mxu1 %v7825_v28  ;;  %v7910_v28 = vld [vmem:[%s10627_s7 + $0x730] ss:$24 sps:$4 sm:$0xff]  }
 0x46f   :  { %5962 = vmatpush1.bf16.msra.mxu1 %v7823_v55  ;;  %v7915_v55 = vld [vmem:[%s10627_s7 + $0x764] ss:$24 sps:$4 sm:$0xff]  }
 0x470   :  { %5963 = vmatprep.subr.bf16.mxu1 %v7828_v32  ;;  %v7913_v32 = vld [vmem:[%s10627_s7 + $0x760] ss:$24 sps:$4 sm:$0xff]  }
 0x473   :  { %5964 = vmatpush1.bf16.msra.mxu1 %v7826_v48  ;;  %v7918_v48 = vld [vmem:[%s10627_s7 + $0x794] ss:$24 sps:$4 sm:$0xff]  }
 0x474   :  { %5965 = vmatprep.subr.bf16.mxu1 %v7831_v12  ;;  %v7916_v12 = vld [vmem:[%s10627_s7 + $0x790] ss:$24 sps:$4 sm:$0xff]  }
 0x477   :  { %5966 = vmatpush1.bf16.msra.mxu1 %v7829_v49  ;;  %v7921_v49 = vld [vmem:[%s10627_s7 + $0x7c4] ss:$24 sps:$4 sm:$0xff]  }
 0x478   :  { %5967 = vmatprep.subr.bf16.mxu1 %v7834_v61  ;;  %v7919_v61 = vld [vmem:[%s10627_s7 + $0x7c0] ss:$24 sps:$4 sm:$0xff]  }
 0x47b   :  { %5968 = vmatpush1.bf16.msra.mxu1 %v7832_v29  ;;  %v7924_v29 = vld [vmem:[%s10627_s7 + $0x7f4] ss:$24 sps:$4 sm:$0xff]  }
 0x47c   :  { %5969 = vmatprep.subr.bf16.mxu1 %v7837_v19  ;;  %v7922_v19 = vld [vmem:[%s10627_s7 + $0x7f0] ss:$24 sps:$4 sm:$0xff]  }
 0x47f   :  { %5970 = vmatpush1.bf16.msra.mxu1 %v7835_v4  ;;  %v7927_v4 = vld [vmem:[%s10627_s7 + $0x824] ss:$24 sps:$4 sm:$0xff]  }
 0x480   :  { %5971 = vmatprep.subr.bf16.mxu1 %v7840_v40  ;;  %v7925_v40 = vld [vmem:[%s10627_s7 + $0x820] ss:$24 sps:$4 sm:$0xff]  }
 0x483   :  { %5972 = vmatpush1.bf16.msra.mxu1 %v7838_v21  ;;  %v7930_v21 = vld [vmem:[%s10627_s7 + $0x854] ss:$24 sps:$4 sm:$0xff]  }
 0x484   :  { %5973 = vmatprep.subr.bf16.mxu1 %v7843_v14  ;;  %v7928_v14 = vld [vmem:[%s10627_s7 + $0x850] ss:$24 sps:$4 sm:$0xff]  }
 0x487   :  { %5974 = vmatpush1.bf16.msra.mxu1 %v7841_v53  ;;  %v7933_v53 = vld [vmem:[%s10627_s7 + $0x884] ss:$24 sps:$4 sm:$0xff]  }
 0x488   :  { %5984 = vmatprep.subr.bf16.mxu1 %v7846_v0  ;;  %v7931_v0 = vld [vmem:[%s10627_s7 + $0x880] ss:$24 sps:$4 sm:$0xff]  }
 0x48a   :  { %5976 = vmatmul.mubr.bf16.vlgmr.msra.gmra.mrb[100].mxu1 %v9827_v56  ;;  %v7855_v56 = vld [vmem:[%s10627_s7 + $0x3a4] ss:$24 sps:$4 sm:$0xff]  }
 0x48b   :  { %5985 = vmatpush1.bf16.msra.mxu1 %v7844_v23  ;;  %6016 = vmatprep.mubr.bf16.mxu1 %v9839_v58  ;;  %v7853_v58 = vld [vmem:[%s10627_s7 + $0x3a0] ss:$24 sps:$4 sm:$0xff]   ;;  %v7936_v23 = vld [vmem:[%s10627_s7 + $0x8b4] ss:$24 sps:$4 sm:$0xff]  }
 0x48c   :  { %5986 = vmatprep.subr.bf16.mxu1 %v7849_v11  ;;  %v7934_v11 = vld [vmem:[%s10627_s7 + $0x8b0] ss:$24 sps:$4 sm:$0xff]  }
 0x48f   :  { %5987 = vmatpush1.bf16.msra.mxu1 %v7847_v60  ;;  %v7939_v60 = vld [vmem:[%s10627_s7 + $0x8e4] ss:$24 sps:$4 sm:$0xff]  }
 0x490   :  { %5988 = vmatprep.subr.bf16.mxu1 %v7852_v34  ;;  %v7937_v34 = vld [vmem:[%s10627_s7 + $0x8e0] ss:$24 sps:$4 sm:$0xff]  }
 0x493   :  { %5989 = vmatpush1.bf16.msra.mxu1 %v7850_v17 }
 0x494   :  { %5990 = vmatprep.subr.bf16.mxu1 %v7855_v56  ;;  %v6073_v17 = vpop.permute.xlu0 %6072  ;;  %v4068_v56 = vld [vmem:[%s10630_s8] sm:$0x3f] }
 0x497   :  { %5991 = vmatpush1.bf16.msra.mxu1 %v7853_v58  ;;  %v6081_v58 = vld [vmem:[%s10631_s10] sm:$0x3f] }
 0x498   :  { %5992 = vmatprep.subr.bf16.mxu1 %v7858_v27  ;;  %v4073_v27 = vrot.slane %v4068_v56, %v8294_v36 }
 0x49b   :  { %5993 = vmatpush1.bf16.msra.mxu1 %v7856_v39  ;;  %v4081_v39 = vrot.slane %v4068_v56, %v8946_v57 }
 0x49c   :  { %5994 = vmatprep.subr.bf16.mxu1 %v7861_v33  ;;  %v6087_v33 = vrot.slane %v6081_v58, %v8294_v36 }
 0x49f   :  { %5995 = vmatpush1.bf16.msra.mxu1 %v7859_v22  ;;  %v6095_v22 = vrot.slane %v6081_v58, %v8946_v57 }
 0x4a0   :  { %5996 = vmatprep.subr.bf16.mxu1 %v7864_v13  ;;  %v10639_v13 = vld [vmem:[#allocation3_spill] sm:$0xff] }
 0x4a3   :  { %5997 = vmatpush1.bf16.msra.mxu1 %v7862_v7  ;;  %v4077_v7 = vrot.slane %v4068_v56, %v10639_v13 }
 0x4a4   :  { %5998 = vmatprep.subr.bf16.mxu1 %v7867_v37 }
 0x4a7   :  { %5999 = vmatpush1.bf16.msra.mxu1 %v7865_v46  ;;  %v6091_v46 = vrot.slane %v6081_v58, %v10639_v13 }
 0x4a8   :  { %6000 = vmatprep.subr.bf16.mxu1 %v7870_v3 }
 0x4ab   :  { %6001 = vmatpush1.bf16.msra.mxu1 %v7868_v44  ;;  %v6117_v44 = vpop.permute.xlu0 %6116 }
 0x4ac   :  { %6002 = vmatprep.subr.bf16.mxu1 %v7873_v62  ;;  %v6120_v57 = vmul.f32 %v6117_v44, %v6091_v46 }
 0x4af   :  { %6003 = vmatpush1.bf16.msra.mxu1 %v7871_v50 }
 0x4b0   :  { %6004 = vmatprep.subr.bf16.mxu1 %v7876_v15 }
 0x4b3   :  { %6005 = vmatpush1.bf16.msra.mxu1 %v7874_v54 }
 0x4b4   :  { %6006 = vmatprep.subr.bf16.mxu1 %v7879_v31 }
 0x4b7   :  { %6007 = vmatpush1.bf16.msra.mxu1 %v7877_v25 }
 0x4b8   :  { %6008 = vmatprep.subr.bf16.mxu1 %v7882_v8  ;;  %v6119_v8 = vmul.f32 %v6117_v44, %v6087_v33 }
 0x4bb   :  { %6009 = vmatpush1.bf16.msra.mxu1 %v7880_v2  ;;  %v6121_v2 = vmul.f32 %v6117_v44, %v6095_v22 }
 0x4bc   :  { %6010 = vmatprep.subr.bf16.mxu1 %v7885_v41 }
 0x4bf   :  { %6011 = vmatpush1.bf16.msra.mxu1 %v7883_v26 }
 0x4c0   :  { %6012 = vmatprep.subr.bf16.mxu1 %v7888_v1 }
 0x4c3   :  { %6013 = vmatpush1.bf16.msra.mxu1 %v7886_v52 }
 0x4c4   :  { %6014 = vmatprep.subr.bf16.mxu1 %v7891_v51 }
 0x4c7   :  { %6015 = vmatpush1.bf16.msra.mxu1 %v7889_v38 }
 0x4c8   :  { %6025 = vmatprep.subr.bf16.mxu1 %v7894_v63 }
 0x4ca   :  { %6017 = vmatmul.mubr.bf16.vlgmr.msra.gmra.mrb[100].mxu1 %v10080_v20  ;;  %v7903_v20 = vld [vmem:[%s10627_s7 + $0x6a4] ss:$24 sps:$4 sm:$0xff]  }
 0x4cb   :  { %6026 = vmatpush1.bf16.msra.mxu1 %v7892_v9  ;;  %6057 = vmatprep.mubr.bf16.mxu1 %v10191_v18  ;;  %v7901_v18 = vld [vmem:[%s10627_s7 + $0x6a0] ss:$24 sps:$4 sm:$0xff]  }
 0x4cc   :  { %6027 = vmatprep.subr.bf16.mxu1 %v7897_v24 }
 0x4cf   :  { %6028 = vmatpush1.bf16.msra.mxu1 %v7895_v10 }
 0x4d0   :  { %6029 = vmatprep.subr.bf16.mxu1 %v7900_v42 }
 0x4d3   :  { %6030 = vmatpush1.bf16.msra.mxu1 %v7898_v43 }
 0x4d4   :  { %6031 = vmatprep.subr.bf16.mxu1 %v7903_v20 }
 0x4d7   :  { %6032 = vmatpush1.bf16.msra.mxu1 %v7901_v18 }
 0x4d8   :  { %6033 = vmatprep.subr.bf16.mxu1 %v7906_v16  ;;  %v4089_v16 = vrot.slane %v4068_v56, %v9842_v59 }
 0x4db   :  { %6034 = vmatpush1.bf16.msra.mxu1 %v7904_v5  ;;  %v4093_v5 = vrot.slane %v4068_v56, %v9851_v47 }
 0x4dc   :  { %6035 = vmatprep.subr.bf16.mxu1 %v7909_v35  ;;  %v6103_v35 = vrot.slane %v6081_v58, %v9842_v59 }
 0x4df   :  { %6036 = vmatpush1.bf16.msra.mxu1 %v7907_v6 }
 0x4e0   :  { %6037 = vmatprep.subr.bf16.mxu1 %v7912_v45  ;;  %v6107_v45 = vrot.slane %v6081_v58, %v9851_v47 }
 0x4e3   :  { %6038 = vmatpush1.bf16.msra.mxu1 %v7910_v28 }
 0x4e4   :  { %6039 = vmatprep.subr.bf16.mxu1 %v7915_v55 }
 0x4e7   :  { %6040 = vmatpush1.bf16.msra.mxu1 %v7913_v32 }
 0x4e8   :  { %6041 = vmatprep.subr.bf16.mxu1 %v7918_v48 }
 0x4eb   :  { %6042 = vmatpush1.bf16.msra.mxu1 %v7916_v12 }
 0x4ec   :  { %6043 = vmatprep.subr.bf16.mxu1 %v7921_v49  ;;  %v6123_v49 = vmul.f32 %v6117_v44, %v6103_v35 }
 0x4ef   :  { %6044 = vmatpush1.bf16.msra.mxu1 %v7919_v61 }
 0x4f0   :  { %6045 = vmatprep.subr.bf16.mxu1 %v7924_v29 }
 0x4f3   :  { %6046 = vmatpush1.bf16.msra.mxu1 %v7922_v19  ;;  %v6124_v19 = vmul.f32 %v6117_v44, %v6107_v45 }
 0x4f4   :  { %6047 = vmatprep.subr.bf16.mxu1 %v7927_v4 }
 0x4f7   :  { %6048 = vmatpush1.bf16.msra.mxu1 %v7925_v40 }
 0x4f8   :  { %6049 = vmatprep.subr.bf16.mxu1 %v7930_v21 }
 0x4fb   :  { %6050 = vmatpush1.bf16.msra.mxu1 %v7928_v14 }
 0x4fc   :  { %6051 = vmatprep.subr.bf16.mxu1 %v7933_v53 }
 0x4ff   :  { %6052 = vmatpush1.bf16.msra.mxu1 %v7931_v0 }
 0x500   :  { %6053 = vmatprep.subr.bf16.mxu1 %v7936_v23 }
 0x503   :  { %6054 = vmatpush1.bf16.msra.mxu1 %v7934_v11 }
 0x504   :  { %6055 = vmatprep.subr.bf16.mxu1 %v7939_v60 }
 0x507   :  { %6056 = vmatpush1.bf16.msra.mxu1 %v7937_v34 }
 0x50a   :  { %6058 = vmatmul.mubr.bf16.vlgmr.msra.gmra.mrb[100].mxu1 %v10293_v30  ;;  %v10640_v30 = vld [vmem:[#allocation4_spill] sm:$0xff] }
 0x50b   :  { %v4085_v37 = vrot.slane %v4068_v56, %v10640_v30  ;;  %v6099_v3 = vrot.slane %v6081_v58, %v10640_v30 }
 0x50d   :  { %v6122_v26 = vmul.f32 %v6117_v44, %v6099_v3 }
 0x51d   :  { %v5813_v62 = vpop.f32.mrb[96].mxu1  ;;  %v5936_v50 = vpop.f32.mrb[96].mxu0 }
 0x51e   :  { %v6880_v15 = vadd.f32 %v5813_v62, %v4073_v27  ;;  %v6882_v54 = vadd.f32 %v5936_v50, %v4081_v39  ;;  %v5815_v31 = vpop.f32.mrb[97].mxu1  ;;  %v5938_v25 = vpop.f32.mrb[97].mxu0 }
 0x51f   :  { %v6881_v36 = vadd.f32 %v5815_v31, %v4077_v7  ;;  %v6883_v41 = vadd.f32 %v5938_v25, %v4085_v37  ;;  %v5817_v1 = vpop.f32.mrb[98].mxu1  ;;  %v5940_v52 = vpop.f32.mrb[98].mxu0 }
 0x520   :  { %v6075_v51 = vmul.f32 %v6880_v15, %v6073_v17  ;;  %v6077_v38 = vmul.f32 %v6882_v54, %v6073_v17  ;;  %v5818_v63 = vpop.f32.mrb[99].mxu1  ;;  %v5941_v9 = vpop.f32.mrb[99].mxu0 }
 0x521   :  { %v6076_v24 = vmul.f32 %v6881_v36, %v6073_v17  ;;  %v6078_v10 = vmul.f32 %v6883_v41, %v6073_v17 }
 0x522   :  { %v6125_v42 = vadd.f32 %v6119_v8, %v6075_v51  ;;  %v6127_v43 = vadd.f32 %v6121_v2, %v6077_v38 }
 0x523   :  { %v6126_v20 = vadd.f32 %v6120_v57, %v6076_v24  ;;  %v6128_v18 = vadd.f32 %v6122_v26, %v6078_v10 }
 0x524   :  { %6131 = vst [vmem:[%s10632_s11] sm:$0xff] %v6125_v42  ;;  %6133 = vst [vmem:[%s10632_s11 + $0x10] sm:$0xff] %v6127_v43 }
 0x525   :  { %6132 = vst [vmem:[%s10632_s11 + $0x8] sm:$0xff] %v6126_v20  ;;  %6134 = vst [vmem:[%s10632_s11 + $0x18] sm:$0xff] %v6128_v18 }
 0x5dd   :  { %v6059_v6 = vpop.f32.mrb[100].mxu1 }
 0x5de   :  { %v6884_v28 = vadd.f32 %v6059_v6, %v4089_v16  ;;  %v6061_v55 = vpop.f32.mrb[101].mxu1 }
 0x5df   :  { %v6885_v32 = vadd.f32 %v6061_v55, %v4093_v5  ;;  %v6063_v48 = vpop.f32.mrb[102].mxu1 }
 0x5e0   :  { %v6079_v12 = vmul.f32 %v6884_v28, %v6073_v17  ;;  %v6064_v61 = vpop.f32.mrb[103].mxu1 }
 0x5e1   :  { %v6080_v29 = vmul.f32 %v6885_v32, %v6073_v17 }
 0x5e2   :  { %v6129_v4 = vadd.f32 %v6123_v49, %v6079_v12 }
 0x5e3   :  { %v6130_v40 = vadd.f32 %v6124_v19, %v6080_v29 }
 0x5e4   :  { %6135 = vst [vmem:[%s10632_s11 + $0x20] sm:$0xff] %v6129_v4 }
 0x5e5   :  { %6136 = vst [vmem:[%s10632_s11 + $0x28] sm:$0xff] %v6130_v40 }

</bundles_post_ra>
